<compile_context>
chip_gen: v7x
topology: tpu7x:2x2x1
jax: 0.10.0
libtpu: 0.0.40
codegen_flags: <defaults>
</compile_context>

<pallas_src>
import functools

import numpy as np
import jax
import jax.numpy as jnp
from jax.experimental import pallas as pl
from jax.experimental.pallas import tpu as pltpu


# ---------------------------------------------------------------------------
# Fixed architecture constants (feature stack must flatten to 512 features)
# ---------------------------------------------------------------------------
IN_C = 3                 # raw input channels
CIN_PAD = 8              # conv1 input channels zero-padded 3 -> 8 (alignment)
H0 = W0 = 16             # input spatial size
CONV_CFG = [(IN_C, 32), (32, 64), (64, 128)]   # each conv followed by 2x2 pool
FEAT_H = FEAT_W = 2      # spatial size at flatten
FEAT_C = CONV_CFG[-1][1]                       # 128 channels -> 512 features
NCLASS_PAD = 128         # classifier output lane dim padded to 128 in-kernel


# ---------------------------------------------------------------------------
# Fused whole-network kernel (one image per grid step)
# ---------------------------------------------------------------------------
def _vgg_fused_kernel(x_ref,
                      w1_ref, b1_ref, w2_ref, b2_ref, w3_ref, b3_ref,
                      f1w_ref, f1b_ref, f2w_ref, f2b_ref,
                      o_ref,
                      xp1_ref, p1_ref, xp2_ref, p2_ref, xp3_ref, p3_ref):

    def stage(xp_ref, act_bf16, H, W, C):
        # Zero only the 1-pixel halo every step (cheap, and stays correct even
        # when the parallel batch axis is split across v7x's two TensorCores);
        # the interior is fully overwritten right after.
        xp_ref[0:1, :, :] = jnp.zeros((1, W + 2, C), jnp.bfloat16)
        xp_ref[H + 1:H + 2, :, :] = jnp.zeros((1, W + 2, C), jnp.bfloat16)
        xp_ref[1:H + 1, 0:1, :] = jnp.zeros((H, 1, C), jnp.bfloat16)
        xp_ref[1:H + 1, W + 1:W + 2, :] = jnp.zeros((H, 1, C), jnp.bfloat16)
        xp_ref[1:H + 1, 1:W + 1, :] = act_bf16

    def conv_relu_pool(xp_ref, p_ref, w_ref, b_ref, H, W, C, Cout):
        # im2col: 9 halo-shifted copies into the (H, W, 9*C) patch scratch,
        # then ONE MXU dot with K = 9*C (replaces 9 accumulating K=C dots).
        for ky in range(3):
            for kx in range(3):
                j = 3 * ky + kx
                p_ref[:, :, j * C:(j + 1) * C] = xp_ref[ky:ky + H, kx:kx + W, :]
        lhs = p_ref[...].reshape(H * W, 9 * C)                 # bf16, K = 9*C
        y = jnp.dot(lhs, w_ref[...], preferred_element_type=jnp.float32)
        y = jnp.maximum(y + b_ref[...], 0.0)                   # bias + ReLU (f32)
        # Fused 2x2 max-pool while the tile is still in VMEM.
        y = jnp.max(y.reshape(H * (W // 2), 2, Cout), axis=1)  # pool along w
        y = jnp.max(y.reshape(H // 2, 2, W // 2, Cout), axis=1)  # pool along h
        return y                                               # (H//2, W//2, Cout) f32

    # ---- feature stack: 16x16x8 -> 8x8x32 -> 4x4x64 -> 2x2x128 --------------
    stage(xp1_ref, x_ref[0], 16, 16, 8)
    y = conv_relu_pool(xp1_ref, p1_ref, w1_ref, b1_ref, 16, 16, 8, 32)
    stage(xp2_ref, y.astype(jnp.bfloat16), 8, 8, 32)
    y = conv_relu_pool(xp2_ref, p2_ref, w2_ref, b2_ref, 8, 8, 32, 64)
    stage(xp3_ref, y.astype(jnp.bfloat16), 4, 4, 64)
    y = conv_relu_pool(xp3_ref, p3_ref, w3_ref, b3_ref, 4, 4, 64, 128)  # (2,2,128)

    # ---- classifier: relu(feat @ W1 + b1) @ W2 + b2, fully VMEM-resident -----
    # feat is the NHWC flatten of y; the NCHW-vs-NHWC flatten mismatch was
    # folded into W1's rows at param-prep time.  Contract the 512 features as
    # 4 chunks of 128 lanes to avoid a lane-merging (4,128)->(1,512) relayout.
    f = y.reshape(4, 128).astype(jnp.bfloat16)
    h = jnp.zeros((1, 512), jnp.float32)
    for r in range(4):
        h = h + jnp.dot(f[r:r + 1, :], f1w_ref[128 * r:128 * (r + 1), :],
                        preferred_element_type=jnp.float32)
    h = jnp.maximum(h + f1b_ref[...], 0.0)
    logits = jnp.dot(h.astype(jnp.bfloat16), f2w_ref[...],
                     preferred_element_type=jnp.float32) + f2b_ref[...]
    o_ref[...] = logits.reshape(1, 1, NCLASS_PAD).astype(o_ref.dtype)


def vgg_forward(params, x_nchw, *, n_class):
    """x_nchw: (N, 3, 16, 16) f32 -> logits (N, n_class) f32."""
    n, c, h, w = x_nchw.shape
    assert (c, h, w) == (IN_C, H0, W0), (c, h, w)

    x = jnp.transpose(x_nchw, (0, 2, 3, 1))                       # NCHW -> NHWC
    x = jnp.pad(x, ((0, 0), (0, 0), (0, 0), (0, CIN_PAD - c)))    # Cin 3 -> 8
    x = x.astype(jnp.bfloat16)                                    # bf16 activations

    (w1, b1), (w2, b2), (w3, b3) = params["convs"]
    f1w, f1b = params["fc1"]
    f2w, f2b = params["fc2"]

    full = lambda i: (0, 0)   # weights/biases: one constant block, never re-DMA'd
    out = pl.pallas_call(
        _vgg_fused_kernel,
        out_shape=jax.ShapeDtypeStruct((n, 1, NCLASS_PAD), jnp.float32),
        grid=(n,),                               # >=2 parallel steps for v7x's 2 TCs
        in_specs=[
            pl.BlockSpec((1, H0, W0, CIN_PAD), lambda i: (i, 0, 0, 0)),
            pl.BlockSpec(w1.shape, full), pl.BlockSpec(b1.shape, full),
            pl.BlockSpec(w2.shape, full), pl.BlockSpec(b2.shape, full),
            pl.BlockSpec(w3.shape, full), pl.BlockSpec(b3.shape, full),
            pl.BlockSpec(f1w.shape, full), pl.BlockSpec(f1b.shape, full),
            pl.BlockSpec(f2w.shape, full), pl.BlockSpec(f2b.shape, full),
        ],
        out_specs=pl.BlockSpec((1, 1, NCLASS_PAD), lambda i: (i, 0, 0)),
        scratch_shapes=[
            pltpu.VMEM((18, 18, 8), jnp.bfloat16),    # padded act,  layer 1
            pltpu.VMEM((16, 16, 72), jnp.bfloat16),   # im2col patches, layer 1
            pltpu.VMEM((10, 10, 32), jnp.bfloat16),   # padded act,  layer 2
            pltpu.VMEM((8, 8, 288), jnp.bfloat16),    # im2col patches, layer 2
            pltpu.VMEM((6, 6, 64), jnp.bfloat16),     # padded act,  layer 3
            pltpu.VMEM((4, 4, 576), jnp.bfloat16),    # im2col patches, layer 3
        ],
        compiler_params=pltpu.CompilerParams(dimension_semantics=("parallel",)),
    )(x, w1, b1, w2, b2, w3, b3, f1w, f1b, f2w, f2b)
    return out.reshape(n, NCLASS_PAD)[:, :n_class]


# ---------------------------------------------------------------------------
# Parameters
# ---------------------------------------------------------------------------
def init_params(key, n_class=10):
    """Random parameters in framework-equivalent layouts (conv: (3,3,Cin,Cout),
    fc: (in, out) with fc1 input rows in PyTorch NCHW-flatten order)."""
    keys = jax.random.split(key, len(CONV_CFG) + 2)
    convs = []
    for k, (cin, cout) in zip(keys[:len(CONV_CFG)], CONV_CFG):
        wk, bk = jax.random.split(k)
        fan_in = 9 * cin
        w = jax.random.normal(wk, (3, 3, cin, cout), jnp.float32) / (fan_in ** 0.5)
        b = jax.random.normal(bk, (cout,), jnp.float32) * 0.01
        convs.append((w, b))
    w1k, b1k = jax.random.split(keys[-2])
    w2k, b2k = jax.random.split(keys[-1])
    fc1_w = jax.random.normal(w1k, (512, 512), jnp.float32) / (512.0 ** 0.5)
    fc1_b = jax.random.normal(b1k, (512,), jnp.float32) * 0.01
    fc2_w = jax.random.normal(w2k, (512, n_class), jnp.float32) / (512.0 ** 0.5)
    fc2_b = jax.random.normal(b2k, (n_class,), jnp.float32) * 0.01
    return {"convs": convs, "fc1": (fc1_w, fc1_b), "fc2": (fc2_w, fc2_b)}


def prepare_params(params):
    """One-time conversion to kernel layouts: pad conv1's Cin 3->8, flatten conv
    weights to (9*Cin, Cout) bf16 (rows ordered (ky,kx,ci) to match the im2col
    columns), fold the NCHW-flatten permutation into fc1's rows, and pad the
    classifier output to 128 lanes."""
    convs = []
    for idx, (w, b) in enumerate(params["convs"]):
        if idx == 0:
            w = jnp.pad(w, ((0, 0), (0, 0), (0, CIN_PAD - w.shape[2]), (0, 0)))
        cin, cout = w.shape[2], w.shape[3]
        wmat = w.reshape(9 * cin, cout).astype(jnp.bfloat16)
        convs.append((wmat, b.reshape(1, cout).astype(jnp.float32)))

    w1, b1 = params["fc1"]
    w2, b2 = params["fc2"]
    # Our flatten order is NHWC (h, w, c); PyTorch's x.view(N, -1) is NCHW.
    # Permute fc1's input rows once so no runtime transpose is needed.
    perm = np.array([c * (FEAT_H * FEAT_W) + h * FEAT_W + w
                     for h in range(FEAT_H)
                     for w in range(FEAT_W)
                     for c in range(FEAT_C)])
    w1p = w1[perm, :].astype(jnp.bfloat16)
    n_class = w2.shape[1]
    w2p = jnp.pad(w2, ((0, 0), (0, NCLASS_PAD - n_class))).astype(jnp.bfloat16)
    b2p = jnp.pad(b2, (0, NCLASS_PAD - n_class)).reshape(1, NCLASS_PAD)
    return {
        "convs": convs,
        "fc1": (w1p, b1.reshape(1, -1).astype(jnp.float32)),
        "fc2": (w2p, b2p.astype(jnp.float32)),
    }


if __name__ == "__main__":
    key = jax.random.PRNGKey(0)
    pkey, xkey = jax.random.split(key)
    n_class = 10
    params = prepare_params(init_params(pkey, n_class=n_class))
    x = jax.random.normal(xkey, (2, IN_C, H0, W0), dtype=jnp.float32)  # NCHW input

    fwd = jax.jit(functools.partial(vgg_forward, n_class=n_class))
    out = fwd(params, x)
    jax.block_until_ready(out)
    assert out.shape == (2, n_class), out.shape
    assert bool(jnp.all(jnp.isfinite(out)))
    print("KERNEL_OK")
</pallas_src>

<mosaic_0001>
module attributes {stable_mosaic.version = 11 : i64} {
  func.func @_vgg_fused_kernel(%arg0: i32, %arg1: memref<1x16x16x8xbf16, #tpu.memory_space<vmem>>, %arg2: memref<72x32xbf16, #tpu.memory_space<vmem>>, %arg3: memref<1x32xf32, #tpu.memory_space<vmem>>, %arg4: memref<288x64xbf16, #tpu.memory_space<vmem>>, %arg5: memref<1x64xf32, #tpu.memory_space<vmem>>, %arg6: memref<576x128xbf16, #tpu.memory_space<vmem>>, %arg7: memref<1x128xf32, #tpu.memory_space<vmem>>, %arg8: memref<512x512xbf16, #tpu.memory_space<vmem>>, %arg9: memref<1x512xf32, #tpu.memory_space<vmem>>, %arg10: memref<512x128xbf16, #tpu.memory_space<vmem>>, %arg11: memref<1x128xf32, #tpu.memory_space<vmem>>, %arg12: memref<1x1x128xf32, #tpu.memory_space<vmem>>, %arg13: memref<18x18x8xbf16, #tpu.memory_space<vmem>>, %arg14: memref<16x16x72xbf16, #tpu.memory_space<vmem>>, %arg15: memref<10x10x32xbf16, #tpu.memory_space<vmem>>, %arg16: memref<8x8x288xbf16, #tpu.memory_space<vmem>>, %arg17: memref<6x6x64xbf16, #tpu.memory_space<vmem>>, %arg18: memref<4x4x576xbf16, #tpu.memory_space<vmem>>) attributes {dimension_semantics = [#tpu.dimension_semantics<parallel>], iteration_bounds = array<i64: 2>, scalar_prefetch = 0 : i64, scratch_operands = 6 : i64, tpu.core_type = #tpu.core_type<tc>, window_params = [{transform_indices = @transform_0, window_bounds = array<i64: 1, 16, 16, 8>}, {pipeline_mode = #tpu.pipeline_mode<synchronous>, transform_indices = @transform_1, window_bounds = array<i64: 72, 32>}, {pipeline_mode = #tpu.pipeline_mode<synchronous>, transform_indices = @transform_2, window_bounds = array<i64: 1, 32>}, {pipeline_mode = #tpu.pipeline_mode<synchronous>, transform_indices = @transform_3, window_bounds = array<i64: 288, 64>}, {pipeline_mode = #tpu.pipeline_mode<synchronous>, transform_indices = @transform_4, window_bounds = array<i64: 1, 64>}, {pipeline_mode = #tpu.pipeline_mode<synchronous>, transform_indices = @transform_5, window_bounds = array<i64: 576, 128>}, {pipeline_mode = #tpu.pipeline_mode<synchronous>, transform_indices = @transform_6, window_bounds = array<i64: 1, 128>}, {pipeline_mode = #tpu.pipeline_mode<synchronous>, transform_indices = @transform_7, window_bounds = array<i64: 512, 512>}, {pipeline_mode = #tpu.pipeline_mode<synchronous>, transform_indices = @transform_8, window_bounds = array<i64: 1, 512>}, {pipeline_mode = #tpu.pipeline_mode<synchronous>, transform_indices = @transform_9, window_bounds = array<i64: 512, 128>}, {pipeline_mode = #tpu.pipeline_mode<synchronous>, transform_indices = @transform_10, window_bounds = array<i64: 1, 128>}, {transform_indices = @transform_11, window_bounds = array<i64: 1, 1, 128>}]} {
    %c0 = arith.constant 0 : index
    %c0_0 = arith.constant 0 : index
    %c0_1 = arith.constant 0 : index
    %c0_2 = arith.constant 0 : index
    %0 = vector.load %arg1[%c0, %c0_0, %c0_1, %c0_2] : memref<1x16x16x8xbf16, #tpu.memory_space<vmem>>, vector<1x16x16x8xbf16>
    %1 = vector.shape_cast %0 : vector<1x16x16x8xbf16> to vector<16x16x8xbf16>
    %cst = arith.constant 0.000000e+00 : bf16
    %2 = vector.broadcast %cst : bf16 to vector<1x18x8xbf16>
    %c0_3 = arith.constant 0 : index
    %c0_4 = arith.constant 0 : index
    %c0_5 = arith.constant 0 : index
    %3 = vector.load %arg13[%c0_3, %c0_4, %c0_5] : memref<18x18x8xbf16, #tpu.memory_space<vmem>>, vector<1x18x8xbf16>
    tpu.vector_store %arg13[%c0_3, %c0_4, %c0_5], %2 {strides = array<i32>} : memref<18x18x8xbf16, #tpu.memory_space<vmem>>, vector<1x18x8xbf16>,
    %cst_6 = arith.constant 0.000000e+00 : bf16
    %4 = vector.broadcast %cst_6 : bf16 to vector<1x18x8xbf16>
    %c17 = arith.constant 17 : index
    %c0_7 = arith.constant 0 : index
    %c0_8 = arith.constant 0 : index
    %5 = vector.load %arg13[%c17, %c0_7, %c0_8] : memref<18x18x8xbf16, #tpu.memory_space<vmem>>, vector<1x18x8xbf16>
    tpu.vector_store %arg13[%c17, %c0_7, %c0_8], %4 {strides = array<i32>} : memref<18x18x8xbf16, #tpu.memory_space<vmem>>, vector<1x18x8xbf16>,
    %cst_9 = arith.constant 0.000000e+00 : bf16
    %6 = vector.broadcast %cst_9 : bf16 to vector<16x1x8xbf16>
    %c1 = arith.constant 1 : index
    %c0_10 = arith.constant 0 : index
    %c0_11 = arith.constant 0 : index
    %7 = vector.load %arg13[%c1, %c0_10, %c0_11] : memref<18x18x8xbf16, #tpu.memory_space<vmem>>, vector<16x1x8xbf16>
    tpu.vector_store %arg13[%c1, %c0_10, %c0_11], %6 {strides = array<i32>} : memref<18x18x8xbf16, #tpu.memory_space<vmem>>, vector<16x1x8xbf16>,
    %cst_12 = arith.constant 0.000000e+00 : bf16
    %8 = vector.broadcast %cst_12 : bf16 to vector<16x1x8xbf16>
    %c1_13 = arith.constant 1 : index
    %c17_14 = arith.constant 17 : index
    %c0_15 = arith.constant 0 : index
    %9 = vector.load %arg13[%c1_13, %c17_14, %c0_15] : memref<18x18x8xbf16, #tpu.memory_space<vmem>>, vector<16x1x8xbf16>
    tpu.vector_store %arg13[%c1_13, %c17_14, %c0_15], %8 {strides = array<i32>} : memref<18x18x8xbf16, #tpu.memory_space<vmem>>, vector<16x1x8xbf16>,
    %c1_16 = arith.constant 1 : index
    %c1_17 = arith.constant 1 : index
    %c0_18 = arith.constant 0 : index
    %10 = vector.load %arg13[%c1_16, %c1_17, %c0_18] : memref<18x18x8xbf16, #tpu.memory_space<vmem>>, vector<16x16x8xbf16>
    tpu.vector_store %arg13[%c1_16, %c1_17, %c0_18], %1 {strides = array<i32>} : memref<18x18x8xbf16, #tpu.memory_space<vmem>>, vector<16x16x8xbf16>,
    %c0_19 = arith.constant 0 : index
    %c0_20 = arith.constant 0 : index
    %c0_21 = arith.constant 0 : index
    %11 = vector.load %arg13[%c0_19, %c0_20, %c0_21] : memref<18x18x8xbf16, #tpu.memory_space<vmem>>, vector<16x16x8xbf16>
    %c0_22 = arith.constant 0 : index
    %c0_23 = arith.constant 0 : index
    %c0_24 = arith.constant 0 : index
    %12 = vector.load %arg14[%c0_22, %c0_23, %c0_24] : memref<16x16x72xbf16, #tpu.memory_space<vmem>>, vector<16x16x8xbf16>
    tpu.vector_store %arg14[%c0_22, %c0_23, %c0_24], %11 {strides = array<i32>} : memref<16x16x72xbf16, #tpu.memory_space<vmem>>, vector<16x16x8xbf16>,
    %c0_25 = arith.constant 0 : index
    %c1_26 = arith.constant 1 : index
    %c0_27 = arith.constant 0 : index
    %13 = vector.load %arg13[%c0_25, %c1_26, %c0_27] : memref<18x18x8xbf16, #tpu.memory_space<vmem>>, vector<16x16x8xbf16>
    %c0_28 = arith.constant 0 : index
    %c0_29 = arith.constant 0 : index
    %c8 = arith.constant 8 : index
    %14 = vector.load %arg14[%c0_28, %c0_29, %c8] : memref<16x16x72xbf16, #tpu.memory_space<vmem>>, vector<16x16x8xbf16>
    tpu.vector_store %arg14[%c0_28, %c0_29, %c8], %13 {strides = array<i32>} : memref<16x16x72xbf16, #tpu.memory_space<vmem>>, vector<16x16x8xbf16>,
    %c0_30 = arith.constant 0 : index
    %c2 = arith.constant 2 : index
    %c0_31 = arith.constant 0 : index
    %15 = vector.load %arg13[%c0_30, %c2, %c0_31] : memref<18x18x8xbf16, #tpu.memory_space<vmem>>, vector<16x16x8xbf16>
    %c0_32 = arith.constant 0 : index
    %c0_33 = arith.constant 0 : index
    %c16 = arith.constant 16 : index
    %16 = vector.load %arg14[%c0_32, %c0_33, %c16] : memref<16x16x72xbf16, #tpu.memory_space<vmem>>, vector<16x16x8xbf16>
    tpu.vector_store %arg14[%c0_32, %c0_33, %c16], %15 {strides = array<i32>} : memref<16x16x72xbf16, #tpu.memory_space<vmem>>, vector<16x16x8xbf16>,
    %c1_34 = arith.constant 1 : index
    %c0_35 = arith.constant 0 : index
    %c0_36 = arith.constant 0 : index
    %17 = vector.load %arg13[%c1_34, %c0_35, %c0_36] : memref<18x18x8xbf16, #tpu.memory_space<vmem>>, vector<16x16x8xbf16>
    %c0_37 = arith.constant 0 : index
    %c0_38 = arith.constant 0 : index
    %c24 = arith.constant 24 : index
    %18 = vector.load %arg14[%c0_37, %c0_38, %c24] : memref<16x16x72xbf16, #tpu.memory_space<vmem>>, vector<16x16x8xbf16>
    tpu.vector_store %arg14[%c0_37, %c0_38, %c24], %17 {strides = array<i32>} : memref<16x16x72xbf16, #tpu.memory_space<vmem>>, vector<16x16x8xbf16>,
    %c1_39 = arith.constant 1 : index
    %c1_40 = arith.constant 1 : index
    %c0_41 = arith.constant 0 : index
    %19 = vector.load %arg13[%c1_39, %c1_40, %c0_41] : memref<18x18x8xbf16, #tpu.memory_space<vmem>>, vector<16x16x8xbf16>
    %c0_42 = arith.constant 0 : index
    %c0_43 = arith.constant 0 : index
    %c32 = arith.constant 32 : index
    %20 = vector.load %arg14[%c0_42, %c0_43, %c32] : memref<16x16x72xbf16, #tpu.memory_space<vmem>>, vector<16x16x8xbf16>
    tpu.vector_store %arg14[%c0_42, %c0_43, %c32], %19 {strides = array<i32>} : memref<16x16x72xbf16, #tpu.memory_space<vmem>>, vector<16x16x8xbf16>,
    %c1_44 = arith.constant 1 : index
    %c2_45 = arith.constant 2 : index
    %c0_46 = arith.constant 0 : index
    %21 = vector.load %arg13[%c1_44, %c2_45, %c0_46] : memref<18x18x8xbf16, #tpu.memory_space<vmem>>, vector<16x16x8xbf16>
    %c0_47 = arith.constant 0 : index
    %c0_48 = arith.constant 0 : index
    %c40 = arith.constant 40 : index
    %22 = vector.load %arg14[%c0_47, %c0_48, %c40] : memref<16x16x72xbf16, #tpu.memory_space<vmem>>, vector<16x16x8xbf16>
    tpu.vector_store %arg14[%c0_47, %c0_48, %c40], %21 {strides = array<i32>} : memref<16x16x72xbf16, #tpu.memory_space<vmem>>, vector<16x16x8xbf16>,
    %c2_49 = arith.constant 2 : index
    %c0_50 = arith.constant 0 : index
    %c0_51 = arith.constant 0 : index
    %23 = vector.load %arg13[%c2_49, %c0_50, %c0_51] : memref<18x18x8xbf16, #tpu.memory_space<vmem>>, vector<16x16x8xbf16>
    %c0_52 = arith.constant 0 : index
    %c0_53 = arith.constant 0 : index
    %c48 = arith.constant 48 : index
    %24 = vector.load %arg14[%c0_52, %c0_53, %c48] : memref<16x16x72xbf16, #tpu.memory_space<vmem>>, vector<16x16x8xbf16>
    tpu.vector_store %arg14[%c0_52, %c0_53, %c48], %23 {strides = array<i32>} : memref<16x16x72xbf16, #tpu.memory_space<vmem>>, vector<16x16x8xbf16>,
    %c2_54 = arith.constant 2 : index
    %c1_55 = arith.constant 1 : index
    %c0_56 = arith.constant 0 : index
    %25 = vector.load %arg13[%c2_54, %c1_55, %c0_56] : memref<18x18x8xbf16, #tpu.memory_space<vmem>>, vector<16x16x8xbf16>
    %c0_57 = arith.constant 0 : index
    %c0_58 = arith.constant 0 : index
    %c56 = arith.constant 56 : index
    %26 = vector.load %arg14[%c0_57, %c0_58, %c56] : memref<16x16x72xbf16, #tpu.memory_space<vmem>>, vector<16x16x8xbf16>
    tpu.vector_store %arg14[%c0_57, %c0_58, %c56], %25 {strides = array<i32>} : memref<16x16x72xbf16, #tpu.memory_space<vmem>>, vector<16x16x8xbf16>,
    %c2_59 = arith.constant 2 : index
    %c2_60 = arith.constant 2 : index
    %c0_61 = arith.constant 0 : index
    %27 = vector.load %arg13[%c2_59, %c2_60, %c0_61] : memref<18x18x8xbf16, #tpu.memory_space<vmem>>, vector<16x16x8xbf16>
    %c0_62 = arith.constant 0 : index
    %c0_63 = arith.constant 0 : index
    %c64 = arith.constant 64 : index
    %28 = vector.load %arg14[%c0_62, %c0_63, %c64] : memref<16x16x72xbf16, #tpu.memory_space<vmem>>, vector<16x16x8xbf16>
    tpu.vector_store %arg14[%c0_62, %c0_63, %c64], %27 {strides = array<i32>} : memref<16x16x72xbf16, #tpu.memory_space<vmem>>, vector<16x16x8xbf16>,
    %c0_64 = arith.constant 0 : index
    %c0_65 = arith.constant 0 : index
    %c0_66 = arith.constant 0 : index
    %29 = vector.load %arg14[%c0_64, %c0_65, %c0_66] : memref<16x16x72xbf16, #tpu.memory_space<vmem>>, vector<16x16x72xbf16>
    %30 = vector.shape_cast %29 : vector<16x16x72xbf16> to vector<256x72xbf16>
    %c0_67 = arith.constant 0 : index
    %c0_68 = arith.constant 0 : index
    %31 = vector.load %arg2[%c0_67, %c0_68] : memref<72x32xbf16, #tpu.memory_space<vmem>>, vector<72x32xbf16>
    %cst_69 = arith.constant dense<0.000000e+00> : vector<256x32xf32>
    %32 = tpu.matmul %30, %31, %cst_69 {dimension_numbers = #tpu.dot_dimension_numbers<[1], [0], [0], [1], [0, 0, 1, 1], [], []>} : vector<256x72xbf16>, vector<72x32xbf16>, vector<256x32xf32> -> vector<256x32xf32>
    %c0_70 = arith.constant 0 : index
    %c0_71 = arith.constant 0 : index
    %33 = vector.load %arg3[%c0_70, %c0_71] : memref<1x32xf32, #tpu.memory_space<vmem>>, vector<1x32xf32>
    %34 = vector.broadcast %33 : vector<1x32xf32> to vector<256x32xf32>
    %35 = arith.addf %32, %34 : vector<256x32xf32>
    %cst_72 = arith.constant 0.000000e+00 : f32
    %36 = vector.broadcast %cst_72 : f32 to vector<256x32xf32>
    %37 = arith.maximumf %35, %36 : vector<256x32xf32>
    %38 = vector.shape_cast %37 : vector<256x32xf32> to vector<128x2x32xf32>
    %cst_73 = arith.constant dense<0xFF800000> : vector<128x32xf32>
    %39 = vector.multi_reduction <maximumf>, %38, %cst_73 [1] : vector<128x2x32xf32> to vector<128x32xf32>
    %40 = vector.shape_cast %39 : vector<128x32xf32> to vector<8x2x8x32xf32>
    %cst_74 = arith.constant dense<0xFF800000> : vector<8x8x32xf32>
    %41 = vector.multi_reduction <maximumf>, %40, %cst_74 [1] : vector<8x2x8x32xf32> to vector<8x8x32xf32>
    %42 = arith.truncf %41 : vector<8x8x32xf32> to vector<8x8x32xbf16>
    %cst_75 = arith.constant 0.000000e+00 : bf16
    %43 = vector.broadcast %cst_75 : bf16 to vector<1x10x32xbf16>
    %c0_76 = arith.constant 0 : index
    %c0_77 = arith.constant 0 : index
    %c0_78 = arith.constant 0 : index
    %44 = vector.load %arg15[%c0_76, %c0_77, %c0_78] : memref<10x10x32xbf16, #tpu.memory_space<vmem>>, vector<1x10x32xbf16>
    tpu.vector_store %arg15[%c0_76, %c0_77, %c0_78], %43 {strides = array<i32>} : memref<10x10x32xbf16, #tpu.memory_space<vmem>>, vector<1x10x32xbf16>,
    %cst_79 = arith.constant 0.000000e+00 : bf16
    %45 = vector.broadcast %cst_79 : bf16 to vector<1x10x32xbf16>
    %c9 = arith.constant 9 : index
    %c0_80 = arith.constant 0 : index
    %c0_81 = arith.constant 0 : index
    %46 = vector.load %arg15[%c9, %c0_80, %c0_81] : memref<10x10x32xbf16, #tpu.memory_space<vmem>>, vector<1x10x32xbf16>
    tpu.vector_store %arg15[%c9, %c0_80, %c0_81], %45 {strides = array<i32>} : memref<10x10x32xbf16, #tpu.memory_space<vmem>>, vector<1x10x32xbf16>,
    %cst_82 = arith.constant 0.000000e+00 : bf16
    %47 = vector.broadcast %cst_82 : bf16 to vector<8x1x32xbf16>
    %c1_83 = arith.constant 1 : index
    %c0_84 = arith.constant 0 : index
    %c0_85 = arith.constant 0 : index
    %48 = vector.load %arg15[%c1_83, %c0_84, %c0_85] : memref<10x10x32xbf16, #tpu.memory_space<vmem>>, vector<8x1x32xbf16>
    tpu.vector_store %arg15[%c1_83, %c0_84, %c0_85], %47 {strides = array<i32>} : memref<10x10x32xbf16, #tpu.memory_space<vmem>>, vector<8x1x32xbf16>,
    %cst_86 = arith.constant 0.000000e+00 : bf16
    %49 = vector.broadcast %cst_86 : bf16 to vector<8x1x32xbf16>
    %c1_87 = arith.constant 1 : index
    %c9_88 = arith.constant 9 : index
    %c0_89 = arith.constant 0 : index
    %50 = vector.load %arg15[%c1_87, %c9_88, %c0_89] : memref<10x10x32xbf16, #tpu.memory_space<vmem>>, vector<8x1x32xbf16>
    tpu.vector_store %arg15[%c1_87, %c9_88, %c0_89], %49 {strides = array<i32>} : memref<10x10x32xbf16, #tpu.memory_space<vmem>>, vector<8x1x32xbf16>,
    %c1_90 = arith.constant 1 : index
    %c1_91 = arith.constant 1 : index
    %c0_92 = arith.constant 0 : index
    %51 = vector.load %arg15[%c1_90, %c1_91, %c0_92] : memref<10x10x32xbf16, #tpu.memory_space<vmem>>, vector<8x8x32xbf16>
    tpu.vector_store %arg15[%c1_90, %c1_91, %c0_92], %42 {strides = array<i32>} : memref<10x10x32xbf16, #tpu.memory_space<vmem>>, vector<8x8x32xbf16>,
    %c0_93 = arith.constant 0 : index
    %c0_94 = arith.constant 0 : index
    %c0_95 = arith.constant 0 : index
    %52 = vector.load %arg15[%c0_93, %c0_94, %c0_95] : memref<10x10x32xbf16, #tpu.memory_space<vmem>>, vector<8x8x32xbf16>
    %c0_96 = arith.constant 0 : index
    %c0_97 = arith.constant 0 : index
    %c0_98 = arith.constant 0 : index
    %53 = vector.load %arg16[%c0_96, %c0_97, %c0_98] : memref<8x8x288xbf16, #tpu.memory_space<vmem>>, vector<8x8x32xbf16>
    tpu.vector_store %arg16[%c0_96, %c0_97, %c0_98], %52 {strides = array<i32>} : memref<8x8x288xbf16, #tpu.memory_space<vmem>>, vector<8x8x32xbf16>,
    %c0_99 = arith.constant 0 : index
    %c1_100 = arith.constant 1 : index
    %c0_101 = arith.constant 0 : index
    %54 = vector.load %arg15[%c0_99, %c1_100, %c0_101] : memref<10x10x32xbf16, #tpu.memory_space<vmem>>, vector<8x8x32xbf16>
    %c0_102 = arith.constant 0 : index
    %c0_103 = arith.constant 0 : index
    %c32_104 = arith.constant 32 : index
    %55 = vector.load %arg16[%c0_102, %c0_103, %c32_104] : memref<8x8x288xbf16, #tpu.memory_space<vmem>>, vector<8x8x32xbf16>
    tpu.vector_store %arg16[%c0_102, %c0_103, %c32_104], %54 {strides = array<i32>} : memref<8x8x288xbf16, #tpu.memory_space<vmem>>, vector<8x8x32xbf16>,
    %c0_105 = arith.constant 0 : index
    %c2_106 = arith.constant 2 : index
    %c0_107 = arith.constant 0 : index
    %56 = vector.load %arg15[%c0_105, %c2_106, %c0_107] : memref<10x10x32xbf16, #tpu.memory_space<vmem>>, vector<8x8x32xbf16>
    %c0_108 = arith.constant 0 : index
    %c0_109 = arith.constant 0 : index
    %c64_110 = arith.constant 64 : index
    %57 = vector.load %arg16[%c0_108, %c0_109, %c64_110] : memref<8x8x288xbf16, #tpu.memory_space<vmem>>, vector<8x8x32xbf16>
    tpu.vector_store %arg16[%c0_108, %c0_109, %c64_110], %56 {strides = array<i32>} : memref<8x8x288xbf16, #tpu.memory_space<vmem>>, vector<8x8x32xbf16>,
    %c1_111 = arith.constant 1 : index
    %c0_112 = arith.constant 0 : index
    %c0_113 = arith.constant 0 : index
    %58 = vector.load %arg15[%c1_111, %c0_112, %c0_113] : memref<10x10x32xbf16, #tpu.memory_space<vmem>>, vector<8x8x32xbf16>
    %c0_114 = arith.constant 0 : index
    %c0_115 = arith.constant 0 : index
    %c96 = arith.constant 96 : index
    %59 = vector.load %arg16[%c0_114, %c0_115, %c96] : memref<8x8x288xbf16, #tpu.memory_space<vmem>>, vector<8x8x32xbf16>
    tpu.vector_store %arg16[%c0_114, %c0_115, %c96], %58 {strides = array<i32>} : memref<8x8x288xbf16, #tpu.memory_space<vmem>>, vector<8x8x32xbf16>,
    %c1_116 = arith.constant 1 : index
    %c1_117 = arith.constant 1 : index
    %c0_118 = arith.constant 0 : index
    %60 = vector.load %arg15[%c1_116, %c1_117, %c0_118] : memref<10x10x32xbf16, #tpu.memory_space<vmem>>, vector<8x8x32xbf16>
    %c0_119 = arith.constant 0 : index
    %c0_120 = arith.constant 0 : index
    %c128 = arith.constant 128 : index
    %61 = vector.load %arg16[%c0_119, %c0_120, %c128] : memref<8x8x288xbf16, #tpu.memory_space<vmem>>, vector<8x8x32xbf16>
    tpu.vector_store %arg16[%c0_119, %c0_120, %c128], %60 {strides = array<i32>} : memref<8x8x288xbf16, #tpu.memory_space<vmem>>, vector<8x8x32xbf16>,
    %c1_121 = arith.constant 1 : index
    %c2_122 = arith.constant 2 : index
    %c0_123 = arith.constant 0 : index
    %62 = vector.load %arg15[%c1_121, %c2_122, %c0_123] : memref<10x10x32xbf16, #tpu.memory_space<vmem>>, vector<8x8x32xbf16>
    %c0_124 = arith.constant 0 : index
    %c0_125 = arith.constant 0 : index
    %c160 = arith.constant 160 : index
    %63 = vector.load %arg16[%c0_124, %c0_125, %c160] : memref<8x8x288xbf16, #tpu.memory_space<vmem>>, vector<8x8x32xbf16>
    tpu.vector_store %arg16[%c0_124, %c0_125, %c160], %62 {strides = array<i32>} : memref<8x8x288xbf16, #tpu.memory_space<vmem>>, vector<8x8x32xbf16>,
    %c2_126 = arith.constant 2 : index
    %c0_127 = arith.constant 0 : index
    %c0_128 = arith.constant 0 : index
    %64 = vector.load %arg15[%c2_126, %c0_127, %c0_128] : memref<10x10x32xbf16, #tpu.memory_space<vmem>>, vector<8x8x32xbf16>
    %c0_129 = arith.constant 0 : index
    %c0_130 = arith.constant 0 : index
    %c192 = arith.constant 192 : index
    %65 = vector.load %arg16[%c0_129, %c0_130, %c192] : memref<8x8x288xbf16, #tpu.memory_space<vmem>>, vector<8x8x32xbf16>
    tpu.vector_store %arg16[%c0_129, %c0_130, %c192], %64 {strides = array<i32>} : memref<8x8x288xbf16, #tpu.memory_space<vmem>>, vector<8x8x32xbf16>,
    %c2_131 = arith.constant 2 : index
    %c1_132 = arith.constant 1 : index
    %c0_133 = arith.constant 0 : index
    %66 = vector.load %arg15[%c2_131, %c1_132, %c0_133] : memref<10x10x32xbf16, #tpu.memory_space<vmem>>, vector<8x8x32xbf16>
    %c0_134 = arith.constant 0 : index
    %c0_135 = arith.constant 0 : index
    %c224 = arith.constant 224 : index
    %67 = vector.load %arg16[%c0_134, %c0_135, %c224] : memref<8x8x288xbf16, #tpu.memory_space<vmem>>, vector<8x8x32xbf16>
    tpu.vector_store %arg16[%c0_134, %c0_135, %c224], %66 {strides = array<i32>} : memref<8x8x288xbf16, #tpu.memory_space<vmem>>, vector<8x8x32xbf16>,
    %c2_136 = arith.constant 2 : index
    %c2_137 = arith.constant 2 : index
    %c0_138 = arith.constant 0 : index
    %68 = vector.load %arg15[%c2_136, %c2_137, %c0_138] : memref<10x10x32xbf16, #tpu.memory_space<vmem>>, vector<8x8x32xbf16>
    %c0_139 = arith.constant 0 : index
    %c0_140 = arith.constant 0 : index
    %c256 = arith.constant 256 : index
    %69 = vector.load %arg16[%c0_139, %c0_140, %c256] : memref<8x8x288xbf16, #tpu.memory_space<vmem>>, vector<8x8x32xbf16>
    tpu.vector_store %arg16[%c0_139, %c0_140, %c256], %68 {strides = array<i32>} : memref<8x8x288xbf16, #tpu.memory_space<vmem>>, vector<8x8x32xbf16>,
    %c0_141 = arith.constant 0 : index
    %c0_142 = arith.constant 0 : index
    %c0_143 = arith.constant 0 : index
    %70 = vector.load %arg16[%c0_141, %c0_142, %c0_143] : memref<8x8x288xbf16, #tpu.memory_space<vmem>>, vector<8x8x288xbf16>
    %71 = vector.shape_cast %70 : vector<8x8x288xbf16> to vector<64x288xbf16>
    %c0_144 = arith.constant 0 : index
    %c0_145 = arith.constant 0 : index
    %72 = vector.load %arg4[%c0_144, %c0_145] : memref<288x64xbf16, #tpu.memory_space<vmem>>, vector<288x64xbf16>
    %cst_146 = arith.constant dense<0.000000e+00> : vector<64x64xf32>
    %73 = tpu.matmul %71, %72, %cst_146 {dimension_numbers = #tpu.dot_dimension_numbers<[1], [0], [0], [1], [0, 0, 1, 1], [], []>} : vector<64x288xbf16>, vector<288x64xbf16>, vector<64x64xf32> -> vector<64x64xf32>
    %c0_147 = arith.constant 0 : index
    %c0_148 = arith.constant 0 : index
    %74 = vector.load %arg5[%c0_147, %c0_148] : memref<1x64xf32, #tpu.memory_space<vmem>>, vector<1x64xf32>
    %75 = vector.broadcast %74 : vector<1x64xf32> to vector<64x64xf32>
    %76 = arith.addf %73, %75 : vector<64x64xf32>
    %cst_149 = arith.constant 0.000000e+00 : f32
    %77 = vector.broadcast %cst_149 : f32 to vector<64x64xf32>
    %78 = arith.maximumf %76, %77 : vector<64x64xf32>
    %79 = vector.shape_cast %78 : vector<64x64xf32> to vector<32x2x64xf32>
    %cst_150 = arith.constant dense<0xFF800000> : vector<32x64xf32>
    %80 = vector.multi_reduction <maximumf>, %79, %cst_150 [1] : vector<32x2x64xf32> to vector<32x64xf32>
    %81 = vector.shape_cast %80 : vector<32x64xf32> to vector<4x2x4x64xf32>
    %cst_151 = arith.constant dense<0xFF800000> : vector<4x4x64xf32>
    %82 = vector.multi_reduction <maximumf>, %81, %cst_151 [1] : vector<4x2x4x64xf32> to vector<4x4x64xf32>
    %83 = arith.truncf %82 : vector<4x4x64xf32> to vector<4x4x64xbf16>
    %cst_152 = arith.constant 0.000000e+00 : bf16
    %84 = vector.broadcast %cst_152 : bf16 to vector<1x6x64xbf16>
    %c0_153 = arith.constant 0 : index
    %c0_154 = arith.constant 0 : index
    %c0_155 = arith.constant 0 : index
    %85 = vector.load %arg17[%c0_153, %c0_154, %c0_155] : memref<6x6x64xbf16, #tpu.memory_space<vmem>>, vector<1x6x64xbf16>
    tpu.vector_store %arg17[%c0_153, %c0_154, %c0_155], %84 {strides = array<i32>} : memref<6x6x64xbf16, #tpu.memory_space<vmem>>, vector<1x6x64xbf16>,
    %cst_156 = arith.constant 0.000000e+00 : bf16
    %86 = vector.broadcast %cst_156 : bf16 to vector<1x6x64xbf16>
    %c5 = arith.constant 5 : index
    %c0_157 = arith.constant 0 : index
    %c0_158 = arith.constant 0 : index
    %87 = vector.load %arg17[%c5, %c0_157, %c0_158] : memref<6x6x64xbf16, #tpu.memory_space<vmem>>, vector<1x6x64xbf16>
    tpu.vector_store %arg17[%c5, %c0_157, %c0_158], %86 {strides = array<i32>} : memref<6x6x64xbf16, #tpu.memory_space<vmem>>, vector<1x6x64xbf16>,
    %cst_159 = arith.constant 0.000000e+00 : bf16
    %88 = vector.broadcast %cst_159 : bf16 to vector<4x1x64xbf16>
    %c1_160 = arith.constant 1 : index
    %c0_161 = arith.constant 0 : index
    %c0_162 = arith.constant 0 : index
    %89 = vector.load %arg17[%c1_160, %c0_161, %c0_162] : memref<6x6x64xbf16, #tpu.memory_space<vmem>>, vector<4x1x64xbf16>
    tpu.vector_store %arg17[%c1_160, %c0_161, %c0_162], %88 {strides = array<i32>} : memref<6x6x64xbf16, #tpu.memory_space<vmem>>, vector<4x1x64xbf16>,
    %cst_163 = arith.constant 0.000000e+00 : bf16
    %90 = vector.broadcast %cst_163 : bf16 to vector<4x1x64xbf16>
    %c1_164 = arith.constant 1 : index
    %c5_165 = arith.constant 5 : index
    %c0_166 = arith.constant 0 : index
    %91 = vector.load %arg17[%c1_164, %c5_165, %c0_166] : memref<6x6x64xbf16, #tpu.memory_space<vmem>>, vector<4x1x64xbf16>
    tpu.vector_store %arg17[%c1_164, %c5_165, %c0_166], %90 {strides = array<i32>} : memref<6x6x64xbf16, #tpu.memory_space<vmem>>, vector<4x1x64xbf16>,
    %c1_167 = arith.constant 1 : index
    %c1_168 = arith.constant 1 : index
    %c0_169 = arith.constant 0 : index
    %92 = vector.load %arg17[%c1_167, %c1_168, %c0_169] : memref<6x6x64xbf16, #tpu.memory_space<vmem>>, vector<4x4x64xbf16>
    tpu.vector_store %arg17[%c1_167, %c1_168, %c0_169], %83 {strides = array<i32>} : memref<6x6x64xbf16, #tpu.memory_space<vmem>>, vector<4x4x64xbf16>,
    %c0_170 = arith.constant 0 : index
    %c0_171 = arith.constant 0 : index
    %c0_172 = arith.constant 0 : index
    %93 = vector.load %arg17[%c0_170, %c0_171, %c0_172] : memref<6x6x64xbf16, #tpu.memory_space<vmem>>, vector<4x4x64xbf16>
    %c0_173 = arith.constant 0 : index
    %c0_174 = arith.constant 0 : index
    %c0_175 = arith.constant 0 : index
    %94 = vector.load %arg18[%c0_173, %c0_174, %c0_175] : memref<4x4x576xbf16, #tpu.memory_space<vmem>>, vector<4x4x64xbf16>
    tpu.vector_store %arg18[%c0_173, %c0_174, %c0_175], %93 {strides = array<i32>} : memref<4x4x576xbf16, #tpu.memory_space<vmem>>, vector<4x4x64xbf16>,
    %c0_176 = arith.constant 0 : index
    %c1_177 = arith.constant 1 : index
    %c0_178 = arith.constant 0 : index
    %95 = vector.load %arg17[%c0_176, %c1_177, %c0_178] : memref<6x6x64xbf16, #tpu.memory_space<vmem>>, vector<4x4x64xbf16>
    %c0_179 = arith.constant 0 : index
    %c0_180 = arith.constant 0 : index
    %c64_181 = arith.constant 64 : index
    %96 = vector.load %arg18[%c0_179, %c0_180, %c64_181] : memref<4x4x576xbf16, #tpu.memory_space<vmem>>, vector<4x4x64xbf16>
    tpu.vector_store %arg18[%c0_179, %c0_180, %c64_181], %95 {strides = array<i32>} : memref<4x4x576xbf16, #tpu.memory_space<vmem>>, vector<4x4x64xbf16>,
    %c0_182 = arith.constant 0 : index
    %c2_183 = arith.constant 2 : index
    %c0_184 = arith.constant 0 : index
    %97 = vector.load %arg17[%c0_182, %c2_183, %c0_184] : memref<6x6x64xbf16, #tpu.memory_space<vmem>>, vector<4x4x64xbf16>
    %c0_185 = arith.constant 0 : index
    %c0_186 = arith.constant 0 : index
    %c128_187 = arith.constant 128 : index
    %98 = vector.load %arg18[%c0_185, %c0_186, %c128_187] : memref<4x4x576xbf16, #tpu.memory_space<vmem>>, vector<4x4x64xbf16>
    tpu.vector_store %arg18[%c0_185, %c0_186, %c128_187], %97 {strides = array<i32>} : memref<4x4x576xbf16, #tpu.memory_space<vmem>>, vector<4x4x64xbf16>,
    %c1_188 = arith.constant 1 : index
    %c0_189 = arith.constant 0 : index
    %c0_190 = arith.constant 0 : index
    %99 = vector.load %arg17[%c1_188, %c0_189, %c0_190] : memref<6x6x64xbf16, #tpu.memory_space<vmem>>, vector<4x4x64xbf16>
    %c0_191 = arith.constant 0 : index
    %c0_192 = arith.constant 0 : index
    %c192_193 = arith.constant 192 : index
    %100 = vector.load %arg18[%c0_191, %c0_192, %c192_193] : memref<4x4x576xbf16, #tpu.memory_space<vmem>>, vector<4x4x64xbf16>
    tpu.vector_store %arg18[%c0_191, %c0_192, %c192_193], %99 {strides = array<i32>} : memref<4x4x576xbf16, #tpu.memory_space<vmem>>, vector<4x4x64xbf16>,
    %c1_194 = arith.constant 1 : index
    %c1_195 = arith.constant 1 : index
    %c0_196 = arith.constant 0 : index
    %101 = vector.load %arg17[%c1_194, %c1_195, %c0_196] : memref<6x6x64xbf16, #tpu.memory_space<vmem>>, vector<4x4x64xbf16>
    %c0_197 = arith.constant 0 : index
    %c0_198 = arith.constant 0 : index
    %c256_199 = arith.constant 256 : index
    %102 = vector.load %arg18[%c0_197, %c0_198, %c256_199] : memref<4x4x576xbf16, #tpu.memory_space<vmem>>, vector<4x4x64xbf16>
    tpu.vector_store %arg18[%c0_197, %c0_198, %c256_199], %101 {strides = array<i32>} : memref<4x4x576xbf16, #tpu.memory_space<vmem>>, vector<4x4x64xbf16>,
    %c1_200 = arith.constant 1 : index
    %c2_201 = arith.constant 2 : index
    %c0_202 = arith.constant 0 : index
    %103 = vector.load %arg17[%c1_200, %c2_201, %c0_202] : memref<6x6x64xbf16, #tpu.memory_space<vmem>>, vector<4x4x64xbf16>
    %c0_203 = arith.constant 0 : index
    %c0_204 = arith.constant 0 : index
    %c320 = arith.constant 320 : index
    %104 = vector.load %arg18[%c0_203, %c0_204, %c320] : memref<4x4x576xbf16, #tpu.memory_space<vmem>>, vector<4x4x64xbf16>
    tpu.vector_store %arg18[%c0_203, %c0_204, %c320], %103 {strides = array<i32>} : memref<4x4x576xbf16, #tpu.memory_space<vmem>>, vector<4x4x64xbf16>,
    %c2_205 = arith.constant 2 : index
    %c0_206 = arith.constant 0 : index
    %c0_207 = arith.constant 0 : index
    %105 = vector.load %arg17[%c2_205, %c0_206, %c0_207] : memref<6x6x64xbf16, #tpu.memory_space<vmem>>, vector<4x4x64xbf16>
    %c0_208 = arith.constant 0 : index
    %c0_209 = arith.constant 0 : index
    %c384 = arith.constant 384 : index
    %106 = vector.load %arg18[%c0_208, %c0_209, %c384] : memref<4x4x576xbf16, #tpu.memory_space<vmem>>, vector<4x4x64xbf16>
    tpu.vector_store %arg18[%c0_208, %c0_209, %c384], %105 {strides = array<i32>} : memref<4x4x576xbf16, #tpu.memory_space<vmem>>, vector<4x4x64xbf16>,
    %c2_210 = arith.constant 2 : index
    %c1_211 = arith.constant 1 : index
    %c0_212 = arith.constant 0 : index
    %107 = vector.load %arg17[%c2_210, %c1_211, %c0_212] : memref<6x6x64xbf16, #tpu.memory_space<vmem>>, vector<4x4x64xbf16>
    %c0_213 = arith.constant 0 : index
    %c0_214 = arith.constant 0 : index
    %c448 = arith.constant 448 : index
    %108 = vector.load %arg18[%c0_213, %c0_214, %c448] : memref<4x4x576xbf16, #tpu.memory_space<vmem>>, vector<4x4x64xbf16>
    tpu.vector_store %arg18[%c0_213, %c0_214, %c448], %107 {strides = array<i32>} : memref<4x4x576xbf16, #tpu.memory_space<vmem>>, vector<4x4x64xbf16>,
    %c2_215 = arith.constant 2 : index
    %c2_216 = arith.constant 2 : index
    %c0_217 = arith.constant 0 : index
    %109 = vector.load %arg17[%c2_215, %c2_216, %c0_217] : memref<6x6x64xbf16, #tpu.memory_space<vmem>>, vector<4x4x64xbf16>
    %c0_218 = arith.constant 0 : index
    %c0_219 = arith.constant 0 : index
    %c512 = arith.constant 512 : index
    %110 = vector.load %arg18[%c0_218, %c0_219, %c512] : memref<4x4x576xbf16, #tpu.memory_space<vmem>>, vector<4x4x64xbf16>
    tpu.vector_store %arg18[%c0_218, %c0_219, %c512], %109 {strides = array<i32>} : memref<4x4x576xbf16, #tpu.memory_space<vmem>>, vector<4x4x64xbf16>,
    %c0_220 = arith.constant 0 : index
    %c0_221 = arith.constant 0 : index
    %c0_222 = arith.constant 0 : index
    %111 = vector.load %arg18[%c0_220, %c0_221, %c0_222] : memref<4x4x576xbf16, #tpu.memory_space<vmem>>, vector<4x4x576xbf16>
    %112 = vector.shape_cast %111 : vector<4x4x576xbf16> to vector<16x576xbf16>
    %c0_223 = arith.constant 0 : index
    %c0_224 = arith.constant 0 : index
    %113 = vector.load %arg6[%c0_223, %c0_224] : memref<576x128xbf16, #tpu.memory_space<vmem>>, vector<576x128xbf16>
    %cst_225 = arith.constant dense<0.000000e+00> : vector<16x128xf32>
    %114 = tpu.matmul %112, %113, %cst_225 {dimension_numbers = #tpu.dot_dimension_numbers<[1], [0], [0], [1], [0, 0, 1, 1], [], []>} : vector<16x576xbf16>, vector<576x128xbf16>, vector<16x128xf32> -> vector<16x128xf32>
    %c0_226 = arith.constant 0 : index
    %c0_227 = arith.constant 0 : index
    %115 = vector.load %arg7[%c0_226, %c0_227] : memref<1x128xf32, #tpu.memory_space<vmem>>, vector<1x128xf32>
    %116 = vector.broadcast %115 : vector<1x128xf32> to vector<16x128xf32>
    %117 = arith.addf %114, %116 : vector<16x128xf32>
    %cst_228 = arith.constant 0.000000e+00 : f32
    %118 = vector.broadcast %cst_228 : f32 to vector<16x128xf32>
    %119 = arith.maximumf %117, %118 : vector<16x128xf32>
    %120 = vector.shape_cast %119 : vector<16x128xf32> to vector<8x2x128xf32>
    %cst_229 = arith.constant dense<0xFF800000> : vector<8x128xf32>
    %121 = vector.multi_reduction <maximumf>, %120, %cst_229 [1] : vector<8x2x128xf32> to vector<8x128xf32>
    %122 = vector.shape_cast %121 : vector<8x128xf32> to vector<2x2x2x128xf32>
    %cst_230 = arith.constant dense<0xFF800000> : vector<2x2x128xf32>
    %123 = vector.multi_reduction <maximumf>, %122, %cst_230 [1] : vector<2x2x2x128xf32> to vector<2x2x128xf32>
    %124 = vector.shape_cast %123 : vector<2x2x128xf32> to vector<4x128xf32>
    %125 = arith.truncf %124 : vector<4x128xf32> to vector<4x128xbf16>
    %cst_231 = arith.constant 0.000000e+00 : f32
    %126 = vector.broadcast %cst_231 : f32 to vector<1x512xf32>
    %127 = vector.extract_strided_slice %125 {offsets = [0, 0], sizes = [1, 128], strides = [1, 1]} : vector<4x128xbf16> to vector<1x128xbf16>
    %c0_232 = arith.constant 0 : index
    %c0_233 = arith.constant 0 : index
    %128 = vector.load %arg8[%c0_232, %c0_233] : memref<512x512xbf16, #tpu.memory_space<vmem>>, vector<128x512xbf16>
    %cst_234 = arith.constant dense<0.000000e+00> : vector<1x512xf32>
    %129 = tpu.matmul %127, %128, %cst_234 {dimension_numbers = #tpu.dot_dimension_numbers<[1], [0], [0], [1], [0, 0, 1, 1], [], []>} : vector<1x128xbf16>, vector<128x512xbf16>, vector<1x512xf32> -> vector<1x512xf32>
    %130 = arith.addf %126, %129 : vector<1x512xf32>
    %131 = vector.extract_strided_slice %125 {offsets = [1, 0], sizes = [1, 128], strides = [1, 1]} : vector<4x128xbf16> to vector<1x128xbf16>
    %c128_235 = arith.constant 128 : index
    %c0_236 = arith.constant 0 : index
    %132 = vector.load %arg8[%c128_235, %c0_236] : memref<512x512xbf16, #tpu.memory_space<vmem>>, vector<128x512xbf16>
    %cst_237 = arith.constant dense<0.000000e+00> : vector<1x512xf32>
    %133 = tpu.matmul %131, %132, %cst_237 {dimension_numbers = #tpu.dot_dimension_numbers<[1], [0], [0], [1], [0, 0, 1, 1], [], []>} : vector<1x128xbf16>, vector<128x512xbf16>, vector<1x512xf32> -> vector<1x512xf32>
    %134 = arith.addf %130, %133 : vector<1x512xf32>
    %135 = vector.extract_strided_slice %125 {offsets = [2, 0], sizes = [1, 128], strides = [1, 1]} : vector<4x128xbf16> to vector<1x128xbf16>
    %c256_238 = arith.constant 256 : index
    %c0_239 = arith.constant 0 : index
    %136 = vector.load %arg8[%c256_238, %c0_239] : memref<512x512xbf16, #tpu.memory_space<vmem>>, vector<128x512xbf16>
    %cst_240 = arith.constant dense<0.000000e+00> : vector<1x512xf32>
    %137 = tpu.matmul %135, %136, %cst_240 {dimension_numbers = #tpu.dot_dimension_numbers<[1], [0], [0], [1], [0, 0, 1, 1], [], []>} : vector<1x128xbf16>, vector<128x512xbf16>, vector<1x512xf32> -> vector<1x512xf32>
    %138 = arith.addf %134, %137 : vector<1x512xf32>
    %139 = vector.extract_strided_slice %125 {offsets = [3, 0], sizes = [1, 128], strides = [1, 1]} : vector<4x128xbf16> to vector<1x128xbf16>
    %c384_241 = arith.constant 384 : index
    %c0_242 = arith.constant 0 : index
    %140 = vector.load %arg8[%c384_241, %c0_242] : memref<512x512xbf16, #tpu.memory_space<vmem>>, vector<128x512xbf16>
    %cst_243 = arith.constant dense<0.000000e+00> : vector<1x512xf32>
    %141 = tpu.matmul %139, %140, %cst_243 {dimension_numbers = #tpu.dot_dimension_numbers<[1], [0], [0], [1], [0, 0, 1, 1], [], []>} : vector<1x128xbf16>, vector<128x512xbf16>, vector<1x512xf32> -> vector<1x512xf32>
    %142 = arith.addf %138, %141 : vector<1x512xf32>
    %c0_244 = arith.constant 0 : index
    %c0_245 = arith.constant 0 : index
    %143 = vector.load %arg9[%c0_244, %c0_245] : memref<1x512xf32, #tpu.memory_space<vmem>>, vector<1x512xf32>
    %144 = arith.addf %142, %143 : vector<1x512xf32>
    %cst_246 = arith.constant 0.000000e+00 : f32
    %145 = vector.broadcast %cst_246 : f32 to vector<1x512xf32>
    %146 = arith.maximumf %144, %145 : vector<1x512xf32>
    %147 = arith.truncf %146 : vector<1x512xf32> to vector<1x512xbf16>
    %c0_247 = arith.constant 0 : index
    %c0_248 = arith.constant 0 : index
    %148 = vector.load %arg10[%c0_247, %c0_248] : memref<512x128xbf16, #tpu.memory_space<vmem>>, vector<512x128xbf16>
    %cst_249 = arith.constant dense<0.000000e+00> : vector<1x128xf32>
    %149 = tpu.matmul %147, %148, %cst_249 {dimension_numbers = #tpu.dot_dimension_numbers<[1], [0], [0], [1], [0, 0, 1, 1], [], []>} : vector<1x512xbf16>, vector<512x128xbf16>, vector<1x128xf32> -> vector<1x128xf32>
    %c0_250 = arith.constant 0 : index
    %c0_251 = arith.constant 0 : index
    %150 = vector.load %arg11[%c0_250, %c0_251] : memref<1x128xf32, #tpu.memory_space<vmem>>, vector<1x128xf32>
    %151 = arith.addf %149, %150 : vector<1x128xf32>
    %152 = vector.shape_cast %151 : vector<1x128xf32> to vector<1x1x128xf32>
    %c0_252 = arith.constant 0 : index
    %c0_253 = arith.constant 0 : index
    %c0_254 = arith.constant 0 : index
    %153 = vector.load %arg12[%c0_252, %c0_253, %c0_254] : memref<1x1x128xf32, #tpu.memory_space<vmem>>, vector<1x1x128xf32>
    tpu.vector_store %arg12[%c0_252, %c0_253, %c0_254], %152 {strides = array<i32>} : memref<1x1x128xf32, #tpu.memory_space<vmem>>, vector<1x1x128xf32>,
    return
  }
  func.func @transform_0(%arg0: i32) -> (i32, i32, i32, i32) {
    %c0_i32 = arith.constant 0 : i32
    %c0_i32_0 = arith.constant 0 : i32
    %c0_i32_1 = arith.constant 0 : i32
    %c0_i32_2 = arith.constant 0 : i32
    return %arg0, %c0_i32, %c0_i32_0, %c0_i32_1 : i32, i32, i32, i32
  }
  func.func @transform_1(%arg0: i32) -> (i32, i32) {
    %c0_i32 = arith.constant 0 : i32
    %c0_i32_0 = arith.constant 0 : i32
    %c0_i32_1 = arith.constant 0 : i32
    return %c0_i32, %c0_i32_0 : i32, i32
  }
  func.func @transform_2(%arg0: i32) -> (i32, i32) {
    %c0_i32 = arith.constant 0 : i32
    %c0_i32_0 = arith.constant 0 : i32
    %c0_i32_1 = arith.constant 0 : i32
    return %c0_i32, %c0_i32_0 : i32, i32
  }
  func.func @transform_3(%arg0: i32) -> (i32, i32) {
    %c0_i32 = arith.constant 0 : i32
    %c0_i32_0 = arith.constant 0 : i32
    %c0_i32_1 = arith.constant 0 : i32
    return %c0_i32, %c0_i32_0 : i32, i32
  }
  func.func @transform_4(%arg0: i32) -> (i32, i32) {
    %c0_i32 = arith.constant 0 : i32
    %c0_i32_0 = arith.constant 0 : i32
    %c0_i32_1 = arith.constant 0 : i32
    return %c0_i32, %c0_i32_0 : i32, i32
  }
  func.func @transform_5(%arg0: i32) -> (i32, i32) {
    %c0_i32 = arith.constant 0 : i32
    %c0_i32_0 = arith.constant 0 : i32
    %c0_i32_1 = arith.constant 0 : i32
    return %c0_i32, %c0_i32_0 : i32, i32
  }
  func.func @transform_6(%arg0: i32) -> (i32, i32) {
    %c0_i32 = arith.constant 0 : i32
    %c0_i32_0 = arith.constant 0 : i32
    %c0_i32_1 = arith.constant 0 : i32
    return %c0_i32, %c0_i32_0 : i32, i32
  }
  func.func @transform_7(%arg0: i32) -> (i32, i32) {
    %c0_i32 = arith.constant 0 : i32
    %c0_i32_0 = arith.constant 0 : i32
    %c0_i32_1 = arith.constant 0 : i32
    return %c0_i32, %c0_i32_0 : i32, i32
  }
  func.func @transform_8(%arg0: i32) -> (i32, i32) {
    %c0_i32 = arith.constant 0 : i32
    %c0_i32_0 = arith.constant 0 : i32
    %c0_i32_1 = arith.constant 0 : i32
    return %c0_i32, %c0_i32_0 : i32, i32
  }
  func.func @transform_9(%arg0: i32) -> (i32, i32) {
    %c0_i32 = arith.constant 0 : i32
    %c0_i32_0 = arith.constant 0 : i32
    %c0_i32_1 = arith.constant 0 : i32
    return %c0_i32, %c0_i32_0 : i32, i32
  }
  func.func @transform_10(%arg0: i32) -> (i32, i32) {
    %c0_i32 = arith.constant 0 : i32
    %c0_i32_0 = arith.constant 0 : i32
    %c0_i32_1 = arith.constant 0 : i32
    return %c0_i32, %c0_i32_0 : i32, i32
  }
  func.func @transform_11(%arg0: i32) -> (i32, i32, i32) {
    %c0_i32 = arith.constant 0 : i32
    %c0_i32_0 = arith.constant 0 : i32
    %c0_i32_1 = arith.constant 0 : i32
    return %arg0, %c0_i32, %c0_i32_0 : i32, i32, i32
  }
}

</mosaic_0001>

<bundles_post_ra>
// kernel: vgg_forward.1
= control target key start
LH: loop header
LB: loop body
LE: loop exit
PB: predicated region body
PF: predicated region fallthrough
CT: control target
= control target key end

     0   :  { %16 = vsyncpa [#allocation9], 0  ;;  %s15576_s0 = inlined_call_operand.vmem [shape: bf16[2,16,16,8], index: 0, kind: input, shape index: {}]   ;;  %s15577_s1 = inlined_call_operand.vmem [shape: bf16[72,32], index: 1, kind: input, shape index: {}]   ;;  %s15578_s2 = inlined_call_operand.vmem [shape: f32[1,32], index: 2, kind: input, shape index: {}]   ;;  %s15579_s3 = inlined_call_operand.vmem [shape: bf16[288,64], index: 3, kind: input, shape index: {}]   ;;  %s15580_s4 = inlined_call_operand.vmem [shape: f32[1,64], index: 4, kind: input, shape index: {}]   ;;  %s15581_s5 = inlined_call_operand.hbm [shape: bf16[576,128], index: 5, kind: input, shape index: {}]   ;;  %s15582_s6 = inlined_call_operand.vmem [shape: f32[1,128], index: 6, kind: input, shape index: {}]   ;;  %s15583_s7 = inlined_call_operand.vmem [shape: bf16[512,512], index: 7, kind: input, shape index: {}]   ;;  %s15584_s8 = inlined_call_operand.vmem [shape: f32[1,512], index: 8, kind: input, shape index: {}]   ;;  %s15585_s9 = inlined_call_operand.hbm [shape: bf16[512,128], index: 9, kind: input, shape index: {}]   ;;  %s15586_s10 = inlined_call_operand.vmem [shape: f32[1,128], index: 10, kind: input, shape index: {}]   ;;  %s15587_s11 = inlined_call_operand.hbm [shape: f32[2,1,128], index: 11, kind: output, shape index: {}]  }
   0x1   :  { %17 = vsyncpa [#allocation12], 0 }
   0x2   :  { %18 = vsyncpa [#allocation10], 0 }
   0x3   :  { %20 = vsyncpa [#allocation10 + $0x1], 0  ;;  %s12699_s17 = smov 0   ;;  %s12701_s18 = smov 0  }
   0x4   :  { %s12703_s19 = smov 0   ;;  %s12705_s20 = smov 0  }
   0x5 LB: > { %15603 = sst [smem:[#allocation17_spill]] %s12607_s17  ;;  %s12720_s21 = sadd.s32 4294967295, %s12619_s20   ;;  %s12619_s20 = sphi %s12705_s20, %s15701_s20   ;;  %s12615_s19 = sphi %s12703_s19, %s15703_s19   ;;  %s12611_s18 = sphi %s12701_s18, %s15705_s18   ;;  %s12607_s17 = sphi %s12699_s17, %s15704_s17  }
   0x6   : > { %15604 = sst [smem:[#allocation18_spill]] %s12615_s19  ;;  %s10893_s22 = sadd.s32 4294967294, %s12619_s20  }
   0x7   : > { %s12724_s23 = sadd.s32 1, %s12619_s20   ;;  %s269_s24 = sadd.s32 1, %s12615_s19 }
   0x8   : > { %15605 = sst [smem:[#allocation19_spill]] %s12724_s23  ;;  %s266_s25 = ssub.s32 %s12619_s20, %s12724_s23 }
   0x9   : > { %p279_p0 = scmp.ne.s32.totalorder %s12615_s19, %s12611_s18  ;;  %p267_p1 = scmp.eq.s32.totalorder %s266_s25, 0 }
   0xa   : > { %p280_p2 = scmp.eq.s32.totalorder %s12720_s21, 1  ;;  %p285_p3 = scmp.ne.s32.totalorder %s12611_s18, %s12607_s17 }
   0xb   : > { %p286_p4 = scmp.eq.s32.totalorder %s10893_s22, 1  ;;  %p10894_p7 = scmp.ge.s32.totalorder %s12619_s20, 1 }
   0xc   : > { %s12735_s26 = scalar_select %p267_p1, %s12615_s19, %s269_s24  }
   0xd   : > { %p12737_p5 = por %p280_p2, %p279_p0  ;;  %p12741_p6 = por %p286_p4, %p285_p3 }
   0xe   : > { %15606 = sst [smem:[#allocation20_spill]] %s12735_s26  ;;  %p293_p8 = scmp.lt.s32.totalorder %s12619_s20, 3 }
   0xf   : > { %s15607_s27 = scalar_select %p12737_p5, 1, 0 }
  0x10   : > { %s15608_s28 = scalar_select %p12741_p6, 1, 0 }
  0x11   : > { %p15589_p9 = scmp.eq.s32.totalorder %s12720_s21, 0  ;;  %p12748_p10 = pnand %p10894_p7, %p293_p8 }
  0x12   : > { %15609 = sst [smem:[#allocation21_spill]] %s15608_s28  ;;  %s12621_s30 = smov [#allocation8]  }
  0x13   : > { %s15610_s29 = scalar_select %p12748_p10, 1, 0 }
  0x14   : > { %s317_s12 = sshll.u32 %s12621_s30, 4  ;;  %p11879_p11 = pneg %p12748_p10  ;;  %s318_s12 = int_to_ptr.vmem [resolvable:$true] %s317_s12 }
  0x15   : > { %s12622_s14 = smov [#allocation11]   ;;  %s12493_s24 = scalar_lea.hbm %s15581_s5, 4608 }
  0x16   : > { %p12756_p12 = pnand %p15589_p9, %p11879_p11  ;;  %s339_s15 = sshll.u32 %s12622_s14, 4  ;;  %s12760_s15 = int_to_ptr.vmem [resolvable:$true] %s339_s15 }
  0x17   : > { %p12494_p13 = scmp.ne.s32.totalorder %s15581_s5, %s12493_s24  ;;  %p12500_p3 = scmp.lt.u32.totalorder %s12493_s24, %s15581_s5 }
  0x18   : > { %p12495_p0 = pneg %p12756_p12 }
  0x1a   : > { %p12496_p1 = pnand %p12495_p0, %p12494_p13 }
  0x1c   : > { %p12497_p2 = pneg %p12496_p1 }
  0x1e   : > { %p12502_p4 = pnand %p12500_p3, %p12497_p2 }
  0x20   : > { %12505 = shalt.err (!%p12502_p4)
}
  0x21   : > { %s12506_s14 = scalar_lea.vmem %s318_s12, 4608  ;;  %p12514_p9 = scmp.lt.s32.totalorder %s318_s12, %s318_s12 }
  0x22   : > { %p12507_p7 = scmp.ne.s32.totalorder %s318_s12, %s12506_s14  ;;  %p12515_p6 = scmp.lt.s32.totalorder %s12506_s14, %s12506_s14 }
  0x24   : > { %p12509_p8 = pnand %p12507_p7, %p12495_p0  ;;  %p12516_p5 = por %p12515_p6, %p12514_p9 }
  0x26   : > { %p12510_p11 = pneg %p12509_p8 }
  0x28   : > { %p12517_p10 = pnand %p12516_p5, %p12510_p11 }
  0x2a   : > { %12520 = shalt.err (!%p12517_p10)
}
  0x2b   : > { %s12623_s16 = smov 64   ;;  %s12624_s22 = smov 4  }
  0x2c   : > { %11882 = dma.hbm_to_vmem [thread:$0]  (!%p12756_p12), %s15581_s5, 4608, %s318_s12, [#allocation9], %s12623_s16, %s12623_s16, %s12624_s22  }
  0x2d   : > { %s12521_s30 = scalar_lea.hbm %s15585_s9, 4096 }
  0x2e   : > { %p12522_p13 = scmp.ne.s32.totalorder %s15585_s9, %s12521_s30  ;;  %p12528_p9 = scmp.lt.u32.totalorder %s12521_s30, %s15585_s9 }
  0x30   : > { %p12524_p5 = pnand %p12522_p13, %p12495_p0 }
  0x32   : > { %p12525_p6 = pneg %p12524_p5 }
  0x34   : > { %p12530_p10 = pnand %p12528_p9, %p12525_p6 }
  0x36   : > { %12533 = shalt.err (!%p12530_p10)
}
  0x37   : > { %s12534_s12 = scalar_lea.vmem %s12760_s15, 4096  ;;  %p12542_p4 = scmp.lt.s32.totalorder %s12760_s15, %s12760_s15 }
  0x38   : > { %p12535_p1 = scmp.ne.s32.totalorder %s12760_s15, %s12534_s12  ;;  %p12543_p7 = scmp.lt.s32.totalorder %s12534_s12, %s12534_s12 }
  0x3a   : > { %p12537_p2 = pnand %p12535_p1, %p12495_p0  ;;  %p12544_p8 = por %p12543_p7, %p12542_p4 }
  0x3c   : > { %p12538_p3 = pneg %p12537_p2 }
  0x3e   : > { %p12545_p11 = pnand %p12544_p8, %p12538_p3 }
  0x40   : > { %12548 = shalt.err (!%p12545_p11)
}
  0x41   : > { %11885 = dma.hbm_to_vmem [thread:$0]  (!%p12756_p12), %s15585_s9, 4096, %s12760_s15, [#allocation12], %s12623_s16, %s12623_s16, %s12624_s22  }
  0x42   : > { %p15612_p13 = scmp.ne.s32.totalorder %s15610_s29, 0 }
  0x43   : > { %p15613_p5 = scmp.eq.s32.totalorder (!%p15612_p13), %s12720_s21, 0 }
  0x44   : > { %366 = sbr.rel (%p15612_p13) target bundleno = 2350 (0x92e), region = 64 }
  0x4b   : > { %12594 = dma.done.wait (%p15613_p5), [#allocation9], 4608   ;;  %p15614_p0 = pmov %p15613_p5 }
  0x4d   : > { %12596 = vsyncadd (%p15614_p0), [#allocation9], 4294962688  ;;  %p15615_p6 = pmov %p15614_p0 }
  0x4e   : > { %p15616_p9 = pmov %p15614_p0 }
  0x4f   : > { %12598 = dma.done.wait (%p15615_p6), [#allocation12], 4096  }
  0x50   : > { %12600 = vsyncadd (%p15616_p9), [#allocation12], 4294963200  ;;  %vm447_vm0 = vcmask 60416   ;;  %vm450_vm1 = vcmask 57344   ;;  %v12625_v0 = vmov 0   ;;  %p409_p12 = scmp.lt.s32.totalorder %s12720_s21, 1 }
  0x51   : > { %448 = vst.msk [vmem:[#allocation2] sm:$0xf] %vm447_vm0, %v12625_v0  ;;  %449 = vst.msk [vmem:[#allocation2 + $0x4] sm:$0xf] %vm447_vm0, %v12625_v0  ;;  %vm15597_vm2 = vsmask.f32 256 }
  0x52   : > { %451 = vst.msk [vmem:[#allocation2 + $0x8] sm:$0x1] %vm450_vm1, %v12625_v0  ;;  %455 = vst.msk [vmem:[#allocation2 + $0xd4] sm:$0x1] %vm450_vm1, %v12625_v0  ;;  %s410_s28 = scalar_select %p409_p12, %s12720_s21, 1  ;;  %vm1749_vm6 = vcmask 1046528  }
  0x53   : > { %453 = vst.msk [vmem:[#allocation2 + $0xcc] sm:$0xf] %vm447_vm0, %v12625_v0  ;;  %454 = vst.msk [vmem:[#allocation2 + $0xd0] sm:$0xf] %vm447_vm0, %v12625_v0  ;;  %vm15596_vm3 = vsmask.f32 7938 }
  0x54   : > { %vm1315_vm4 = vsmask.f32 7424  ;;  %s11553_s29 = sshll.u32 %s410_s28, 7  ;;  %vm12835_vm5 = vmand %vm450_vm1, %vm15597_vm2  ;;  %v460_v2 = vld [vmem:[#allocation2 + $0xc] sm:$0x1]  ;;  %s12626_s22 = smov 16  }
  0x55   : > { %vm558_vm7 = vsmask.f32 4368  ;;  %s12842_s16 = scalar_lea.vmem %s15576_s0, %s11553_s29  ;;  %v463_v5 = vld [vmem:[#allocation2 + $0x18] sm:$0x1]  ;;  %v461_v14 = vsel %vm12835_vm5, 0, %v460_v2  ;;  %vm12855_vm8 = vmand %vm450_vm1, %vm15596_vm3  ;;  %s12627_s19 = smov 8  }
  0x56   : > { %v415_v12 = vld [vmem:[%s12842_s16] sm:$0xf]  ;;  %v416_v13 = vld [vmem:[%s12842_s16 + $0x4] sm:$0xf]  ;;  %462 = vst [vmem:[#allocation2 + $0xc] sm:$0x1] %v461_v14  ;;  %vm12866_vm9 = vmor %vm15597_vm2, %vm558_vm7 }
  0x57   : > { %v561_v18 = vshrl.u32 %v415_v12, 16  ;;  %v417_v19 = vld [vmem:[%s12842_s16 + $0x8] sm:$0xf]  ;;  %v564_v20 = vshll.u32 %v415_v12, 16  ;;  %v569_v21 = vshrl.u32 %v416_v13, 16  ;;  %v572_v22 = vshll.u32 %v416_v13, 16  ;;  %vm12873_vm10 = vmand %vm447_vm0, %vm15596_vm3 }
  0x58   : > { %v11944_v3 = vld [vmem:[#allocation2] sm:$0xff]   ;;  %v418_v23 = vld [vmem:[%s12842_s16 + $0xc] sm:$0xf]  ;;  %v464_v24 = vsel %vm12835_vm5, 0, %v463_v5  ;;  %v578_v28 = vshrl.u32 %v417_v19, 16  ;;  %v581_v32 = vshll.u32 %v417_v19, 16 }
  0x59   : > { %v11945_v4 = vld [vmem:[#allocation2 + $0x8] ss:$0 sps:$4 sm:$0x11]   ;;  %v11946_v6 = vld [vmem:[#allocation2] sm:$0xfe]   ;;  %v1317_v7 = vshrl.u32 %v11944_v3, 16 }
  0x5a   : > { %v1319_v8 = vshll.u32 %v11944_v3, 16  ;;  %v1324_v9 = vshll.u32 %v11945_v4, 16  ;;  %v11947_v10 = vld [vmem:[#allocation2 + $0x8] ss:$0 sps:$4 sm:$0x11]   ;;  %v1750_v11 = vrot.slane %v11946_v6, 1 }
  0x5b   : > { %v1751_v17 = vrot.slane %v11947_v10, 1  ;;  %v563_v27 = vrot.slane %v561_v18, 7  ;;  %465 = vst [vmem:[#allocation2 + $0x18] sm:$0x1] %v464_v24  ;;  %v466_v29 = vld [vmem:[#allocation2 + $0x24] sm:$0x1] }
  0x5c   : > { %v1321_v15 = vrot.slane %v1319_v8, 1  ;;  %v1326_v16 = vrot.slane %v1324_v9, 1  ;;  %v12860_v31 = vrot.slane %v569_v21, 7  ;;  %v586_v33 = vshrl.u32 %v418_v23, 16  ;;  %v419_v35 = vld [vmem:[%s12842_s16 + $0x10] sm:$0xf] }
  0x5d   : > { %v1752_v26 = vsel %vm1749_vm6, %v1750_v11, %v1751_v17  ;;  %v589_v34 = vshll.u32 %v418_v23, 16  ;;  %v566_v38 = vor.u32 %v564_v20, %v563_v27  ;;  %v567_v39 = vrot.slane %v563_v27, 4  ;;  %v420_v41 = vld [vmem:[%s12842_s16 + $0x14] sm:$0xf]  ;;  %v513_v47 = vld [vmem:[#allocation2 + $0x20] sm:$0x1] }
  0x5e   : > { %v1322_v25 = vor.u32 %v1321_v15, %v1317_v7  ;;  %1798 = vrot.lane.b32.xlu1 %v1752_v26, %s12626_s22  ;;  %v580_v40 = vrot.slane %v578_v28, 7  ;;  %v510_v42 = vld [vmem:[#allocation2 + $0x14] sm:$0x1]  ;;  %v574_v44 = vor.u32 %v572_v22, %v12860_v31  ;;  %v12879_v45 = vrot.slane %v586_v33, 7  ;;  %v516_v48 = vld [vmem:[#allocation2 + $0x2c] sm:$0x1] }
  0x5f   : > { %v467_v46 = vsel %vm12835_vm5, 0, %v466_v29  ;;  %v595_v51 = vshrl.u32 %v419_v35, 16  ;;  %v598_v52 = vshll.u32 %v419_v35, 16  ;;  %v12884_v53 = vld [vmem:[%s12842_s16 + $0x18] sm:$0xf]  ;;  %v576_v55 = vrot.slane %v12860_v31, 4 }
  0x60   : > { %v1327_v36 = vsel %vm1315_vm4, %v1322_v25, %v1326_v16  ;;  %v583_v49 = vor.u32 %v581_v32, %v580_v40  ;;  %v584_v50 = vrot.slane %v580_v40, 4  ;;  %468 = vst [vmem:[#allocation2 + $0x24] sm:$0x1] %v467_v46  ;;  %v575_v54 = vsel %vm12866_vm9, %v567_v39, %v574_v44  ;;  %v882_v56 = vld [vmem:[#allocation2 + $0xc] sm:$0xf]  ;;  %s12628_s26 = smov 24  }
  0x61   : > { %1508 = vrot.lane.b32.xlu0 %v1327_v36, %s12627_s19  ;;  %v591_v57 = vor.u32 %v589_v34, %v12879_v45  ;;  %v603_v58 = vshrl.u32 %v420_v41, 16  ;;  %v422_v59 = vld [vmem:[%s12842_s16 + $0x1c] sm:$0xf]  ;;  %v469_v60 = vld [vmem:[#allocation2 + $0x30] sm:$0x1]  ;;  %v883_v61 = vsel %vm12873_vm10, %v566_v38, %v882_v56  ;;  %v597_v62 = vrot.slane %v595_v51, 7 }
  0x62   : > { %885 = vst.msk [vmem:[#allocation2 + $0x10] sm:$0xf] %vm447_vm0, %v575_v54  ;;  %v606_v63 = vshll.u32 %v420_v41, 16  ;;  %v511_v2 = vsel %vm12855_vm8, 0, %v510_v42  ;;  %v519_v3 = vld [vmem:[#allocation2 + $0x38] sm:$0x1] }
  0x63   : > { %884 = vst [vmem:[#allocation2 + $0xc] sm:$0xf] %v883_v61  ;;  %v592_v4 = vsel %vm12866_vm9, %v584_v50, %v591_v57  ;;  %v889_v5 = vld [vmem:[#allocation2 + $0x18] sm:$0xf]  ;;  %v12898_v6 = vrot.slane %v603_v58, 7  ;;  %v514_v7 = vsel %vm12855_vm8, 0, %v513_v47  ;;  %v600_v10 = vor.u32 %v598_v52, %v597_v62 }
  0x64   : > { %512 = vst [vmem:[#allocation2 + $0x14] sm:$0x1] %v511_v2  ;;  %v517_v8 = vsel %vm12855_vm8, 0, %v516_v48  ;;  %v890_v9 = vsel %vm12873_vm10, %v583_v49, %v889_v5  ;;  %892 = vst.msk [vmem:[#allocation2 + $0x1c] sm:$0xf] %vm447_vm0, %v592_v4  ;;  %v601_v11 = vrot.slane %v597_v62, 4 }
  0x65   : > { %515 = vst [vmem:[#allocation2 + $0x20] sm:$0x1] %v514_v7  ;;  %518 = vst [vmem:[#allocation2 + $0x2c] sm:$0x1] %v517_v8  ;;  %v470_v12 = vsel %vm12835_vm5, 0, %v469_v60  ;;  %v593_v15 = vrot.slane %v12879_v45, 4  ;;  %v608_v16 = vor.u32 %v606_v63, %v12898_v6 }
  0x66   : > { %v12910_v13 = vld [vmem:[%s12842_s16 + $0x20] sm:$0xf]  ;;  %v12913_v14 = vld [vmem:[%s12842_s16 + $0x24] sm:$0xf]  ;;  %891 = vst [vmem:[#allocation2 + $0x18] sm:$0xf] %v890_v9 }
  0x67   : > { %v610_v17 = vrot.slane %v12898_v6, 4  ;;  %471 = vst [vmem:[#allocation2 + $0x30] sm:$0x1] %v470_v12  ;;  %v612_v18 = vshrl.u32 %v12884_v53, 16  ;;  %v472_v19 = vld [vmem:[#allocation2 + $0x3c] sm:$0x1]  ;;  %v609_v24 = vsel %vm12866_vm9, %v601_v11, %v608_v16 }
  0x68   : > { %v620_v20 = vshrl.u32 %v422_v59, 16  ;;  %v623_v21 = vshll.u32 %v422_v59, 16  ;;  %v520_v22 = vsel %vm12855_vm8, 0, %v519_v3  ;;  %v473_v23 = vsel %vm12835_vm5, 0, %v472_v19  ;;  %v896_v25 = vld [vmem:[#allocation2 + $0x24] sm:$0xf] }
  0x69   : > { %v12925_v26 = vrot.slane %v612_v18, 7  ;;  %v615_v27 = vshll.u32 %v12884_v53, 16  ;;  %521 = vst [vmem:[#allocation2 + $0x38] sm:$0x1] %v520_v22  ;;  %474 = vst [vmem:[#allocation2 + $0x3c] sm:$0x1] %v473_v23  ;;  %v897_v29 = vsel %vm12873_vm10, %v600_v10, %v896_v25 }
  0x6a   : > { %v629_v28 = vshrl.u32 %v12910_v13, 16  ;;  %899 = vst.msk [vmem:[#allocation2 + $0x28] sm:$0xf] %vm447_vm0, %v609_v24  ;;  %v12932_v31 = vrot.slane %v620_v20, 7  ;;  %v632_v32 = vshll.u32 %v12910_v13, 16  ;;  %v637_v33 = vshrl.u32 %v12913_v14, 16 }
  0x6b   : > { %898 = vst [vmem:[#allocation2 + $0x24] sm:$0xf] %v897_v29  ;;  %v11948_v34 = vld [vmem:[#allocation2 + $0xc] sm:$0xff]   ;;  %v886_v35 = vld [vmem:[#allocation2 + $0x14] sm:$0x1]  ;;  %v618_v36 = vrot.slane %v12925_v26, 4 }
  0x6c   : > { %v625_v38 = vor.u32 %v623_v21, %v12932_v31  ;;  %v887_v39 = vsel %vm12835_vm5, %v576_v55, %v886_v35  ;;  %1975 = vrot.lane.b32.xlu0 %v11948_v34, %s12628_s26  ;;  %v640_v42 = vshll.u32 %v12913_v14, 16  ;;  %v11952_v45 = vld [vmem:[#allocation2 + $0xc] sm:$0xfe]   ;;  %v12945_v46 = vrot.slane %v629_v28, 7  ;;  %v893_v48 = vld [vmem:[#allocation2 + $0x20] sm:$0x1] }
  0x6d   : > { %v11949_v40 = vld [vmem:[#allocation2 + $0x18] sm:$0xff]   ;;  %888 = vst [vmem:[#allocation2 + $0x14] sm:$0x1] %v887_v39  ;;  %v11954_v47 = vld [vmem:[#allocation2 + $0xc] sm:$0xfe]   ;;  %v2649_v49 = vrot.slane %v11952_v45, 1  ;;  %v894_v50 = vsel %vm12835_vm5, %v593_v15, %v893_v48 }
  0x6e   : > { %v626_v41 = vsel %vm12866_vm9, %v618_v36, %v625_v38  ;;  %v11950_v44 = vld [vmem:[#allocation2 + $0x18] sm:$0xff]   ;;  %1977 = vrot.lane.b32.xlu1 %v11949_v40, %s12628_s26  ;;  %s12629_s24 = smov 48   ;;  %v1753_v54 = vrot.slane %v11954_v47, 1  ;;  %895 = vst [vmem:[#allocation2 + $0x20] sm:$0x1] %v894_v50  ;;  %v11964_v5 = vld [vmem:[#allocation2 + $0xc] sm:$0xff]  }
  0x6f   : > { %906 = vst.msk [vmem:[#allocation2 + $0x34] sm:$0xf] %vm447_vm0, %v626_v41  ;;  %v11962_v51 = vld [vmem:[#allocation2 + $0x18] sm:$0xff]   ;;  %v900_v58 = vld [vmem:[#allocation2 + $0x2c] sm:$0x1]  ;;  %s12630_s25 = smov 40  }
  0x70   : > { %2875 = vrot.lane.b32.xlu0 %v11950_v44, %s12629_s24  ;;  %v11956_v55 = vld [vmem:[#allocation2 + $0x18] sm:$0xfe]   ;;  %v2229_v59 = vshrl.u32 %v11962_v51, 16  ;;  %v901_v62 = vsel %vm12835_vm5, %v610_v17, %v900_v58  ;;  %v2231_v2 = vshll.u32 %v11962_v51, 16  ;;  %v1329_v15 = vshrl.u32 %v11964_v5, 16  ;;  %s12631_s30 = smov 64  }
  0x71   : > { %v11958_v56 = vld [vmem:[#allocation2 + $0x18] sm:$0xfe]   ;;  %v3549_v57 = vrot.slane %v11956_v55, 1  ;;  %902 = vst [vmem:[#allocation2 + $0x2c] sm:$0x1] %v901_v62  ;;  %v1331_v19 = vshll.u32 %v11964_v5, 16 }
  0x72   : > { %v11951_v52 = vld [vmem:[#allocation2 + $0x24] sm:$0xff]   ;;  %v2652_v61 = vrot.slane %v11958_v56, 1  ;;  %v2233_v7 = vrot.slane %v2231_v2, 1  ;;  %v11968_v44 = vld [vmem:[#allocation2 + $0xc] sm:$0xff]   ;;  %s12632_s14 = smov 32   ;;  %v11972_v2 = vld [vmem:[#allocation2 + $0x18] sm:$0xff]  }
  0x73   : > { %2877 = vrot.lane.b32.xlu1 %v11951_v52, %s12629_s24  ;;  %v11960_v4 = vld [vmem:[#allocation2 + $0x24] sm:$0xfe]   ;;  %v1333_v28 = vrot.slane %v1331_v19, 1  ;;  %v2217_v52 = vshrl.u32 %v11968_v44, 16  ;;  %s12633_s12 = smov 56   ;;  %vm1122_vm11 = vcmask 64512  }
  0x74   : > { %v11953_v60 = vld [vmem:[#allocation2 + $0x14] ss:$0 sps:$4 sm:$0x11]   ;;  %v3552_v10 = vrot.slane %v11960_v4, 1  ;;  %v2234_v22 = vor.u32 %v2233_v7, %v2229_v59  ;;  %v11966_v38 = vld [vmem:[#allocation2 + $0x24] sm:$0xff]   ;;  %vm1556_vm12 = vcmask 130112  }
  0x75   : > { %v11955_v63 = vld [vmem:[#allocation2 + $0x14] ss:$0 sps:$4 sm:$0x11]   ;;  %v2650_v3 = vrot.slane %v11953_v60, 1  ;;  %v1334_v35 = vor.u32 %v1333_v28, %v1329_v15  ;;  %v3129_v47 = vshrl.u32 %v11966_v38, 16  ;;  %v3131_v48 = vshll.u32 %v11966_v38, 16 }
  0x76   : > { %v1754_v6 = vrot.slane %v11955_v63, 1  ;;  %v11957_v9 = vld [vmem:[#allocation2 + $0x20] ss:$0 sps:$4 sm:$0x11]   ;;  %vm15599_vm13 = vcmask 195712   ;;  %vm2023_vm14 = vcmask 261312  }
  0x77   : > { %v2651_v8 = vsel %vm1749_vm6, %v2649_v49, %v2650_v3  ;;  %v11959_v12 = vld [vmem:[#allocation2 + $0x20] ss:$0 sps:$4 sm:$0x11]   ;;  %v3550_v16 = vrot.slane %v11957_v9, 1  ;;  %v11970_v49 = vld [vmem:[#allocation2 + $0x18] sm:$0xff]   ;;  %v3133_v56 = vrot.slane %v3131_v48, 1 }
  0x78   : > { %2697 = vrot.lane.b32.xlu0 %v2651_v8, %s12630_s25  ;;  %v1755_v11 = vsel %vm1749_vm6, %v1753_v54, %v1754_v6  ;;  %v11963_v17 = vld [vmem:[#allocation2 + $0x20] ss:$0 sps:$4 sm:$0x11]   ;;  %v2653_v18 = vrot.slane %v11959_v12, 1  ;;  %v2219_v54 = vshll.u32 %v11968_v44, 16  ;;  %v3117_v9 = vshrl.u32 %v11972_v2, 16 }
  0x79   : > { %1800 = vrot.lane.b32.xlu1 %v1755_v11, %s12626_s22  ;;  %v3551_v20 = vsel %vm1749_vm6, %v3549_v57, %v3550_v16  ;;  %v11961_v21 = vld [vmem:[#allocation2 + $0x2c] ss:$0 sps:$4 sm:$0x11]   ;;  %v2236_v23 = vshll.u32 %v11963_v17, 16  ;;  %v1341_v57 = vshrl.u32 %v11970_v49, 16  ;;  %v3134_v62 = vor.u32 %v3133_v56, %v3129_v47  ;;  %p15697_p1 = scmp.ne.s32.totalorder %s15607_s27, 0 }
  0x7a   : > { %v2654_v24 = vsel %vm1749_vm6, %v2652_v61, %v2653_v18  ;;  %v11965_v25 = vld [vmem:[#allocation2 + $0x14] ss:$0 sps:$4 sm:$0x11]   ;;  %v3553_v29 = vrot.slane %v11961_v21, 1  ;;  %v2221_v59 = vrot.slane %v2219_v54, 1  ;;  %v1343_v61 = vshll.u32 %v11970_v49, 16 }
  0x7b   : > { %v2238_v34 = vrot.slane %v2236_v23, 1  ;;  %v1336_v36 = vshll.u32 %v11965_v25, 16  ;;  %v11967_v41 = vld [vmem:[#allocation2 + $0x2c] ss:$0 sps:$4 sm:$0x11]   ;;  %v11974_v18 = vld [vmem:[#allocation2 + $0x24] sm:$0xff]  }
  0x7c   : > { %3597 = vrot.lane.b32.xlu0 %v3551_v20, %s12631_s30  ;;  %v3554_v39 = vsel %vm1749_vm6, %v3552_v10, %v3553_v29  ;;  %v3136_v50 = vshll.u32 %v11967_v41, 16  ;;  %v11969_v51 = vld [vmem:[#allocation2 + $0x14] ss:$0 sps:$4 sm:$0x11]   ;;  %v2222_v3 = vor.u32 %v2221_v59, %v2217_v52  ;;  %v1345_v5 = vrot.slane %v1343_v61, 1  ;;  %v11980_v54 = vld [vmem:[#allocation2 + $0x24] sm:$0xff]  }
  0x7d   : > { %2699 = vrot.lane.b32.xlu1 %v2654_v24, %s12630_s25  ;;  %v2239_v40 = vsel %vm1315_vm4, %v2234_v22, %v2238_v34  ;;  %v1338_v45 = vrot.slane %v1336_v36, 1  ;;  %v2224_v60 = vshll.u32 %v11969_v51, 16  ;;  %v11971_v63 = vld [vmem:[#allocation2 + $0x20] ss:$0 sps:$4 sm:$0x11]   ;;  %v3119_v10 = vshll.u32 %v11972_v2, 16 }
  0x7e   : > { %v3138_v58 = vrot.slane %v3136_v50, 1  ;;  %v1348_v7 = vshll.u32 %v11971_v63, 16  ;;  %v11973_v8 = vld [vmem:[#allocation2 + $0x20] ss:$0 sps:$4 sm:$0x11]   ;;  %v1346_v12 = vor.u32 %v1345_v5, %v1341_v57  ;;  %v627_v20 = vrot.slane %v12932_v31, 4 }
  0x7f   : > { %v1339_v55 = vsel %vm1315_vm4, %v1334_v35, %v1338_v45  ;;  %v2226_v4 = vrot.slane %v2224_v60, 1  ;;  %v3121_v16 = vrot.slane %v3119_v10, 1  ;;  %v3124_v17 = vshll.u32 %v11973_v8, 16  ;;  %v11975_v19 = vld [vmem:[#allocation2 + $0x2c] ss:$0 sps:$4 sm:$0x11]  }
  0x80   : > { %3599 = vrot.lane.b32.xlu0 %v3554_v39, %s12631_s30  ;;  %v3139_v6 = vsel %vm1315_vm4, %v3134_v62, %v3138_v58  ;;  %v1350_v15 = vrot.slane %v1348_v7, 1  ;;  %v1353_v24 = vshrl.u32 %v11974_v18, 16  ;;  %v11976_v25 = vld [vmem:[#allocation2 + $0x18] sm:$0xfe]   ;;  %v1355_v28 = vshll.u32 %v11974_v18, 16  ;;  %v11982_v35 = vld [vmem:[#allocation2 + $0x24] sm:$0xff]  }
  0x81   : > { %2410 = vrot.lane.b32.xlu1 %v2239_v40, %s12632_s14  ;;  %v2227_v11 = vsel %vm1315_vm4, %v2222_v3, %v2226_v4  ;;  %v3122_v22 = vor.u32 %v3121_v16, %v3117_v9  ;;  %v3126_v23 = vrot.slane %v3124_v17, 1  ;;  %v1360_v29 = vshll.u32 %v11975_v19, 16  ;;  %v11977_v34 = vld [vmem:[#allocation2 + $0x20] ss:$0 sps:$4 sm:$0x11]  }
  0x82   : > { %v1351_v21 = vsel %vm1315_vm4, %v1346_v12, %v1350_v15  ;;  %v1756_v38 = vrot.slane %v11976_v25, 1  ;;  %v617_v39 = vor.u32 %v615_v27, %v12925_v26  ;;  %v635_v31 = vrot.slane %v12945_v46, 4  ;;  %v522_v47 = vld [vmem:[#allocation2 + $0x44] sm:$0x1]  ;;  %v11978_v48 = vld [vmem:[#allocation2 + $0x24] sm:$0xfe]  }
  0x83   : > { %v3127_v36 = vsel %vm1315_vm4, %v3122_v22, %v3126_v23  ;;  %v1357_v40 = vrot.slane %v1355_v28, 1  ;;  %v1362_v41 = vrot.slane %v1360_v29, 1  ;;  %v1757_v44 = vrot.slane %v11977_v34, 1  ;;  %v11979_v49 = vld [vmem:[#allocation2 + $0x2c] ss:$0 sps:$4 sm:$0x11]  }
  0x84   : > { %1510 = vrot.lane.b32.xlu0 %v1339_v55, %s12627_s19  ;;  %v2241_v45 = vshrl.u32 %v11982_v35, 16  ;;  %v2243_v50 = vshll.u32 %v11982_v35, 16  ;;  %v903_v55 = vld [vmem:[#allocation2 + $0x30] sm:$0xf]  ;;  %v1759_v53 = vrot.slane %v11978_v48, 1  ;;  %v1760_v26 = vrot.slane %v11979_v49, 1 }
  0x85   : > { %3310 = vrot.lane.b32.xlu1 %v3139_v6, %s12633_s12  ;;  %v1358_v51 = vor.u32 %v1357_v40, %v1353_v24  ;;  %v1758_v52 = vsel %vm1749_vm6, %v1756_v38, %v1757_v44  ;;  %v904_v27 = vsel %vm12873_vm10, %v617_v39, %v903_v55  ;;  %v12985_v56 = vld [vmem:[%s12842_s16 + $0x28] sm:$0xf]  ;;  %v639_v59 = vrot.slane %v637_v33, 7  ;;  %v11983_v60 = vld [vmem:[#allocation2 + $0x2c] ss:$0 sps:$4 sm:$0x11]  }
  0x86   : > { %905 = vst [vmem:[#allocation2 + $0x30] sm:$0xf] %v904_v27  ;;  %v2245_v58 = vrot.slane %v2243_v50, 1  ;;  %v907_v61 = vld [vmem:[#allocation2 + $0x38] sm:$0x1]  ;;  %v523_v62 = vsel %vm12855_vm8, 0, %v522_v47  ;;  %v1761_v63 = vsel %vm1749_vm6, %v1759_v53, %v1760_v26  ;;  %v634_v3 = vor.u32 %v632_v32, %v12945_v46 }
  0x87   : > { %v1363_v57 = vsel %vm1315_vm4, %v1358_v51, %v1362_v41  ;;  %v908_v2 = vsel %vm12835_vm5, %v627_v20, %v907_v61  ;;  %v642_v4 = vor.u32 %v640_v42, %v639_v59  ;;  %524 = vst [vmem:[#allocation2 + $0x44] sm:$0x1] %v523_v62  ;;  %v2248_v5 = vshll.u32 %v11983_v60, 16  ;;  %v11986_v6 = vld [vmem:[#allocation2 + $0x24] sm:$0xfe]  }
  0x88   : > { %2408 = vrot.lane.b32.xlu0 %v2227_v11, %s12632_s14  ;;  %v2246_v33 = vor.u32 %v2245_v58, %v2241_v45  ;;  %909 = vst [vmem:[#allocation2 + $0x38] sm:$0x1] %v908_v2  ;;  %v11987_v7 = vld [vmem:[#allocation2 + $0x2c] ss:$0 sps:$4 sm:$0x11]   ;;  %v646_v9 = vshrl.u32 %v12985_v56, 16 }
  0x89   : > { %1512 = vrot.lane.b32.xlu1 %v1351_v21, %s12627_s19  ;;  %v643_v8 = vsel %vm12866_vm9, %v635_v31, %v642_v4  ;;  %v2250_v13 = vrot.slane %v2248_v5, 1  ;;  %v2655_v32 = vrot.slane %v11986_v6, 1  ;;  %v910_v46 = vld [vmem:[#allocation2 + $0x3c] sm:$0xf]  ;;  %v2656_v14 = vrot.slane %v11987_v7, 1 }
  0x8a   : > { %913 = vst.msk [vmem:[#allocation2 + $0x40] sm:$0xf] %vm447_vm0, %v643_v8  ;;  %v911_v42 = vsel %vm12873_vm10, %v634_v3, %v910_v46  ;;  %v644_v15 = vrot.slane %v639_v59, 4  ;;  %v13012_v16 = vrot.slane %v646_v9, 7  ;;  %v649_v55 = vshll.u32 %v12985_v56, 16 }
  0x8b   : > { %v2251_v11 = vsel %vm1315_vm4, %v2246_v33, %v2250_v13  ;;  %912 = vst [vmem:[#allocation2 + $0x3c] sm:$0xf] %v911_v42  ;;  %v2657_v17 = vsel %vm1749_vm6, %v2655_v32, %v2656_v14  ;;  %vm15600_vm15 = vcmask 326912   ;;  %vm15598_vm1 = vcmask 392512  }
  0x8c   : > { %3308 = vrot.lane.b32.xlu0 %v3127_v36, %s12633_s12  ;;  %vm2923_vm7 = vcmask 458112   ;;  %vm3356_vm3 = vcmask 523712   ;;  %vm3645_vm2 = vcmask 589312  }
  0x8d   : > { %1514 = vrot.lane.b32.xlu1 %v1363_v57, %s12627_s19  ;;  %v11981_v10 = vld [vmem:[#allocation2 + $0x30] sm:$0xff]  }
  0x8e   : > { %v11984_v12 = vld [vmem:[#allocation2 + $0x30] sm:$0xff]   ;;  %v914_v38 = vld [vmem:[#allocation2 + $0x44] sm:$0x1] }
  0x8f   : > { %v11988_v18 = vld [vmem:[#allocation2 + $0x30] sm:$0xfe]   ;;  %v11985_v19 = vld [vmem:[#allocation2 + $0x38] ss:$0 sps:$4 sm:$0x11]   ;;  %v2253_v20 = vshrl.u32 %v11984_v12, 16  ;;  %v915_v44 = vsel %vm12835_vm5, %v644_v15, %v914_v38 }
  0x90   : > { %1802 = vrot.lane.b32.xlu0 %v1758_v52, %s12626_s22  ;;  %v2255_v21 = vshll.u32 %v11984_v12, 16  ;;  %v11989_v22 = vld [vmem:[#allocation2 + $0x38] ss:$0 sps:$4 sm:$0x11]   ;;  %v2260_v23 = vshll.u32 %v11985_v19, 16  ;;  %v11990_v24 = vld [vmem:[#allocation2 + $0x30] sm:$0xff]  }
  0x91   : > { %1804 = vrot.lane.b32.xlu1 %v1761_v63, %s12626_s22  ;;  %v2658_v28 = vrot.slane %v11988_v18, 1  ;;  %v11992_v29 = vld [vmem:[#allocation2 + $0x30] sm:$0xff]   ;;  %v11993_v34 = vld [vmem:[#allocation2 + $0x38] ss:$0 sps:$4 sm:$0x11]   ;;  %v2659_v36 = vrot.slane %v11989_v22, 1 }
  0x92   : > { %v2257_v25 = vrot.slane %v2255_v21, 1  ;;  %v2262_v35 = vrot.slane %v2260_v23, 1  ;;  %v3141_v31 = vshrl.u32 %v11992_v29, 16  ;;  %v3143_v40 = vshll.u32 %v11992_v29, 16  ;;  %v11994_v45 = vld [vmem:[#allocation2 + $0x3c] sm:$0xff]  }
  0x93   : > { %v3148_v41 = vshll.u32 %v11993_v34, 16  ;;  %916 = vst [vmem:[#allocation2 + $0x44] sm:$0x1] %v915_v44  ;;  %v11996_v49 = vld [vmem:[#allocation2 + $0x30] sm:$0xfe]   ;;  %v3155_v52 = vshll.u32 %v11994_v45, 16  ;;  %v2660_v53 = vsel %vm1749_vm6, %v2658_v28, %v2659_v36 }
  0x94   : > { %1979 = vrot.lane.b32.xlu0 %v11980_v54, %s12628_s26  ;;  %v2258_v39 = vor.u32 %v2257_v25, %v2253_v20  ;;  %v3145_v48 = vrot.slane %v3143_v40, 1  ;;  %v11997_v50 = vld [vmem:[#allocation2 + $0x38] ss:$0 sps:$4 sm:$0x11]   ;;  %v11998_v54 = vld [vmem:[#allocation2 + $0x30] sm:$0xff]   ;;  %v3555_v27 = vrot.slane %v11996_v49, 1 }
  0x95   : > { %1981 = vrot.lane.b32.xlu1 %v11981_v10, %s12628_s26  ;;  %v3150_v51 = vrot.slane %v3148_v41, 1  ;;  %v3556_v57 = vrot.slane %v11997_v50, 1  ;;  %v11991_v58 = vld [vmem:[#allocation2 + $0x3c] sm:$0xff]   ;;  %v3153_v59 = vshrl.u32 %v11994_v45, 16  ;;  %v3157_v60 = vrot.slane %v3155_v52, 1 }
  0x96   : > { %v2263_v47 = vsel %vm1315_vm4, %v2258_v39, %v2262_v35  ;;  %v3146_v26 = vor.u32 %v3145_v48, %v3141_v31  ;;  %v11999_v61 = vld [vmem:[#allocation2 + $0x38] ss:$0 sps:$4 sm:$0x11]   ;;  %v1367_v62 = vshll.u32 %v11998_v54, 16  ;;  %v12000_v2 = vld [vmem:[#allocation2 + $0x3c] sm:$0xfe]  }
  0x97   : > { %v1365_v3 = vshrl.u32 %v11998_v54, 16  ;;  %v1372_v4 = vshll.u32 %v11999_v61, 16  ;;  %v3557_v33 = vsel %vm1749_vm6, %v3555_v27, %v3556_v57  ;;  %v12002_v6 = vld [vmem:[#allocation2 + $0x3c] sm:$0xff]   ;;  %v3558_v8 = vrot.slane %v12000_v2, 1  ;;  %v426_v31 = vld [vmem:[%s12842_s16 + $0x2c] sm:$0xf] }
  0x98   : > { %2412 = vrot.lane.b32.xlu0 %v2251_v11, %s12632_s14  ;;  %v3151_v63 = vsel %vm1315_vm4, %v3146_v26, %v3150_v51  ;;  %v1369_v5 = vrot.slane %v1367_v62, 1  ;;  %v3158_v32 = vor.u32 %v3157_v60, %v3153_v59  ;;  %v1379_v10 = vshll.u32 %v12002_v6, 16  ;;  %v12004_v11 = vld [vmem:[#allocation2 + $0x30] sm:$0xfe]   ;;  %v12006_v25 = vld [vmem:[#allocation2 + $0x3c] sm:$0xfe]  }
  0x99   : > { %2414 = vrot.lane.b32.xlu1 %v2263_v47, %s12632_s14  ;;  %v1374_v9 = vrot.slane %v1372_v4, 1  ;;  %v12005_v19 = vld [vmem:[#allocation2 + $0x38] ss:$0 sps:$4 sm:$0x11]   ;;  %v1762_v22 = vrot.slane %v12004_v11, 1  ;;  %v652_v28 = vrot.slane %v13012_v16, 4  ;;  %v651_v2 = vor.u32 %v649_v55, %v13012_v16 }
  0x9a   : > { %v11995_v7 = vld [vmem:[#allocation2 + $0x44] ss:$0 sps:$4 sm:$0x11]   ;;  %v1370_v15 = vor.u32 %v1369_v5, %v1365_v3  ;;  %v1381_v21 = vrot.slane %v1379_v10, 1  ;;  %v12008_v39 = vld [vmem:[#allocation2 + $0x3c] sm:$0xff]   ;;  %v1765_v41 = vrot.slane %v12006_v25, 1 }
  0x9b   : > { %v12001_v13 = vld [vmem:[#allocation2 + $0x44] ss:$0 sps:$4 sm:$0x11]   ;;  %v3160_v46 = vshll.u32 %v11995_v7, 16  ;;  %v12010_v40 = vld [vmem:[#allocation2 + $0x3c] sm:$0xff]   ;;  %v654_v45 = vshrl.u32 %v426_v31, 16 }
  0x9c   : > { %2701 = vrot.lane.b32.xlu0 %v2657_v17, %s12630_s25  ;;  %v12003_v14 = vld [vmem:[#allocation2 + $0x44] ss:$0 sps:$4 sm:$0x11]   ;;  %v3559_v42 = vrot.slane %v12001_v13, 1  ;;  %v1377_v17 = vshrl.u32 %v12002_v6, 16  ;;  %v1375_v34 = vsel %vm1315_vm4, %v1370_v15, %v1374_v9  ;;  %v657_v47 = vshll.u32 %v426_v31, 16 }
  0x9d   : > { %2703 = vrot.lane.b32.xlu1 %v2660_v53, %s12630_s25  ;;  %v3162_v12 = vrot.slane %v3160_v46, 1  ;;  %v1384_v18 = vshll.u32 %v12003_v14, 16  ;;  %v12007_v29 = vld [vmem:[#allocation2 + $0x44] ss:$0 sps:$4 sm:$0x11]   ;;  %v13042_v51 = vrot.slane %v654_v45, 7 }
  0x9e   : > { %v3560_v20 = vsel %vm1749_vm6, %v3558_v8, %v3559_v42  ;;  %v1382_v35 = vor.u32 %v1381_v21, %v1377_v17  ;;  %v475_v44 = vld [vmem:[#allocation2 + $0x48] sm:$0x1]  ;;  %v12046_v48 = vld [vmem:[#allocation2] sm:$0xff]   ;;  %v1766_v49 = vrot.slane %v12007_v29, 1  ;;  %v2265_v53 = vshrl.u32 %v12010_v40, 16  ;;  %v12068_v17 = vld [vmem:[#allocation2 + $0xc] sm:$0xff]  }
  0x9f   : > { %v3163_v23 = vsel %vm1315_vm4, %v3158_v32, %v3162_v12  ;;  %v1386_v36 = vrot.slane %v1384_v18, 1  ;;  %v476_v50 = vsel %vm12835_vm5, 0, %v475_v44  ;;  %v12011_v52 = vld [vmem:[#allocation2 + $0x44] ss:$0 sps:$4 sm:$0x11]   ;;  %1123 = vst.msk [vmem:[#allocation3] sm:$0xff] %vm1122_vm11, %v12046_v48  ;;  %v659_v57 = vor.u32 %v657_v47, %v13042_v51 }
  0xa0   : > { %2879 = vrot.lane.b32.xlu0 %v11990_v24, %s12629_s24  ;;  %v1763_v24 = vrot.slane %v12005_v19, 1  ;;  %477 = vst [vmem:[#allocation2 + $0x48] sm:$0x1] %v476_v50  ;;  %v2267_v26 = vshll.u32 %v12010_v40, 16  ;;  %v525_v27 = vld [vmem:[#allocation2 + $0x50] sm:$0x1]  ;;  %v1767_v6 = vsel %vm1749_vm6, %v1765_v41, %v1766_v49 }
  0xa1   : > { %2881 = vrot.lane.b32.xlu1 %v11991_v58, %s12629_s24  ;;  %v1387_v54 = vsel %vm1315_vm4, %v1382_v35, %v1386_v36  ;;  %v2272_v58 = vshll.u32 %v12011_v52, 16  ;;  %v526_v59 = vsel %vm12855_vm8, 0, %v525_v27  ;;  %v12066_v60 = vld [vmem:[%s15577_s1] sm:$0xff]   ;;  %v661_v61 = vrot.slane %v13042_v51, 4  ;;  %v427_v5 = vld [vmem:[%s12842_s16 + $0x30] sm:$0xf] }
  0xa2   : > { %v1764_v38 = vsel %vm1749_vm6, %v1762_v22, %v1763_v24  ;;  %v2269_v62 = vrot.slane %v2267_v26, 1  ;;  %527 = vst [vmem:[#allocation2 + $0x50] sm:$0x1] %v526_v59  ;;  %v660_v3 = vsel %vm12866_vm9, %v652_v28, %v659_v57  ;;  %11802 = vmatprep.subr.bf16.mxu0 %v12066_v60  ;;  %v428_v9 = vld [vmem:[%s12842_s16 + $0x34] sm:$0xf]  ;;  %v663_v32 = vshrl.u32 %v427_v5, 16 }
  0xa3   : > { %v2274_v4 = vrot.slane %v2272_v58, 1  ;;  %920 = vst.msk [vmem:[#allocation2 + $0x4c] sm:$0xf] %vm447_vm0, %v660_v3  ;;  %v478_v13 = vld [vmem:[#allocation2 + $0x54] sm:$0x1]  ;;  %11803 = vmatpush3.bf16.msra.mxu0 %v12066_v60  ;;  %v666_v16 = vshll.u32 %v427_v5, 16 }
  0xa4   : > { %3312 = vrot.lane.b32.xlu0 %v3151_v63, %s12633_s12  ;;  %v12014_v63 = vld [vmem:[#allocation2 + $0x3c] sm:$0xfe]   ;;  %v2270_v7 = vor.u32 %v2269_v62, %v2265_v53  ;;  %v479_v56 = vsel %vm12835_vm5, 0, %v478_v13  ;;  %v671_v55 = vshrl.u32 %v428_v9, 16  ;;  %v528_v14 = vld [vmem:[#allocation2 + $0x5c] sm:$0x1] }
  0xa5   : > { %3314 = vrot.lane.b32.xlu1 %v3163_v23, %s12633_s12  ;;  %v2661_v8 = vrot.slane %v12014_v63, 1  ;;  %480 = vst [vmem:[#allocation2 + $0x54] sm:$0x1] %v479_v56  ;;  %v665_v11 = vrot.slane %v663_v32, 7  ;;  %v674_v12 = vshll.u32 %v428_v9, 16  ;;  %v529_v15 = vsel %vm12855_vm8, 0, %v528_v14 }
  0xa6   : > { %v2275_v10 = vsel %vm1315_vm4, %v2270_v7, %v2274_v4  ;;  %v673_v19 = vrot.slane %v671_v55, 7  ;;  %530 = vst [vmem:[#allocation2 + $0x5c] sm:$0x1] %v529_v15  ;;  %v430_v21 = vld [vmem:[%s12842_s16 + $0x3c] sm:$0xf]  ;;  %1124 = vst.msk [vmem:[#allocation3 + $0x8] sm:$0xff] %vm1122_vm11, %v12068_v17 }
  0xa7   : > { %v917_v42 = vld [vmem:[#allocation2 + $0x48] sm:$0xf]  ;;  %v669_v23 = vrot.slane %v665_v11, 4  ;;  %v481_v24 = vld [vmem:[#allocation2 + $0x60] sm:$0x1]  ;;  %v668_v40 = vor.u32 %v666_v16, %v665_v11  ;;  %v691_v44 = vshll.u32 %v430_v21, 16 }
  0xa8   : > { %3601 = vrot.lane.b32.xlu0 %v3557_v33, %s12631_s30  ;;  %v12015_v33 = vld [vmem:[#allocation2 + $0x44] ss:$0 sps:$4 sm:$0x11]   ;;  %v918_v18 = vsel %vm12873_vm10, %v651_v2, %v917_v42  ;;  %v12071_v28 = vld [vmem:[%s15577_s1 + $0x8] sm:$0xff]   ;;  %v678_v35 = vrot.slane %v673_v19, 4  ;;  %v482_v36 = vsel %vm12835_vm5, 0, %v481_v24 }
  0xa9   : > { %1516 = vrot.lane.b32.xlu1 %v1375_v34, %s12627_s19  ;;  %v2662_v46 = vrot.slane %v12015_v33, 1  ;;  %919 = vst [vmem:[#allocation2 + $0x48] sm:$0xf] %v918_v18  ;;  %v921_v29 = vld [vmem:[#allocation2 + $0x50] sm:$0x1]  ;;  %v676_v34 = vor.u32 %v674_v12, %v673_v19  ;;  %11804 = vmatprep.subr.bf16.mxu0 %v12071_v28 }
  0xaa   : > { %v922_v31 = vsel %vm12835_vm5, %v661_v61, %v921_v29  ;;  %483 = vst [vmem:[#allocation2 + $0x60] sm:$0x1] %v482_v36  ;;  %v531_v45 = vld [vmem:[#allocation2 + $0x68] sm:$0x1]  ;;  %11805 = vmatpush3.bf16.msra.mxu0 %v12071_v28  ;;  %v12077_v53 = vld [vmem:[%s15577_s1 + $0x10] sm:$0xff]  }
  0xab   : > { %v2663_v22 = vsel %vm1749_vm6, %v2661_v8, %v2662_v46  ;;  %923 = vst [vmem:[#allocation2 + $0x50] sm:$0x1] %v922_v31  ;;  %v677_v47 = vsel %vm12866_vm9, %v669_v23, %v676_v34  ;;  %11806 = vmatprep.subr.bf16.mxu0 %v12077_v53 }
  0xac   : > { %3603 = vrot.lane.b32.xlu0 %v3560_v20, %s12631_s30  ;;  %v13074_v20 = vld [vmem:[%s12842_s16 + $0x38] sm:$0xf]  ;;  %927 = vst.msk [vmem:[#allocation2 + $0x58] sm:$0xf] %vm447_vm0, %v677_v47  ;;  %v924_v48 = vld [vmem:[#allocation2 + $0x54] sm:$0xf] }
  0xad   : > { %1518 = vrot.lane.b32.xlu1 %v1387_v54, %s12627_s19  ;;  %v680_v25 = vshrl.u32 %v13074_v20, 16  ;;  %v925_v49 = vsel %vm12873_vm10, %v668_v40, %v924_v48  ;;  %v928_v50 = vld [vmem:[#allocation2 + $0x5c] sm:$0x1]  ;;  %v532_v54 = vsel %vm12855_vm8, 0, %v531_v45  ;;  %v683_v18 = vshll.u32 %v13074_v20, 16 }
  0xae   : > { %926 = vst [vmem:[#allocation2 + $0x54] sm:$0xf] %v925_v49  ;;  %v929_v27 = vsel %vm12835_vm5, %v678_v35, %v928_v50  ;;  %533 = vst [vmem:[#allocation2 + $0x68] sm:$0x1] %v532_v54  ;;  %11807 = vmatpush3.bf16.msra.mxu0 %v12077_v53 }
  0xaf   : > { %v13087_v41 = vrot.slane %v680_v25, 7  ;;  %930 = vst [vmem:[#allocation2 + $0x5c] sm:$0x1] %v929_v27 }
  0xb0   : > { %1806 = vrot.lane.b32.xlu0 %v1764_v38, %s12626_s22  ;;  %v688_v38 = vshrl.u32 %v430_v21, 16  ;;  %v12009_v26 = vld [vmem:[#allocation2 + $0x48] sm:$0xff]  }
  0xb1   : > { %1808 = vrot.lane.b32.xlu1 %v1767_v6, %s12626_s22  ;;  %v686_v51 = vrot.slane %v13087_v41, 4  ;;  %v12012_v57 = vld [vmem:[#allocation2 + $0x48] sm:$0xff]  }
  0xb2   : > { %v13097_v52 = vrot.slane %v688_v38, 7  ;;  %v12016_v58 = vld [vmem:[#allocation2 + $0x48] sm:$0xfe]   ;;  %v12013_v61 = vld [vmem:[#allocation2 + $0x50] ss:$0 sps:$4 sm:$0x11]  }
  0xb3   : > { %v12018_v60 = vld [vmem:[#allocation2 + $0x48] sm:$0xff]   ;;  %v2277_v62 = vshrl.u32 %v12012_v57, 16  ;;  %v2279_v2 = vshll.u32 %v12012_v57, 16  ;;  %v12017_v3 = vld [vmem:[#allocation2 + $0x50] ss:$0 sps:$4 sm:$0x11]  }
  0xb4   : > { %1983 = vrot.lane.b32.xlu0 %v12008_v39, %s12628_s26  ;;  %v12074_v39 = vld [vmem:[#allocation2 + $0x18] sm:$0xff]   ;;  %v693_v59 = vor.u32 %v691_v44, %v13097_v52  ;;  %v2284_v4 = vshll.u32 %v12013_v61, 16  ;;  %v2664_v5 = vrot.slane %v12016_v58, 1  ;;  %v12020_v6 = vld [vmem:[#allocation2 + $0x48] sm:$0xff]   ;;  %v2665_v9 = vrot.slane %v12017_v3, 1 }
  0xb5   : > { %1125 = vst.msk [vmem:[#allocation3 + $0x10] sm:$0xff] %vm1122_vm11, %v12074_v39  ;;  %1985 = vrot.lane.b32.xlu1 %v12009_v26, %s12628_s26  ;;  %v2281_v33 = vrot.slane %v2279_v2, 1  ;;  %v12021_v7 = vld [vmem:[#allocation2 + $0x50] ss:$0 sps:$4 sm:$0x11]   ;;  %v3165_v32 = vshrl.u32 %v12020_v6, 16  ;;  %v685_v3 = vor.u32 %v683_v18, %v13087_v41 }
  0xb6   : > { %v694_v63 = vsel %vm12866_vm9, %v686_v51, %v693_v59  ;;  %v2286_v8 = vrot.slane %v2284_v4, 1  ;;  %v3167_v46 = vshll.u32 %v12020_v6, 16  ;;  %v3172_v56 = vshll.u32 %v12021_v7, 16  ;;  %v12022_v16 = vld [vmem:[#allocation2 + $0x54] sm:$0xff]   ;;  %v12026_v14 = vld [vmem:[#allocation2 + $0x48] sm:$0xff]  }
  0xb7   : > { %934 = vst.msk [vmem:[#allocation2 + $0x64] sm:$0xf] %vm447_vm0, %v694_v63  ;;  %v2282_v13 = vor.u32 %v2281_v33, %v2277_v62  ;;  %v12023_v55 = vld [vmem:[#allocation2 + $0x5c] ss:$0 sps:$4 sm:$0x11]   ;;  %v3179_v12 = vshll.u32 %v12022_v16, 16  ;;  %v2666_v19 = vsel %vm1749_vm6, %v2664_v5, %v2665_v9 }
  0xb8   : > { %2416 = vrot.lane.b32.xlu0 %v2275_v10, %s12632_s14  ;;  %v3169_v10 = vrot.slane %v3167_v46, 1  ;;  %v3174_v11 = vrot.slane %v3172_v56, 1  ;;  %v3184_v15 = vshll.u32 %v12023_v55, 16  ;;  %v12024_v17 = vld [vmem:[#allocation2 + $0x48] sm:$0xfe]   ;;  %v12019_v25 = vld [vmem:[#allocation2 + $0x54] sm:$0xff]  }
  0xb9   : > { %v2287_v42 = vsel %vm1315_vm4, %v2282_v13, %v2286_v8  ;;  %v12025_v23 = vld [vmem:[#allocation2 + $0x50] ss:$0 sps:$4 sm:$0x11]   ;;  %v3181_v28 = vrot.slane %v3179_v12, 1  ;;  %v3561_v29 = vrot.slane %v12024_v17, 1  ;;  %v1389_v34 = vshrl.u32 %v12026_v14, 16 }
  0xba   : > { %2418 = vrot.lane.b32.xlu1 %v2287_v42, %s12632_s14  ;;  %v3170_v21 = vor.u32 %v3169_v10, %v3165_v32  ;;  %v1391_v35 = vshll.u32 %v12026_v14, 16  ;;  %v12030_v36 = vld [vmem:[#allocation2 + $0x54] sm:$0xff]   ;;  %v3562_v31 = vrot.slane %v12025_v23, 1  ;;  %v12027_v40 = vld [vmem:[#allocation2 + $0x50] ss:$0 sps:$4 sm:$0x11]  }
  0xbb   : > { %v3186_v20 = vrot.slane %v3184_v15, 1  ;;  %v1396_v48 = vshll.u32 %v12027_v40, 16  ;;  %v12028_v49 = vld [vmem:[#allocation2 + $0x54] sm:$0xfe]   ;;  %v1401_v26 = vshrl.u32 %v12030_v36, 16  ;;  %v1403_v57 = vshll.u32 %v12030_v36, 16 }
  0xbc   : > { %2705 = vrot.lane.b32.xlu0 %v2663_v22, %s12630_s25  ;;  %v3177_v22 = vshrl.u32 %v12022_v16, 16  ;;  %v3175_v39 = vsel %vm1315_vm4, %v3170_v21, %v3174_v11  ;;  %v1393_v44 = vrot.slane %v1391_v35, 1  ;;  %v3563_v47 = vsel %vm1749_vm6, %v3561_v29, %v3562_v31  ;;  %v12029_v50 = vld [vmem:[#allocation2 + $0x5c] ss:$0 sps:$4 sm:$0x11]   ;;  %v12038_v6 = vld [vmem:[#allocation2 + $0x54] sm:$0xff]  }
  0xbd   : > { %v3564_v51 = vrot.slane %v12028_v49, 1  ;;  %v3565_v54 = vrot.slane %v12029_v50, 1  ;;  %v12031_v53 = vld [vmem:[#allocation2 + $0x5c] ss:$0 sps:$4 sm:$0x11]   ;;  %v1398_v27 = vrot.slane %v1396_v48, 1 }
  0xbe   : > { %2707 = vrot.lane.b32.xlu1 %v2666_v19, %s12630_s25  ;;  %v3182_v45 = vor.u32 %v3181_v28, %v3177_v22  ;;  %v1394_v59 = vor.u32 %v1393_v44, %v1389_v34  ;;  %v1408_v61 = vshll.u32 %v12031_v53, 16  ;;  %v12032_v62 = vld [vmem:[#allocation2 + $0x48] sm:$0xfe]   ;;  %v12033_v63 = vld [vmem:[#allocation2 + $0x50] ss:$0 sps:$4 sm:$0x11]  }
  0xbf   : > { %v1405_v2 = vrot.slane %v1403_v57, 1  ;;  %v1768_v4 = vrot.slane %v12032_v62, 1  ;;  %v1769_v33 = vrot.slane %v12033_v63, 1  ;;  %v695_v5 = vrot.slane %v13097_v52, 4  ;;  %v12034_v8 = vld [vmem:[#allocation2 + $0x54] sm:$0xfe]  }
  0xc0   : > { %2883 = vrot.lane.b32.xlu0 %v12018_v60, %s12629_s24  ;;  %v3187_v58 = vsel %vm1315_vm4, %v3182_v45, %v3186_v20  ;;  %v3566_v60 = vsel %vm1749_vm6, %v3564_v51, %v3565_v54  ;;  %v1410_v7 = vrot.slane %v1408_v61, 1  ;;  %v12035_v9 = vld [vmem:[#allocation2 + $0x5c] ss:$0 sps:$4 sm:$0x11]   ;;  %v1399_v13 = vsel %vm1315_vm4, %v1394_v59, %v1398_v27  ;;  %v931_v56 = vld [vmem:[#allocation2 + $0x60] sm:$0xf] }
  0xc1   : > { %v1406_v32 = vor.u32 %v1405_v2, %v1401_v26  ;;  %v1770_v46 = vsel %vm1749_vm6, %v1768_v4, %v1769_v33  ;;  %v1771_v41 = vrot.slane %v12034_v8, 1  ;;  %v12036_v16 = vld [vmem:[#allocation2 + $0x54] sm:$0xff]   ;;  %v932_v55 = vsel %vm12873_vm10, %v685_v3, %v931_v56  ;;  %v12039_v11 = vld [vmem:[#allocation2 + $0x5c] ss:$0 sps:$4 sm:$0x11]   ;;  %v12080_v15 = vld [vmem:[#allocation2 + $0x24] sm:$0xff]  }
  0xc2   : > { %2885 = vrot.lane.b32.xlu1 %v12019_v25, %s12629_s24  ;;  %v2289_v52 = vshrl.u32 %v12038_v6, 16  ;;  %v1772_v14 = vrot.slane %v12035_v9, 1  ;;  %933 = vst [vmem:[#allocation2 + $0x60] sm:$0xf] %v932_v55  ;;  %v2291_v42 = vshll.u32 %v12038_v6, 16  ;;  %v12082_v22 = vld [vmem:[%s15577_s1 + $0x18] sm:$0xff]  }
  0xc3   : > { %v935_v12 = vld [vmem:[#allocation2 + $0x68] sm:$0x1]  ;;  %v1411_v17 = vsel %vm1315_vm4, %v1406_v32, %v1410_v7  ;;  %v2296_v23 = vshll.u32 %v12039_v11, 16  ;;  %1126 = vst.msk [vmem:[#allocation3 + $0x18] sm:$0xff] %vm1122_vm11, %v12080_v15  ;;  %v12042_v25 = vld [vmem:[#allocation2 + $0x54] sm:$0xfe]   ;;  %11808 = vmatprep.subr.bf16.mxu0 %v12082_v22 }
  0xc4   : > { %3316 = vrot.lane.b32.xlu0 %v3175_v39, %s12633_s12  ;;  %v2293_v18 = vrot.slane %v2291_v42, 1  ;;  %v936_v19 = vsel %vm12835_vm5, %v695_v5, %v935_v12  ;;  %v12043_v28 = vld [vmem:[#allocation2 + $0x5c] ss:$0 sps:$4 sm:$0x11]   ;;  %v12107_v34 = vld [vmem:[#allocation2 + $0x30] sm:$0xff]   ;;  %v1773_v35 = vsel %vm1749_vm6, %v1771_v41, %v1772_v14  ;;  %v2667_v36 = vrot.slane %v12042_v25, 1  ;;  %11809 = vmatpush3.bf16.msra.mxu0 %v12082_v22 }
  0xc5   : > { %937 = vst [vmem:[#allocation2 + $0x68] sm:$0x1] %v936_v19  ;;  %v2298_v29 = vrot.slane %v2296_v23, 1  ;;  %v431_v39 = vld [vmem:[%s12842_s16 + $0x40] sm:$0xf]  ;;  %1127 = vst.msk [vmem:[#allocation3 + $0x20] sm:$0xff] %vm1122_vm11, %v12107_v34 }
  0xc6   : > { %3318 = vrot.lane.b32.xlu1 %v3187_v58, %s12633_s12  ;;  %v697_v44 = vshrl.u32 %v431_v39, 16  ;;  %v432_v49 = vld [vmem:[%s12842_s16 + $0x44] sm:$0xf]  ;;  %v700_v51 = vshll.u32 %v431_v39, 16  ;;  %v484_v61 = vld [vmem:[#allocation2 + $0x6c] sm:$0x1] }
  0xc7   : > { %v705_v63 = vshrl.u32 %v432_v49, 16  ;;  %v485_v33 = vsel %vm12835_vm5, 0, %v484_v61  ;;  %v708_v5 = vshll.u32 %v432_v49, 16  ;;  %v12112_v19 = vld [vmem:[#allocation2 + $0x3c] sm:$0xff]   ;;  %v433_v61 = vld [vmem:[%s12842_s16 + $0x48] sm:$0xf] }
  0xc8   : > { %3605 = vrot.lane.b32.xlu0 %v3563_v47, %s12631_s30  ;;  %v699_v50 = vrot.slane %v697_v44, 7  ;;  %486 = vst [vmem:[#allocation2 + $0x6c] sm:$0x1] %v485_v33  ;;  %1128 = vst.msk [vmem:[#allocation3 + $0x28] sm:$0xff] %vm1122_vm11, %v12112_v19  ;;  %v714_v33 = vshrl.u32 %v433_v61, 16 }
  0xc9   : > { %v12037_v40 = vld [vmem:[#allocation2 + $0x60] sm:$0xff]   ;;  %v707_v8 = vrot.slane %v705_v63, 7 }
  0xca   : > { %1520 = vrot.lane.b32.xlu1 %v1399_v13, %s12627_s19  ;;  %v12040_v47 = vld [vmem:[#allocation2 + $0x60] sm:$0xff]   ;;  %v703_v62 = vrot.slane %v699_v50, 4  ;;  %v702_v12 = vor.u32 %v700_v51, %v699_v50 }
  0xcb   : > { %v12044_v48 = vld [vmem:[#allocation2 + $0x60] sm:$0xfe]   ;;  %v2301_v53 = vshrl.u32 %v12040_v47, 16  ;;  %v2303_v27 = vshll.u32 %v12040_v47, 16  ;;  %v710_v56 = vor.u32 %v708_v5, %v707_v8  ;;  %v712_v25 = vrot.slane %v707_v8, 4 }
  0xcc   : > { %3607 = vrot.lane.b32.xlu0 %v3566_v60, %s12631_s30  ;;  %v12041_v54 = vld [vmem:[#allocation2 + $0x68] ss:$0 sps:$4 sm:$0x11]   ;;  %v12047_v58 = vld [vmem:[#allocation2 + $0x60] sm:$0xff]   ;;  %v2670_v60 = vrot.slane %v12044_v48, 1  ;;  %v717_v5 = vshll.u32 %v433_v61, 16 }
  0xcd   : > { %v12045_v57 = vld [vmem:[#allocation2 + $0x68] ss:$0 sps:$4 sm:$0x11]   ;;  %v2308_v59 = vshll.u32 %v12041_v54, 16  ;;  %v2305_v3 = vrot.slane %v2303_v27, 1  ;;  %v12049_v13 = vld [vmem:[#allocation2 + $0x60] sm:$0xff]   ;;  %v711_v15 = vsel %vm12866_vm9, %v703_v62, %v710_v56 }
  0xce   : > { %1522 = vrot.lane.b32.xlu1 %v1411_v17, %s12627_s19  ;;  %v2671_v4 = vrot.slane %v12045_v57, 1  ;;  %v12050_v32 = vld [vmem:[#allocation2 + $0x68] ss:$0 sps:$4 sm:$0x11]   ;;  %v3191_v14 = vshll.u32 %v12049_v13, 16 }
  0xcf   : > { %v2310_v7 = vrot.slane %v2308_v59, 1  ;;  %v2306_v9 = vor.u32 %v2305_v3, %v2301_v53  ;;  %v3196_v42 = vshll.u32 %v12050_v32, 16  ;;  %v12053_v17 = vld [vmem:[#allocation2 + $0x60] sm:$0xfe]   ;;  %941 = vst.msk [vmem:[#allocation2 + $0x70] sm:$0xf] %vm447_vm0, %v711_v15 }
  0xd0   : > { %v1799_v24 = vpop.permute.xlu1 %1798  ;;  %1810 = vrot.lane.b32.xlu0 %v1770_v46, %s12626_s22  ;;  %v534_v46 = vld [vmem:[#allocation2 + $0x74] sm:$0x1]  ;;  %v2672_v22 = vsel %vm1749_vm6, %v2670_v60, %v2671_v4  ;;  %v3193_v23 = vrot.slane %v3191_v14, 1  ;;  %v12056_v39 = vld [vmem:[#allocation2 + $0x68] ss:$0 sps:$4 sm:$0x11]  }
  0xd1   : > { %v535_v41 = vsel %vm12855_vm8, 0, %v534_v46  ;;  %v2311_v55 = vsel %vm1315_vm4, %v2306_v9, %v2310_v7  ;;  %v1420_v48 = vshll.u32 %v12056_v39, 16  ;;  %v13186_v49 = vld [vmem:[#allocation2 + $0x60] sm:$0xfe]   ;;  %v12137_v53 = vld [vmem:[#allocation2 + $0x48] sm:$0xff]  }
  0xd2   : > { %1812 = vrot.lane.b32.xlu1 %v1773_v35, %s12626_s22  ;;  %536 = vst [vmem:[#allocation2 + $0x74] sm:$0x1] %v535_v41  ;;  %v13189_v51 = vld [vmem:[#allocation2 + $0x68] ss:$0 sps:$4 sm:$0x11]   ;;  %1129 = vst.msk [vmem:[#allocation3 + $0x30] sm:$0xff] %vm1122_vm11, %v12137_v53 }
  0xd3   : > { %v1509_v38 = vpop.permute.xlu0 %1508  ;;  %v1774_v59 = vrot.slane %v13186_v49, 1  ;;  %v13205_v62 = vld [vmem:[%s12842_s16 + $0x4c] sm:$0xf]  ;;  %v1775_v3 = vrot.slane %v13189_v51, 1  ;;  %v487_v4 = vld [vmem:[#allocation2 + $0x78] sm:$0x1] }
  0xd4   : > { %1557 = vst.msk [vmem:[#allocation3] sm:$0xff] %vm1556_vm12, %v1509_v38  ;;  %1987 = vrot.lane.b32.xlu0 %v12036_v16, %s12628_s26  ;;  %v2668_v38 = vrot.slane %v12043_v28, 1  ;;  %v3567_v28 = vrot.slane %v12053_v17, 1  ;;  %v488_v7 = vsel %vm12835_vm5, 0, %v487_v4 }
  0xd5   : > { %1847 = vst.msk [vmem:[#allocation3] sm:$0xff] %vm15599_vm13, %v1799_v24  ;;  %v2294_v24 = vor.u32 %v2293_v18, %v2289_v52  ;;  %v3189_v52 = vshrl.u32 %v12049_v13, 16  ;;  %v12054_v18 = vld [vmem:[#allocation2 + $0x68] ss:$0 sps:$4 sm:$0x11]   ;;  %v722_v13 = vshrl.u32 %v13205_v62, 16 }
  0xd6   : > { %v2669_v26 = vsel %vm1749_vm6, %v2667_v36, %v2668_v38  ;;  %1989 = vrot.lane.b32.xlu1 %v12037_v40, %s12628_s26  ;;  %v938_v36 = vld [vmem:[#allocation2 + $0x6c] sm:$0xf]  ;;  %489 = vst [vmem:[#allocation2 + $0x78] sm:$0x1] %v488_v7 }
  0xd7   : > { %v2299_v20 = vsel %vm1315_vm4, %v2294_v24, %v2298_v29  ;;  %v3198_v24 = vrot.slane %v3196_v42, 1  ;;  %v3568_v29 = vrot.slane %v12054_v18, 1  ;;  %v3194_v38 = vor.u32 %v3193_v23, %v3189_v52 }
  0xd8   : > { %2420 = vrot.lane.b32.xlu0 %v2299_v20, %s12632_s14  ;;  %v939_v20 = vsel %vm12873_vm10, %v702_v12, %v938_v36 }
  0xd9   : > { %940 = vst [vmem:[#allocation2 + $0x6c] sm:$0xf] %v939_v20  ;;  %v3199_v47 = vsel %vm1315_vm4, %v3194_v38, %v3198_v24  ;;  %v942_v50 = vld [vmem:[#allocation2 + $0x74] sm:$0x1]  ;;  %v3569_v27 = vsel %vm1749_vm6, %v3567_v28, %v3568_v29  ;;  %v725_v20 = vshll.u32 %v13205_v62, 16 }
  0xda   : > { %2422 = vrot.lane.b32.xlu1 %v2311_v55, %s12632_s14 }
  0xdc   : > { %2709 = vrot.lane.b32.xlu0 %v2669_v26, %s12630_s25  ;;  %v943_v26 = vsel %vm12835_vm5, %v712_v25, %v942_v50 }
  0xdd   : > { %944 = vst [vmem:[#allocation2 + $0x74] sm:$0x1] %v943_v26 }
  0xde   : > { %v1976_v10 = vpop.permute.xlu0 %1975  ;;  %2711 = vrot.lane.b32.xlu1 %v2672_v22, %s12630_s25 }
  0xdf   : > { %2024 = vst.msk [vmem:[#allocation3] sm:$0xff] %vm2023_vm14, %v1976_v10  ;;  %v13172_v10 = vld [vmem:[#allocation2 + $0x60] sm:$0xff]  }
  0xe0   : > { %v13140_v21 = vpop.permute.xlu1 %1977  ;;  %2887 = vrot.lane.b32.xlu0 %v12047_v58, %s12629_s24  ;;  %v1415_v34 = vshll.u32 %v13172_v10, 16  ;;  %v1413_v44 = vshrl.u32 %v13172_v10, 16  ;;  %v13194_v58 = vrot.slane %v1420_v48, 1  ;;  %v12051_v8 = vld [vmem:[#allocation2 + $0x6c] sm:$0xff]  }
  0xe1   : > { %v12057_v9 = vld [vmem:[#allocation2 + $0x6c] sm:$0xfe]   ;;  %v3201_v56 = vshrl.u32 %v12051_v8, 16  ;;  %v3203_v55 = vshll.u32 %v12051_v8, 16 }
  0xe2   : > { %v13150_v31 = vpop.permute.xlu0 %2875  ;;  %v1417_v57 = vrot.slane %v1415_v34, 1  ;;  %v12059_v46 = vld [vmem:[#allocation2 + $0x6c] sm:$0xff]   ;;  %v3570_v14 = vrot.slane %v12057_v9, 1 }
  0xe3   : > { %v1427_v42 = vshll.u32 %v12059_v46, 16  ;;  %v3205_v12 = vrot.slane %v3203_v55, 1  ;;  %v1425_v18 = vshrl.u32 %v12059_v46, 16  ;;  %v13230_v23 = vld [vmem:[#allocation2 + $0x6c] sm:$0xfe]  }
  0xe4   : > { %3320 = vrot.lane.b32.xlu0 %v3199_v47, %s12633_s12  ;;  %v12058_v52 = vld [vmem:[#allocation2 + $0x74] ss:$0 sps:$4 sm:$0x11]   ;;  %v1418_v29 = vor.u32 %v1417_v57, %v1413_v44  ;;  %v1777_v39 = vrot.slane %v13230_v23, 1  ;;  %v945_v47 = vld [vmem:[#allocation2 + $0x78] sm:$0xf] }
  0xe5   : > { %v13153_v45 = vpop.permute.xlu1 %2877  ;;  %v3571_v15 = vrot.slane %v12058_v52, 1  ;;  %v12060_v17 = vld [vmem:[#allocation2 + $0x74] ss:$0 sps:$4 sm:$0x11]   ;;  %v1429_v22 = vrot.slane %v1427_v42, 1  ;;  %v3206_v28 = vor.u32 %v3205_v12, %v3201_v56  ;;  %v12069_v48 = vld [vmem:[#allocation2 + $0x6c] sm:$0xff]  }
  0xe6   : > { %v12064_v36 = vld [vmem:[#allocation2 + $0x74] ss:$0 sps:$4 sm:$0x11]   ;;  %v12065_v51 = vld [vmem:[#allocation2 + $0x6c] sm:$0xff]  }
  0xe7   : > { %v3572_v34 = vsel %vm1749_vm6, %v3570_v14, %v3571_v15  ;;  %v1778_v49 = vrot.slane %v12064_v36, 1  ;;  %v1430_v57 = vor.u32 %v1429_v22, %v1425_v18  ;;  %v436_v22 = vld [vmem:[%s12842_s16 + $0x54] sm:$0xf] }
  0xe8   : > { %3609 = vrot.lane.b32.xlu0 %v3569_v27, %s12631_s30  ;;  %v1423_v27 = vsel %vm1315_vm4, %v1418_v29, %v13194_v58  ;;  %v537_v58 = vld [vmem:[#allocation2 + $0x80] sm:$0x1]  ;;  %v742_v36 = vshll.u32 %v436_v22, 16 }
  0xea   : > { %v13160_v2 = vpop.permute.xlu0 %2697 }
  0xeb   : > { %v1801_v6 = vpop.permute.xlu1 %1800 }
  0xec   : > { %3611 = vrot.lane.b32.xlu0 %v3572_v34, %s12631_s30  ;;  %v739_v34 = vshrl.u32 %v436_v22, 16 }
  0xee   : > { %v13168_v16 = vpop.permute.xlu0 %3597 }
  0xef   : > { %v2700_v11 = vpop.permute.xlu1 %2699 }
  0xf2   : > { %v3600_v35 = vpop.permute.xlu0 %3599 }
  0xf3   : > { %v2411_v40 = vpop.permute.xlu1 %2410 }
  0xf6   : > { %v1511_v54 = vpop.permute.xlu0 %1510 }
  0xf7   : > { %1558 = vst.msk [vmem:[#allocation3 + $0x8] sm:$0xff] %vm1556_vm12, %v1511_v54  ;;  %v3311_v60 = vpop.permute.xlu1 %3310 }
  0xf8   : > { %1848 = vst.msk [vmem:[#allocation3 + $0x8] sm:$0xff] %vm15599_vm13, %v1801_v6  ;;  %v12142_v6 = vld [vmem:[#allocation2 + $0x54] sm:$0xff]  }
  0xf9   : > { %2025 = vst.msk [vmem:[#allocation3 + $0x8] sm:$0xff] %vm2023_vm14, %v13140_v21  ;;  %v12048_v21 = vld [vmem:[#allocation2 + $0x6c] sm:$0xff]  }
  0xfa   : > { %2458 = vst.msk [vmem:[#allocation3 + $0x8] sm:$0xff] %vm15600_vm15, %v2411_v40  ;;  %v2409_v63 = vpop.permute.xlu0 %2408  ;;  %2889 = vrot.lane.b32.xlu1 %v12048_v21, %s12629_s24 }
  0xfb   : > { %2747 = vst.msk [vmem:[#allocation3 + $0x8] sm:$0xff] %vm15598_vm1, %v2700_v11  ;;  %v1513_v32 = vpop.permute.xlu1 %1512  ;;  %v13226_v11 = vrot.slane %v722_v13, 7  ;;  %v12075_v13 = vld [vmem:[#allocation2 + $0x6c] sm:$0xfe]  }
  0xfc   : > { %2457 = vst.msk [vmem:[#allocation3] sm:$0xff] %vm15600_vm15, %v2409_v63  ;;  %v2315_v63 = vshll.u32 %v12069_v48, 16 }
  0xfd   : > { %2925 = vst.msk [vmem:[#allocation3 + $0x8] sm:$0xff] %vm2923_vm7, %v13153_v45  ;;  %v716_v45 = vrot.slane %v714_v33, 7  ;;  %v729_v50 = vrot.slane %v13226_v11, 4  ;;  %v727_v54 = vor.u32 %v725_v20, %v13226_v11 }
  0xfe   : > { %2746 = vst.msk [vmem:[#allocation3] sm:$0xff] %vm15598_vm1, %v13160_v2  ;;  %v12052_v2 = vld [vmem:[#allocation2 + $0x74] ss:$0 sps:$4 sm:$0x11]   ;;  %v3309_v41 = vpop.permute.xlu0 %3308  ;;  %vm3721_vm1 = vcmask 588800   ;;  %v2317_v33 = vrot.slane %v2315_v63, 1 }
  0xff   : > { %3358 = vst.msk [vmem:[#allocation3 + $0x8] sm:$0xff] %vm3356_vm3, %v3311_v60  ;;  %v719_v24 = vor.u32 %v717_v5, %v716_v45  ;;  %v1515_v38 = vpop.permute.xlu1 %1514  ;;  %v720_v40 = vrot.slane %v716_v45, 4  ;;  %v2313_v60 = vshrl.u32 %v12069_v48, 16  ;;  %v538_v5 = vsel %vm12855_vm8, 0, %v537_v58  ;;  %v540_v48 = vld [vmem:[#allocation2 + $0x8c] sm:$0x1] }
 0x100   : > { %2924 = vst.msk [vmem:[#allocation3] sm:$0xff] %vm2923_vm7, %v13150_v31  ;;  %v3208_v31 = vshll.u32 %v12052_v2, 16  ;;  %539 = vst [vmem:[#allocation2 + $0x80] sm:$0x1] %v538_v5  ;;  %v2673_v45 = vrot.slane %v12075_v13, 1 }
 0x101   : > { %1130 = vst.msk [vmem:[#allocation3 + $0x38] sm:$0xff] %vm1122_vm11, %v12142_v6  ;;  %v946_v53 = vsel %vm12873_vm10, %v719_v24, %v945_v47  ;;  %v728_v62 = vsel %vm12866_vm9, %v720_v40, %v727_v54  ;;  %v2318_v9 = vor.u32 %v2317_v33, %v2313_v60  ;;  %v12086_v47 = vld [vmem:[%s15577_s1 + $0x20] ss:$0 sps:$4 sm:$0xff]  }
 0x102   : > { %3647 = vst.msk [vmem:[#allocation3 + $0x8] sm:$0xff] %vm3645_vm2, %v3600_v35  ;;  %v3210_v19 = vrot.slane %v3208_v31, 1  ;;  %v1803_v25 = vpop.permute.xlu0 %1802  ;;  %v1432_v35 = vshll.u32 %v12060_v17, 16  ;;  %947 = vst [vmem:[#allocation2 + $0x78] sm:$0xf] %v946_v53 }
 0x103   : > { %1559 = vst.msk [vmem:[#allocation3 + $0x10] sm:$0xff] %vm1556_vm12, %v1513_v32  ;;  %1560 = vst.msk [vmem:[#allocation3 + $0x18] sm:$0xff] %vm1556_vm12, %v1515_v38  ;;  %v1805_v61 = vpop.permute.xlu1 %1804  ;;  %v12076_v32 = vld [vmem:[#allocation2 + $0x74] ss:$0 sps:$4 sm:$0x11]  }
 0x104   : > { %3357 = vst.msk [vmem:[#allocation3] sm:$0xff] %vm3356_vm3, %v3309_v41  ;;  %v3211_v10 = vsel %vm1315_vm4, %v3206_v28, %v3210_v19  ;;  %v1434_v44 = vrot.slane %v1432_v35, 1  ;;  %v2674_v2 = vrot.slane %v12076_v32, 1  ;;  %v1779_v41 = vsel %vm1749_vm6, %v1777_v39, %v1778_v49  ;;  %v435_v19 = vld [vmem:[%s12842_s16 + $0x50] sm:$0xf] }
 0x105   : > { %3646 = vst.msk [vmem:[#allocation3] sm:$0xff] %vm3645_vm2, %v13168_v16  ;;  %v1776_v16 = vsel %vm1749_vm6, %v1774_v59, %v1775_v3  ;;  %3322 = vrot.lane.b32.xlu1 %v3211_v10, %s12633_s12  ;;  %v12070_v59 = vld [vmem:[#allocation2 + $0x74] ss:$0 sps:$4 sm:$0x11]   ;;  %v490_v28 = vld [vmem:[#allocation2 + $0x84] sm:$0x1] }
 0x106   : > { %1849 = vst.msk [vmem:[#allocation3 + $0x10] sm:$0xff] %vm15599_vm13, %v1803_v25  ;;  %v1980_v26 = vpop.permute.xlu0 %1979  ;;  %1814 = vrot.lane.b32.xlu0 %v1776_v16, %s12626_s22  ;;  %1850 = vst.msk [vmem:[#allocation3 + $0x18] sm:$0xff] %vm15599_vm13, %v1805_v61  ;;  %v2320_v4 = vshll.u32 %v12070_v59, 16  ;;  %v1435_v21 = vsel %vm1315_vm4, %v1430_v57, %v1434_v44  ;;  %vm15625_vm13 = vcmask 392512   ;;  %v2675_v52 = vsel %vm1749_vm6, %v2673_v45, %v2674_v2 }
 0x107   : > { %2026 = vst.msk [vmem:[#allocation3 + $0x10] sm:$0xff] %vm2023_vm14, %v1980_v26  ;;  %v1982_v8 = vpop.permute.xlu1 %1981  ;;  %v949_v42 = vld [vmem:[#allocation2 + $0x80] sm:$0x1]  ;;  %v731_v29 = vshrl.u32 %v435_v19, 16  ;;  %v491_v35 = vsel %vm12835_vm5, 0, %v490_v28  ;;  %v734_v16 = vshll.u32 %v435_v19, 16 }
 0x108   : > { %948 = vst.msk [vmem:[#allocation2 + $0x7c] sm:$0xf] %vm447_vm0, %v728_v62  ;;  %v2322_v7 = vrot.slane %v2320_v4, 1  ;;  %v950_v12 = vsel %vm12835_vm5, %v729_v50, %v949_v42  ;;  %492 = vst [vmem:[#allocation2 + $0x84] sm:$0x1] %v491_v35  ;;  %v741_v39 = vrot.slane %v739_v34, 7 }
 0x109   : > { %1524 = vrot.lane.b32.xlu1 %v1423_v27, %s12627_s19  ;;  %2027 = vst.msk [vmem:[#allocation3 + $0x18] sm:$0xff] %vm2023_vm14, %v1982_v8  ;;  %951 = vst [vmem:[#allocation2 + $0x80] sm:$0x1] %v950_v12  ;;  %v733_v38 = vrot.slane %v731_v29, 7  ;;  %v541_v26 = vsel %vm12855_vm8, 0, %v540_v48  ;;  %v3663_v63 = vld [vmem:[#allocation3 + $0x8] sm:$0xff] }
 0x10a   : > { %v2413_v6 = vpop.permute.xlu0 %2412  ;;  %1991 = vrot.lane.b32.xlu0 %v12065_v51, %s12628_s26  ;;  %v2323_v46 = vsel %vm1315_vm4, %v2318_v9, %v2322_v7  ;;  %v744_v51 = vor.u32 %v742_v36, %v741_v39  ;;  %v746_v54 = vrot.slane %v741_v39, 4  ;;  %542 = vst [vmem:[#allocation2 + $0x8c] sm:$0x1] %v541_v26  ;;  %v13324_v29 = vld [vmem:[%s12842_s16 + $0x58] sm:$0xf] }
 0x10b   : > { %2459 = vst.msk [vmem:[#allocation3 + $0x10] sm:$0xff] %vm15600_vm15, %v2413_v6  ;;  %v2415_v23 = vpop.permute.xlu1 %2414  ;;  %v737_v50 = vrot.slane %v733_v38, 4  ;;  %v736_v60 = vor.u32 %v734_v16, %v733_v38 }
 0x10c   : > { %v3662_v3 = vld [vmem:[#allocation3] sm:$0xff]  ;;  %2460 = vst.msk [vmem:[#allocation3 + $0x18] sm:$0xff] %vm15600_vm15, %v2415_v23  ;;  %vm15626_vm15 = vcmask 392512  }
 0x10d   : > { %11812 = vmatprep.mubr.msk.bf16.mxu0 %vm3721_vm1, %v3662_v3  ;;  %1526 = vrot.lane.b32.xlu1 %v1435_v21, %s12627_s19  ;;  %v745_v61 = vsel %vm12866_vm9, %v737_v50, %v744_v51  ;;  %v748_v50 = vshrl.u32 %v13324_v29, 16 }
 0x10e   : > { %v2702_v56 = vpop.permute.xlu0 %2701  ;;  %2424 = vrot.lane.b32.xlu0 %v2323_v46, %s12632_s14  ;;  %955 = vst.msk [vmem:[#allocation2 + $0x88] sm:$0xf] %vm447_vm0, %v745_v61 }
 0x10f   : > { %2748 = vst.msk [vmem:[#allocation3 + $0x10] sm:$0xff] %vm15625_vm13, %v2702_v56  ;;  %v12072_v55 = vld [vmem:[#allocation2 + $0x78] sm:$0xff]   ;;  %vm3770_vm13 = vcmask 1043456   ;;  %v2704_v10 = vpop.permute.xlu1 %2703  ;;  %v952_v8 = vld [vmem:[#allocation2 + $0x84] sm:$0xf] }
 0x110   : > { %v13269_v31 = vld [vmem:[#allocation2 + $0x78] sm:$0xfe]   ;;  %v2325_v15 = vshrl.u32 %v12072_v55, 16  ;;  %v2327_v24 = vshll.u32 %v12072_v55, 16  ;;  %2749 = vst.msk [vmem:[#allocation3 + $0x18] sm:$0xff] %vm15626_vm15, %v2704_v10  ;;  %11868 = vmatprep.subr.msk.bf16.mxu0 %vm3770_vm13, %v12086_v47  ;;  %v3772_v27 = vsel %vm3770_vm13, %v12086_v47, 0  ;;  %v953_v32 = vsel %vm12873_vm10, %v736_v60, %v952_v8 }
 0x111   : > { %1816 = vrot.lane.b32.xlu1 %v1779_v41, %s12626_s22  ;;  %v12067_v14 = vld [vmem:[#allocation2 + $0x78] sm:$0xff]   ;;  %v2676_v25 = vrot.slane %v13269_v31, 1  ;;  %v12073_v59 = vld [vmem:[#allocation2 + $0x80] ss:$0 sps:$4 sm:$0x11]   ;;  %11811 = vmatpush3.bf16.msra.mxu0 %v3772_v27  ;;  %vm15627_vm15 = vcmask 195712  }
 0x112   : > { %v2880_v11 = vpop.permute.xlu0 %2879  ;;  %v12081_v17 = vld [vmem:[#allocation2 + $0x78] sm:$0xff]   ;;  %2713 = vrot.lane.b32.xlu0 %v2675_v52, %s12630_s25  ;;  %v2329_v49 = vrot.slane %v2327_v24, 1  ;;  %v12079_v3 = vld [vmem:[#allocation2 + $0x80] ss:$0 sps:$4 sm:$0x11]   ;;  %v2332_v6 = vshll.u32 %v12073_v59, 16  ;;  %vm15628_vm13 = vmmov %vm15627_vm15 }
 0x113   : > { %v13274_v18 = vld [vmem:[#allocation2 + $0x78] sm:$0xff]   ;;  %2926 = vst.msk [vmem:[#allocation3 + $0x10] sm:$0xff] %vm2923_vm7, %v2880_v11  ;;  %v2882_v58 = vpop.permute.xlu1 %2881  ;;  %v12085_v21 = vld [vmem:[#allocation2 + $0x80] ss:$0 sps:$4 sm:$0x11]   ;;  %v2677_v7 = vrot.slane %v12079_v3, 1 }
 0x114   : > { %v13285_v40 = vld [vmem:[#allocation2 + $0x78] sm:$0xff]   ;;  %v3215_v20 = vshll.u32 %v13274_v18, 16  ;;  %v3213_v53 = vshrl.u32 %v13274_v18, 16  ;;  %v2330_v5 = vor.u32 %v2329_v49, %v2325_v15  ;;  %2927 = vst.msk [vmem:[#allocation3 + $0x18] sm:$0xff] %vm2923_vm7, %v2882_v58  ;;  %11813 = vmatmul.mubr.msk.bf16.vlgmr.msra.gmra.mrb[0].mxu0 %vm3721_vm1, %v3663_v63  ;;  %v2334_v13 = vrot.slane %v2332_v6, 1  ;;  %v12167_v11 = vld [vmem:[#allocation2 + $0x60] sm:$0xff]  }
 0x115   : > { %1993 = vrot.lane.b32.xlu1 %v12067_v14, %s12628_s26  ;;  %v12089_v57 = vld [vmem:[#allocation2 + $0x78] sm:$0xfe]   ;;  %v1439_v4 = vshll.u32 %v13285_v40, 16  ;;  %v3220_v45 = vshll.u32 %v12085_v21, 16  ;;  %954 = vst [vmem:[#allocation2 + $0x84] sm:$0xf] %v953_v32  ;;  %v2678_v15 = vsel %vm1749_vm6, %v2676_v25, %v2677_v7 }
 0x116   : > { %2891 = vrot.lane.b32.xlu0 %v12081_v17, %s12629_s24  ;;  %v3313_v44 = vpop.permute.xlu0 %3312  ;;  %v3217_v62 = vrot.slane %v3215_v20, 1  ;;  %v3573_v9 = vrot.slane %v12089_v57, 1  ;;  %v12090_v2 = vld [vmem:[#allocation2 + $0x80] ss:$0 sps:$4 sm:$0x11]   ;;  %v2335_v41 = vsel %vm1315_vm4, %v2330_v5, %v2334_v13  ;;  %1131 = vst.msk [vmem:[#allocation3 + $0x40] sm:$0xff] %vm1122_vm11, %v12167_v11 }
 0x117   : > { %3359 = vst.msk [vmem:[#allocation3 + $0x10] sm:$0xff] %vm3356_vm3, %v3313_v44  ;;  %v3222_v55 = vrot.slane %v3220_v45, 1  ;;  %v3574_v52 = vrot.slane %v12090_v2, 1  ;;  %v12092_v14 = vld [vmem:[#allocation2 + $0x80] ss:$0 sps:$4 sm:$0x11]   ;;  %v3315_v42 = vpop.permute.xlu1 %3314 }
 0x118   : > { %v3218_v46 = vor.u32 %v3217_v62, %v3213_v53  ;;  %v956_v12 = vld [vmem:[#allocation2 + $0x8c] sm:$0x1]  ;;  %3360 = vst.msk [vmem:[#allocation3 + $0x18] sm:$0xff] %vm3356_vm3, %v3315_v42  ;;  %v1444_v19 = vshll.u32 %v12092_v14, 16  ;;  %v1437_v31 = vshrl.u32 %v13285_v40, 16  ;;  %v1441_v35 = vrot.slane %v1439_v4, 1 }
 0x119   : > { %2426 = vrot.lane.b32.xlu1 %v2335_v41, %s12632_s14  ;;  %v957_v18 = vsel %vm12835_vm5, %v746_v54, %v956_v12  ;;  %v3575_v23 = vsel %vm1749_vm6, %v3573_v9, %v3574_v52  ;;  %v12097_v24 = vld [vmem:[#allocation2 + $0x78] sm:$0xfe]   ;;  %v12098_v25 = vld [vmem:[#allocation2 + $0x80] ss:$0 sps:$4 sm:$0x11]   ;;  %v750_v6 = vrot.slane %v748_v50, 7 }
 0x11a   : > { %v3602_v33 = vpop.permute.xlu0 %3601  ;;  %v3223_v17 = vsel %vm1315_vm4, %v3218_v46, %v3222_v55  ;;  %958 = vst [vmem:[#allocation2 + $0x8c] sm:$0x1] %v957_v18  ;;  %v1446_v38 = vrot.slane %v1444_v19, 1  ;;  %v1780_v40 = vrot.slane %v12097_v24, 1  ;;  %v1781_v20 = vrot.slane %v12098_v25, 1 }
 0x11b   : > { %3648 = vst.msk [vmem:[#allocation3 + $0x10] sm:$0xff] %vm3645_vm2, %v3602_v33  ;;  %3324 = vrot.lane.b32.xlu0 %v3223_v17, %s12633_s12  ;;  %v1517_v28 = vpop.permute.xlu1 %1516  ;;  %v1442_v57 = vor.u32 %v1441_v35, %v1437_v31  ;;  %v438_v9 = vld [vmem:[%s12842_s16 + $0x5c] sm:$0xf]  ;;  %v493_v45 = vld [vmem:[#allocation2 + $0x90] sm:$0x1]  ;;  %v751_v2 = vshll.u32 %v13324_v29, 16 }
 0x11c   : > { %1561 = vst.msk [vmem:[#allocation3 + $0x20] sm:$0xff] %vm1556_vm12, %v1517_v28  ;;  %v12083_v34 = vld [vmem:[#allocation2 + $0x84] sm:$0xff]   ;;  %v1782_v52 = vsel %vm1749_vm6, %v1780_v40, %v1781_v20  ;;  %v494_v14 = vsel %vm12835_vm5, 0, %v493_v45  ;;  %v756_v42 = vshrl.u32 %v438_v9, 16  ;;  %v759_v17 = vshll.u32 %v438_v9, 16  ;;  %v12172_v20 = vld [vmem:[#allocation2 + $0x6c] sm:$0xff]  }
 0x11d   : > { %2715 = vrot.lane.b32.xlu1 %v2678_v15, %s12630_s25  ;;  %v12087_v36 = vld [vmem:[#allocation2 + $0x84] sm:$0xff]   ;;  %v1447_v11 = vsel %vm1315_vm4, %v1442_v57, %v1446_v38  ;;  %495 = vst [vmem:[#allocation2 + $0x90] sm:$0x1] %v494_v14  ;;  %v543_v31 = vld [vmem:[#allocation2 + $0x98] sm:$0x1]  ;;  %v753_v38 = vor.u32 %v751_v2, %v750_v6  ;;  %1132 = vst.msk [vmem:[#allocation3 + $0x48] sm:$0xff] %vm1122_vm11, %v12172_v20 }
 0x11e   : > { %v3604_v56 = vpop.permute.xlu0 %3603  ;;  %v12093_v16 = vld [vmem:[#allocation2 + $0x84] sm:$0xfe]   ;;  %v3225_v48 = vshrl.u32 %v12087_v36, 16  ;;  %v3227_v10 = vshll.u32 %v12087_v36, 16  ;;  %v758_v19 = vrot.slane %v756_v42, 7  ;;  %v544_v28 = vsel %vm12855_vm8, 0, %v543_v31 }
 0x11f   : > { %3649 = vst.msk [vmem:[#allocation3 + $0x18] sm:$0xff] %vm3645_vm2, %v3604_v56  ;;  %3613 = vrot.lane.b32.xlu0 %v3575_v23, %s12631_s30  ;;  %v1519_v47 = vpop.permute.xlu1 %1518  ;;  %v12095_v44 = vld [vmem:[#allocation2 + $0x84] sm:$0xff]   ;;  %v3576_v54 = vrot.slane %v12093_v16, 1  ;;  %v754_v56 = vrot.slane %v750_v6, 4  ;;  %545 = vst [vmem:[#allocation2 + $0x98] sm:$0x1] %v544_v28 }
 0x120   : > { %v13331_v49 = vld [vmem:[#allocation2 + $0x84] sm:$0xfe]   ;;  %1562 = vst.msk [vmem:[#allocation3 + $0x28] sm:$0xff] %vm1556_vm12, %v1519_v47  ;;  %v3229_v53 = vrot.slane %v3227_v10, 1  ;;  %v1449_v3 = vshrl.u32 %v12095_v44, 16  ;;  %v1451_v4 = vshll.u32 %v12095_v44, 16 }
 0x121   : > { %2893 = vrot.lane.b32.xlu1 %v12083_v34, %s12629_s24  ;;  %v12088_v51 = vld [vmem:[#allocation2 + $0x8c] ss:$0 sps:$4 sm:$0x11]   ;;  %v1783_v5 = vrot.slane %v13331_v49, 1  ;;  %v12103_v13 = vld [vmem:[#allocation2 + $0x84] sm:$0xff]   ;;  %v761_v34 = vor.u32 %v759_v17, %v758_v19  ;;  %v763_v44 = vrot.slane %v758_v19, 4 }
 0x122   : > { %v1807_v22 = vpop.permute.xlu0 %1806  ;;  %v12094_v26 = vld [vmem:[#allocation2 + $0x8c] ss:$0 sps:$4 sm:$0x11]   ;;  %v3232_v27 = vshll.u32 %v12088_v51, 16  ;;  %v3230_v62 = vor.u32 %v3229_v53, %v3225_v48  ;;  %v1453_v7 = vrot.slane %v1451_v4, 1  ;;  %v12101_v15 = vld [vmem:[#allocation2 + $0x84] sm:$0xff]  }
 0x123   : > { %1851 = vst.msk [vmem:[#allocation3 + $0x20] sm:$0xff] %vm15627_vm15, %v1807_v22  ;;  %v12096_v59 = vld [vmem:[#allocation2 + $0x8c] ss:$0 sps:$4 sm:$0x11]   ;;  %v1809_v60 = vpop.permute.xlu1 %1808  ;;  %v3577_v63 = vrot.slane %v12094_v26, 1  ;;  %vm15629_vm15 = vcmask 326912   ;;  %v762_v47 = vsel %vm12866_vm9, %v754_v56, %v761_v34 }
 0x124   : > { %1852 = vst.msk [vmem:[#allocation3 + $0x28] sm:$0xff] %vm15628_vm13, %v1809_v60  ;;  %v3234_v58 = vrot.slane %v3232_v27, 1  ;;  %v1456_v33 = vshll.u32 %v12096_v59, 16  ;;  %v13339_v8 = vld [vmem:[#allocation2 + $0x8c] ss:$0 sps:$4 sm:$0x11]   ;;  %v1454_v12 = vor.u32 %v1453_v7, %v1449_v3 }
 0x125   : > { %v3578_v21 = vsel %vm1749_vm6, %v3576_v54, %v3577_v63  ;;  %v3664_v41 = vld [vmem:[#allocation3 + $0x10] sm:$0xff]  ;;  %vm15630_vm13 = vcmask 392512   ;;  %v2337_v22 = vshrl.u32 %v12103_v13, 16  ;;  %v2339_v23 = vshll.u32 %v12103_v13, 16  ;;  %962 = vst.msk [vmem:[#allocation2 + $0x94] sm:$0xf] %vm447_vm0, %v762_v47 }
 0x126   : > { %v1984_v39 = vpop.permute.xlu0 %1983  ;;  %v3235_v32 = vsel %vm1315_vm4, %v3230_v62, %v3234_v58  ;;  %3615 = vrot.lane.b32.xlu0 %v3578_v21, %s12631_s30  ;;  %v1458_v46 = vrot.slane %v1456_v33, 1  ;;  %11816 = vmatprep.mubr.msk.bf16.mxu0 %vm3721_vm1, %v3664_v41  ;;  %v12104_v18 = vld [vmem:[#allocation2 + $0x8c] ss:$0 sps:$4 sm:$0x11]   ;;  %v3665_v24 = vld [vmem:[#allocation3 + $0x18] sm:$0xff]  ;;  %v1784_v29 = vrot.slane %v13339_v8, 1 }
 0x127   : > { %2028 = vst.msk [vmem:[#allocation3 + $0x20] sm:$0xff] %vm2023_vm14, %v1984_v39  ;;  %3326 = vrot.lane.b32.xlu1 %v3235_v32, %s12633_s12  ;;  %v2344_v25 = vshll.u32 %v12104_v18, 16  ;;  %11817 = vmatmul.mubr.msk.bf16.gmra.mrb[4].mxu0 %vm3721_vm1, %v3665_v24  ;;  %v2341_v35 = vrot.slane %v2339_v23, 1  ;;  %v12108_v39 = vld [vmem:[#allocation2 + $0x84] sm:$0xfe]   ;;  %v1986_v40 = vpop.permute.xlu1 %1985  ;;  %v12183_v4 = vld [vmem:[#allocation2 + $0x78] sm:$0xff]  }
 0x128   : > { %v1459_v36 = vsel %vm1315_vm4, %v1454_v12, %v1458_v46  ;;  %v12109_v10 = vld [vmem:[#allocation2 + $0x8c] ss:$0 sps:$4 sm:$0x11]   ;;  %2029 = vst.msk [vmem:[#allocation3 + $0x28] sm:$0xff] %vm2023_vm14, %v1986_v40  ;;  %v2679_v50 = vrot.slane %v12108_v39, 1  ;;  %v1785_v60 = vsel %vm1749_vm6, %v1783_v5, %v1784_v29 }
 0x129   : > { %v2346_v16 = vrot.slane %v2344_v25, 1  ;;  %v2342_v48 = vor.u32 %v2341_v35, %v2337_v22  ;;  %v439_v51 = vld [vmem:[%s12842_s16 + $0x60] sm:$0xf]  ;;  %v959_v53 = vld [vmem:[#allocation2 + $0x90] sm:$0xf]  ;;  %v2680_v27 = vrot.slane %v12109_v10, 1 }
 0x12a   : > { %v2417_v61 = vpop.permute.xlu0 %2416  ;;  %1818 = vrot.lane.b32.xlu0 %v1782_v52, %s12626_s22  ;;  %v440_v57 = vld [vmem:[%s12842_s16 + $0x64] sm:$0xf]  ;;  %v765_v59 = vshrl.u32 %v439_v51, 16  ;;  %v496_v62 = vld [vmem:[#allocation2 + $0x9c] sm:$0x1]  ;;  %v768_v5 = vshll.u32 %v439_v51, 16 }
 0x12b   : > { %2461 = vst.msk [vmem:[#allocation3 + $0x20] sm:$0xff] %vm15629_vm15, %v2417_v61  ;;  %1528 = vrot.lane.b32.xlu1 %v1447_v11, %s12627_s19  ;;  %v2347_v26 = vsel %vm1315_vm4, %v2342_v48, %v2346_v16  ;;  %v960_v61 = vsel %vm12873_vm10, %v753_v38, %v959_v53  ;;  %v773_v63 = vshrl.u32 %v440_v57, 16  ;;  %v776_v3 = vshll.u32 %v440_v57, 16  ;;  %v546_v6 = vld [vmem:[#allocation2 + $0xa4] sm:$0x1] }
 0x12c   : > { %961 = vst [vmem:[#allocation2 + $0x90] sm:$0xf] %v960_v61  ;;  %v497_v58 = vsel %vm12835_vm5, 0, %v496_v62  ;;  %v767_v33 = vrot.slane %v765_v59, 7  ;;  %v13378_v21 = vld [vmem:[%s12842_s16 + $0x68] sm:$0xf]  ;;  %v2681_v13 = vsel %vm1749_vm6, %v2679_v50, %v2680_v27  ;;  %v2419_v14 = vpop.permute.xlu1 %2418 }
 0x12d   : > { %v963_v49 = vld [vmem:[#allocation2 + $0x98] sm:$0x1]  ;;  %498 = vst [vmem:[#allocation2 + $0x9c] sm:$0x1] %v497_v58  ;;  %v13381_v7 = vrot.slane %v773_v63, 7  ;;  %v547_v8 = vsel %vm12855_vm8, 0, %v546_v6 }
 0x12e   : > { %v2706_v55 = vpop.permute.xlu0 %2705  ;;  %1995 = vrot.lane.b32.xlu0 %v12101_v15, %s12628_s26  ;;  %1133 = vst.msk [vmem:[#allocation3 + $0x50] sm:$0xff] %vm1122_vm11, %v12183_v4  ;;  %v964_v9 = vsel %vm12835_vm5, %v763_v44, %v963_v49  ;;  %v771_v32 = vrot.slane %v767_v33, 4  ;;  %548 = vst [vmem:[#allocation2 + $0xa4] sm:$0x1] %v547_v8  ;;  %v442_v46 = vld [vmem:[%s12842_s16 + $0x6c] sm:$0xf]  ;;  %v770_v11 = vor.u32 %v768_v5, %v767_v33 }
 0x12f   : > { %2750 = vst.msk [vmem:[#allocation3 + $0x20] sm:$0xff] %vm15630_vm13, %v2706_v55  ;;  %1530 = vrot.lane.b32.xlu1 %v1459_v36, %s12627_s19  ;;  %v499_v45 = vld [vmem:[#allocation2 + $0xa8] sm:$0x1]  ;;  %v782_v2 = vshrl.u32 %v13378_v21, 16  ;;  %965 = vst [vmem:[#allocation2 + $0x98] sm:$0x1] %v964_v9  ;;  %v778_v56 = vor.u32 %v776_v3, %v13381_v7 }
 0x130   : > { %v780_v41 = vrot.slane %v13381_v7, 4  ;;  %v500_v55 = vsel %vm12835_vm5, 0, %v499_v45  ;;  %v12184_v52 = vld [vmem:[#allocation2 + $0x84] sm:$0xff]   ;;  %2462 = vst.msk [vmem:[#allocation3 + $0x28] sm:$0xff] %vm15629_vm15, %v2419_v14  ;;  %v790_v15 = vshrl.u32 %v442_v46, 16  ;;  %v793_v18 = vshll.u32 %v442_v46, 16  ;;  %v2708_v23 = vpop.permute.xlu1 %2707 }
 0x131   : > { %501 = vst [vmem:[#allocation2 + $0xa8] sm:$0x1] %v500_v55  ;;  %v779_v42 = vsel %vm12866_vm9, %v771_v32, %v778_v56  ;;  %1134 = vst.msk [vmem:[#allocation3 + $0x58] sm:$0xff] %vm1122_vm11, %v12184_v52  ;;  %v13402_v12 = vrot.slane %v782_v2, 7  ;;  %v785_v7 = vshll.u32 %v13378_v21, 16  ;;  %vm15631_vm15 = vcmask 195712  }
 0x132   : > { %v2884_v54 = vpop.permute.xlu0 %2883  ;;  %2428 = vrot.lane.b32.xlu0 %v2347_v26, %s12632_s14  ;;  %969 = vst.msk [vmem:[#allocation2 + $0xa0] sm:$0xf] %vm447_vm0, %v779_v42  ;;  %v13407_v29 = vrot.slane %v790_v15, 7 }
 0x133   : > { %2928 = vst.msk [vmem:[#allocation3 + $0x20] sm:$0xff] %vm2923_vm7, %v2884_v54  ;;  %1820 = vrot.lane.b32.xlu1 %v1785_v60, %s12626_s22  ;;  %v12102_v17 = vld [vmem:[#allocation2 + $0x90] sm:$0xff]   ;;  %v788_v31 = vrot.slane %v13402_v12, 4 }
 0x134   : > { %v12105_v19 = vld [vmem:[#allocation2 + $0x90] sm:$0xff]   ;;  %v966_v28 = vld [vmem:[#allocation2 + $0x9c] sm:$0xf]  ;;  %2751 = vst.msk [vmem:[#allocation3 + $0x28] sm:$0xff] %vm15630_vm13, %v2708_v23  ;;  %v795_v39 = vor.u32 %v793_v18, %v13407_v29  ;;  %v2886_v47 = vpop.permute.xlu1 %2885  ;;  %vm15632_vm13 = vmmov %vm15631_vm15 }
 0x135   : > { %v12110_v22 = vld [vmem:[#allocation2 + $0x90] sm:$0xfe]   ;;  %v2349_v35 = vshrl.u32 %v12105_v19, 16  ;;  %v967_v36 = vsel %vm12873_vm10, %v770_v11, %v966_v28  ;;  %v2351_v38 = vshll.u32 %v12105_v19, 16  ;;  %2929 = vst.msk [vmem:[#allocation3 + $0x28] sm:$0xff] %vm2923_vm7, %v2886_v47 }
 0x136   : > { %2717 = vrot.lane.b32.xlu0 %v2681_v13, %s12630_s25  ;;  %v3317_v24 = vpop.permute.xlu0 %3316  ;;  %v12113_v25 = vld [vmem:[#allocation2 + $0x90] sm:$0xff]   ;;  %v12106_v34 = vld [vmem:[#allocation2 + $0x98] ss:$0 sps:$4 sm:$0x11]   ;;  %968 = vst [vmem:[#allocation2 + $0x9c] sm:$0xf] %v967_v36  ;;  %v796_v54 = vsel %vm12866_vm9, %v788_v31, %v795_v39 }
 0x137   : > { %1997 = vrot.lane.b32.xlu1 %v12102_v17, %s12628_s26  ;;  %3361 = vst.msk [vmem:[#allocation3 + $0x20] sm:$0xff] %vm3356_vm3, %v3317_v24  ;;  %v12111_v16 = vld [vmem:[#allocation2 + $0x98] ss:$0 sps:$4 sm:$0x11]   ;;  %v2356_v40 = vshll.u32 %v12106_v34, 16  ;;  %v2682_v20 = vrot.slane %v12110_v22, 1 }
 0x138   : > { %v2353_v10 = vrot.slane %v2351_v38, 1  ;;  %v2683_v44 = vrot.slane %v12111_v16, 1  ;;  %v12115_v50 = vld [vmem:[#allocation2 + $0x90] sm:$0xff]   ;;  %v12116_v26 = vld [vmem:[#allocation2 + $0x98] ss:$0 sps:$4 sm:$0x11]   ;;  %v3319_v3 = vpop.permute.xlu1 %3318 }
 0x139   : > { %v13414_v51 = vld [vmem:[#allocation2 + $0x90] sm:$0xff]   ;;  %v2358_v53 = vrot.slane %v2356_v40, 1  ;;  %v970_v27 = vld [vmem:[#allocation2 + $0xa4] sm:$0x1]  ;;  %976 = vst.msk [vmem:[#allocation2 + $0xac] sm:$0xf] %vm447_vm0, %v796_v54 }
 0x13a   : > { %2895 = vrot.lane.b32.xlu0 %v12113_v25, %s12629_s24  ;;  %v3606_v48 = vpop.permute.xlu0 %3605  ;;  %v2354_v57 = vor.u32 %v2353_v10, %v2349_v35  ;;  %v3237_v59 = vshrl.u32 %v12115_v50, 16  ;;  %v3239_v60 = vshll.u32 %v12115_v50, 16  ;;  %v3244_v61 = vshll.u32 %v12116_v26, 16  ;;  %v12119_v63 = vld [vmem:[#allocation2 + $0x90] sm:$0xfe]   ;;  %3362 = vst.msk [vmem:[#allocation3 + $0x28] sm:$0xff] %vm3356_vm3, %v3319_v3 }
 0x13b   : > { %3650 = vst.msk [vmem:[#allocation3 + $0x20] sm:$0xff] %vm3645_vm2, %v3606_v48  ;;  %v971_v62 = vsel %vm12835_vm5, %v780_v41, %v970_v27  ;;  %v12120_v6 = vld [vmem:[#allocation2 + $0x98] ss:$0 sps:$4 sm:$0x11]   ;;  %v2684_v49 = vsel %vm1749_vm6, %v2682_v20, %v2683_v44  ;;  %v3579_v13 = vrot.slane %v12119_v63, 1  ;;  %v1463_v46 = vshll.u32 %v13414_v51, 16 }
 0x13c   : > { %v2359_v58 = vsel %vm1315_vm4, %v2354_v57, %v2358_v53  ;;  %v3241_v33 = vrot.slane %v3239_v60, 1  ;;  %972 = vst [vmem:[#allocation2 + $0xa4] sm:$0x1] %v971_v62  ;;  %v3246_v5 = vrot.slane %v3244_v61, 1  ;;  %v3580_v32 = vrot.slane %v12120_v6, 1  ;;  %v1521_v56 = vpop.permute.xlu1 %1520 }
 0x13d   : > { %2430 = vrot.lane.b32.xlu1 %v2359_v58, %s12632_s14  ;;  %v12117_v9 = vld [vmem:[#allocation2 + $0x9c] sm:$0xff]   ;;  %v12122_v45 = vld [vmem:[#allocation2 + $0x98] ss:$0 sps:$4 sm:$0x11]   ;;  %v1461_v14 = vshrl.u32 %v13414_v51, 16  ;;  %1563 = vst.msk [vmem:[#allocation3 + $0x30] sm:$0xff] %vm1556_vm12, %v1521_v56  ;;  %v787_v27 = vor.u32 %v785_v7, %v13402_v12 }
 0x13e   : > { %v3608_v4 = vpop.permute.xlu0 %3607  ;;  %v3242_v8 = vor.u32 %v3241_v33, %v3237_v59  ;;  %v12125_v2 = vld [vmem:[#allocation2 + $0x9c] sm:$0xff]   ;;  %v3251_v52 = vshll.u32 %v12117_v9, 16  ;;  %v3249_v11 = vshrl.u32 %v12117_v9, 16  ;;  %v3581_v15 = vsel %vm1749_vm6, %v3579_v13, %v3580_v32  ;;  %v12127_v20 = vld [vmem:[#allocation2 + $0x90] sm:$0xfe]  }
 0x13f   : > { %3651 = vst.msk [vmem:[#allocation3 + $0x28] sm:$0xff] %vm3645_vm2, %v3608_v4  ;;  %v12123_v42 = vld [vmem:[#allocation2 + $0x9c] sm:$0xfe]   ;;  %v1465_v18 = vrot.slane %v1463_v46, 1  ;;  %v1468_v19 = vshll.u32 %v12122_v45, 16  ;;  %v1475_v31 = vshll.u32 %v12125_v2, 16 }
 0x140   : > { %v3247_v55 = vsel %vm1315_vm4, %v3242_v8, %v3246_v5  ;;  %v12114_v21 = vld [vmem:[#allocation2 + $0x9c] sm:$0xff]   ;;  %v3253_v17 = vrot.slane %v3251_v52, 1  ;;  %v3582_v22 = vrot.slane %v12123_v42, 1  ;;  %v1523_v24 = vpop.permute.xlu1 %1522  ;;  %v1473_v34 = vshrl.u32 %v12125_v2, 16  ;;  %v549_v50 = vld [vmem:[#allocation2 + $0xb0] sm:$0x1] }
 0x141   : > { %2719 = vrot.lane.b32.xlu1 %v2684_v49, %s12630_s25  ;;  %3328 = vrot.lane.b32.xlu0 %v3247_v55, %s12633_s12  ;;  %1564 = vst.msk [vmem:[#allocation3 + $0x38] sm:$0xff] %vm1556_vm12, %v1523_v24  ;;  %v1466_v16 = vor.u32 %v1465_v18, %v1461_v14  ;;  %v1470_v39 = vrot.slane %v1468_v19, 1  ;;  %v1477_v48 = vrot.slane %v1475_v31, 1  ;;  %v12128_v44 = vld [vmem:[#allocation2 + $0x98] ss:$0 sps:$4 sm:$0x11]  }
 0x142   : > { %v1811_v41 = vpop.permute.xlu0 %1810  ;;  %v3254_v35 = vor.u32 %v3253_v17, %v3249_v11  ;;  %v1786_v26 = vrot.slane %v12127_v20, 1  ;;  %v12133_v57 = vld [vmem:[#allocation2 + $0x9c] sm:$0xff]   ;;  %v1787_v61 = vrot.slane %v12128_v44, 1  ;;  %v973_v49 = vld [vmem:[#allocation2 + $0xa8] sm:$0xf]  ;;  %v550_v32 = vsel %vm12855_vm8, 0, %v549_v50 }
 0x143   : > { %1853 = vst.msk [vmem:[#allocation3 + $0x30] sm:$0xff] %vm15631_vm15, %v1811_v41  ;;  %v12118_v23 = vld [vmem:[#allocation2 + $0xa4] ss:$0 sps:$4 sm:$0x11]   ;;  %vm15633_vm15 = vcmask 326912   ;;  %v1471_v63 = vsel %vm1315_vm4, %v1466_v16, %v1470_v39  ;;  %v2361_v4 = vshrl.u32 %v12133_v57, 16  ;;  %v1478_v58 = vor.u32 %v1477_v48, %v1473_v34 }
 0x144   : > { %v12124_v28 = vld [vmem:[#allocation2 + $0xa4] ss:$0 sps:$4 sm:$0x11]   ;;  %v3256_v36 = vshll.u32 %v12118_v23, 16  ;;  %v1813_v51 = vpop.permute.xlu1 %1812  ;;  %v12129_v62 = vld [vmem:[#allocation2 + $0x9c] sm:$0xfe]   ;;  %v1788_v12 = vsel %vm1749_vm6, %v1786_v26, %v1787_v61  ;;  %v974_v13 = vsel %vm12873_vm10, %v787_v27, %v973_v49 }
 0x145   : > { %2897 = vrot.lane.b32.xlu1 %v12114_v21, %s12629_s24  ;;  %3617 = vrot.lane.b32.xlu0 %v3581_v15, %s12631_s30  ;;  %v12126_v38 = vld [vmem:[#allocation2 + $0xa4] ss:$0 sps:$4 sm:$0x11]   ;;  %v3583_v40 = vrot.slane %v12124_v28, 1  ;;  %1854 = vst.msk [vmem:[#allocation3 + $0x38] sm:$0xff] %vm15632_vm13, %v1813_v51  ;;  %v1789_v33 = vrot.slane %v12129_v62, 1 }
 0x146   : > { %v1988_v25 = vpop.permute.xlu0 %1987  ;;  %v3258_v47 = vrot.slane %v3256_v36, 1  ;;  %v1480_v10 = vshll.u32 %v12126_v38, 16  ;;  %v12130_v3 = vld [vmem:[#allocation2 + $0xa4] ss:$0 sps:$4 sm:$0x11]   ;;  %v12131_v6 = vld [vmem:[#allocation2 + $0x9c] sm:$0xff]  }
 0x147   : > { %2030 = vst.msk [vmem:[#allocation3 + $0x30] sm:$0xff] %vm2023_vm14, %v1988_v25  ;;  %v3584_v53 = vsel %vm1749_vm6, %v3582_v22, %v3583_v40  ;;  %v2363_v5 = vshll.u32 %v12133_v57, 16  ;;  %v1790_v9 = vrot.slane %v12130_v3, 1  ;;  %vm15634_vm13 = vcmask 392512   ;;  %975 = vst [vmem:[#allocation2 + $0xa8] sm:$0xf] %v974_v13 }
 0x148   : > { %v3259_v59 = vsel %vm1315_vm4, %v3254_v35, %v3258_v47  ;;  %v1482_v60 = vrot.slane %v1480_v10, 1  ;;  %v1990_v7 = vpop.permute.xlu1 %1989  ;;  %551 = vst [vmem:[#allocation2 + $0xb0] sm:$0x1] %v550_v32  ;;  %v3666_v45 = vld [vmem:[#allocation3 + $0x20] sm:$0xff]  ;;  %v3667_v56 = vld [vmem:[#allocation3 + $0x28] sm:$0xff]  ;;  %v797_v52 = vrot.slane %v13407_v29, 4 }
 0x149   : > { %3619 = vrot.lane.b32.xlu0 %v3584_v53, %s12631_s30  ;;  %3330 = vrot.lane.b32.xlu1 %v3259_v59, %s12633_s12  ;;  %2031 = vst.msk [vmem:[#allocation3 + $0x38] sm:$0xff] %vm2023_vm14, %v1990_v7  ;;  %v2365_v46 = vrot.slane %v2363_v5, 1  ;;  %v12134_v2 = vld [vmem:[#allocation2 + $0xa4] ss:$0 sps:$4 sm:$0x11]   ;;  %v12185_v17 = vld [vmem:[#allocation2 + $0x90] sm:$0xff]   ;;  %v1791_v22 = vsel %vm1749_vm6, %v1789_v33, %v1790_v9 }
 0x14a   : > { %v2421_v54 = vpop.permute.xlu0 %2420  ;;  %11820 = vmatprep.mubr.msk.bf16.mxu0 %vm3721_vm1, %v3666_v45  ;;  %v1483_v41 = vsel %vm1315_vm4, %v1478_v58, %v1482_v60  ;;  %v2368_v42 = vshll.u32 %v12134_v2, 16  ;;  %v12138_v21 = vld [vmem:[#allocation2 + $0x9c] sm:$0xfe]   ;;  %v12139_v15 = vld [vmem:[#allocation2 + $0xa4] ss:$0 sps:$4 sm:$0x11]  }
 0x14b   : > { %2463 = vst.msk [vmem:[#allocation3 + $0x30] sm:$0xff] %vm15633_vm15, %v2421_v54  ;;  %11821 = vmatmul.mubr.msk.bf16.gmra.mrb[8].mxu0 %vm3721_vm1, %v3667_v56  ;;  %v2366_v14 = vor.u32 %v2365_v46, %v2361_v4  ;;  %v2685_v19 = vrot.slane %v12138_v21, 1  ;;  %v2686_v23 = vrot.slane %v12139_v15, 1  ;;  %v443_v29 = vld [vmem:[%s12842_s16 + $0x70] sm:$0xf] }
 0x14c   : > { %v2423_v11 = vpop.permute.xlu1 %2422  ;;  %v2370_v18 = vrot.slane %v2368_v42, 1  ;;  %1135 = vst.msk [vmem:[#allocation3 + $0x60] sm:$0xff] %vm1122_vm11, %v12185_v17  ;;  %v799_v25 = vshrl.u32 %v443_v29, 16  ;;  %v444_v47 = vld [vmem:[%s12842_s16 + $0x74] sm:$0xf]  ;;  %v802_v50 = vshll.u32 %v443_v29, 16 }
 0x14d   : > { %1822 = vrot.lane.b32.xlu0 %v1788_v12, %s12626_s22  ;;  %1532 = vrot.lane.b32.xlu1 %v1471_v63, %s12627_s19  ;;  %2464 = vst.msk [vmem:[#allocation3 + $0x38] sm:$0xff] %vm15633_vm15, %v2423_v11  ;;  %v2687_v38 = vsel %vm1749_vm6, %v2685_v19, %v2686_v23  ;;  %v502_v48 = vld [vmem:[#allocation2 + $0xb4] sm:$0x1]  ;;  %v807_v26 = vshrl.u32 %v444_v47, 16  ;;  %v810_v27 = vshll.u32 %v444_v47, 16  ;;  %v12186_v11 = vld [vmem:[#allocation2 + $0x9c] sm:$0xff]  }
 0x14e   : > { %v2710_v8 = vpop.permute.xlu0 %2709  ;;  %v2371_v31 = vsel %vm1315_vm4, %v2366_v14, %v2370_v18  ;;  %v12135_v35 = vld [vmem:[#allocation2 + $0xa8] sm:$0xff]   ;;  %v801_v39 = vrot.slane %v799_v25, 7  ;;  %v503_v44 = vsel %vm12835_vm5, 0, %v502_v48  ;;  %v552_v60 = vld [vmem:[#allocation2 + $0xbc] sm:$0x1]  ;;  %1136 = vst.msk [vmem:[#allocation3 + $0x68] sm:$0xff] %vm1122_vm11, %v12186_v11 }
 0x14f   : > { %2752 = vst.msk [vmem:[#allocation3 + $0x30] sm:$0xff] %vm15634_vm13, %v2710_v8  ;;  %v977_v24 = vld [vmem:[#allocation2 + $0xb0] sm:$0x1]  ;;  %v12132_v36 = vld [vmem:[#allocation2 + $0xa8] sm:$0xff]   ;;  %v2375_v20 = vshll.u32 %v12135_v35, 16  ;;  %v2373_v54 = vshrl.u32 %v12135_v35, 16 }
 0x150   : > { %v2712_v28 = vpop.permute.xlu1 %2711  ;;  %v978_v34 = vsel %vm12835_vm5, %v797_v52, %v977_v24  ;;  %v13476_v16 = vld [vmem:[#allocation2 + $0xa8] sm:$0xfe]   ;;  %504 = vst [vmem:[#allocation2 + $0xb4] sm:$0x1] %v503_v44  ;;  %v805_v57 = vrot.slane %v801_v39, 4  ;;  %v809_v63 = vrot.slane %v807_v26, 7 }
 0x151   : > { %1999 = vrot.lane.b32.xlu0 %v12131_v6, %s12628_s26  ;;  %1534 = vrot.lane.b32.xlu1 %v1483_v41, %s12627_s19  ;;  %2753 = vst.msk [vmem:[#allocation3 + $0x38] sm:$0xff] %vm15634_vm13, %v2712_v28  ;;  %979 = vst [vmem:[#allocation2 + $0xb0] sm:$0x1] %v978_v34  ;;  %v12143_v10 = vld [vmem:[#allocation2 + $0xa8] sm:$0xff]   ;;  %v2688_v53 = vrot.slane %v13476_v16, 1  ;;  %v2377_v62 = vrot.slane %v2375_v20, 1  ;;  %v804_v6 = vor.u32 %v802_v50, %v801_v39 }
 0x152   : > { %v2888_v55 = vpop.permute.xlu0 %2887  ;;  %v12145_v51 = vld [vmem:[#allocation2 + $0xa8] sm:$0xff]   ;;  %v553_v4 = vsel %vm12855_vm8, 0, %v552_v60  ;;  %v812_v49 = vor.u32 %v810_v27, %v809_v63  ;;  %v814_v8 = vrot.slane %v809_v63, 4  ;;  %v13509_v39 = vld [vmem:[%s12842_s16 + $0x78] sm:$0xf]  ;;  %vm15635_vm15 = vcmask 195712  }
 0x153   : > { %2930 = vst.msk [vmem:[#allocation3 + $0x30] sm:$0xff] %vm2923_vm7, %v2888_v55  ;;  %v3263_v59 = vshll.u32 %v12145_v51, 16  ;;  %v3261_v3 = vshrl.u32 %v12145_v51, 16  ;;  %554 = vst [vmem:[#allocation2 + $0xbc] sm:$0x1] %v553_v4  ;;  %v13488_v12 = vld [vmem:[#allocation2 + $0xa8] sm:$0xff]   ;;  %v2378_v13 = vor.u32 %v2377_v62, %v2373_v54 }
 0x154   : > { %v12149_v58 = vld [vmem:[#allocation2 + $0xa8] sm:$0xfe]   ;;  %v813_v46 = vsel %vm12866_vm9, %v805_v57, %v812_v49  ;;  %v1487_v17 = vshll.u32 %v13488_v12, 16  ;;  %v819_v27 = vshll.u32 %v13509_v39, 16  ;;  %vm15636_vm13 = vcmask 326912  }
 0x155   : > { %2432 = vrot.lane.b32.xlu0 %v2371_v31, %s12632_s14  ;;  %1824 = vrot.lane.b32.xlu1 %v1791_v22, %s12626_s22  ;;  %v3265_v5 = vrot.slane %v3263_v59, 1  ;;  %983 = vst.msk [vmem:[#allocation2 + $0xb8] sm:$0xf] %vm447_vm0, %v813_v46  ;;  %v3585_v41 = vrot.slane %v12149_v58, 1  ;;  %v12157_v34 = vld [vmem:[#allocation2 + $0xa8] sm:$0xfe]  }
 0x156   : > { %v3321_v40 = vpop.permute.xlu0 %3320  ;;  %v1489_v16 = vrot.slane %v1487_v17, 1  ;;  %v1792_v48 = vrot.slane %v12157_v34, 1 }
 0x157   : > { %3363 = vst.msk [vmem:[#allocation3 + $0x30] sm:$0xff] %vm3356_vm3, %v3321_v40  ;;  %v980_v56 = vld [vmem:[#allocation2 + $0xb4] sm:$0xf]  ;;  %v3266_v14 = vor.u32 %v3265_v5, %v3261_v3 }
 0x158   : > { %v12136_v33 = vld [vmem:[#allocation2 + $0xb0] ss:$0 sps:$4 sm:$0x11]   ;;  %v981_v52 = vsel %vm12873_vm10, %v804_v6, %v980_v56 }
 0x159   : > { %2721 = vrot.lane.b32.xlu0 %v2687_v38, %s12630_s25  ;;  %2001 = vrot.lane.b32.xlu1 %v12132_v36, %s12628_s26  ;;  %v12141_v7 = vld [vmem:[#allocation2 + $0xb0] ss:$0 sps:$4 sm:$0x11]   ;;  %v2380_v32 = vshll.u32 %v12136_v33, 16  ;;  %982 = vst [vmem:[#allocation2 + $0xb4] sm:$0xf] %v981_v52 }
 0x15a   : > { %v3610_v61 = vpop.permute.xlu0 %3609  ;;  %v12146_v45 = vld [vmem:[#allocation2 + $0xb0] ss:$0 sps:$4 sm:$0x11]   ;;  %v2689_v2 = vrot.slane %v12141_v7, 1  ;;  %v984_v22 = vld [vmem:[#allocation2 + $0xbc] sm:$0x1] }
 0x15b   : > { %3652 = vst.msk [vmem:[#allocation3 + $0x30] sm:$0xff] %vm3645_vm2, %v3610_v61  ;;  %v2382_v55 = vrot.slane %v2380_v32, 1  ;;  %v3268_v42 = vshll.u32 %v12146_v45, 16  ;;  %v12150_v21 = vld [vmem:[#allocation2 + $0xb0] ss:$0 sps:$4 sm:$0x11]   ;;  %v985_v29 = vsel %vm12835_vm5, %v814_v8, %v984_v22 }
 0x15c   : > { %v12152_v15 = vld [vmem:[#allocation2 + $0xb0] ss:$0 sps:$4 sm:$0x11]   ;;  %v3586_v23 = vrot.slane %v12150_v21, 1  ;;  %v2690_v25 = vsel %vm1749_vm6, %v2688_v53, %v2689_v2  ;;  %986 = vst [vmem:[#allocation2 + $0xbc] sm:$0x1] %v985_v29 }
 0x15d   : > { %2899 = vrot.lane.b32.xlu0 %v12143_v10, %s12629_s24  ;;  %v2383_v18 = vsel %vm1315_vm4, %v2378_v13, %v2382_v55  ;;  %v3270_v19 = vrot.slane %v3268_v42, 1  ;;  %v1492_v31 = vshll.u32 %v12152_v15, 16  ;;  %v12158_v35 = vld [vmem:[#allocation2 + $0xb0] ss:$0 sps:$4 sm:$0x11]   ;;  %v1485_v38 = vshrl.u32 %v13488_v12, 16 }
 0x15e   : > { %2434 = vrot.lane.b32.xlu1 %v2383_v18, %s12632_s14  ;;  %v3612_v36 = vpop.permute.xlu0 %3611  ;;  %v3587_v40 = vsel %vm1749_vm6, %v3585_v41, %v3586_v23  ;;  %v1793_v44 = vrot.slane %v12158_v35, 1  ;;  %v816_v53 = vshrl.u32 %v13509_v39, 16  ;;  %v446_v7 = vld [vmem:[%s12842_s16 + $0x7c] sm:$0xf]  ;;  %v505_v42 = vld [vmem:[#allocation2 + $0xc0] sm:$0x1] }
 0x15f   : > { %v3271_v28 = vsel %vm1315_vm4, %v3266_v14, %v3270_v19  ;;  %v1494_v47 = vrot.slane %v1492_v31, 1  ;;  %v1490_v45 = vor.u32 %v1489_v16, %v1485_v38  ;;  %v506_v18 = vsel %vm12835_vm5, 0, %v505_v42  ;;  %s407_s16 = sand.u32 1, %s12611_s18  }
 0x160   : > { %v12144_v10 = vld [vmem:[#allocation2 + $0xb4] sm:$0xff]   ;;  %v13521_v12 = vrot.slane %v816_v53, 7  ;;  %v1794_v52 = vsel %vm1749_vm6, %v1792_v48, %v1793_v44  ;;  %507 = vst [vmem:[#allocation2 + $0xc0] sm:$0x1] %v506_v18  ;;  %v824_v29 = vshrl.u32 %v446_v7, 16  ;;  %v827_v31 = vshll.u32 %v446_v7, 16 }
 0x161   : > { %3332 = vrot.lane.b32.xlu0 %v3271_v28, %s12633_s12  ;;  %v12147_v51 = vld [vmem:[#allocation2 + $0xb4] sm:$0xff]  }
 0x162   : > { %v3668_v24 = vld [vmem:[#allocation3 + $0x30] sm:$0xff]  ;;  %2723 = vrot.lane.b32.xlu1 %v2690_v25, %s12630_s25  ;;  %v12153_v54 = vld [vmem:[#allocation2 + $0xb4] sm:$0xfe]   ;;  %v3273_v60 = vshrl.u32 %v12147_v51, 16  ;;  %v3275_v61 = vshll.u32 %v12147_v51, 16  ;;  %v822_v21 = vrot.slane %v13521_v12, 4  ;;  %v821_v51 = vor.u32 %v819_v27, %v13521_v12 }
 0x163   : > { %11824 = vmatprep.mubr.msk.bf16.mxu0 %vm3721_vm1, %v3668_v24  ;;  %v12155_v26 = vld [vmem:[#allocation2 + $0xb4] sm:$0xff]   ;;  %v12148_v59 = vld [vmem:[#allocation2 + $0xbc] ss:$0 sps:$4 sm:$0x11]   ;;  %v3588_v4 = vrot.slane %v12153_v54, 1  ;;  %v1495_v24 = vsel %vm1315_vm4, %v1490_v45, %v1494_v47  ;;  %v826_v16 = vrot.slane %v824_v29, 7 }
 0x164   : > { %v12154_v62 = vld [vmem:[#allocation2 + $0xbc] ss:$0 sps:$4 sm:$0x11]   ;;  %v3280_v3 = vshll.u32 %v12148_v59, 16  ;;  %v1499_v58 = vshll.u32 %v12155_v26, 16  ;;  %v3277_v33 = vrot.slane %v3275_v61, 1 }
 0x165   : > { %3621 = vrot.lane.b32.xlu0 %v3587_v40, %s12631_s30  ;;  %v3589_v6 = vrot.slane %v12154_v62, 1  ;;  %v12156_v49 = vld [vmem:[#allocation2 + $0xbc] ss:$0 sps:$4 sm:$0x11]   ;;  %v1497_v5 = vshrl.u32 %v12155_v26, 16  ;;  %v12163_v19 = vld [vmem:[#allocation2 + $0xb4] sm:$0xff]   ;;  %v829_v54 = vor.u32 %v827_v31, %v826_v16 }
 0x166   : > { %2901 = vrot.lane.b32.xlu1 %v12144_v10, %s12629_s24  ;;  %v1501_v13 = vrot.slane %v1499_v58, 1  ;;  %v13525_v32 = vld [vmem:[#allocation2 + $0xb4] sm:$0xfe]   ;;  %v3278_v46 = vor.u32 %v3277_v33, %v3273_v60  ;;  %v1504_v56 = vshll.u32 %v12156_v49, 16  ;;  %v2385_v34 = vshrl.u32 %v12163_v19, 16  ;;  %v13559_v61 = vld [vmem:[#allocation2 + $0xcc] sm:$0xff]  }
 0x167   : > { %v3590_v2 = vsel %vm1749_vm6, %v3588_v4, %v3589_v6  ;;  %v13529_v41 = vld [vmem:[#allocation2 + $0xbc] ss:$0 sps:$4 sm:$0x11]   ;;  %v1795_v14 = vrot.slane %v13525_v32, 1  ;;  %v12161_v23 = vld [vmem:[#allocation2 + $0xb4] sm:$0xff]   ;;  %v2387_v35 = vshll.u32 %v12163_v19, 16  ;;  %v830_v39 = vsel %vm12866_vm9, %v822_v21, %v829_v54 }
 0x168   : > { %v1506_v15 = vrot.slane %v1504_v56, 1  ;;  %v1796_v17 = vrot.slane %v13529_v41, 1  ;;  %v1502_v25 = vor.u32 %v1501_v13, %v1497_v5  ;;  %v12164_v28 = vld [vmem:[#allocation2 + $0xbc] ss:$0 sps:$4 sm:$0x11]   ;;  %v831_v53 = vrot.slane %v826_v16, 4 }
 0x169   : > { %3623 = vrot.lane.b32.xlu0 %v3590_v2, %s12631_s30  ;;  %v555_v40 = vld [vmem:[#allocation2 + $0xc8] sm:$0x1]  ;;  %v2389_v48 = vrot.slane %v2387_v35, 1  ;;  %v2392_v10 = vshll.u32 %v12164_v28, 16  ;;  %v12168_v59 = vld [vmem:[#allocation2 + $0xb4] sm:$0xfe]  }
 0x16a   : > { %v556_v47 = vsel %vm12855_vm8, 0, %v555_v40  ;;  %v1507_v26 = vsel %vm1315_vm4, %v1502_v25, %v1506_v15  ;;  %v12169_v27 = vld [vmem:[#allocation2 + $0xbc] ss:$0 sps:$4 sm:$0x11]   ;;  %v987_v62 = vld [vmem:[#allocation2 + $0xc0] sm:$0xf]  ;;  %v1797_v37 = vsel %vm1749_vm6, %v1795_v14, %v1796_v17 }
 0x16b   : > { %557 = vst [vmem:[#allocation2 + $0xc8] sm:$0x1] %v556_v47  ;;  %v2394_v30 = vrot.slane %v2392_v10, 1  ;;  %990 = vst.msk [vmem:[#allocation2 + $0xc4] sm:$0xf] %vm447_vm0, %v830_v39  ;;  %v988_v4 = vsel %vm12873_vm10, %v821_v51, %v987_v62  ;;  %v2692_v58 = vrot.slane %v12169_v27, 1 }
 0x16c   : > { %v2890_v9 = vpop.permute.xlu1 %2889  ;;  %989 = vst [vmem:[#allocation2 + $0xc0] sm:$0xf] %v988_v4  ;;  %v13573_v49 = vld [vmem:[#allocation2 + $0xd4] ss:$0 sps:$4 sm:$0x11]   ;;  %v3299_v5 = vshll.u32 %v13559_v61, 16 }
 0x16d   : > { %2931 = vst.msk [vmem:[#allocation3 + $0x38] sm:$0xff] %vm2923_vm7, %v2890_v9  ;;  %v3282_v9 = vrot.slane %v3280_v3, 1  ;;  %1826 = vrot.lane.b32.xlu0 %v1794_v52, %s12626_s22  ;;  %v2691_v3 = vrot.slane %v12168_v59, 1  ;;  %vm15638_vm0 = vcmask 326912   ;;  %v3304_v45 = vshll.u32 %v13573_v49, 16  ;;  %v12174_v47 = vld [vmem:[#allocation2 + $0xcc] sm:$0xff]  }
 0x16e   : > { %v3301_v32 = vrot.slane %v3299_v5, 1  ;;  %v12181_v54 = vld [vmem:[#allocation2 + $0xcc] sm:$0xfe]   ;;  %vm5825_vm8 = vcmask 257024   ;;  %vm5827_vm9 = vcmask 253952  }
 0x16f   : > { %v3283_v11 = vsel %vm1315_vm4, %v3278_v46, %v3282_v9  ;;  %v2693_v33 = vsel %vm1749_vm6, %v2691_v3, %v2692_v58  ;;  %vm15640_vm10 = vsmask.f32 256  ;;  %5826 = vst.msk [vmem:[#allocation4] sm:$0xf] %vm5825_vm8, %v12625_v0  ;;  %5830 = vst.msk [vmem:[#allocation4 + $0x48] sm:$0xf] %vm5825_vm8, %v12625_v0 }
 0x170   : > { %3334 = vrot.lane.b32.xlu1 %v3283_v11, %s12633_s12  ;;  %5828 = vst.msk [vmem:[#allocation4 + $0x4] sm:$0x1] %vm5827_vm9, %v12625_v0  ;;  %5831 = vst.msk [vmem:[#allocation4 + $0x4c] sm:$0x1] %vm5827_vm9, %v12625_v0 }
 0x171   : > { %2003 = vrot.lane.b32.xlu0 %v12161_v23, %s12628_s26 }
 0x172   : > { %v991_v12 = vld [vmem:[#allocation2 + $0xc8] sm:$0x1] }
 0x173   : > { %v992_v6 = vsel %vm12835_vm5, %v831_v53, %v991_v12  ;;  %v12162_v7 = vld [vmem:[#allocation2 + $0xc0] sm:$0xff]  }
 0x174   : > { %1536 = vrot.lane.b32.xlu1 %v1495_v24, %s12627_s19  ;;  %993 = vst [vmem:[#allocation2 + $0xc8] sm:$0x1] %v992_v6  ;;  %v12165_v9 = vld [vmem:[#allocation2 + $0xc0] sm:$0xff]  }
 0x175   : > { %v12170_v13 = vld [vmem:[#allocation2 + $0xc0] sm:$0xfe]   ;;  %v2397_v2 = vshrl.u32 %v12165_v9, 16  ;;  %v2399_v56 = vshll.u32 %v12165_v9, 16 }
 0x176   : > { %v12173_v1 = vld [vmem:[#allocation2 + $0xc0] sm:$0xff]   ;;  %v2694_v41 = vrot.slane %v12170_v13, 1  ;;  %v6292_v13 = vld [vmem:[#allocation4] sm:$0xf] }
 0x177   : > { %v3323_v20 = vpop.permute.xlu1 %3322  ;;  %v2401_v42 = vrot.slane %v2399_v56, 1  ;;  %v12179_v25 = vld [vmem:[#allocation2 + $0xc0] sm:$0xfe]  }
 0x178   : > { %3364 = vst.msk [vmem:[#allocation3 + $0x38] sm:$0xff] %vm3356_vm3, %v3323_v20  ;;  %v1815_v50 = vpop.permute.xlu0 %1814  ;;  %v12187_v20 = vld [vmem:[#allocation2 + $0xa8] sm:$0xff]   ;;  %1538 = vrot.lane.b32.xlu1 %v1507_v26, %s12627_s19  ;;  %v5835_v26 = vld [vmem:[#allocation4 + $0x8] sm:$0x1]  ;;  %s12635_s19 = smov 96  }
 0x179   : > { %3653 = vst.msk [vmem:[#allocation3 + $0x38] sm:$0xff] %vm3645_vm2, %v3612_v36  ;;  %v2402_v18 = vor.u32 %v2401_v42, %v2397_v2  ;;  %v6908_v59 = vld [vmem:[#allocation4 + $0x48] sm:$0xf] }
 0x17a   : > { %1137 = vst.msk [vmem:[#allocation3 + $0x70] sm:$0xff] %vm1122_vm11, %v12187_v20 }
 0x17b   : > { %v1525_v57 = vpop.permute.xlu1 %1524  ;;  %v12166_v14 = vld [vmem:[#allocation2 + $0xc8] ss:$0 sps:$4 sm:$0x11]  }
 0x17c   : > { %1565 = vst.msk [vmem:[#allocation3 + $0x40] sm:$0xff] %vm1556_vm12, %v1525_v57  ;;  %v1992_v63 = vpop.permute.xlu0 %1991  ;;  %v2390_v57 = vor.u32 %v2389_v48, %v2385_v34  ;;  %1828 = vrot.lane.b32.xlu1 %v1797_v37, %s12626_s22  ;;  %v12171_v21 = vld [vmem:[#allocation2 + $0xc8] ss:$0 sps:$4 sm:$0x11]   ;;  %v2404_v15 = vshll.u32 %v12166_v14, 16 }
 0x17d   : > { %1855 = vst.msk [vmem:[#allocation3 + $0x40] sm:$0xff] %vm15635_vm15, %v1815_v50  ;;  %v12188_v50 = vld [vmem:[#allocation2 + $0xb4] sm:$0xff]   ;;  %v12176_v17 = vld [vmem:[#allocation2 + $0xc8] ss:$0 sps:$4 sm:$0x11]   ;;  %v2695_v19 = vrot.slane %v12171_v21, 1 }
 0x17e   : > { %2032 = vst.msk [vmem:[#allocation3 + $0x40] sm:$0xff] %vm2023_vm14, %v1992_v63  ;;  %v2395_v63 = vsel %vm1315_vm4, %v2390_v57, %v2394_v30  ;;  %v2406_v31 = vrot.slane %v2404_v15, 1  ;;  %v3292_v24 = vshll.u32 %v12176_v17, 16  ;;  %v12180_v34 = vld [vmem:[#allocation2 + $0xc8] ss:$0 sps:$4 sm:$0x11]  }
 0x17f   : > { %v1527_v8 = vpop.permute.xlu1 %1526  ;;  %1138 = vst.msk [vmem:[#allocation3 + $0x78] sm:$0xff] %vm1122_vm11, %v12188_v50  ;;  %2436 = vrot.lane.b32.xlu0 %v2395_v63, %s12632_s14  ;;  %v3592_v40 = vrot.slane %v12180_v34, 1  ;;  %v2696_v20 = vsel %vm1749_vm6, %v2694_v41, %v2695_v19  ;;  %v3306_v30 = vrot.slane %v3304_v45, 1  ;;  %vm13596_vm11 = vmand %vm5827_vm9, %vm15640_vm10  ;;  %v3594_v63 = vrot.slane %v12181_v54, 1  ;;  %v6293_v41 = vld [vmem:[#allocation4 + $0x4] sm:$0x1] }
 0x180   : > { %1566 = vst.msk [vmem:[#allocation3 + $0x48] sm:$0xff] %vm1556_vm12, %v1527_v8  ;;  %v2425_v55 = vpop.permute.xlu0 %2424  ;;  %v3669_v36 = vld [vmem:[#allocation3 + $0x38] sm:$0xff]  ;;  %v3297_v8 = vshrl.u32 %v13559_v61, 16  ;;  %2005 = vrot.lane.b32.xlu1 %v12162_v7, %s12628_s26  ;;  %v2407_v35 = vsel %vm1315_vm4, %v2402_v18, %v2406_v31  ;;  %v5836_v39 = vsel %vm13596_vm11, 0, %v5835_v26  ;;  %v6456_v18 = vld [vmem:[#allocation4] sm:$0xe] }
 0x181   : > { %2465 = vst.msk [vmem:[#allocation3 + $0x40] sm:$0xff] %vm15636_vm13, %v2425_v55  ;;  %11825 = vmatmul.mubr.msk.bf16.gmra.mrb[12].mxu0 %vm3721_vm1, %v3669_v36  ;;  %vm15637_vm13 = vcmask 392512   ;;  %v12175_v55 = vld [vmem:[#allocation2 + $0xc0] sm:$0xff]   ;;  %v3294_v36 = vrot.slane %v3292_v24, 1  ;;  %5837 = vst [vmem:[#allocation4 + $0x8] sm:$0x1] %v5836_v39  ;;  %v4003_v39 = vlaneseq }
 0x182   : > { %vm15639_vm5 = vmmov %vm15637_vm13  ;;  %v3287_v23 = vshll.u32 %v12175_v55, 16  ;;  %v3302_v57 = vor.u32 %v3301_v32, %v3297_v8  ;;  %v6312_v32 = vshrl.u32 %v6292_v13, 16  ;;  %v6457_v19 = vld [vmem:[#allocation4 + $0x4] sm:$0x1] }
 0x183   : > { %v1817_v22 = vpop.permute.xlu1 %1816  ;;  %2725 = vrot.lane.b32.xlu0 %v2693_v33, %s12630_s25 }
 0x184   : > { %1856 = vst.msk [vmem:[#allocation3 + $0x48] sm:$0xff] %vm15635_vm15, %v1817_v22  ;;  %v2714_v38 = vpop.permute.xlu0 %2713  ;;  %v3285_v22 = vshrl.u32 %v12175_v55, 16  ;;  %v3289_v28 = vrot.slane %v3287_v23, 1  ;;  %2438 = vrot.lane.b32.xlu1 %v2407_v35, %s12632_s14  ;;  %vm15643_vm15 = vsmask.f32 7938  ;;  %v3307_v58 = vsel %vm1315_vm4, %v3302_v57, %v3306_v30 }
 0x185   : > { %2754 = vst.msk [vmem:[#allocation3 + $0x40] sm:$0xff] %vm15637_vm13, %v2714_v38  ;;  %v3591_v38 = vrot.slane %v12179_v25, 1  ;;  %vm13610_vm13 = vmand %vm5827_vm9, %vm15643_vm15  ;;  %vm15649_vm9 = vcmask 392512   ;;  %vm6308_vm15 = vsmask.f32 3328  ;;  %v6493_v23 = vrot.slane %v6457_v19, 5 }
 0x186   : > { %v3290_v16 = vor.u32 %v3289_v28, %v3285_v22  ;;  %vm15651_vm10 = vmmov %vm15649_vm9  ;;  %v11237_v22 = vrot.slane %v6456_v18, 9  ;;  %v6853_v35 = vld [vmem:[#allocation4 + $0x48] sm:$0xf]  ;;  %v12634_v30 = vmov 1983009808  }
 0x187   : > { %v1994_v44 = vpop.permute.xlu1 %1993  ;;  %2903 = vrot.lane.b32.xlu0 %v12173_v1, %s12629_s24  ;;  %v3593_v51 = vsel %vm1749_vm6, %v3591_v38, %v3592_v40  ;;  %v6314_v1 = vrot.slane %v6312_v32, 4 }
 0x188   : > { %2033 = vst.msk [vmem:[#allocation3 + $0x48] sm:$0xff] %vm2023_vm14, %v1994_v44  ;;  %v2892_v60 = vpop.permute.xlu0 %2891  ;;  %v3295_v48 = vsel %vm1315_vm4, %v3290_v16, %v3294_v36  ;;  %v12182_v44 = vld [vmem:[#allocation2 + $0xd4] ss:$0 sps:$4 sm:$0x11]   ;;  %2727 = vrot.lane.b32.xlu1 %v2696_v20, %s12630_s25  ;;  %vm15647_vm4 = vcmask 326912   ;;  %s408_s25 = scalar_lea.vmem [#allocation13], %s407_s16 }
 0x189   : > { %2932 = vst.msk [vmem:[#allocation3 + $0x40] sm:$0xff] %vm2923_vm7, %v2892_v60  ;;  %v5860_v60 = vld [vmem:[#allocation4 + $0xc] sm:$0x1]  ;;  %v3595_v3 = vrot.slane %v12182_v44, 1  ;;  %v5838_v20 = vld [vmem:[#allocation4 + $0x10] sm:$0x1] }
 0x18a   : > { %v5861_v62 = vsel %vm13610_vm13, 0, %v5860_v60  ;;  %v4001_v60 = vunpack.c.l.s4 %v12634_v30 }
 0x18b   : > { %v2427_v43 = vpop.permute.xlu1 %2426  ;;  %3336 = vrot.lane.b32.xlu0 %v3295_v48, %s12633_s12  ;;  %5862 = vst [vmem:[#allocation4 + $0xc] sm:$0x1] %v5861_v62  ;;  %v3596_v33 = vsel %vm1749_vm6, %v3594_v63, %v3595_v3  ;;  %vm15650_vm6 = vmmov %vm15647_vm4  ;;  %v5863_v48 = vld [vmem:[#allocation4 + $0x14] sm:$0x1]  ;;  %v13675_v63 = vld [vmem:[%s15578_s2] ss:$0 sm:$0xff] }
 0x18c   : > { %2466 = vst.msk [vmem:[#allocation3 + $0x48] sm:$0xff] %vm15638_vm0, %v2427_v43  ;;  %2905 = vrot.lane.b32.xlu1 %v12174_v47, %s12629_s24  ;;  %vm15646_vm0 = vcmask 195712   ;;  %v5839_v47 = vsel %vm13596_vm11, 0, %v5838_v20  ;;  %v5864_v44 = vsel %vm13610_vm13, 0, %v5863_v48  ;;  %v4002_v3 = vunpack.c.0.s8 %v4001_v60  ;;  %s11550_s24 = sshll.u32 %s12720_s21, 4  ;;  %s12638_s21 = smov [#allocation13]  }
 0x18d   : > { %v3325_v46 = vpop.permute.xlu0 %3324  ;;  %5840 = vst [vmem:[#allocation4 + $0x10] sm:$0x1] %v5839_v47  ;;  %5865 = vst [vmem:[#allocation4 + $0x14] sm:$0x1] %v5864_v44  ;;  %s12553_s17 = sshll.u32 %s12638_s21, 4  ;;  %s12554_s17 = int_to_ptr.vmem [resolvable:$false] %s12553_s17 }
 0x18e   : > { %3365 = vst.msk [vmem:[#allocation3 + $0x40] sm:$0xff] %vm3356_vm3, %v3325_v46  ;;  %v6315_v46 = vshll.u32 %v6292_v13, 16  ;;  %s12555_s23 = scalar_lea.vmem %s12554_s17, 32 }
 0x18f   : > { %v2716_v52 = vpop.permute.xlu1 %2715  ;;  %3625 = vrot.lane.b32.xlu0 %v3593_v51, %s12631_s30 }
 0x190   : > { %2755 = vst.msk [vmem:[#allocation3 + $0x48] sm:$0xff] %vm15639_vm5, %v2716_v52  ;;  %3338 = vrot.lane.b32.xlu1 %v3307_v58, %s12633_s12  ;;  %vm15648_vm5 = vmmov %vm15646_vm0  ;;  %v6317_v45 = vrot.slane %v6315_v46, 5  ;;  %v6321_v52 = vshll.u32 %v6293_v41, 16  ;;  %s10816_s12 = sshll.u32 %s408_s25, 4  ;;  %s15536_s12 = int_to_ptr.vmem [resolvable:$true] %s10816_s12 }
 0x191   : > { %v3614_v11 = vpop.permute.xlu0 %3613  ;;  %p12556_p4 = scmp.lt.s32.totalorder %s15536_s12, %s12554_s17 }
 0x192   : > { %3654 = vst.msk [vmem:[#allocation3 + $0x40] sm:$0xff] %vm3645_vm2, %v3614_v11  ;;  %v6318_v55 = vor.u32 %v6317_v45, %v6314_v1  ;;  %v6323_v42 = vrot.slane %v6321_v52, 5 }
 0x193   : > { %v2894_v29 = vpop.permute.xlu1 %2893 }
 0x194   : > { %2933 = vst.msk [vmem:[#allocation3 + $0x48] sm:$0xff] %vm2923_vm7, %v2894_v29  ;;  %3627 = vrot.lane.b32.xlu1 %v3596_v33, %s12631_s30  ;;  %v6319_v14 = vrot.slane %v6318_v55, 4 }
 0x198   : > { %v3616_v50 = vpop.permute.xlu0 %3615  ;;  %6876 = vrot.lane.b32.xlu1 %v6853_v35, %s12631_s30 }
 0x199   : > { %v3670_v10 = vld [vmem:[#allocation3 + $0x40] sm:$0xff]  ;;  %v3327_v53 = vpop.permute.xlu1 %3326 }
 0x19a   : > { %11828 = vmatprep.mubr.msk.bf16.mxu0 %vm3721_vm1, %v3670_v10  ;;  %3366 = vst.msk [vmem:[#allocation3 + $0x48] sm:$0xff] %vm3356_vm3, %v3327_v53 }
 0x19b   : > { %3655 = vst.msk [vmem:[#allocation3 + $0x48] sm:$0xff] %vm3645_vm2, %v3616_v50 }
 0x19c   : > { %v1819_v61 = vpop.permute.xlu0 %1818 }
 0x19d   : > { %v1529_v4 = vpop.permute.xlu1 %1528 }
 0x19e   : > { %1567 = vst.msk [vmem:[#allocation3 + $0x50] sm:$0xff] %vm1556_vm12, %v1529_v4  ;;  %v13678_v4 = vshrl.u32 %v4003_v39, 7 }
 0x19f   : > { %1857 = vst.msk [vmem:[#allocation3 + $0x50] sm:$0xff] %vm15646_vm0, %v1819_v61  ;;  %vm6309_vm0 = vsmask.f32 7440 }
 0x1a0   : > { %v1996_v37 = vpop.permute.xlu0 %1995  ;;  %v13683_v33 = vsub.s32 %v4002_v3, %v13678_v4 }
 0x1a1   : > { %v1531_v12 = vpop.permute.xlu1 %1530  ;;  %2034 = vst.msk [vmem:[#allocation3 + $0x50] sm:$0xff] %vm2023_vm14, %v1996_v37 }
 0x1a2   : > { %1568 = vst.msk [vmem:[#allocation3 + $0x58] sm:$0xff] %vm1556_vm12, %v1531_v12  ;;  %v3671_v6 = vld [vmem:[#allocation3 + $0x48] sm:$0xff] }
 0x1a3   : > { %11829 = vmatmul.mubr.msk.bf16.gmra.mrb[16].mxu0 %vm3721_vm1, %v3671_v6 }
 0x1a4   : > { %v2429_v49 = vpop.permute.xlu0 %2428 }
 0x1a5   : > { %v1821_v5 = vpop.permute.xlu1 %1820  ;;  %2467 = vst.msk [vmem:[#allocation3 + $0x50] sm:$0xff] %vm15647_vm4, %v2429_v49  ;;  %vm13635_vm4 = vmor %vm6308_vm15, %vm6309_vm0  ;;  %vm15657_vm15 = vcmask 326912  }
 0x1a6   : > { %1858 = vst.msk [vmem:[#allocation3 + $0x58] sm:$0xff] %vm15648_vm5, %v1821_v5  ;;  %v6324_v17 = vsel %vm13635_vm4, %v6319_v14, %v6323_v42  ;;  %vm6488_vm5 = vcmask 1042432  }
 0x1a7   : > { %6423 = vrot.lane.b32.xlu0 %v6324_v17, %s12632_s14 }
 0x1a8   : > { %v2718_v43 = vpop.permute.xlu0 %2717 }
 0x1a9   : > { %2756 = vst.msk [vmem:[#allocation3 + $0x50] sm:$0xff] %vm15649_vm9, %v2718_v43  ;;  %v1998_v7 = vpop.permute.xlu1 %1997  ;;  %vm6489_vm9 = vcmask 1046532  }
 0x1aa   : > { %2035 = vst.msk [vmem:[#allocation3 + $0x58] sm:$0xff] %vm2023_vm14, %v1998_v7 }
 0x1ac   : > { %v2896_v8 = vpop.permute.xlu0 %2895 }
 0x1ad   : > { %2934 = vst.msk [vmem:[#allocation3 + $0x50] sm:$0xff] %vm2923_vm7, %v2896_v8 }
 0x1af   : > { %v2431_v9 = vpop.permute.xlu1 %2430 }
 0x1b0   : > { %2468 = vst.msk [vmem:[#allocation3 + $0x58] sm:$0xff] %vm15650_vm6, %v2431_v9  ;;  %vm13644_vm6 = vmor %vm6488_vm5, %vm6489_vm9  ;;  %vm15659_vm5 = vcmask 392512  }
 0x1b1   : > { %v6494_v25 = vsel %vm13644_vm6, %v11237_v22, %v6493_v23  ;;  %vm15660_vm9 = vmmov %vm15657_vm15 }
 0x1b2   : > { %6523 = vrot.lane.b32.xlu0 %v6494_v25, %s12631_s30 }
 0x1b3   : > { %v2720_v2 = vpop.permute.xlu1 %2719  ;;  %v3329_v56 = vpop.permute.xlu0 %3328 }
 0x1b4   : > { %2757 = vst.msk [vmem:[#allocation3 + $0x58] sm:$0xff] %vm15651_vm10, %v2720_v2  ;;  %vm15656_vm10 = vcmask 195712  }
 0x1b5   : > { %3367 = vst.msk [vmem:[#allocation3 + $0x50] sm:$0xff] %vm3356_vm3, %v3329_v56  ;;  %vm15658_vm0 = vmmov %vm15656_vm10 }
 0x1b7   : > { %v2898_v21 = vpop.permute.xlu1 %2897  ;;  %v3618_v11 = vpop.permute.xlu0 %3617 }
 0x1b8   : > { %2935 = vst.msk [vmem:[#allocation3 + $0x58] sm:$0xff] %vm2923_vm7, %v2898_v21 }
 0x1b9   : > { %3656 = vst.msk [vmem:[#allocation3 + $0x50] sm:$0xff] %vm3645_vm2, %v3618_v11 }
 0x1bb   : > { %v3620_v29 = vpop.permute.xlu0 %3619  ;;  %v3331_v24 = vpop.permute.xlu1 %3330 }
 0x1bc   : > { %3368 = vst.msk [vmem:[#allocation3 + $0x58] sm:$0xff] %vm3356_vm3, %v3331_v24 }
 0x1bd   : > { %3657 = vst.msk [vmem:[#allocation3 + $0x58] sm:$0xff] %vm3645_vm2, %v3620_v29 }
 0x1bf   : > { %v1823_v28 = vpop.permute.xlu0 %1822  ;;  %v1533_v36 = vpop.permute.xlu1 %1532 }
 0x1c0   : > { %v3672_v34 = vld [vmem:[#allocation3 + $0x50] sm:$0xff]  ;;  %1569 = vst.msk [vmem:[#allocation3 + $0x60] sm:$0xff] %vm1556_vm12, %v1533_v36 }
 0x1c1   : > { %11832 = vmatprep.mubr.msk.bf16.mxu0 %vm3721_vm1, %v3672_v34  ;;  %1859 = vst.msk [vmem:[#allocation3 + $0x60] sm:$0xff] %vm15656_vm10, %v1823_v28  ;;  %vm15661_vm10 = vmmov %vm15659_vm5 }
 0x1c3   : > { %v2000_v38 = vpop.permute.xlu0 %1999  ;;  %v1535_v16 = vpop.permute.xlu1 %1534 }
 0x1c4   : > { %2036 = vst.msk [vmem:[#allocation3 + $0x60] sm:$0xff] %vm2023_vm14, %v2000_v38  ;;  %v3673_v40 = vld [vmem:[#allocation3 + $0x58] sm:$0xff] }
 0x1c5   : > { %1570 = vst.msk [vmem:[#allocation3 + $0x68] sm:$0xff] %vm1556_vm12, %v1535_v16  ;;  %11833 = vmatmul.mubr.msk.bf16.gmra.mrb[20].mxu0 %vm3721_vm1, %v3673_v40 }
 0x1c7   : > { %v2433_v10 = vpop.permute.xlu0 %2432  ;;  %v1825_v50 = vpop.permute.xlu1 %1824 }
 0x1c8   : > { %2469 = vst.msk [vmem:[#allocation3 + $0x60] sm:$0xff] %vm15657_vm15, %v2433_v10  ;;  %vm4671_vm15 = vcmask 254976  }
 0x1c9   : > { %1860 = vst.msk [vmem:[#allocation3 + $0x68] sm:$0xff] %vm15658_vm0, %v1825_v50  ;;  %vm5568_vm0 = vcmask 261120  }
 0x1cb   : > { %v2722_v51 = vpop.permute.xlu0 %2721  ;;  %v2002_v54 = vpop.permute.xlu1 %2001 }
 0x1cc   : > { %2758 = vst.msk [vmem:[#allocation3 + $0x60] sm:$0xff] %vm15659_vm5, %v2722_v51  ;;  %vm15662_vm5 = vcmask 195712  }
 0x1cd   : > { %2037 = vst.msk [vmem:[#allocation3 + $0x68] sm:$0xff] %vm2023_vm14, %v2002_v54 }
 0x1cf   : > { %v2900_v53 = vpop.permute.xlu0 %2899 }
 0x1d0   : > { %2936 = vst.msk [vmem:[#allocation3 + $0x60] sm:$0xff] %vm2923_vm7, %v2900_v53  ;;  %v2435_v26 = vpop.permute.xlu1 %2434 }
 0x1d1   : > { %2470 = vst.msk [vmem:[#allocation3 + $0x68] sm:$0xff] %vm15660_vm9, %v2435_v26 }
 0x1d3   : > { %v3333_v57 = vpop.permute.xlu0 %3332 }
 0x1d4   : > { %3369 = vst.msk [vmem:[#allocation3 + $0x60] sm:$0xff] %vm3356_vm3, %v3333_v57  ;;  %v2724_v61 = vpop.permute.xlu1 %2723 }
 0x1d5   : > { %2759 = vst.msk [vmem:[#allocation3 + $0x68] sm:$0xff] %vm15661_vm10, %v2724_v61 }
 0x1d7   : > { %v3622_v62 = vpop.permute.xlu0 %3621 }
 0x1d8   : > { %3658 = vst.msk [vmem:[#allocation3 + $0x60] sm:$0xff] %vm3645_vm2, %v3622_v62  ;;  %v2902_v58 = vpop.permute.xlu1 %2901 }
 0x1d9   : > { %2937 = vst.msk [vmem:[#allocation3 + $0x68] sm:$0xff] %vm2923_vm7, %v2902_v58 }
 0x1db   : > { %v3624_v9 = vpop.permute.xlu0 %3623 }
 0x1df   : > { %v3674_v13 = vld [vmem:[#allocation3 + $0x60] sm:$0xff]  ;;  %v1827_v17 = vpop.permute.xlu0 %1826 }
 0x1e0   : > { %11836 = vmatprep.mubr.msk.bf16.mxu0 %vm3721_vm1, %v3674_v13 }
 0x1e2   : > { %v3335_v56 = vpop.permute.xlu1 %3334 }
 0x1e3   : > { %3370 = vst.msk [vmem:[#allocation3 + $0x68] sm:$0xff] %vm3356_vm3, %v3335_v56  ;;  %v2004_v47 = vpop.permute.xlu0 %2003 }
 0x1e4   : > { %3659 = vst.msk [vmem:[#allocation3 + $0x68] sm:$0xff] %vm3645_vm2, %v3624_v9 }
 0x1e6   : > { %v1537_v34 = vpop.permute.xlu1 %1536 }
 0x1e7   : > { %v11814_v37 = vpop.f32.mrb[0].mxu0  ;;  %1571 = vst.msk [vmem:[#allocation3 + $0x70] sm:$0xff] %vm1556_vm12, %v1537_v34 }
 0x1e8   : > { %v3817_v12 = vadd.f32 %v11814_v37, %v13675_v63  ;;  %v3808_v6 = vpop.f32.mrb[1].mxu0  ;;  %1861 = vst.msk [vmem:[#allocation3 + $0x70] sm:$0xff] %vm15662_vm5, %v1827_v17 }
 0x1e9   : > { %v3809_v49 = vadd.f32 %v13675_v63, %v3808_v6  ;;  %v11815_v5 = vpop.f32.mrb[2].mxu0  ;;  %2038 = vst.msk [vmem:[#allocation3 + $0x70] sm:$0xff] %vm2023_vm14, %v2004_v47 }
 0x1ea   : > { %v3937_v43 = vmax.f32 %v3817_v12, 0.0  ;;  %v3820_v7 = vadd.f32 %v11815_v5, %v13675_v63  ;;  %v3811_v8 = vpop.f32.mrb[3].mxu0  ;;  %v1539_v60 = vpop.permute.xlu1 %1538 }
 0x1eb   : > { %v3935_v32 = vmax.f32 %v3809_v49, 0.0  ;;  %v3812_v46 = vadd.f32 %v13675_v63, %v3811_v8  ;;  %1572 = vst.msk [vmem:[#allocation3 + $0x78] sm:$0xff] %vm1556_vm12, %v1539_v60  ;;  %v3675_v58 = vld [vmem:[#allocation3 + $0x68] sm:$0xff]  ;;  %vm15663_vm12 = vmmov %vm15662_vm5  ;;  %vm6140_vm5 = vcmask 1042434  }
 0x1ec   : > { %v4033_v1 = vcombine.high %v3937_v43, %v3937_v43  ;;  %v4040_v45 = vrot.slane %v3937_v43, %v13683_v33  ;;  %v13690_v2 = vmax.f32 %v3820_v7, 0.0  ;;  %11837 = vmatmul.mubr.msk.bf16.gmra.mrb[24].mxu0 %vm3721_vm1, %v3675_v58 }
 0x1ed   : > { %v3999_v41 = vcombine.high %v3935_v32, %v3935_v32  ;;  %v4006_v55 = vrot.slane %v3935_v32, %v13683_v33  ;;  %v13693_v52 = vmax.f32 %v3812_v46, 0.0 }
 0x1ee   : > { %v4047_v14 = vrot.slane %v4033_v1, %v13683_v33  ;;  %v4048_v42 = vcombine.high %v4040_v45, %v4040_v45  ;;  %v4728_v21 = vsel %vm4671_vm15, %v4040_v45, -inf  ;;  %v4050_v11 = vcombine.high %v13690_v2, %v13690_v2  ;;  %v1829_v45 = vpop.permute.xlu1 %1828 }
 0x1ef   : > { %v4729_v18 = vrot.slane %v4728_v21, 4  ;;  %v4013_v19 = vrot.slane %v3999_v41, %v13683_v33  ;;  %v4014_v22 = vcombine.high %v4006_v55, %v4006_v55  ;;  %v4672_v23 = vsel %vm4671_vm15, %v4006_v55, -inf  ;;  %1862 = vst.msk [vmem:[#allocation3 + $0x78] sm:$0xff] %vm15663_vm12, %v1829_v45 }
 0x1f0   : > { %v4049_v29 = vcombine.high %v4047_v14, %v4047_v14  ;;  %v4735_v24 = vsel %vm4671_vm15, %v4048_v42, -inf  ;;  %v4742_v25 = vsel %vm4671_vm15, %v4047_v14, -inf  ;;  %v4673_v28 = vrot.slane %v4672_v23, 4 }
 0x1f1   : > { %v4730_v35 = vmax.f32 %v4728_v21, %v4729_v18  ;;  %v4736_v36 = vrot.slane %v4735_v24, 4  ;;  %v4743_v38 = vrot.slane %v4742_v25, 4  ;;  %v4015_v16 = vcombine.high %v4013_v19, %v4013_v19  ;;  %v2437_v5 = vpop.permute.xlu0 %2436 }
 0x1f2   : > { %v4749_v40 = vsel %vm4671_vm15, %v4049_v29, -inf  ;;  %v4674_v20 = vmax.f32 %v4672_v23, %v4673_v28  ;;  %v4679_v48 = vsel %vm4671_vm15, %v4014_v22, -inf  ;;  %v4686_v10 = vsel %vm4671_vm15, %v4013_v19, -inf  ;;  %2471 = vst.msk [vmem:[#allocation3 + $0x70] sm:$0xff] %vm15660_vm9, %v2437_v5 }
 0x1f3   : > { %v4731_v44 = vrot.slane %v4730_v35, 2  ;;  %v4737_v50 = vmax.f32 %v4735_v24, %v4736_v36  ;;  %v4744_v51 = vmax.f32 %v4742_v25, %v4743_v38  ;;  %v4750_v54 = vrot.slane %v4749_v40, 4 }
 0x1f4   : > { %v4675_v53 = vrot.slane %v4674_v20, 2  ;;  %v4680_v26 = vrot.slane %v4679_v48, 4  ;;  %v4687_v57 = vrot.slane %v4686_v10, 4  ;;  %v4693_v30 = vsel %vm4671_vm15, %v4015_v16, -inf }
 0x1f5   : > { %v4732_v39 = vmax.f32 %v4730_v35, %v4731_v44  ;;  %v4738_v61 = vrot.slane %v4737_v50, 2  ;;  %v4745_v62 = vrot.slane %v4744_v51, 2  ;;  %v4751_v3 = vmax.f32 %v4749_v40, %v4750_v54  ;;  %v2726_v19 = vpop.permute.xlu0 %2725 }
 0x1f6   : > { %v4676_v37 = vmax.f32 %v4674_v20, %v4675_v53  ;;  %v4681_v12 = vmax.f32 %v4679_v48, %v4680_v26  ;;  %v4688_v6 = vmax.f32 %v4686_v10, %v4687_v57  ;;  %v4694_v49 = vrot.slane %v4693_v30, 4  ;;  %2760 = vst.msk [vmem:[#allocation3 + $0x70] sm:$0xff] %vm15661_vm10, %v2726_v19 }
 0x1f7   : > { %v4733_v43 = vrot.slane %v4732_v39, 1  ;;  %v4739_v7 = vmax.f32 %v4737_v50, %v4738_v61  ;;  %v4746_v8 = vmax.f32 %v4744_v51, %v4745_v62  ;;  %v4752_v9 = vrot.slane %v4751_v3, 2  ;;  %v2006_v50 = vpop.permute.xlu1 %2005 }
 0x1f8   : > { %v4677_v13 = vrot.slane %v4676_v37, 1  ;;  %v4682_v32 = vrot.slane %v4681_v12, 2  ;;  %v4689_v46 = vrot.slane %v4688_v6, 2  ;;  %v4695_v1 = vmax.f32 %v4693_v30, %v4694_v49  ;;  %2039 = vst.msk [vmem:[#allocation3 + $0x78] sm:$0xff] %vm2023_vm14, %v2006_v50 }
 0x1f9   : > { %v4734_v56 = vmax.f32 %v4732_v39, %v4733_v43  ;;  %v4740_v41 = vrot.slane %v4739_v7, 1  ;;  %v4747_v55 = vrot.slane %v4746_v8, 1  ;;  %v4753_v14 = vmax.f32 %v4751_v3, %v4752_v9  ;;  %v2904_v3 = vpop.permute.xlu0 %2903 }
 0x1fa   : > { %v4678_v42 = vmax.f32 %v4676_v37, %v4677_v13  ;;  %v4683_v21 = vmax.f32 %v4681_v12, %v4682_v32  ;;  %v4690_v17 = vmax.f32 %v4688_v6, %v4689_v46  ;;  %v4696_v18 = vrot.slane %v4695_v1, 2  ;;  %v13723_v44 = vpop.f32.mrb[4].mxu0  ;;  %2938 = vst.msk [vmem:[#allocation3 + $0x70] sm:$0xff] %vm2923_vm7, %v2904_v3 }
 0x1fb   : > { %v4741_v22 = vmax.f32 %v4739_v7, %v4740_v41  ;;  %v4748_v23 = vmax.f32 %v4746_v8, %v4747_v55  ;;  %v4754_v29 = vrot.slane %v4753_v14, 1  ;;  %v5570_v24 = vsel %vm5568_vm0, %v4734_v56, -inf  ;;  %v13732_v57 = vpop.f32.mrb[5].mxu0 }
 0x1fc   : > { %v4684_v25 = vrot.slane %v4683_v21, 1  ;;  %v4691_v28 = vrot.slane %v4690_v17, 1  ;;  %v4697_v34 = vmax.f32 %v4695_v1, %v4696_v18  ;;  %v5569_v35 = vsel %vm5568_vm0, %v4678_v42, -inf  ;;  %v13737_v62 = vpop.f32.mrb[6].mxu0 }
 0x1fd   : > { %v4755_v36 = vmax.f32 %v4753_v14, %v4754_v29  ;;  %v5573_v38 = vsel %vm5568_vm0, %v4741_v22, -inf  ;;  %v5576_v16 = vsel %vm5568_vm0, %v4748_v23, -inf  ;;  %v5571_v40 = vmax.f32 %v5569_v35, %v5570_v24  ;;  %v13739_v12 = vpop.f32.mrb[7].mxu0  ;;  %v2439_v24 = vpop.permute.xlu1 %2438 }
 0x1fe   : > { %vm15601_vm9 = vcmask 1043459   ;;  %v4685_v20 = vmax.f32 %v4683_v21, %v4684_v25  ;;  %v4692_v48 = vmax.f32 %v4690_v17, %v4691_v28  ;;  %v4698_v10 = vrot.slane %v4697_v34, 1 }
 0x1ff   : > { %v4057_v47 = vrot.slane %v13690_v2, %v13683_v33  ;;  %v5579_v51 = vsel %vm5568_vm0, %v4755_v36, -inf  ;;  %v11554_v54 = vpack.c.bf16 %v5571_v40, %v5571_v40  ;;  %v4064_v53 = vrot.slane %v4050_v11, %v13683_v33 }
 0x200   : > { %v4016_v26 = vcombine.high %v13693_v52, %v13693_v52  ;;  %v4699_v30 = vmax.f32 %v4697_v34, %v4698_v10  ;;  %v5572_v60 = vsel %vm5568_vm0, %v4685_v20, -inf  ;;  %v5575_v39 = vsel %vm5568_vm0, %v4692_v48, -inf }
 0x201   : > { %v4065_v61 = vcombine.high %v4057_v47, %v4057_v47  ;;  %v5574_v58 = vmax.f32 %v5572_v60, %v5573_v38  ;;  %v5577_v37 = vmax.f32 %v5575_v39, %v5576_v16  ;;  %v6076_v2 = vunpack.c.l.b16 %v11554_v54 }
 0x202   : > { %v4066_v11 = vcombine.high %v4064_v53, %v4064_v53  ;;  %v5578_v6 = vsel %vm5568_vm0, %v4699_v30, -inf  ;;  %v4756_v49 = vsel %vm4671_vm15, %v4057_v47, -inf  ;;  %v4770_v43 = vsel %vm4671_vm15, %v4064_v53, -inf  ;;  %v3337_v47 = vpop.permute.xlu0 %3336 }
 0x203   : > { %v4763_v5 = vsel %vm4671_vm15, %v4065_v61, -inf  ;;  %v5580_v7 = vmax.f32 %v5578_v6, %v5579_v51  ;;  %v11555_v8 = vpack.c.bf16 %v5574_v58, %v5574_v58  ;;  %v11556_v9 = vpack.c.bf16 %v5577_v37, %v5577_v37  ;;  %3371 = vst.msk [vmem:[#allocation3 + $0x70] sm:$0xff] %vm3356_vm3, %v3337_v47 }
 0x204   : > { %v4757_v13 = vrot.slane %v4756_v49, 4  ;;  %v4764_v32 = vrot.slane %v4763_v5, 4  ;;  %v4771_v46 = vrot.slane %v4770_v43, 4  ;;  %v4777_v1 = vsel %vm4671_vm15, %v4066_v11, -inf }
 0x205   : > { %v4023_v45 = vrot.slane %v13693_v52, %v13683_v33  ;;  %v11557_v56 = vpack.c.bf16 %v5580_v7, %v5580_v7  ;;  %v6077_v41 = vunpack.c.l.b16 %v11555_v8  ;;  %v6078_v55 = vunpack.c.l.b16 %v11556_v9 }
 0x206   : > { %v4758_v14 = vmax.f32 %v4756_v49, %v4757_v13  ;;  %v4765_v42 = vmax.f32 %v4763_v5, %v4764_v32  ;;  %v4772_v21 = vmax.f32 %v4770_v43, %v4771_v46  ;;  %v4778_v17 = vrot.slane %v4777_v1, 4  ;;  %v3626_v43 = vpop.permute.xlu0 %3625 }
 0x207   : > { %v4030_v18 = vrot.slane %v4016_v26, %v13683_v33  ;;  %vm6144_vm14 = vcmask 1044484   ;;  %v6079_v19 = vunpack.c.l.b16 %v11557_v56  ;;  %v6141_v22 = vsel %vm6140_vm5, %v6077_v41, %v6076_v2  ;;  %v2728_v26 = vpop.permute.xlu1 %2727  ;;  %3660 = vst.msk [vmem:[#allocation3 + $0x70] sm:$0xff] %vm3645_vm2, %v3626_v43 }
 0x208   : > { %v4759_v23 = vrot.slane %v4758_v14, 2  ;;  %v4031_v29 = vcombine.high %v4023_v45, %v4023_v45  ;;  %v6143_v25 = vsel %vm15601_vm9, %v6078_v55, %v6141_v22  ;;  %v4766_v28 = vrot.slane %v4765_v42, 2 }
 0x209   : > { %v4773_v52 = vrot.slane %v4772_v21, 2  ;;  %v4779_v34 = vmax.f32 %v4777_v1, %v4778_v17  ;;  %vm15664_vm12 = vcmask 326912   ;;  %v4032_v36 = vcombine.high %v4030_v18, %v4030_v18 }
 0x20a   : > { %2472 = vst.msk [vmem:[#allocation3 + $0x78] sm:$0xff] %vm15664_vm12, %v2439_v24  ;;  %v4760_v35 = vmax.f32 %v4758_v14, %v4759_v23  ;;  %v4700_v38 = vsel %vm4671_vm15, %v4023_v45, -inf  ;;  %v4707_v16 = vsel %vm4671_vm15, %v4031_v29, -inf  ;;  %v4767_v40 = vmax.f32 %v4765_v42, %v4766_v28 }
 0x20b   : > { %v4774_v20 = vmax.f32 %v4772_v21, %v4773_v52  ;;  %v4780_v48 = vrot.slane %v4779_v34, 2  ;;  %v4701_v10 = vrot.slane %v4700_v38, 4  ;;  %v4708_v51 = vrot.slane %v4707_v16, 4  ;;  %2761 = vst.msk [vmem:[#allocation3 + $0x78] sm:$0xff] %vm15661_vm10, %v2728_v26  ;;  %v2906_v32 = vpop.permute.xlu1 %2905 }
 0x20c   : > { %v4761_v50 = vrot.slane %v4760_v35, 1  ;;  %v4714_v54 = vsel %vm4671_vm15, %v4030_v18, -inf  ;;  %v4721_v53 = vsel %vm4671_vm15, %v4032_v36, -inf  ;;  %v4768_v30 = vrot.slane %v4767_v40, 1  ;;  %2939 = vst.msk [vmem:[#allocation3 + $0x78] sm:$0xff] %vm2923_vm7, %v2906_v32 }
 0x20d   : > { %v4775_v60 = vrot.slane %v4774_v20, 1  ;;  %v4781_v39 = vmax.f32 %v4779_v34, %v4780_v48  ;;  %v4702_v61 = vmax.f32 %v4700_v38, %v4701_v10  ;;  %v4709_v58 = vmax.f32 %v4707_v16, %v4708_v51 }
 0x20e   : > { %v4762_v3 = vmax.f32 %v4760_v35, %v4761_v50  ;;  %v4715_v37 = vrot.slane %v4714_v54, 4  ;;  %v4722_v2 = vrot.slane %v4721_v53, 4  ;;  %v4769_v11 = vmax.f32 %v4767_v40, %v4768_v30 }
 0x20f   : > { %v4776_v6 = vmax.f32 %v4774_v20, %v4775_v60  ;;  %v4782_v49 = vrot.slane %v4781_v39, 1  ;;  %v4703_v5 = vrot.slane %v4702_v61, 2  ;;  %v4710_v8 = vrot.slane %v4709_v58, 2  ;;  %v3339_v52 = vpop.permute.xlu1 %3338 }
 0x210   : > { %v5582_v7 = vsel %vm5568_vm0, %v4762_v3, -inf  ;;  %v4716_v9 = vmax.f32 %v4714_v54, %v4715_v37  ;;  %v4723_v13 = vmax.f32 %v4721_v53, %v4722_v2  ;;  %v5585_v1 = vsel %vm5568_vm0, %v4769_v11, -inf  ;;  %3372 = vst.msk [vmem:[#allocation3 + $0x78] sm:$0xff] %vm3356_vm3, %v3339_v52 }
 0x211   : > { %v4783_v46 = vmax.f32 %v4781_v39, %v4782_v49  ;;  %v5588_v45 = vsel %vm5568_vm0, %v4776_v6, -inf  ;;  %v4704_v56 = vmax.f32 %v4702_v61, %v4703_v5  ;;  %v4711_v41 = vmax.f32 %v4709_v58, %v4710_v8  ;;  %v6231_v6 = vld [vmem:[#allocation4 + $0xc] sm:$0x1] }
 0x212   : > { %v4717_v55 = vrot.slane %v4716_v9, 2  ;;  %v4724_v14 = vrot.slane %v4723_v13, 2  ;;  %v6145_v42 = vsel %vm6144_vm14, %v6079_v19, %v6143_v25  ;;  %vm6146_vm12 = vcmask 1045509  }
 0x213   : > { %v5591_v21 = vsel %vm5568_vm0, %v4783_v46, -inf  ;;  %v4705_v17 = vrot.slane %v4704_v56, 1  ;;  %v3833_v18 = vadd.f32 %v13723_v44, %v13675_v63  ;;  %v3825_v22 = vadd.f32 %v13675_v63, %v13732_v57  ;;  %v3628_v50 = vpop.permute.xlu1 %3627 }
 0x214   : > { %v4712_v23 = vrot.slane %v4711_v41, 1  ;;  %v4718_v29 = vmax.f32 %v4716_v9, %v4717_v55  ;;  %v4725_v24 = vmax.f32 %v4723_v13, %v4724_v14  ;;  %vm6148_vm10 = vcmask 1046534   ;;  %3661 = vst.msk [vmem:[#allocation3 + $0x78] sm:$0xff] %vm3645_vm2, %v3628_v50 }
 0x215   : > { %v3836_v28 = vadd.f32 %v13737_v62, %v13675_v63  ;;  %v4706_v34 = vmax.f32 %v4704_v56, %v4705_v17  ;;  %v3941_v19 = vmax.f32 %v3833_v18, 0.0  ;;  %v3939_v25 = vmax.f32 %v3825_v22, 0.0 }
 0x216   : > { %v13774_v35 = vadd.f32 %v13675_v63, %v13739_v12  ;;  %v4713_v44 = vmax.f32 %v4711_v41, %v4712_v23  ;;  %v4719_v36 = vrot.slane %v4718_v29, 1  ;;  %v4726_v57 = vrot.slane %v4725_v24, 1  ;;  %v3676_v12 = vld [vmem:[#allocation3 + $0x70] sm:$0xff] }
 0x217   : > { %vm6150_vm7 = vcmask 1047559   ;;  %v13777_v38 = vmax.f32 %v3836_v28, 0.0  ;;  %v5581_v16 = vsel %vm5568_vm0, %v4706_v34, -inf  ;;  %v4101_v40 = vcombine.high %v3941_v19, %v3941_v19  ;;  %11840 = vmatprep.mubr.msk.bf16.mxu0 %vm3721_vm1, %v3676_v12 }
 0x218   : > { %v4108_v62 = vrot.slane %v3941_v19, %v13683_v33  ;;  %v4067_v20 = vcombine.high %v3939_v25, %v3939_v25  ;;  %v4720_v48 = vmax.f32 %v4718_v29, %v4719_v36  ;;  %v4727_v10 = vmax.f32 %v4725_v24, %v4726_v57  ;;  %v6228_v29 = vld [vmem:[#allocation4 + $0x8] sm:$0xf] }
 0x219   : > { %v5583_v47 = vmax.f32 %v5581_v16, %v5582_v7  ;;  %v5584_v63 = vsel %vm5568_vm0, %v4713_v44, -inf  ;;  %v4115_v54 = vrot.slane %v4101_v40, %v13683_v33  ;;  %v4074_v22 = vrot.slane %v3939_v25, %v13683_v33 }
 0x21a   : > { %v5586_v51 = vmax.f32 %v5584_v63, %v5585_v1  ;;  %v4116_v53 = vcombine.high %v4108_v62, %v4108_v62  ;;  %v4840_v26 = vsel %vm4671_vm15, %v4108_v62, -inf  ;;  %v5587_v30 = vsel %vm5568_vm0, %v4720_v48, -inf }
 0x21b   : > { %v5590_v60 = vsel %vm5568_vm0, %v4727_v10, -inf  ;;  %v11558_v39 = vpack.c.bf16 %v5583_v47, %v5583_v47  ;;  %v4841_v61 = vrot.slane %v4840_v26, 4  ;;  %v5589_v3 = vmax.f32 %v5587_v30, %v5588_v45  ;;  %v3677_v24 = vld [vmem:[#allocation3 + $0x78] sm:$0xff] }
 0x21c   : > { %v5592_v58 = vmax.f32 %v5590_v60, %v5591_v21  ;;  %v11559_v37 = vpack.c.bf16 %v5586_v51, %v5586_v51  ;;  %v4117_v2 = vcombine.high %v4115_v54, %v4115_v54  ;;  %v4847_v5 = vsel %vm4671_vm15, %v4116_v53, -inf  ;;  %11841 = vmatmul.mubr.msk.bf16.gmra.mrb[28].mxu0 %vm3721_vm1, %v3677_v24 }
 0x21d   : > { %v6080_v11 = vunpack.c.l.b16 %v11558_v39  ;;  %v4842_v49 = vmax.f32 %v4840_v26, %v4841_v61  ;;  %v4854_v43 = vsel %vm4671_vm15, %v4115_v54, -inf  ;;  %v11560_v7 = vpack.c.bf16 %v5589_v3, %v5589_v3 }
 0x21e   : > { %v6081_v8 = vunpack.c.l.b16 %v11559_v37  ;;  %v11618_v9 = vpack.c.bf16 %v5592_v58, %v5592_v58  ;;  %v4848_v13 = vrot.slane %v4847_v5, 4  ;;  %v4855_v1 = vrot.slane %v4854_v43, 4 }
 0x21f   : > { %v6147_v32 = vsel %vm6146_vm12, %v6080_v11, %v6145_v42  ;;  %v4843_v46 = vrot.slane %v4842_v49, 2  ;;  %v4861_v45 = vsel %vm4671_vm15, %v4117_v2, -inf  ;;  %v6082_v56 = vunpack.c.l.b16 %v11560_v7 }
 0x220   : > { %v6149_v41 = vsel %vm6148_vm10, %v6081_v8, %v6147_v32  ;;  %v6232_v55 = vsel %vm13596_vm11, %v11618_v9, %v6231_v6  ;;  %v4849_v14 = vmax.f32 %v4847_v5, %v4848_v13  ;;  %v4856_v17 = vmax.f32 %v4854_v43, %v4855_v1  ;;  %v13818_v32 = vpop.f32.mrb[8].mxu0 }
 0x221   : > { %6233 = vst [vmem:[#allocation4 + $0xc] sm:$0x1] %v6232_v55  ;;  %v4844_v21 = vmax.f32 %v4842_v49, %v4843_v46  ;;  %v4862_v18 = vrot.slane %v4861_v45, 4  ;;  %v6151_v23 = vsel %vm6150_vm7, %v6082_v56, %v6149_v41  ;;  %vm15665_vm2 = vsmask.f32 7938  ;;  %v13821_v41 = vpop.f32.mrb[9].mxu0 }
 0x222   : > { %vm13799_vm3 = vmand %vm5825_vm8, %vm15665_vm2  ;;  %v4850_v28 = vrot.slane %v4849_v14, 2  ;;  %v4081_v52 = vrot.slane %v4067_v20, %v13683_v33  ;;  %v4118_v34 = vcombine.high %v13777_v38, %v13777_v38  ;;  %v6194_v19 = vpack.c.b16 %v6151_v23, %v6151_v23 }
 0x223   : > { %v4845_v25 = vrot.slane %v4844_v21, 1  ;;  %v4857_v44 = vrot.slane %v4856_v17, 2  ;;  %v4863_v36 = vmax.f32 %v4861_v45, %v4862_v18  ;;  %v4082_v16 = vcombine.high %v4074_v22, %v4074_v22  ;;  %v13825_v18 = vpop.f32.mrb[10].mxu0 }
 0x224   : > { %v4851_v57 = vmax.f32 %v4849_v14, %v4850_v28  ;;  %v4083_v40 = vcombine.high %v4081_v52, %v4081_v52  ;;  %v4784_v62 = vsel %vm4671_vm15, %v4074_v22, -inf  ;;  %v6229_v48 = vsel %vm13799_vm3, %v6194_v19, %v6228_v29 }
 0x225   : > { %v4846_v10 = vmax.f32 %v4844_v21, %v4845_v25  ;;  %v4858_v47 = vmax.f32 %v4856_v17, %v4857_v44  ;;  %v4864_v20 = vrot.slane %v4863_v36, 2  ;;  %6230 = vst [vmem:[#allocation4 + $0x8] sm:$0xf] %v6229_v48  ;;  %v4785_v12 = vrot.slane %v4784_v62, 4  ;;  %v13830_v25 = vpop.f32.mrb[11].mxu0 }
 0x226   : > { %v4852_v63 = vrot.slane %v4851_v57, 1  ;;  %v4791_v50 = vsel %vm4671_vm15, %v4082_v16, -inf  ;;  %v4798_v51 = vsel %vm4671_vm15, %v4081_v52, -inf  ;;  %v4805_v3 = vsel %vm4671_vm15, %v4083_v40, -inf }
 0x227   : > { %v4859_v54 = vrot.slane %v4858_v47, 1  ;;  %v4865_v53 = vmax.f32 %v4863_v36, %v4864_v20  ;;  %v5594_v26 = vsel %vm5568_vm0, %v4846_v10, -inf  ;;  %v4792_v30 = vrot.slane %v4791_v50, 4 }
 0x228   : > { %v4853_v60 = vmax.f32 %v4851_v57, %v4852_v63  ;;  %v4786_v39 = vmax.f32 %v4784_v62, %v4785_v12  ;;  %v4799_v61 = vrot.slane %v4798_v51, 4  ;;  %v4806_v11 = vrot.slane %v4805_v3, 4 }
 0x229   : > { %v4860_v58 = vmax.f32 %v4858_v47, %v4859_v54  ;;  %v4866_v37 = vrot.slane %v4865_v53, 1  ;;  %v4793_v2 = vmax.f32 %v4791_v50, %v4792_v30  ;;  %v4125_v43 = vrot.slane %v13777_v38, %v13683_v33 }
 0x22a   : > { %v5597_v6 = vsel %vm5568_vm0, %v4853_v60, -inf  ;;  %v4787_v49 = vrot.slane %v4786_v39, 2  ;;  %v4800_v5 = vmax.f32 %v4798_v51, %v4799_v61  ;;  %v4807_v13 = vmax.f32 %v4805_v3, %v4806_v11 }
 0x22b   : > { %v4867_v7 = vmax.f32 %v4865_v53, %v4866_v37  ;;  %v5600_v8 = vsel %vm5568_vm0, %v4860_v58, -inf  ;;  %v4794_v9 = vrot.slane %v4793_v2, 2  ;;  %v4132_v45 = vrot.slane %v4118_v34, %v13683_v33 }
 0x22c   : > { %v4788_v46 = vmax.f32 %v4786_v39, %v4787_v49  ;;  %v4801_v1 = vrot.slane %v4800_v5, 2  ;;  %v4133_v56 = vcombine.high %v4125_v43, %v4125_v43  ;;  %v4808_v21 = vrot.slane %v4807_v13, 2  ;;  %v6556_v17 = vld [vmem:[#allocation4 + $0x8] sm:$0xf] }
 0x22d   : > { %v5603_v55 = vsel %vm5568_vm0, %v4867_v7, -inf  ;;  %v4795_v14 = vmax.f32 %v4793_v2, %v4794_v9  ;;  %v4868_v38 = vsel %vm4671_vm15, %v4125_v43, -inf  ;;  %v4134_v29 = vcombine.high %v4132_v45, %v4132_v45  ;;  %6572 = vrot.lane.b32.xlu0 %v6556_v17, %s12635_s19 }
 0x22e   : > { %v4789_v22 = vrot.slane %v4788_v46, 1  ;;  %v4802_v23 = vmax.f32 %v4800_v5, %v4801_v1  ;;  %v4869_v24 = vrot.slane %v4868_v38, 4  ;;  %v4809_v52 = vmax.f32 %v4807_v13, %v4808_v21 }
 0x22f   : > { %v4796_v28 = vrot.slane %v4795_v14, 1  ;;  %v4875_v34 = vsel %vm4671_vm15, %v4133_v56, -inf  ;;  %v4882_v19 = vsel %vm4671_vm15, %v4132_v45, -inf  ;;  %v4889_v10 = vsel %vm4671_vm15, %v4134_v29, -inf  ;;  %v6459_v29 = vld [vmem:[#allocation4 + $0xc] sm:$0x1] }
 0x230   : > { %v4790_v44 = vmax.f32 %v4788_v46, %v4789_v22  ;;  %v4803_v36 = vrot.slane %v4802_v23, 1  ;;  %v4870_v57 = vmax.f32 %v4868_v38, %v4869_v24  ;;  %v4876_v16 = vrot.slane %v4875_v34, 4  ;;  %v6458_v38 = vld [vmem:[#allocation4 + $0x8] sm:$0xe] }
 0x231   : > { %v4797_v40 = vmax.f32 %v4795_v14, %v4796_v28  ;;  %v4810_v62 = vrot.slane %v4809_v52, 1  ;;  %v4883_v48 = vrot.slane %v4882_v19, 4  ;;  %v4890_v13 = vrot.slane %v4889_v10, 4 }
 0x232   : > { %v4804_v47 = vmax.f32 %v4802_v23, %v4803_v36  ;;  %v5593_v20 = vsel %vm5568_vm0, %v4790_v44, -inf  ;;  %v4871_v63 = vrot.slane %v4870_v57, 2  ;;  %v4877_v12 = vmax.f32 %v4875_v34, %v4876_v16  ;;  %v6750_v44 = vld [vmem:[#allocation4 + $0xc] sm:$0x1] }
 0x233   : > { %v4811_v50 = vmax.f32 %v4809_v52, %v4810_v62  ;;  %v5595_v51 = vmax.f32 %v5593_v20, %v5594_v26  ;;  %v5596_v54 = vsel %vm5568_vm0, %v4797_v40, -inf  ;;  %v4884_v53 = vmax.f32 %v4882_v19, %v4883_v48  ;;  %v6749_v19 = vld [vmem:[#allocation4 + $0x8] sm:$0xe] }
 0x234   : > { %v5598_v30 = vmax.f32 %v5596_v54, %v5597_v6  ;;  %v5599_v60 = vsel %vm5568_vm0, %v4804_v47, -inf  ;;  %v4872_v39 = vmax.f32 %v4870_v57, %v4871_v63  ;;  %v4878_v61 = vrot.slane %v4877_v12, 2 }
 0x235   : > { %v5601_v3 = vmax.f32 %v5599_v60, %v5600_v8  ;;  %v5602_v58 = vsel %vm5568_vm0, %v4811_v50, -inf  ;;  %v11562_v37 = vpack.c.bf16 %v5595_v51, %v5595_v51  ;;  %v4885_v2 = vrot.slane %v4884_v53, 2 }
 0x236   : > { %v5604_v11 = vmax.f32 %v5602_v58, %v5603_v55  ;;  %v11563_v49 = vpack.c.bf16 %v5598_v30, %v5598_v30  ;;  %v4873_v5 = vrot.slane %v4872_v39, 1  ;;  %v4879_v43 = vmax.f32 %v4877_v12, %v4878_v61 }
 0x237   : > { %v11564_v7 = vpack.c.bf16 %v5601_v3, %v5601_v3  ;;  %v6084_v9 = vunpack.c.l.b16 %v11562_v37  ;;  %v4886_v26 = vmax.f32 %v4884_v53, %v4885_v2  ;;  %v4891_v21 = vmax.f32 %v4889_v10, %v4890_v13 }
 0x238   : > { %v11565_v46 = vpack.c.bf16 %v5604_v11, %v5604_v11  ;;  %v6085_v1 = vunpack.c.l.b16 %v11563_v49  ;;  %v4874_v6 = vmax.f32 %v4872_v39, %v4873_v5  ;;  %v4880_v45 = vrot.slane %v4879_v43, 1  ;;  %v13867_v5 = vld [vmem:[%s15578_s2] ss:$0 sm:$0xff] }
 0x239   : > { %v6086_v56 = vunpack.c.l.b16 %v11564_v7  ;;  %v4887_v14 = vrot.slane %v4886_v26, 1  ;;  %v3940_v8 = vmax.f32 %v13774_v35, 0.0  ;;  %v4892_v52 = vrot.slane %v4891_v21, 2 }
 0x23a   : > { %v6087_v17 = vunpack.c.l.b16 %v11565_v46  ;;  %v6152_v55 = vsel %vm6140_vm5, %v6085_v1, %v6084_v9  ;;  %v4881_v22 = vmax.f32 %v4879_v43, %v4880_v45  ;;  %v13840_v23 = vsel %vm5568_vm0, %v4874_v6, -inf }
 0x23b   : > { %v6153_v24 = vsel %vm15601_vm9, %v6086_v56, %v6152_v55  ;;  %v4888_v28 = vmax.f32 %v4886_v26, %v4887_v14  ;;  %v4084_v34 = vcombine.high %v3940_v8, %v3940_v8  ;;  %v4091_v35 = vrot.slane %v3940_v8, %v13683_v33 }
 0x23c   : > { %v13844_v36 = vsel %vm5568_vm0, %v4881_v22, -inf  ;;  %v13848_v57 = vsel %vm6144_vm14, %v6087_v17, %v6153_v24  ;;  %v11238_v16 = vrot.slane %v6458_v38, 9  ;;  %v4893_v40 = vmax.f32 %v4891_v21, %v4892_v52 }
 0x23d   : > { %v13851_v62 = vsel %vm5568_vm0, %v4888_v28, -inf  ;;  %v4098_v48 = vrot.slane %v4084_v34, %v13683_v33  ;;  %v6497_v10 = vrot.slane %v6459_v29, 5  ;;  %v4099_v47 = vcombine.high %v4091_v35, %v4091_v35 }
 0x23e   : > { %v4812_v20 = vsel %vm4671_vm15, %v4091_v35, -inf  ;;  %v11245_v63 = vrot.slane %v6749_v19, 9  ;;  %v6783_v12 = vrot.slane %v6750_v44, 5  ;;  %v4894_v50 = vrot.slane %v4893_v40, 1 }
 0x23f   : > { %v4100_v51 = vcombine.high %v4098_v48, %v4098_v48  ;;  %v4813_v54 = vrot.slane %v4812_v20, 4  ;;  %v4826_v53 = vsel %vm4671_vm15, %v4098_v48, -inf  ;;  %v4819_v30 = vsel %vm4671_vm15, %v4099_v47, -inf }
 0x240   : > { %v4827_v60 = vrot.slane %v4826_v53, 4  ;;  %v6498_v39 = vsel %vm13644_vm6, %v11238_v16, %v6497_v10  ;;  %v6784_v61 = vsel %vm13644_vm6, %v11245_v63, %v6783_v12  ;;  %v4895_v3 = vmax.f32 %v4893_v40, %v4894_v50 }
 0x241   : > { %v4814_v58 = vmax.f32 %v4812_v20, %v4813_v54  ;;  %v4820_v37 = vrot.slane %v4819_v30, 4  ;;  %v4833_v2 = vsel %vm4671_vm15, %v4100_v51, -inf  ;;  %6525 = vrot.lane.b32.xlu1 %v6498_v39, %s12631_s30  ;;  %6813 = vrot.lane.b32.xlu0 %v6784_v61, %s12632_s14  ;;  %v3849_v43 = vadd.f32 %v13867_v5, %v13818_v32 }
 0x242   : > { %v4828_v11 = vmax.f32 %v4826_v53, %v4827_v60  ;;  %v4834_v49 = vrot.slane %v4833_v2, 4  ;;  %v3841_v7 = vadd.f32 %v13867_v5, %v13821_v41  ;;  %v5615_v9 = vsel %vm5568_vm0, %v4895_v3, -inf }
 0x243   : > { %v4815_v26 = vrot.slane %v4814_v58, 2  ;;  %v4821_v13 = vmax.f32 %v4819_v30, %v4820_v37  ;;  %v3852_v46 = vadd.f32 %v13867_v5, %v13825_v18  ;;  %v3945_v45 = vmax.f32 %v3849_v43, 0.0 }
 0x244   : > { %v4829_v1 = vrot.slane %v4828_v11, 2  ;;  %v4835_v6 = vmax.f32 %v4833_v2, %v4834_v49  ;;  %v3943_v56 = vmax.f32 %v3841_v7, 0.0  ;;  %v13880_v32 = vadd.f32 %v13867_v5, %v13830_v25 }
 0x245   : > { %v4816_v14 = vmax.f32 %v4814_v58, %v4815_v26  ;;  %v4822_v21 = vrot.slane %v4821_v13, 2  ;;  %v13876_v8 = vmax.f32 %v3852_v46, 0.0  ;;  %v4169_v17 = vcombine.high %v3945_v45, %v3945_v45  ;;  %v6237_v46 = vld [vmem:[#allocation4 + $0x14] sm:$0x1] }
 0x246   : > { %v4830_v41 = vmax.f32 %v4828_v11, %v4829_v1  ;;  %v4836_v38 = vrot.slane %v4835_v6, 2  ;;  %v4176_v55 = vrot.slane %v3945_v45, %v13683_v33  ;;  %v4135_v18 = vcombine.high %v3943_v56, %v3943_v56 }
 0x247   : > { %v4817_v22 = vrot.slane %v4816_v14, 1  ;;  %v4823_v29 = vmax.f32 %v4821_v13, %v4822_v21  ;;  %v13884_v24 = vrot.slane %v3943_v56, %v13683_v33  ;;  %v4183_v34 = vrot.slane %v4169_v17, %v13683_v33 }
 0x248   : > { %v4831_v28 = vrot.slane %v4830_v41, 1  ;;  %v4837_v52 = vmax.f32 %v4835_v6, %v4836_v38  ;;  %v4184_v19 = vcombine.high %v4176_v55, %v4176_v55  ;;  %v4952_v25 = vsel %vm4671_vm15, %v4176_v55, -inf }
 0x249   : > { %v4818_v44 = vmax.f32 %v4816_v14, %v4817_v22  ;;  %v4824_v35 = vrot.slane %v4823_v29, 1  ;;  %v13889_v16 = vrot.slane %v4135_v18, %v13683_v33  ;;  %v4185_v10 = vcombine.high %v4183_v34, %v4183_v34 }
 0x24a   : > { %v4832_v40 = vmax.f32 %v4830_v41, %v4831_v28  ;;  %v4838_v48 = vrot.slane %v4837_v52, 1  ;;  %v4953_v47 = vrot.slane %v4952_v25, 4  ;;  %v4959_v12 = vsel %vm4671_vm15, %v4184_v19, -inf }
 0x24b   : > { %v4825_v20 = vmax.f32 %v4823_v29, %v4824_v35  ;;  %v5605_v63 = vsel %vm5568_vm0, %v4818_v44, -inf  ;;  %v4966_v50 = vsel %vm4671_vm15, %v4183_v34, -inf  ;;  %v4960_v61 = vrot.slane %v4959_v12, 4  ;;  %v6234_v35 = vld [vmem:[#allocation4 + $0x10] sm:$0xf] }
 0x24c   : > { %v4839_v51 = vmax.f32 %v4837_v52, %v4838_v48  ;;  %v5607_v54 = vmax.f32 %v5605_v63, %v13840_v23  ;;  %v5611_v53 = vsel %vm5568_vm0, %v4832_v40, -inf  ;;  %v4954_v30 = vmax.f32 %v4952_v25, %v4953_v47 }
 0x24d   : > { %v5608_v60 = vsel %vm5568_vm0, %v4825_v20, -inf  ;;  %v5613_v39 = vmax.f32 %v5611_v53, %v13851_v62  ;;  %v4967_v3 = vrot.slane %v4966_v50, 4  ;;  %v4961_v7 = vmax.f32 %v4959_v12, %v4960_v61 }
 0x24e   : > { %v5610_v58 = vmax.f32 %v5608_v60, %v13844_v36  ;;  %v5614_v37 = vsel %vm5568_vm0, %v4839_v51, -inf  ;;  %v11566_v2 = vpack.c.bf16 %v5607_v54, %v5607_v54  ;;  %v4955_v11 = vrot.slane %v4954_v30, 2 }
 0x24f   : > { %v5616_v49 = vmax.f32 %v5614_v37, %v5615_v9  ;;  %v11568_v43 = vpack.c.bf16 %v5613_v39, %v5613_v39  ;;  %v4968_v26 = vmax.f32 %v4966_v50, %v4967_v3  ;;  %v4973_v6 = vsel %vm4671_vm15, %v4185_v10, -inf }
 0x250   : > { %v11567_v23 = vpack.c.bf16 %v5610_v58, %v5610_v58  ;;  %v6088_v13 = vunpack.c.l.b16 %v11566_v2  ;;  %v4956_v1 = vmax.f32 %v4954_v30, %v4955_v11  ;;  %v4962_v56 = vrot.slane %v4961_v7, 2 }
 0x251   : > { %v6090_v45 = vunpack.c.l.b16 %v11568_v43  ;;  %v11619_v62 = vpack.c.bf16 %v5616_v49, %v5616_v49  ;;  %v4969_v14 = vrot.slane %v4968_v26, 2  ;;  %v4974_v38 = vrot.slane %v4973_v6, 4 }
 0x252   : > { %v6089_v21 = vunpack.c.l.b16 %v11567_v23  ;;  %v6155_v36 = vsel %vm6146_vm12, %v6088_v13, %v13848_v57  ;;  %v4957_v41 = vrot.slane %v4956_v1, 1  ;;  %v4963_v55 = vmax.f32 %v4961_v7, %v4962_v56 }
 0x253   : > { %v6238_v17 = vsel %vm13596_vm11, %v11619_v62, %v6237_v46  ;;  %v4970_v22 = vmax.f32 %v4968_v26, %v4969_v14  ;;  %v4150_v29 = vcombine.high %v13884_v24, %v13884_v24  ;;  %v4975_v34 = vmax.f32 %v4973_v6, %v4974_v38 }
 0x254   : > { %v13903_v9 = vpop.f32.mrb[12].mxu0  ;;  %v6156_v28 = vsel %vm6148_vm10, %v6089_v21, %v6155_v36  ;;  %6239 = vst [vmem:[#allocation4 + $0x14] sm:$0x1] %v6238_v17  ;;  %v4958_v52 = vmax.f32 %v4956_v1, %v4957_v41  ;;  %v4151_v57 = vcombine.high %v13889_v16, %v13889_v16  ;;  %v4964_v25 = vrot.slane %v4963_v55, 1 }
 0x255   : > { %v13909_v18 = vpop.f32.mrb[13].mxu0  ;;  %v6157_v44 = vsel %vm6150_vm7, %v6090_v45, %v6156_v28  ;;  %v4971_v40 = vrot.slane %v4970_v22, 1  ;;  %v4896_v48 = vsel %vm4671_vm15, %v13884_v24, -inf  ;;  %v4976_v20 = vrot.slane %v4975_v34, 2 }
 0x256   : > { %v13914_v19 = vpop.f32.mrb[14].mxu0  ;;  %v6196_v47 = vpack.c.b16 %v6157_v44, %v6157_v44  ;;  %v5618_v63 = vsel %vm5568_vm0, %v4958_v52, -inf  ;;  %v4897_v12 = vrot.slane %v4896_v48, 4  ;;  %v4965_v50 = vmax.f32 %v4963_v55, %v4964_v25 }
 0x257   : > { %v13919_v10 = vpop.f32.mrb[15].mxu0  ;;  %v4972_v51 = vmax.f32 %v4970_v22, %v4971_v40  ;;  %v4903_v54 = vsel %vm4671_vm15, %v4150_v29, -inf  ;;  %v4910_v53 = vsel %vm4671_vm15, %v13889_v16, -inf  ;;  %v4977_v60 = vmax.f32 %v4975_v34, %v4976_v20 }
 0x258   : > { %v6235_v30 = vsel %vm13799_vm3, %v6196_v47, %v6234_v35  ;;  %v4898_v39 = vmax.f32 %v4896_v48, %v4897_v12  ;;  %v4904_v24 = vrot.slane %v4903_v54, 4  ;;  %v5621_v61 = vsel %vm5568_vm0, %v4965_v50, -inf }
 0x259   : > { %6236 = vst [vmem:[#allocation4 + $0x10] sm:$0xf] %v6235_v30  ;;  %v5624_v3 = vsel %vm5568_vm0, %v4972_v51, -inf  ;;  %v4911_v58 = vrot.slane %v4910_v53, 4  ;;  %v4917_v37 = vsel %vm4671_vm15, %v4151_v57, -inf  ;;  %v4978_v2 = vrot.slane %v4977_v60, 1 }
 0x25a   : > { %v4899_v11 = vrot.slane %v4898_v39, 2  ;;  %v4905_v49 = vmax.f32 %v4903_v54, %v4904_v24  ;;  %v4918_v43 = vrot.slane %v4917_v37, 4  ;;  %v4186_v16 = vcombine.high %v13876_v8, %v13876_v8 }
 0x25b   : > { %v4912_v7 = vmax.f32 %v4910_v53, %v4911_v58  ;;  %v4193_v26 = vrot.slane %v13876_v8, %v13683_v33  ;;  %v13935_v23 = vmax.f32 %v13880_v32, 0.0  ;;  %v4979_v13 = vmax.f32 %v4977_v60, %v4978_v2 }
 0x25c   : > { %v4900_v46 = vmax.f32 %v4898_v39, %v4899_v11  ;;  %v4906_v1 = vrot.slane %v4905_v49, 2  ;;  %v4919_v6 = vmax.f32 %v4917_v37, %v4918_v43  ;;  %v4200_v62 = vrot.slane %v4186_v16, %v13683_v33 }
 0x25d   : > { %v4913_v45 = vrot.slane %v4912_v7, 2  ;;  %v4201_v56 = vcombine.high %v4193_v26, %v4193_v26  ;;  %v4980_v14 = vsel %vm4671_vm15, %v4193_v26, -inf  ;;  %v5627_v21 = vsel %vm5568_vm0, %v4979_v13, -inf }
 0x25e   : > { %v4901_v36 = vrot.slane %v4900_v46, 1  ;;  %v4907_v41 = vmax.f32 %v4905_v49, %v4906_v1  ;;  %v4920_v38 = vrot.slane %v4919_v6, 2  ;;  %v4202_v8 = vcombine.high %v4200_v62, %v4200_v62 }
 0x25f   : > { %v4914_v17 = vmax.f32 %v4912_v7, %v4913_v45  ;;  %v4981_v55 = vrot.slane %v4980_v14, 4  ;;  %v4987_v32 = vsel %vm4671_vm15, %v4201_v56, -inf  ;;  %v4994_v25 = vsel %vm4671_vm15, %v4200_v62, -inf }
 0x260   : > { %v4902_v22 = vmax.f32 %v4900_v46, %v4901_v36  ;;  %v4908_v29 = vrot.slane %v4907_v41, 1  ;;  %v4921_v28 = vmax.f32 %v4919_v6, %v4920_v38  ;;  %v4988_v52 = vrot.slane %v4987_v32, 4  ;;  %v6846_v34 = vld [vmem:[#allocation4 + $0x10] sm:$0xf] }
 0x261   : > { %v6557_v57 = vld [vmem:[#allocation4 + $0x10] sm:$0xf]  ;;  %v4915_v44 = vrot.slane %v4914_v17, 1  ;;  %v4982_v35 = vmax.f32 %v4980_v14, %v4981_v55  ;;  %v5001_v40 = vsel %vm4671_vm15, %v4202_v8, -inf  ;;  %6862 = vrot.lane.b32.xlu0 %v6846_v34, %s12631_s30  ;;  %v4995_v53 = vrot.slane %v4994_v25, 4 }
 0x262   : > { %6574 = vrot.lane.b32.xlu1 %v6557_v57, %s12635_s19  ;;  %v4909_v48 = vmax.f32 %v4907_v41, %v4908_v29  ;;  %v4922_v47 = vrot.slane %v4921_v28, 1  ;;  %v5617_v20 = vsel %vm5568_vm0, %v4902_v22, -inf  ;;  %v4989_v12 = vmax.f32 %v4987_v32, %v4988_v52  ;;  %v5841_v8 = vld [vmem:[#allocation4 + $0x18] sm:$0x1]  ;;  %v5866_v29 = vld [vmem:[#allocation4 + $0x1c] sm:$0x1] }
 0x263   : > { %v4916_v50 = vmax.f32 %v4914_v17, %v4915_v44  ;;  %v5619_v51 = vmax.f32 %v5617_v20, %v5618_v63  ;;  %v4983_v54 = vrot.slane %v4982_v35, 2  ;;  %v5002_v24 = vrot.slane %v5001_v40, 4 }
 0x264   : > { %v4923_v30 = vmax.f32 %v4921_v28, %v4922_v47  ;;  %v5620_v60 = vsel %vm5568_vm0, %v4909_v48, -inf  ;;  %v4990_v39 = vrot.slane %v4989_v12, 2  ;;  %v4996_v16 = vmax.f32 %v4994_v25, %v4995_v53  ;;  %v6461_v48 = vld [vmem:[#allocation4 + $0x14] sm:$0x1] }
 0x265   : > { %v5622_v58 = vmax.f32 %v5620_v60, %v5621_v61  ;;  %v5623_v37 = vsel %vm5568_vm0, %v4916_v50, -inf  ;;  %v11570_v2 = vpack.c.bf16 %v5619_v51, %v5619_v51  ;;  %v4984_v11 = vmax.f32 %v4982_v35, %v4983_v54  ;;  %v6460_v50 = vld [vmem:[#allocation4 + $0x10] sm:$0xe]  ;;  %v6276_v60 = vld [vmem:[#allocation4] sm:$0xf] }
 0x266   : > { %v5625_v49 = vmax.f32 %v5623_v37, %v5624_v3  ;;  %v5626_v43 = vsel %vm5568_vm0, %v4923_v30, -inf  ;;  %v4991_v7 = vmax.f32 %v4989_v12, %v4990_v39  ;;  %v4997_v45 = vrot.slane %v4996_v16, 2  ;;  %6284 = vst.msk [vmem:[#allocation5] sm:$0xf] %vm5825_vm8, %v6276_v60 }
 0x267   : > { %v5628_v26 = vmax.f32 %v5626_v43, %v5627_v21  ;;  %v11571_v13 = vpack.c.bf16 %v5622_v58, %v5622_v58  ;;  %v6092_v63 = vunpack.c.l.b16 %v11570_v2  ;;  %v4985_v46 = vrot.slane %v4984_v11, 1  ;;  %v6294_v2 = vld [vmem:[#allocation4 + $0x8] sm:$0xf] }
 0x268   : > { %v11572_v1 = vpack.c.bf16 %v5625_v49, %v5625_v49  ;;  %v4992_v6 = vrot.slane %v4991_v7, 1  ;;  %v5003_v62 = vmax.f32 %v5001_v40, %v5002_v24  ;;  %v4152_v36 = vcombine.high %v13935_v23, %v13935_v23 }
 0x269   : > { %v11573_v56 = vpack.c.bf16 %v5628_v26, %v5628_v26  ;;  %v6093_v14 = vunpack.c.l.b16 %v11571_v13  ;;  %v4986_v61 = vmax.f32 %v4984_v11, %v4985_v46  ;;  %v4998_v38 = vmax.f32 %v4996_v16, %v4997_v45  ;;  %v6295_v16 = vld [vmem:[#allocation4 + $0xc] sm:$0x1] }
 0x26a   : > { %v6094_v41 = vunpack.c.l.b16 %v11572_v1  ;;  %v4993_v3 = vmax.f32 %v4991_v7, %v4992_v6  ;;  %v5004_v17 = vrot.slane %v5003_v62, 2  ;;  %v4159_v22 = vrot.slane %v13935_v23, %v13683_v33  ;;  %v6751_v1 = vld [vmem:[#allocation4 + $0x10] sm:$0xe] }
 0x26b   : > { %v6095_v55 = vunpack.c.l.b16 %v11573_v56  ;;  %v6158_v21 = vsel %vm6140_vm5, %v6093_v14, %v6092_v63  ;;  %v13953_v32 = vsel %vm5568_vm0, %v4986_v61, -inf  ;;  %v4999_v52 = vrot.slane %v4998_v38, 1 }
 0x26c   : > { %v6159_v28 = vsel %vm15601_vm9, %v6094_v41, %v6158_v21  ;;  %v5005_v34 = vmax.f32 %v5003_v62, %v5004_v17  ;;  %v13959_v57 = vsel %vm5568_vm0, %v4993_v3, -inf  ;;  %v4166_v44 = vrot.slane %v4152_v36, %v13683_v33  ;;  %v6752_v3 = vld [vmem:[#allocation4 + $0x14] sm:$0x1] }
 0x26d   : > { %v4167_v35 = vcombine.high %v4159_v22, %v4159_v22  ;;  %v4924_v25 = vsel %vm4671_vm15, %v4159_v22, -inf  ;;  %v5842_v40 = vsel %vm13596_vm11, 0, %v5841_v8  ;;  %v5000_v47 = vmax.f32 %v4998_v38, %v4999_v52 }
 0x26e   : > { %v5006_v20 = vrot.slane %v5005_v34, 1  ;;  %v4925_v23 = vrot.slane %v4924_v25, 4  ;;  %5843 = vst [vmem:[#allocation4 + $0x18] sm:$0x1] %v5842_v40  ;;  %v5867_v12 = vsel %vm13610_vm13, 0, %v5866_v29  ;;  %v4168_v51 = vcombine.high %v4166_v44, %v4166_v44 }
 0x26f   : > { %v4931_v54 = vsel %vm4671_vm15, %v4167_v35, -inf  ;;  %v4938_v53 = vsel %vm4671_vm15, %v4166_v44, -inf  ;;  %5868 = vst [vmem:[#allocation4 + $0x1c] sm:$0x1] %v5867_v12  ;;  %v13970_v30 = vsel %vm6144_vm14, %v6095_v55, %v6159_v28  ;;  %v13973_v24 = vsel %vm5568_vm0, %v5000_v47, -inf }
 0x270   : > { %v5007_v39 = vmax.f32 %v5005_v34, %v5006_v20  ;;  %v4926_v58 = vmax.f32 %v4924_v25, %v4925_v23  ;;  %v4932_v37 = vrot.slane %v4931_v54, 4  ;;  %v4939_v11 = vrot.slane %v4938_v53, 4 }
 0x271   : > { %v4945_v49 = vsel %vm4671_vm15, %v4168_v51, -inf  ;;  %v11239_v43 = vrot.slane %v6460_v50, 9  ;;  %v6501_v7 = vrot.slane %v6461_v48, 5  ;;  %v6326_v62 = vshrl.u32 %v6294_v2, 16 }
 0x272   : > { %v5639_v26 = vsel %vm5568_vm0, %v5007_v39, -inf  ;;  %v4927_v13 = vrot.slane %v4926_v58, 2  ;;  %v4933_v63 = vmax.f32 %v4931_v54, %v4932_v37  ;;  %v4946_v46 = vrot.slane %v4945_v49, 4 }
 0x273   : > { %v4940_v6 = vmax.f32 %v4938_v53, %v4939_v11  ;;  %v6502_v45 = vsel %vm13644_vm6, %v11239_v43, %v6501_v7  ;;  %v6329_v56 = vshll.u32 %v6294_v2, 16  ;;  %v6335_v41 = vshll.u32 %v6295_v16, 16 }
 0x274   : > { %v4928_v14 = vmax.f32 %v4926_v58, %v4927_v13  ;;  %v4934_v61 = vrot.slane %v4933_v63, 2  ;;  %v4947_v36 = vmax.f32 %v4945_v49, %v4946_v46  ;;  %6527 = vrot.lane.b32.xlu0 %v6502_v45, %s12631_s30  ;;  %v6328_v17 = vrot.slane %v6326_v62, 4 }
 0x275   : > { %v4941_v38 = vrot.slane %v4940_v6, 2  ;;  %v6331_v8 = vrot.slane %v6329_v56, 5  ;;  %v11246_v55 = vrot.slane %v6751_v1, 9  ;;  %v6337_v28 = vrot.slane %v6335_v41, 5 }
 0x276   : > { %v4929_v21 = vrot.slane %v4928_v14, 1  ;;  %v4935_v22 = vmax.f32 %v4933_v63, %v4934_v61  ;;  %v4948_v29 = vrot.slane %v4947_v36, 2  ;;  %v6787_v44 = vrot.slane %v6752_v3, 5  ;;  %v13987_v51 = vpop.f32.mrb[16].mxu0 }
 0x277   : > { %v4942_v52 = vmax.f32 %v4940_v6, %v4941_v38  ;;  %v6332_v34 = vor.u32 %v6331_v8, %v6328_v17  ;;  %v3865_v35 = vadd.f32 %v13867_v5, %v13903_v9  ;;  %v3857_v47 = vadd.f32 %v13867_v5, %v13909_v18  ;;  %v13990_v9 = vpop.f32.mrb[17].mxu0  ;;  %v6243_v38 = vld [vmem:[#allocation4 + $0x1c] sm:$0x1] }
 0x278   : > { %v4930_v25 = vmax.f32 %v4928_v14, %v4929_v21  ;;  %v4936_v40 = vrot.slane %v4935_v22, 1  ;;  %v4949_v48 = vmax.f32 %v4947_v36, %v4948_v29  ;;  %v6788_v12 = vsel %vm13644_vm6, %v11246_v55, %v6787_v44  ;;  %v13995_v11 = vpop.f32.mrb[18].mxu0 }
 0x279   : > { %v4943_v20 = vrot.slane %v4942_v52, 1  ;;  %v6333_v23 = vrot.slane %v6332_v34, 4  ;;  %v3949_v50 = vmax.f32 %v3865_v35, 0.0  ;;  %v3947_v39 = vmax.f32 %v3857_v47, 0.0  ;;  %v14000_v13 = vpop.f32.mrb[19].mxu0 }
 0x27a   : > { %v4937_v54 = vmax.f32 %v4935_v22, %v4936_v40  ;;  %v4950_v53 = vrot.slane %v4949_v48, 1  ;;  %v5629_v60 = vsel %vm5568_vm0, %v4930_v25, -inf  ;;  %vm6447_vm1 = vcmask 519424  }
 0x27b   : > { %v4944_v58 = vmax.f32 %v4942_v52, %v4943_v20  ;;  %v5631_v37 = vmax.f32 %v5629_v60, %v13953_v32  ;;  %v6338_v18 = vsel %vm13635_vm4, %v6333_v23, %v6337_v28  ;;  %v4237_v2 = vcombine.high %v3949_v50, %v3949_v50 }
 0x27c   : > { %v4951_v49 = vmax.f32 %v4949_v48, %v4950_v53  ;;  %v5632_v43 = vsel %vm5568_vm0, %v4937_v54, -inf  ;;  %6425 = vrot.lane.b32.xlu1 %v6338_v18, %s12632_s14  ;;  %v4244_v7 = vrot.slane %v3949_v50, %v13683_v33  ;;  %v4203_v16 = vcombine.high %v3947_v39, %v3947_v39  ;;  %v6240_v48 = vld [vmem:[#allocation4 + $0x18] sm:$0xf] }
 0x27d   : > { %v5634_v63 = vmax.f32 %v5632_v43, %v13959_v57  ;;  %v5635_v32 = vsel %vm5568_vm0, %v4944_v58, -inf  ;;  %v11574_v46 = vpack.c.bf16 %v5631_v37, %v5631_v37  ;;  %v4251_v1 = vrot.slane %v4237_v2, %v13683_v33 }
 0x27e   : > { %v5637_v6 = vmax.f32 %v5635_v32, %v13973_v24  ;;  %v5638_v45 = vsel %vm5568_vm0, %v4951_v49, -inf  ;;  %v4252_v62 = vcombine.high %v4244_v7, %v4244_v7  ;;  %v5064_v56 = vsel %vm4671_vm15, %v4244_v7, -inf }
 0x27f   : > { %v5640_v14 = vmax.f32 %v5638_v45, %v5639_v26  ;;  %v11575_v61 = vpack.c.bf16 %v5634_v63, %v5634_v63  ;;  %v6096_v36 = vunpack.c.l.b16 %v11574_v46  ;;  %v4253_v41 = vcombine.high %v4251_v1, %v4251_v1 }
 0x280   : > { %v11576_v3 = vpack.c.bf16 %v5637_v6, %v5637_v6  ;;  %6815 = vrot.lane.b32.xlu1 %v6788_v12, %s12632_s14  ;;  %v5065_v57 = vrot.slane %v5064_v56, 4  ;;  %v5071_v17 = vsel %vm4671_vm15, %v4252_v62, -inf  ;;  %v5078_v8 = vsel %vm4671_vm15, %v4251_v1, -inf }
 0x281   : > { %v6097_v55 = vunpack.c.l.b16 %v11575_v61  ;;  %v6161_v24 = vsel %vm6146_vm12, %v6096_v36, %v13970_v30  ;;  %v11620_v21 = vpack.c.bf16 %v5640_v14, %v5640_v14  ;;  %v5072_v22 = vrot.slane %v5071_v17, 4 }
 0x282   : > { %v6098_v29 = vunpack.c.l.b16 %v11576_v3  ;;  %v5066_v26 = vmax.f32 %v5064_v56, %v5065_v57  ;;  %v5079_v28 = vrot.slane %v5078_v8, 4  ;;  %v5085_v52 = vsel %vm4671_vm15, %v4253_v41, -inf }
 0x283   : > { %v6162_v34 = vsel %vm6148_vm10, %v6097_v55, %v6161_v24  ;;  %v6244_v44 = vsel %vm13596_vm11, %v11620_v21, %v6243_v38  ;;  %v5073_v35 = vmax.f32 %v5071_v17, %v5072_v22  ;;  %v5086_v25 = vrot.slane %v5085_v52, 4 }
 0x284   : > { %v6163_v40 = vsel %vm6150_vm7, %v6098_v29, %v6162_v34  ;;  %6245 = vst [vmem:[#allocation4 + $0x1c] sm:$0x1] %v6244_v44  ;;  %v5067_v47 = vrot.slane %v5066_v26, 2  ;;  %v5080_v30 = vmax.f32 %v5078_v8, %v5079_v28  ;;  %v4210_v20 = vrot.slane %v3947_v39, %v13683_v33  ;;  %v5844_v29 = vld [vmem:[#allocation4 + $0x20] sm:$0x1] }
 0x285   : > { %v6198_v23 = vpack.c.b16 %v6163_v40, %v6163_v40  ;;  %v5074_v12 = vrot.slane %v5073_v35, 2  ;;  %v5087_v50 = vmax.f32 %v5085_v52, %v5086_v25  ;;  %v4217_v54 = vrot.slane %v4203_v16, %v13683_v33  ;;  %v5869_v44 = vld [vmem:[#allocation4 + $0x24] sm:$0x1] }
 0x286   : > { %v5068_v53 = vmax.f32 %v5066_v26, %v5067_v47  ;;  %v5081_v60 = vrot.slane %v5080_v30, 2  ;;  %v4218_v58 = vcombine.high %v4210_v20, %v4210_v20  ;;  %v5008_v37 = vsel %vm4671_vm15, %v4210_v20, -inf }
 0x287   : > { %v6241_v18 = vsel %vm13799_vm3, %v6198_v23, %v6240_v48  ;;  %v5075_v2 = vmax.f32 %v5073_v35, %v5074_v12  ;;  %v5088_v49 = vrot.slane %v5087_v50, 2  ;;  %v4219_v43 = vcombine.high %v4217_v54, %v4217_v54 }
 0x288   : > { %6242 = vst [vmem:[#allocation4 + $0x18] sm:$0xf] %v6241_v18  ;;  %v5069_v7 = vrot.slane %v5068_v53, 1  ;;  %v5082_v63 = vmax.f32 %v5080_v30, %v5081_v60  ;;  %v5009_v39 = vrot.slane %v5008_v37, 4  ;;  %v5015_v32 = vsel %vm4671_vm15, %v4218_v58, -inf }
 0x289   : > { %v5076_v46 = vrot.slane %v5075_v2, 1  ;;  %v5089_v1 = vmax.f32 %v5087_v50, %v5088_v49  ;;  %v5016_v16 = vrot.slane %v5015_v32, 4  ;;  %v5022_v6 = vsel %vm4671_vm15, %v4217_v54, -inf }
 0x28a   : > { %v5070_v45 = vmax.f32 %v5068_v53, %v5069_v7  ;;  %v5083_v62 = vrot.slane %v5082_v63, 1  ;;  %v5010_v56 = vmax.f32 %v5008_v37, %v5009_v39  ;;  %v5023_v14 = vrot.slane %v5022_v6, 4 }
 0x28b   : > { %v5077_v61 = vmax.f32 %v5075_v2, %v5076_v46  ;;  %v5090_v36 = vrot.slane %v5089_v1, 1  ;;  %v5017_v41 = vmax.f32 %v5015_v32, %v5016_v16  ;;  %v5029_v3 = vsel %vm4671_vm15, %v4219_v43, -inf }
 0x28c   : > { %v5084_v38 = vmax.f32 %v5082_v63, %v5083_v62  ;;  %v5642_v57 = vsel %vm5568_vm0, %v5070_v45, -inf  ;;  %v5011_v17 = vrot.slane %v5010_v56, 2  ;;  %v5024_v8 = vmax.f32 %v5022_v6, %v5023_v14 }
 0x28d   : > { %v5091_v55 = vmax.f32 %v5089_v1, %v5090_v36  ;;  %v5645_v24 = vsel %vm5568_vm0, %v5077_v61, -inf  ;;  %v5018_v21 = vrot.slane %v5017_v41, 2  ;;  %v5030_v22 = vrot.slane %v5029_v3, 4 }
 0x28e   : > { %v5648_v26 = vsel %vm5568_vm0, %v5084_v38, -inf  ;;  %v5012_v28 = vmax.f32 %v5010_v56, %v5011_v17  ;;  %v5025_v52 = vrot.slane %v5024_v8, 2  ;;  %v3868_v34 = vadd.f32 %v13867_v5, %v13914_v19 }
 0x28f   : > { %v5651_v35 = vsel %vm5568_vm0, %v5091_v55, -inf  ;;  %v5019_v25 = vmax.f32 %v5017_v41, %v5018_v21  ;;  %v5031_v40 = vmax.f32 %v5029_v3, %v5030_v22  ;;  %v3860_v48 = vadd.f32 %v13867_v5, %v13919_v10  ;;  %v6558_v47 = vld [vmem:[#allocation4 + $0x18] sm:$0xf] }
 0x290   : > { %v6847_v30 = vld [vmem:[#allocation4 + $0x18] sm:$0xf]  ;;  %v5013_v20 = vrot.slane %v5012_v28, 1  ;;  %v5026_v23 = vmax.f32 %v5024_v8, %v5025_v52  ;;  %v3950_v12 = vmax.f32 %v3868_v34, 0.0  ;;  %v5845_v50 = vsel %vm13596_vm11, 0, %v5844_v29  ;;  %6576 = vrot.lane.b32.xlu0 %v6558_v47, %s12635_s19 }
 0x291   : > { %6864 = vrot.lane.b32.xlu1 %v6847_v30, %s12631_s30  ;;  %v5020_v19 = vrot.slane %v5019_v25, 1  ;;  %v5032_v54 = vrot.slane %v5031_v40, 2  ;;  %v3948_v53 = vmax.f32 %v3860_v48, 0.0  ;;  %5846 = vst [vmem:[#allocation4 + $0x20] sm:$0x1] %v5845_v50  ;;  %v5870_v60 = vsel %vm13610_vm13, 0, %v5869_v44 }
 0x292   : > { %v5014_v5 = vmax.f32 %v5012_v28, %v5013_v20  ;;  %v5027_v10 = vrot.slane %v5026_v23, 1  ;;  %v4254_v58 = vcombine.high %v3950_v12, %v3950_v12  ;;  %v4261_v37 = vrot.slane %v3950_v12, %v13683_v33  ;;  %5871 = vst [vmem:[#allocation4 + $0x24] sm:$0x1] %v5870_v60 }
 0x293   : > { %v5021_v18 = vmax.f32 %v5019_v25, %v5020_v19  ;;  %v5033_v2 = vmax.f32 %v5031_v40, %v5032_v54  ;;  %v4220_v49 = vcombine.high %v3948_v53, %v3948_v53  ;;  %v4227_v43 = vrot.slane %v3948_v53, %v13683_v33 }
 0x294   : > { %v5028_v7 = vmax.f32 %v5026_v23, %v5027_v10  ;;  %v5641_v63 = vsel %vm5568_vm0, %v5014_v5, -inf  ;;  %v4268_v39 = vrot.slane %v4254_v58, %v13683_v33  ;;  %v4269_v32 = vcombine.high %v4261_v37, %v4261_v37 }
 0x295   : > { %v5034_v46 = vrot.slane %v5033_v2, 1  ;;  %v5643_v1 = vmax.f32 %v5641_v63, %v5642_v57  ;;  %v5644_v16 = vsel %vm5568_vm0, %v5021_v18, -inf  ;;  %v5092_v6 = vsel %vm4671_vm15, %v4261_v37, -inf  ;;  %v6277_v57 = vld [vmem:[#allocation4 + $0x8] sm:$0xf] }
 0x296   : > { %v5646_v45 = vmax.f32 %v5644_v16, %v5645_v24  ;;  %v5647_v62 = vsel %vm5568_vm0, %v5028_v7, -inf  ;;  %v4270_v56 = vcombine.high %v4268_v39, %v4268_v39  ;;  %v5093_v14 = vrot.slane %v5092_v6, 4  ;;  %6285 = vst.msk [vmem:[#allocation5 + $0xc] sm:$0xf] %vm5825_vm8, %v6277_v57  ;;  %v6895_v57 = vld [vmem:[#allocation4 + $0x14] sm:$0x1] }
 0x297   : > { %v5035_v61 = vmax.f32 %v5033_v2, %v5034_v46  ;;  %v5649_v36 = vmax.f32 %v5647_v62, %v5648_v26  ;;  %v11578_v41 = vpack.c.bf16 %v5643_v1, %v5643_v1  ;;  %v5099_v3 = vsel %vm4671_vm15, %v4269_v32, -inf }
 0x298   : > { %v11579_v38 = vpack.c.bf16 %v5646_v45, %v5646_v45  ;;  %v5094_v17 = vmax.f32 %v5092_v6, %v5093_v14  ;;  %v5100_v8 = vrot.slane %v5099_v3, 4  ;;  %v5106_v55 = vsel %vm4671_vm15, %v4268_v39, -inf }
 0x299   : > { %v5650_v21 = vsel %vm5568_vm0, %v5035_v61, -inf  ;;  %v11580_v22 = vpack.c.bf16 %v5649_v36, %v5649_v36  ;;  %v6100_v29 = vunpack.c.l.b16 %v11578_v41  ;;  %v5107_v24 = vrot.slane %v5106_v55, 4  ;;  %v6894_v41 = vld [vmem:[#allocation4 + $0x10] sm:$0xf] }
 0x29a   : > { %v5652_v28 = vmax.f32 %v5650_v21, %v5651_v35  ;;  %v6101_v52 = vunpack.c.l.b16 %v11579_v38  ;;  %v5095_v34 = vrot.slane %v5094_v17, 2  ;;  %v5101_v26 = vmax.f32 %v5099_v3, %v5100_v8 }
 0x29b   : > { %v6102_v44 = vunpack.c.l.b16 %v11580_v22  ;;  %v5108_v25 = vmax.f32 %v5106_v55, %v5107_v24  ;;  %v5113_v40 = vsel %vm4671_vm15, %v4270_v56, -inf  ;;  %v4234_v48 = vrot.slane %v4220_v49, %v13683_v33  ;;  %v14060_v56 = vpop.f32.mrb[20].mxu0 }
 0x29c   : > { %v11581_v47 = vpack.c.bf16 %v5652_v28, %v5652_v28  ;;  %v6164_v30 = vsel %vm6140_vm5, %v6101_v52, %v6100_v29  ;;  %v5096_v20 = vmax.f32 %v5094_v17, %v5095_v34  ;;  %v5102_v23 = vrot.slane %v5101_v26, 2  ;;  %v14062_v3 = vpop.f32.mrb[21].mxu0 }
 0x29d   : > { %v6165_v12 = vsel %vm15601_vm9, %v6102_v44, %v6164_v30  ;;  %v5109_v50 = vrot.slane %v5108_v25, 2  ;;  %v5114_v19 = vrot.slane %v5113_v40, 4  ;;  %v4235_v54 = vcombine.high %v4227_v43, %v4227_v43  ;;  %v14068_v21 = vpop.f32.mrb[22].mxu0 }
 0x29e   : > { %v6103_v35 = vunpack.c.l.b16 %v11581_v47  ;;  %v5097_v53 = vrot.slane %v5096_v20, 1  ;;  %v5103_v60 = vmax.f32 %v5101_v26, %v5102_v23  ;;  %v4236_v5 = vcombine.high %v4234_v48, %v4234_v48  ;;  %v14071_v52 = vpop.f32.mrb[23].mxu0  ;;  %v6462_v23 = vld [vmem:[#allocation4 + $0x18] sm:$0xe] }
 0x29f   : > { %v5110_v10 = vmax.f32 %v5108_v25, %v5109_v50  ;;  %v5115_v58 = vmax.f32 %v5113_v40, %v5114_v19  ;;  %v5036_v37 = vsel %vm4671_vm15, %v4227_v43, -inf  ;;  %v5043_v18 = vsel %vm4671_vm15, %v4235_v54, -inf  ;;  %v6296_v40 = vld [vmem:[#allocation4 + $0x10] sm:$0xf] }
 0x2a0   : > { %v5098_v2 = vmax.f32 %v5096_v20, %v5097_v53  ;;  %v5104_v49 = vrot.slane %v5103_v60, 1  ;;  %v5037_v7 = vrot.slane %v5036_v37, 4  ;;  %v5044_v63 = vrot.slane %v5043_v18, 4 }
 0x2a1   : > { %v5111_v39 = vrot.slane %v5110_v10, 1  ;;  %v5116_v32 = vrot.slane %v5115_v58, 2  ;;  %v5050_v46 = vsel %vm4671_vm15, %v4234_v48, -inf  ;;  %v5057_v1 = vsel %vm4671_vm15, %v4236_v5, -inf }
 0x2a2   : > { %v5105_v16 = vmax.f32 %v5103_v60, %v5104_v49  ;;  %v5654_v6 = vsel %vm5568_vm0, %v5098_v2, -inf  ;;  %v5038_v45 = vmax.f32 %v5036_v37, %v5037_v7  ;;  %v5045_v62 = vmax.f32 %v5043_v18, %v5044_v63 }
 0x2a3   : > { %v5112_v43 = vmax.f32 %v5110_v10, %v5111_v39  ;;  %v5117_v14 = vmax.f32 %v5115_v58, %v5116_v32  ;;  %v5051_v61 = vrot.slane %v5050_v46, 4  ;;  %v5058_v36 = vrot.slane %v5057_v1, 4 }
 0x2a4   : > { %v5657_v38 = vsel %vm5568_vm0, %v5105_v16, -inf  ;;  %v5039_v17 = vrot.slane %v5038_v45, 2  ;;  %v5046_v8 = vrot.slane %v5045_v62, 2  ;;  %v14066_v55 = vsel %vm6144_vm14, %v6103_v35, %v6165_v12  ;;  %v6463_v35 = vld [vmem:[#allocation4 + $0x1c] sm:$0x1] }
 0x2a5   : > { %v5118_v22 = vrot.slane %v5117_v14, 1  ;;  %v5660_v29 = vsel %vm5568_vm0, %v5112_v43, -inf  ;;  %v5052_v24 = vmax.f32 %v5050_v46, %v5051_v61  ;;  %v5059_v28 = vmax.f32 %v5057_v1, %v5058_v36  ;;  %v6297_v61 = vld [vmem:[#allocation4 + $0x14] sm:$0x1] }
 0x2a6   : > { %v5040_v34 = vmax.f32 %v5038_v45, %v5039_v17  ;;  %v5047_v26 = vmax.f32 %v5045_v62, %v5046_v8  ;;  %v6911_v44 = vshrl.u32 %v6894_v41, 16  ;;  %v6914_v25 = vshll.u32 %v6894_v41, 16 }
 0x2a7   : > { %v5119_v48 = vmax.f32 %v5117_v14, %v5118_v22  ;;  %v5053_v47 = vrot.slane %v5052_v24, 2  ;;  %v5060_v30 = vrot.slane %v5059_v28, 2  ;;  %v6920_v20 = vshll.u32 %v6895_v57, 16  ;;  %v6753_v57 = vld [vmem:[#allocation4 + $0x18] sm:$0xe] }
 0x2a8   : > { %v5041_v12 = vrot.slane %v5040_v34, 1  ;;  %v5048_v50 = vrot.slane %v5047_v26, 1  ;;  %v6913_v19 = vrot.slane %v6911_v44, 4  ;;  %v6916_v54 = vrot.slane %v6914_v25, 5  ;;  %v6754_v22 = vld [vmem:[#allocation4 + $0x1c] sm:$0x1] }
 0x2a9   : > { %v5663_v53 = vsel %vm5568_vm0, %v5119_v48, -inf  ;;  %v5054_v60 = vmax.f32 %v5052_v24, %v5053_v47  ;;  %v5061_v5 = vmax.f32 %v5059_v28, %v5060_v30  ;;  %v6922_v10 = vrot.slane %v6920_v20, 5  ;;  %v6249_v47 = vld [vmem:[#allocation4 + $0x24] sm:$0x1] }
 0x2aa   : > { %v5042_v58 = vmax.f32 %v5040_v34, %v5041_v12  ;;  %v5049_v37 = vmax.f32 %v5047_v26, %v5048_v50  ;;  %v6917_v18 = vor.u32 %v6916_v54, %v6913_v19  ;;  %v11240_v2 = vrot.slane %v6462_v23, 9 }
 0x2ab   : > { %v5055_v49 = vrot.slane %v5054_v60, 1  ;;  %v5062_v7 = vrot.slane %v5061_v5, 1  ;;  %v6505_v63 = vrot.slane %v6463_v35, 5  ;;  %v6340_v39 = vshrl.u32 %v6296_v40, 16 }
 0x2ac   : > { %v5653_v32 = vsel %vm5568_vm0, %v5042_v58, -inf  ;;  %v5656_v46 = vsel %vm5568_vm0, %v5049_v37, -inf  ;;  %v6918_v1 = vrot.slane %v6917_v18, 4  ;;  %v6343_v16 = vshll.u32 %v6296_v40, 16  ;;  %v14097_v58 = vld [vmem:[#allocation4 + $0x18] sm:$0xf] }
 0x2ad   : > { %v5056_v45 = vmax.f32 %v5054_v60, %v5055_v49  ;;  %v5063_v62 = vmax.f32 %v5061_v5, %v5062_v7  ;;  %v5655_v43 = vmax.f32 %v5653_v32, %v5654_v6  ;;  %v5658_v14 = vmax.f32 %v5656_v46, %v5657_v38  ;;  %v5847_v5 = vld [vmem:[#allocation4 + $0x28] sm:$0x1] }
 0x2ae   : > { %v6923_v36 = vsel %vm13635_vm4, %v6918_v1, %v6922_v10  ;;  %v6506_v41 = vsel %vm13644_vm6, %v11240_v2, %v6505_v63  ;;  %v6342_v17 = vrot.slane %v6340_v39, 4  ;;  %v6345_v8 = vrot.slane %v6343_v16, 5  ;;  %v5872_v10 = vld [vmem:[#allocation4 + $0x2c] sm:$0x1]  ;;  %v6246_v39 = vld [vmem:[#allocation4 + $0x20] sm:$0xf] }
 0x2af   : > { %v5659_v24 = vsel %vm5568_vm0, %v5056_v45, -inf  ;;  %v5662_v28 = vsel %vm5568_vm0, %v5063_v62, -inf  ;;  %v11582_v34 = vpack.c.bf16 %v5655_v43, %v5655_v43  ;;  %v11583_v26 = vpack.c.bf16 %v5658_v14, %v5658_v14  ;;  %7022 = vrot.lane.b32.xlu0 %v6923_v36, %s12635_s19  ;;  %6529 = vrot.lane.b32.xlu1 %v6506_v41, %s12631_s30 }
 0x2b0   : > { %v5661_v6 = vmax.f32 %v5659_v24, %v5660_v29  ;;  %v5664_v38 = vmax.f32 %v5662_v28, %v5663_v53  ;;  %v6346_v44 = vor.u32 %v6345_v8, %v6342_v17  ;;  %v6349_v25 = vshll.u32 %v6297_v61, 16  ;;  %v14091_v29 = vld [vmem:[%s15578_s2] ss:$0 sm:$0xff] }
 0x2b1   : > { %v6104_v40 = vunpack.c.l.b16 %v11582_v34  ;;  %v6105_v48 = vunpack.c.l.b16 %v11583_v26  ;;  %v11247_v30 = vrot.slane %v6753_v57, 9  ;;  %v6791_v20 = vrot.slane %v6754_v22, 5 }
 0x2b2   : > { %v11584_v23 = vpack.c.bf16 %v5661_v6, %v5661_v6  ;;  %v11621_v12 = vpack.c.bf16 %v5664_v38, %v5664_v38  ;;  %v6347_v50 = vrot.slane %v6346_v44, 4  ;;  %v6351_v19 = vrot.slane %v6349_v25, 5 }
 0x2b3   : > { %v6167_v54 = vsel %vm6146_vm12, %v6104_v40, %v14066_v55  ;;  %v6792_v35 = vsel %vm13644_vm6, %v11247_v30, %v6791_v20  ;;  %v3881_v53 = vadd.f32 %v14091_v29, %v13987_v51  ;;  %v3873_v60 = vadd.f32 %v14091_v29, %v13990_v9 }
 0x2b4   : > { %v6106_v37 = vunpack.c.l.b16 %v11584_v23  ;;  %v6168_v55 = vsel %vm6148_vm10, %v6105_v48, %v6167_v54  ;;  %v6250_v18 = vsel %vm13596_vm11, %v11621_v12, %v6249_v47  ;;  %v6352_v2 = vsel %vm13635_vm4, %v6347_v50, %v6351_v19 }
 0x2b5   : > { %6251 = vst [vmem:[#allocation4 + $0x24] sm:$0x1] %v6250_v18  ;;  %6427 = vrot.lane.b32.xlu0 %v6352_v2, %s12632_s14  ;;  %v3953_v51 = vmax.f32 %v3881_v53, 0.0  ;;  %v3951_v49 = vmax.f32 %v3873_v60, 0.0  ;;  %v3884_v9 = vadd.f32 %v14091_v29, %v13995_v11  ;;  %v3876_v7 = vadd.f32 %v14091_v29, %v14000_v13 }
 0x2b6   : > { %v6169_v63 = vsel %vm6150_vm7, %v6106_v37, %v6168_v55  ;;  %v5848_v32 = vsel %vm13596_vm11, 0, %v5847_v5  ;;  %v5873_v46 = vsel %vm13610_vm13, 0, %v5872_v10  ;;  %v6925_v1 = vshrl.u32 %v14097_v58, 16 }
 0x2b7   : > { %v6200_v16 = vpack.c.b16 %v6169_v63, %v6169_v63  ;;  %v4305_v45 = vcombine.high %v3953_v51, %v3953_v51  ;;  %v4312_v62 = vrot.slane %v3953_v51, %v13683_v33  ;;  %v4271_v43 = vcombine.high %v3951_v49, %v3951_v49  ;;  %5849 = vst [vmem:[#allocation4 + $0x28] sm:$0x1] %v5848_v32 }
 0x2b8   : > { %5874 = vst [vmem:[#allocation4 + $0x2c] sm:$0x1] %v5873_v46  ;;  %v4278_v11 = vrot.slane %v3951_v49, %v13683_v33  ;;  %v14117_v13 = vmax.f32 %v3884_v9, 0.0  ;;  %v14119_v14 = vmax.f32 %v3876_v7, 0.0  ;;  %v14121_v61 = vrot.slane %v6925_v1, 4 }
 0x2b9   : > { %v6247_v36 = vsel %vm13799_vm3, %v6200_v16, %v6246_v39  ;;  %6817 = vrot.lane.b32.xlu0 %v6792_v35, %s12632_s14  ;;  %v4319_v41 = vrot.slane %v4305_v45, %v13683_v33  ;;  %v4320_v17 = vcombine.high %v4312_v62, %v4312_v62  ;;  %v5176_v8 = vsel %vm4671_vm15, %v4312_v62, -inf }
 0x2ba   : > { %6248 = vst [vmem:[#allocation4 + $0x20] sm:$0xf] %v6247_v36  ;;  %v5177_v57 = vrot.slane %v5176_v8, 4  ;;  %v4285_v22 = vrot.slane %v4271_v43, %v13683_v33  ;;  %v4286_v24 = vcombine.high %v4278_v11, %v4278_v11  ;;  %v5120_v28 = vsel %vm4671_vm15, %v4278_v11, -inf }
 0x2bb   : > { %v4321_v34 = vcombine.high %v4319_v41, %v4319_v41  ;;  %v5183_v26 = vsel %vm4671_vm15, %v4320_v17, -inf  ;;  %v5190_v6 = vsel %vm4671_vm15, %v4319_v41, -inf  ;;  %v5121_v38 = vrot.slane %v5120_v28, 4 }
 0x2bc   : > { %v5178_v44 = vmax.f32 %v5176_v8, %v5177_v57  ;;  %v5184_v25 = vrot.slane %v5183_v26, 4  ;;  %v5191_v40 = vrot.slane %v5190_v6, 4  ;;  %v4287_v48 = vcombine.high %v4285_v22, %v4285_v22 }
 0x2bd   : > { %v5197_v47 = vsel %vm4671_vm15, %v4321_v34, -inf  ;;  %v5122_v30 = vmax.f32 %v5120_v28, %v5121_v38  ;;  %v5127_v20 = vsel %vm4671_vm15, %v4286_v24, -inf  ;;  %v5134_v23 = vsel %vm4671_vm15, %v4285_v22, -inf }
 0x2be   : > { %v5179_v12 = vrot.slane %v5178_v44, 2  ;;  %v5185_v50 = vmax.f32 %v5183_v26, %v5184_v25  ;;  %v5192_v19 = vmax.f32 %v5190_v6, %v5191_v40  ;;  %v5198_v54 = vrot.slane %v5197_v47, 4 }
 0x2bf   : > { %v5123_v35 = vrot.slane %v5122_v30, 2  ;;  %v5128_v53 = vrot.slane %v5127_v20, 4  ;;  %v5135_v60 = vrot.slane %v5134_v23, 4  ;;  %v5141_v5 = vsel %vm4671_vm15, %v4287_v48, -inf }
 0x2c0   : > { %v5180_v10 = vmax.f32 %v5178_v44, %v5179_v12  ;;  %v5186_v37 = vrot.slane %v5185_v50, 2  ;;  %v5193_v55 = vrot.slane %v5192_v19, 2  ;;  %v5199_v18 = vmax.f32 %v5197_v47, %v5198_v54 }
 0x2c1   : > { %v5124_v2 = vmax.f32 %v5122_v30, %v5123_v35  ;;  %v5129_v51 = vmax.f32 %v5127_v20, %v5128_v53  ;;  %v5136_v49 = vmax.f32 %v5134_v23, %v5135_v60  ;;  %v5142_v9 = vrot.slane %v5141_v5, 4  ;;  %v6848_v7 = vld [vmem:[#allocation4 + $0x20] sm:$0xf] }
 0x2c2   : > { %v6559_v63 = vld [vmem:[#allocation4 + $0x20] sm:$0xf]  ;;  %v5181_v39 = vrot.slane %v5180_v10, 1  ;;  %v5187_v32 = vmax.f32 %v5185_v50, %v5186_v37  ;;  %v5194_v46 = vmax.f32 %v5192_v19, %v5193_v55  ;;  %v5200_v1 = vrot.slane %v5199_v18, 2  ;;  %6866 = vrot.lane.b32.xlu0 %v6848_v7, %s12631_s30 }
 0x2c3   : > { %6578 = vrot.lane.b32.xlu1 %v6559_v63, %s12635_s19  ;;  %v5125_v16 = vrot.slane %v5124_v2, 1  ;;  %v5130_v45 = vrot.slane %v5129_v51, 2  ;;  %v5137_v62 = vrot.slane %v5136_v49, 2  ;;  %v5143_v43 = vmax.f32 %v5141_v5, %v5142_v9  ;;  %v14152_v9 = vpop.f32.mrb[24].mxu0 }
 0x2c4   : > { %v5182_v11 = vmax.f32 %v5180_v10, %v5181_v39  ;;  %v5188_v36 = vrot.slane %v5187_v32, 1  ;;  %v5195_v41 = vrot.slane %v5194_v46, 1  ;;  %v5201_v17 = vmax.f32 %v5199_v18, %v5200_v1 }
 0x2c5   : > { %v5126_v8 = vmax.f32 %v5124_v2, %v5125_v16  ;;  %v5131_v57 = vmax.f32 %v5129_v51, %v5130_v45  ;;  %v5138_v22 = vmax.f32 %v5136_v49, %v5137_v62  ;;  %v5144_v24 = vrot.slane %v5143_v43, 2 }
 0x2c6   : > { %v5189_v28 = vmax.f32 %v5187_v32, %v5188_v36  ;;  %v5196_v34 = vmax.f32 %v5194_v46, %v5195_v41  ;;  %v5202_v26 = vrot.slane %v5201_v17, 1  ;;  %v5666_v6 = vsel %vm5568_vm0, %v5182_v11, -inf  ;;  %v14157_v32 = vpop.f32.mrb[25].mxu0 }
 0x2c7   : > { %v5132_v38 = vrot.slane %v5131_v57, 1  ;;  %v5139_v44 = vrot.slane %v5138_v22, 1  ;;  %v5145_v25 = vmax.f32 %v5143_v43, %v5144_v24  ;;  %v5665_v40 = vsel %vm5568_vm0, %v5126_v8, -inf  ;;  %v14159_v62 = vpop.f32.mrb[26].mxu0 }
 0x2c8   : > { %v5203_v48 = vmax.f32 %v5201_v17, %v5202_v26  ;;  %v5669_v47 = vsel %vm5568_vm0, %v5189_v28, -inf  ;;  %v5672_v30 = vsel %vm5568_vm0, %v5196_v34, -inf  ;;  %v5667_v20 = vmax.f32 %v5665_v40, %v5666_v6  ;;  %v14165_v17 = vpop.f32.mrb[27].mxu0  ;;  %v6278_v28 = vld [vmem:[#allocation4 + $0x10] sm:$0xf] }
 0x2c9   : > { %v5133_v23 = vmax.f32 %v5131_v57, %v5132_v38  ;;  %v5140_v12 = vmax.f32 %v5138_v22, %v5139_v44  ;;  %v5146_v50 = vrot.slane %v5145_v25, 1  ;;  %v4322_v19 = vcombine.high %v14117_v13, %v14117_v13  ;;  %6286 = vst.msk [vmem:[#allocation5 + $0x18] sm:$0xf] %vm5825_vm8, %v6278_v28 }
 0x2ca   : > { %v5675_v54 = vsel %vm5568_vm0, %v5203_v48, -inf  ;;  %v11586_v35 = vpack.c.bf16 %v5667_v20, %v5667_v20  ;;  %v4329_v53 = vrot.slane %v14117_v13, %v13683_v33  ;;  %v4288_v60 = vcombine.high %v14119_v14, %v14119_v14 }
 0x2cb   : > { %v5147_v5 = vmax.f32 %v5145_v25, %v5146_v50  ;;  %v5668_v10 = vsel %vm5568_vm0, %v5133_v23, -inf  ;;  %v5671_v37 = vsel %vm5568_vm0, %v5140_v12, -inf  ;;  %v4336_v55 = vrot.slane %v4322_v19, %v13683_v33 }
 0x2cc   : > { %v5670_v18 = vmax.f32 %v5668_v10, %v5669_v47  ;;  %v5673_v2 = vmax.f32 %v5671_v37, %v5672_v30  ;;  %v6108_v51 = vunpack.c.l.b16 %v11586_v35  ;;  %v4337_v49 = vcombine.high %v4329_v53, %v4329_v53 }
 0x2cd   : > { %v5674_v7 = vsel %vm5568_vm0, %v5147_v5, -inf  ;;  %v4338_v63 = vcombine.high %v4336_v55, %v4336_v55  ;;  %v5204_v13 = vsel %vm4671_vm15, %v4329_v53, -inf  ;;  %v5218_v39 = vsel %vm4671_vm15, %v4336_v55, -inf }
 0x2ce   : > { %v5676_v46 = vmax.f32 %v5674_v7, %v5675_v54  ;;  %v11587_v1 = vpack.c.bf16 %v5670_v18, %v5670_v18  ;;  %v11588_v16 = vpack.c.bf16 %v5673_v2, %v5673_v2  ;;  %v5205_v45 = vrot.slane %v5204_v13, 4 }
 0x2cf   : > { %v5211_v43 = vsel %vm4671_vm15, %v4337_v49, -inf  ;;  %v5219_v11 = vrot.slane %v5218_v39, 4  ;;  %v5225_v36 = vsel %vm4671_vm15, %v4338_v63, -inf  ;;  %v4295_v41 = vrot.slane %v14119_v14, %v13683_v33 }
 0x2d0   : > { %v11589_v8 = vpack.c.bf16 %v5676_v46, %v5676_v46  ;;  %v6109_v57 = vunpack.c.l.b16 %v11587_v1  ;;  %v6110_v22 = vunpack.c.l.b16 %v11588_v16  ;;  %v5206_v24 = vmax.f32 %v5204_v13, %v5205_v45 }
 0x2d1   : > { %v5212_v34 = vrot.slane %v5211_v43, 4  ;;  %v5220_v26 = vmax.f32 %v5218_v39, %v5219_v11  ;;  %v5226_v6 = vrot.slane %v5225_v36, 4  ;;  %v4302_v38 = vrot.slane %v4288_v60, %v13683_v33 }
 0x2d2   : > { %v6111_v44 = vunpack.c.l.b16 %v11589_v8  ;;  %v6170_v25 = vsel %vm6140_vm5, %v6109_v57, %v6108_v51  ;;  %v5207_v40 = vrot.slane %v5206_v24, 2  ;;  %v4303_v48 = vcombine.high %v4295_v41, %v4295_v41  ;;  %v6464_v8 = vld [vmem:[#allocation4 + $0x20] sm:$0xe] }
 0x2d3   : > { %v6171_v14 = vsel %vm15601_vm9, %v6110_v22, %v6170_v25  ;;  %v5213_v47 = vmax.f32 %v5211_v43, %v5212_v34  ;;  %v5221_v30 = vrot.slane %v5220_v26, 2  ;;  %v5227_v20 = vmax.f32 %v5225_v36, %v5226_v6  ;;  %v6465_v34 = vld [vmem:[#allocation4 + $0x24] sm:$0x1] }
 0x2d4   : > { %v5208_v23 = vmax.f32 %v5206_v24, %v5207_v40  ;;  %v4304_v12 = vcombine.high %v4302_v38, %v4302_v38  ;;  %v5148_v50 = vsel %vm4671_vm15, %v4295_v41, -inf  ;;  %v5155_v19 = vsel %vm4671_vm15, %v4303_v48, -inf  ;;  %v6897_v40 = vld [vmem:[#allocation4 + $0x1c] sm:$0x1]  ;;  %v6298_v48 = vld [vmem:[#allocation4 + $0x18] sm:$0xf] }
 0x2d5   : > { %v5214_v54 = vrot.slane %v5213_v47, 2  ;;  %v5222_v35 = vmax.f32 %v5220_v26, %v5221_v30  ;;  %v5228_v53 = vrot.slane %v5227_v20, 2  ;;  %v5149_v60 = vrot.slane %v5148_v50, 4 }
 0x2d6   : > { %v5209_v5 = vrot.slane %v5208_v23, 1  ;;  %v5156_v10 = vrot.slane %v5155_v19, 4  ;;  %v5162_v37 = vsel %vm4671_vm15, %v4302_v38, -inf  ;;  %v5169_v55 = vsel %vm4671_vm15, %v4304_v12, -inf }
 0x2d7   : > { %v5215_v18 = vmax.f32 %v5213_v47, %v5214_v54  ;;  %v5223_v2 = vrot.slane %v5222_v35, 1  ;;  %v5229_v51 = vmax.f32 %v5227_v20, %v5228_v53  ;;  %v5150_v49 = vmax.f32 %v5148_v50, %v5149_v60 }
 0x2d8   : > { %v5210_v7 = vmax.f32 %v5208_v23, %v5209_v5  ;;  %v5157_v63 = vmax.f32 %v5155_v19, %v5156_v10  ;;  %v5163_v13 = vrot.slane %v5162_v37, 4  ;;  %v5170_v39 = vrot.slane %v5169_v55, 4 }
 0x2d9   : > { %v5216_v46 = vrot.slane %v5215_v18, 1  ;;  %v5224_v1 = vmax.f32 %v5222_v35, %v5223_v2  ;;  %v5230_v16 = vrot.slane %v5229_v51, 1  ;;  %v5151_v45 = vrot.slane %v5150_v49, 2  ;;  %v14180_v35 = vpop.permute.xlu1 %6876 }
 0x2da   : > { %v5678_v43 = vsel %vm5568_vm0, %v5210_v7, -inf  ;;  %v5158_v11 = vrot.slane %v5157_v63, 2  ;;  %v5164_v36 = vmax.f32 %v5162_v37, %v5163_v13  ;;  %v5171_v41 = vmax.f32 %v5169_v55, %v5170_v39 }
 0x2db   : > { %v5217_v57 = vmax.f32 %v5215_v18, %v5216_v46  ;;  %v5231_v22 = vmax.f32 %v5229_v51, %v5230_v16  ;;  %v5684_v24 = vsel %vm5568_vm0, %v5224_v1, -inf  ;;  %v5152_v28 = vmax.f32 %v5150_v49, %v5151_v45  ;;  %v6299_v18 = vld [vmem:[#allocation4 + $0x1c] sm:$0x1]  ;;  %v6424_v46 = vpop.permute.xlu0 %6423 }
 0x2dc   : > { %v5159_v26 = vmax.f32 %v5157_v63, %v5158_v11  ;;  %v5165_v6 = vrot.slane %v5164_v36, 2  ;;  %v5172_v38 = vrot.slane %v5171_v41, 2  ;;  %v6172_v25 = vsel %vm6144_vm14, %v6111_v44, %v6171_v14  ;;  %6448 = vst.msk [vmem:[#allocation5] sm:$0xf] %vm6447_vm1, %v6424_v46 }
 0x2dd   : > { %v5681_v47 = vsel %vm5568_vm0, %v5217_v57, -inf  ;;  %v5687_v30 = vsel %vm5568_vm0, %v5231_v22, -inf  ;;  %v5153_v20 = vrot.slane %v5152_v28, 1  ;;  %v11241_v23 = vrot.slane %v6464_v8, 9  ;;  %v14191_v22 = vpop.permute.xlu1 %6525 }
 0x2de   : > { %v5160_v12 = vrot.slane %v5159_v26, 1  ;;  %v5166_v50 = vmax.f32 %v5164_v36, %v5165_v6  ;;  %v5173_v19 = vmax.f32 %v5171_v41, %v5172_v38  ;;  %v6509_v54 = vrot.slane %v6465_v34, 5  ;;  %v6755_v36 = vld [vmem:[#allocation4 + $0x20] sm:$0xe]  ;;  %v6756_v6 = vld [vmem:[#allocation4 + $0x24] sm:$0x1] }
 0x2df   : > { %v5154_v53 = vmax.f32 %v5152_v28, %v5153_v20  ;;  %v6928_v60 = vshll.u32 %v14097_v58, 16  ;;  %v6934_v5 = vshll.u32 %v6897_v40, 16  ;;  %v6354_v10 = vshrl.u32 %v6298_v48, 16 }
 0x2e0   : > { %v5161_v44 = vmax.f32 %v5159_v26, %v5160_v12  ;;  %v5167_v14 = vrot.slane %v5166_v50, 1  ;;  %v5174_v37 = vrot.slane %v5173_v19, 1  ;;  %v6510_v55 = vsel %vm13644_vm6, %v11241_v23, %v6509_v54  ;;  %v6524_v54 = vpop.permute.xlu0 %6523 }
 0x2e1   : > { %v5677_v2 = vsel %vm5568_vm0, %v5154_v53, -inf  ;;  %6531 = vrot.lane.b32.xlu0 %v6510_v55, %s12631_s30  ;;  %v6930_v51 = vrot.slane %v6928_v60, 5  ;;  %v6936_v49 = vrot.slane %v6934_v5, 5  ;;  %v6356_v7 = vrot.slane %v6354_v10, 4  ;;  %v5850_v53 = vld [vmem:[#allocation4 + $0x30] sm:$0x1]  ;;  %v14198_v60 = vpop.permute.xlu1 %6574 }
 0x2e2   : > { %v5168_v63 = vmax.f32 %v5166_v50, %v5167_v14  ;;  %v5175_v13 = vmax.f32 %v5173_v19, %v5174_v37  ;;  %v5679_v39 = vmax.f32 %v5677_v2, %v5678_v43  ;;  %v5680_v58 = vsel %vm5568_vm0, %v5161_v44, -inf  ;;  %v5875_v2 = vld [vmem:[#allocation4 + $0x34] sm:$0x1] }
 0x2e3   : > { %v5682_v1 = vmax.f32 %v5680_v58, %v5681_v47  ;;  %v6931_v16 = vor.u32 %v6930_v51, %v14121_v61  ;;  %v6357_v45 = vshll.u32 %v6298_v48, 16  ;;  %v6363_v11 = vshll.u32 %v6299_v18, 16  ;;  %v6255_v61 = vld [vmem:[#allocation4 + $0x2c] sm:$0x1] }
 0x2e4   : > { %v5683_v41 = vsel %vm5568_vm0, %v5168_v63, -inf  ;;  %v5686_v8 = vsel %vm5568_vm0, %v5175_v13, -inf  ;;  %v11590_v57 = vpack.c.bf16 %v5679_v39, %v5679_v39  ;;  %v11248_v47 = vrot.slane %v6755_v36, 9 }
 0x2e5   : > { %v5685_v28 = vmax.f32 %v5683_v41, %v5684_v24  ;;  %v5688_v34 = vmax.f32 %v5686_v8, %v5687_v30  ;;  %v11591_v43 = vpack.c.bf16 %v5682_v1, %v5682_v1  ;;  %v6932_v26 = vrot.slane %v6931_v16, 4 }
 0x2e6   : > { %v6112_v38 = vunpack.c.l.b16 %v11590_v57  ;;  %v6359_v40 = vrot.slane %v6357_v45, 5  ;;  %v6365_v48 = vrot.slane %v6363_v11, 5  ;;  %v6795_v30 = vrot.slane %v6756_v6, 5 }
 0x2e7   : > { %v11592_v20 = vpack.c.bf16 %v5685_v28, %v5685_v28  ;;  %v6113_v23 = vunpack.c.l.b16 %v11591_v43  ;;  %v11622_v12 = vpack.c.bf16 %v5688_v34, %v5688_v34  ;;  %v6937_v50 = vsel %vm13635_vm4, %v6932_v26, %v6936_v49  ;;  %v6252_v49 = vld [vmem:[#allocation4 + $0x28] sm:$0xf] }
 0x2e8   : > { %v6173_v19 = vsel %vm6146_vm12, %v6112_v38, %v6172_v25  ;;  %7024 = vrot.lane.b32.xlu1 %v6937_v50, %s12635_s19  ;;  %v6360_v24 = vor.u32 %v6359_v40, %v6356_v7  ;;  %vm6547_vm2 = vcmask 781824   ;;  %v3897_v25 = vadd.f32 %v14091_v29, %v14060_v56 }
 0x2e9   : > { %v6114_v5 = vunpack.c.l.b16 %v11592_v20  ;;  %v6174_v10 = vsel %vm6148_vm10, %v6113_v23, %v6173_v19  ;;  %v6256_v44 = vsel %vm13596_vm11, %v11622_v12, %v6255_v61  ;;  %6548 = vst.msk [vmem:[#allocation5] sm:$0xf] %vm6547_vm2, %v6524_v54  ;;  %v6796_v37 = vsel %vm13644_vm6, %v11248_v47, %v6795_v30 }
 0x2ea   : > { %6257 = vst [vmem:[#allocation4 + $0x2c] sm:$0x1] %v6256_v44  ;;  %v6361_v14 = vrot.slane %v6360_v24, 4  ;;  %v3889_v55 = vadd.f32 %v14091_v29, %v14062_v3  ;;  %v3900_v18 = vadd.f32 %v14091_v29, %v14068_v21  ;;  %v3957_v7 = vmax.f32 %v3897_v25, 0.0 }
 0x2eb   : > { %v6175_v51 = vsel %vm6150_vm7, %v6114_v5, %v6174_v10  ;;  %v3892_v63 = vadd.f32 %v14091_v29, %v14071_v52  ;;  %v5851_v56 = vsel %vm13596_vm11, 0, %v5850_v53  ;;  %v5876_v52 = vsel %vm13610_vm13, 0, %v5875_v2 }
 0x2ec   : > { %v6202_v13 = vpack.c.b16 %v6175_v51, %v6175_v51  ;;  %v6366_v39 = vsel %vm13635_vm4, %v6361_v14, %v6365_v48  ;;  %v3955_v58 = vmax.f32 %v3889_v55, 0.0  ;;  %v14219_v3 = vmax.f32 %v3900_v18, 0.0  ;;  %5852 = vst [vmem:[#allocation4 + $0x30] sm:$0x1] %v5851_v56  ;;  %5877 = vst [vmem:[#allocation4 + $0x34] sm:$0x1] %v5876_v52 }
 0x2ed   : > { %6429 = vrot.lane.b32.xlu1 %v6366_v39, %s12632_s14  ;;  %v4373_v21 = vcombine.high %v3957_v7, %v3957_v7  ;;  %v4380_v46 = vrot.slane %v3957_v7, %v13683_v33  ;;  %v14223_v1 = vmax.f32 %v3892_v63, 0.0 }
 0x2ee   : > { %v6253_v29 = vsel %vm13799_vm3, %v6202_v13, %v6252_v49  ;;  %v4339_v16 = vcombine.high %v3955_v58, %v3955_v58  ;;  %v4346_v45 = vrot.slane %v3955_v58, %v13683_v33  ;;  %v4390_v11 = vcombine.high %v14219_v3, %v14219_v3  ;;  %v6426_v36 = vpop.permute.xlu1 %6425 }
 0x2ef   : > { %6254 = vst [vmem:[#allocation4 + $0x28] sm:$0xf] %v6253_v29  ;;  %v4387_v41 = vrot.slane %v4373_v21, %v13683_v33  ;;  %v4388_v8 = vcombine.high %v4380_v46, %v4380_v46  ;;  %v5288_v57 = vsel %vm4671_vm15, %v4380_v46, -inf  ;;  %v14236_v28 = vrot.slane %v14219_v3, %v13683_v33  ;;  %6449 = vst.msk [vmem:[#allocation5 + $0xc] sm:$0xf] %vm6447_vm1, %v6426_v36  ;;  %v14252_v39 = vpop.f32.mrb[28].mxu0 }
 0x2f0   : > { %v5289_v34 = vrot.slane %v5288_v57, 4  ;;  %v4353_v43 = vrot.slane %v4339_v16, %v13683_v33  ;;  %v4354_v26 = vcombine.high %v4346_v45, %v4346_v45  ;;  %v5232_v6 = vsel %vm4671_vm15, %v4346_v45, -inf  ;;  %6549 = vst.msk [vmem:[#allocation5 + $0xc] sm:$0xf] %vm6547_vm2, %v14191_v22 }
 0x2f1   : > { %6819 = vrot.lane.b32.xlu1 %v6796_v37, %s12632_s14  ;;  %v4389_v38 = vcombine.high %v4387_v41, %v4387_v41  ;;  %v5295_v61 = vsel %vm4671_vm15, %v4388_v8, -inf  ;;  %v5302_v40 = vsel %vm4671_vm15, %v4387_v41, -inf  ;;  %v5233_v48 = vrot.slane %v5232_v6, 4  ;;  %v14254_v41 = vpop.f32.mrb[29].mxu0 }
 0x2f2   : > { %v5290_v47 = vmax.f32 %v5288_v57, %v5289_v34  ;;  %v5296_v20 = vrot.slane %v5295_v61, 4  ;;  %v5303_v23 = vrot.slane %v5302_v40, 4  ;;  %v4355_v12 = vcombine.high %v4353_v43, %v4353_v43 }
 0x2f3   : > { %v5309_v50 = vsel %vm4671_vm15, %v4389_v38, -inf  ;;  %v5234_v19 = vmax.f32 %v5232_v6, %v5233_v48  ;;  %v5239_v24 = vsel %vm4671_vm15, %v4354_v26, -inf  ;;  %v5246_v30 = vsel %vm4671_vm15, %v4353_v43, -inf  ;;  %v14256_v26 = vpop.f32.mrb[30].mxu0 }
 0x2f4   : > { %v5291_v22 = vrot.slane %v5290_v47, 2  ;;  %v5297_v54 = vmax.f32 %v5295_v61, %v5296_v20  ;;  %v5304_v53 = vmax.f32 %v5302_v40, %v5303_v23  ;;  %v5310_v5 = vrot.slane %v5309_v50, 4 }
 0x2f5   : > { %v5235_v10 = vrot.slane %v5234_v19, 2  ;;  %v5240_v44 = vrot.slane %v5239_v24, 4  ;;  %v5247_v25 = vrot.slane %v5246_v30, 4  ;;  %v5253_v14 = vsel %vm4671_vm15, %v4355_v12, -inf }
 0x2f6   : > { %v5292_v37 = vmax.f32 %v5290_v47, %v5291_v22  ;;  %v5298_v55 = vrot.slane %v5297_v54, 2  ;;  %v5305_v18 = vrot.slane %v5304_v53, 2  ;;  %v5311_v2 = vmax.f32 %v5309_v50, %v5310_v5  ;;  %v6560_v51 = vld [vmem:[#allocation4 + $0x28] sm:$0xf] }
 0x2f7   : > { %v6849_v49 = vld [vmem:[#allocation4 + $0x28] sm:$0xf]  ;;  %v5236_v7 = vmax.f32 %v5234_v19, %v5235_v10  ;;  %v5241_v63 = vmax.f32 %v5239_v24, %v5240_v44  ;;  %v5248_v56 = vmax.f32 %v5246_v30, %v5247_v25  ;;  %v5254_v13 = vrot.slane %v5253_v14, 4  ;;  %6580 = vrot.lane.b32.xlu0 %v6560_v51, %s12635_s19 }
 0x2f8   : > { %6868 = vrot.lane.b32.xlu1 %v6849_v49, %s12631_s30  ;;  %v5293_v58 = vrot.slane %v5292_v37, 1  ;;  %v5299_v21 = vmax.f32 %v5297_v54, %v5298_v55  ;;  %v5306_v46 = vmax.f32 %v5304_v53, %v5305_v18  ;;  %v5312_v52 = vrot.slane %v5311_v2, 2 }
 0x2f9   : > { %v5237_v29 = vrot.slane %v5236_v7, 1  ;;  %v5242_v16 = vrot.slane %v5241_v63, 2  ;;  %v5249_v45 = vrot.slane %v5248_v56, 2  ;;  %v5255_v36 = vmax.f32 %v5253_v14, %v5254_v13 }
 0x2fa   : > { %v5294_v8 = vmax.f32 %v5292_v37, %v5293_v58  ;;  %v5300_v57 = vrot.slane %v5299_v21, 1  ;;  %v5307_v34 = vrot.slane %v5306_v46, 1  ;;  %v5313_v43 = vmax.f32 %v5311_v2, %v5312_v52 }
 0x2fb   : > { %v5238_v6 = vmax.f32 %v5236_v7, %v5237_v29  ;;  %v5243_v38 = vmax.f32 %v5241_v63, %v5242_v16  ;;  %v5250_v61 = vmax.f32 %v5248_v56, %v5249_v45  ;;  %v5256_v40 = vrot.slane %v5255_v36, 2  ;;  %v14273_v63 = vpop.f32.mrb[31].mxu0 }
 0x2fc   : > { %v5301_v48 = vmax.f32 %v5299_v21, %v5300_v57  ;;  %v5308_v47 = vmax.f32 %v5306_v46, %v5307_v34  ;;  %v5314_v20 = vrot.slane %v5313_v43, 1  ;;  %v5690_v23 = vsel %vm5568_vm0, %v5294_v8, -inf }
 0x2fd   : > { %v5244_v12 = vrot.slane %v5243_v38, 1  ;;  %v5251_v50 = vrot.slane %v5250_v61, 1  ;;  %v5257_v19 = vmax.f32 %v5255_v36, %v5256_v40  ;;  %v5689_v24 = vsel %vm5568_vm0, %v5238_v6, -inf }
 0x2fe   : > { %v5315_v30 = vmax.f32 %v5313_v43, %v5314_v20  ;;  %v5693_v22 = vsel %vm5568_vm0, %v5301_v48, -inf  ;;  %v5696_v54 = vsel %vm5568_vm0, %v5308_v47, -inf  ;;  %v5691_v53 = vmax.f32 %v5689_v24, %v5690_v23  ;;  %v6573_v23 = vpop.permute.xlu0 %6572 }
 0x2ff   : > { %v5245_v5 = vmax.f32 %v5243_v38, %v5244_v12  ;;  %v5252_v10 = vmax.f32 %v5250_v61, %v5251_v50  ;;  %v5258_v44 = vrot.slane %v5257_v19, 1  ;;  %v4404_v25 = vrot.slane %v4390_v11, %v13683_v33 }
 0x300   : > { %v5699_v14 = vsel %vm5568_vm0, %v5315_v30, -inf  ;;  %v11594_v37 = vpack.c.bf16 %v5691_v53, %v5691_v53  ;;  %v4405_v55 = vcombine.high %v14236_v28, %v14236_v28  ;;  %v5316_v18 = vsel %vm4671_vm15, %v14236_v28, -inf  ;;  %v6279_v30 = vld [vmem:[#allocation4 + $0x18] sm:$0xf] }
 0x301   : > { %v5259_v2 = vmax.f32 %v5257_v19, %v5258_v44  ;;  %v5692_v51 = vsel %vm5568_vm0, %v5245_v5, -inf  ;;  %v5695_v49 = vsel %vm5568_vm0, %v5252_v10, -inf  ;;  %v4406_v7 = vcombine.high %v4404_v25, %v4404_v25  ;;  %6287 = vst.msk [vmem:[#allocation5 + $0x24] sm:$0xf] %vm5825_vm8, %v6279_v30 }
 0x302   : > { %v5694_v56 = vmax.f32 %v5692_v51, %v5693_v22  ;;  %v5697_v3 = vmax.f32 %v5695_v49, %v5696_v54  ;;  %v6116_v11 = vunpack.c.l.b16 %v11594_v37  ;;  %v5317_v13 = vrot.slane %v5316_v18, 4 }
 0x303   : > { %v5698_v58 = vsel %vm5568_vm0, %v5259_v2, -inf  ;;  %v5323_v21 = vsel %vm4671_vm15, %v4405_v55, -inf  ;;  %v5330_v46 = vsel %vm4671_vm15, %v4404_v25, -inf  ;;  %v5337_v28 = vsel %vm4671_vm15, %v4406_v7, -inf }
 0x304   : > { %v5700_v52 = vmax.f32 %v5698_v58, %v5699_v14  ;;  %v11595_v29 = vpack.c.bf16 %v5694_v56, %v5694_v56  ;;  %v11596_v16 = vpack.c.bf16 %v5697_v3, %v5697_v3  ;;  %v5318_v45 = vmax.f32 %v5316_v18, %v5317_v13  ;;  %v14291_v58 = vpop.permute.xlu0 %6813 }
 0x305   : > { %v5324_v36 = vrot.slane %v5323_v21, 4  ;;  %v5331_v8 = vrot.slane %v5330_v46, 4  ;;  %v5338_v57 = vrot.slane %v5337_v28, 4  ;;  %v4356_v34 = vcombine.high %v14223_v1, %v14223_v1 }
 0x306   : > { %v11597_v43 = vpack.c.bf16 %v5700_v52, %v5700_v52  ;;  %v6117_v6 = vunpack.c.l.b16 %v11595_v29  ;;  %v6118_v38 = vunpack.c.l.b16 %v11596_v16  ;;  %v5319_v61 = vrot.slane %v5318_v45, 2 }
 0x307   : > { %v5325_v40 = vmax.f32 %v5323_v21, %v5324_v36  ;;  %v5332_v48 = vmax.f32 %v5330_v46, %v5331_v8  ;;  %v5339_v47 = vmax.f32 %v5337_v28, %v5338_v57  ;;  %v4363_v20 = vrot.slane %v14223_v1, %v13683_v33 }
 0x308   : > { %v6119_v12 = vunpack.c.l.b16 %v11597_v43  ;;  %v6176_v50 = vsel %vm6140_vm5, %v6117_v6, %v6116_v11  ;;  %v5320_v19 = vmax.f32 %v5318_v45, %v5319_v61  ;;  %v4370_v24 = vrot.slane %v4356_v34, %v13683_v33  ;;  %v6605_v6 = vld [vmem:[#allocation4 + $0x8] sm:$0xf] }
 0x309   : > { %v6177_v22 = vsel %vm15601_vm9, %v6118_v38, %v6176_v50  ;;  %v5326_v54 = vrot.slane %v5325_v40, 2  ;;  %v5333_v53 = vrot.slane %v5332_v48, 2  ;;  %v5340_v5 = vrot.slane %v5339_v47, 2  ;;  %v6606_v38 = vld [vmem:[#allocation4 + $0xc] sm:$0x1]  ;;  %v14300_v50 = vpop.permute.xlu0 %6862 }
 0x30a   : > { %v5321_v10 = vrot.slane %v5320_v19, 1  ;;  %v4371_v44 = vcombine.high %v4363_v20, %v4363_v20  ;;  %v4372_v25 = vcombine.high %v4370_v24, %v4370_v24  ;;  %v5260_v1 = vsel %vm4671_vm15, %v4363_v20, -inf  ;;  %v6898_v20 = vld [vmem:[#allocation4 + $0x20] sm:$0xf] }
 0x30b   : > { %v5327_v14 = vmax.f32 %v5325_v40, %v5326_v54  ;;  %v5334_v37 = vmax.f32 %v5332_v48, %v5333_v53  ;;  %v5341_v55 = vmax.f32 %v5339_v47, %v5340_v5  ;;  %v5261_v18 = vrot.slane %v5260_v1, 4 }
 0x30c   : > { %v5322_v2 = vmax.f32 %v5320_v19, %v5321_v10  ;;  %v5267_v51 = vsel %vm4671_vm15, %v4371_v44, -inf  ;;  %v5274_v49 = vsel %vm4671_vm15, %v4370_v24, -inf  ;;  %v5281_v7 = vsel %vm4671_vm15, %v4372_v25, -inf  ;;  %v6899_v25 = vld [vmem:[#allocation4 + $0x24] sm:$0x1] }
 0x30d   : > { %v5328_v56 = vrot.slane %v5327_v14, 1  ;;  %v5335_v3 = vrot.slane %v5334_v37, 1  ;;  %v5342_v11 = vrot.slane %v5341_v55, 1  ;;  %v5262_v13 = vmax.f32 %v5260_v1, %v5261_v18 }
 0x30e   : > { %v5702_v21 = vsel %vm5568_vm0, %v5322_v2, -inf  ;;  %v5268_v46 = vrot.slane %v5267_v51, 4  ;;  %v5275_v28 = vrot.slane %v5274_v49, 4  ;;  %v5282_v52 = vrot.slane %v5281_v7, 4  ;;  %v12189_v2 = vld [vmem:[%s15579_s3 + $0x40] sm:$0xff]  }
 0x30f   : > { %v5329_v29 = vmax.f32 %v5327_v14, %v5328_v56  ;;  %v5336_v16 = vmax.f32 %v5334_v37, %v5335_v3  ;;  %v5343_v45 = vmax.f32 %v5341_v55, %v5342_v11  ;;  %v5263_v36 = vrot.slane %v5262_v13, 2  ;;  %v6466_v3 = vld [vmem:[#allocation4 + $0x28] sm:$0xe]  ;;  %11663 = vmatprep.subr.bf16.mxu1 %v12189_v2 }
 0x310   : > { %v5269_v8 = vmax.f32 %v5267_v51, %v5268_v46  ;;  %v5276_v57 = vmax.f32 %v5274_v49, %v5275_v28  ;;  %v5283_v34 = vmax.f32 %v5281_v7, %v5282_v52  ;;  %v14295_v43 = vsel %vm6144_vm14, %v6119_v12, %v6177_v22  ;;  %v14315_v52 = vpop.permute.xlu0 %6527 }
 0x311   : > { %v5705_v61 = vsel %vm5568_vm0, %v5329_v29, -inf  ;;  %v5708_v40 = vsel %vm5568_vm0, %v5336_v16, -inf  ;;  %v5711_v48 = vsel %vm5568_vm0, %v5343_v45, -inf  ;;  %v5264_v47 = vmax.f32 %v5262_v13, %v5263_v36 }
 0x312   : > { %v5270_v19 = vrot.slane %v5269_v8, 2  ;;  %v5277_v24 = vrot.slane %v5276_v57, 2  ;;  %v5284_v30 = vrot.slane %v5283_v34, 2  ;;  %vm15602_vm9 = vcmask 1044224  }
 0x313   : > { %v5265_v54 = vrot.slane %v5264_v47, 1  ;;  %6597 = vst.msk [vmem:[#allocation5] sm:$0xf] %vm15602_vm9, %v6573_v23  ;;  %v6622_v12 = vshrl.u32 %v6605_v6, 16  ;;  %v6625_v22 = vshll.u32 %v6605_v6, 16  ;;  %v6631_v53 = vshll.u32 %v6606_v38, 16 }
 0x314   : > { %6598 = vst.msk [vmem:[#allocation5 + $0xc] sm:$0xf] %vm15602_vm9, %v14198_v60  ;;  %v5271_v5 = vmax.f32 %v5269_v8, %v5270_v19  ;;  %v5278_v10 = vmax.f32 %v5276_v57, %v5277_v24  ;;  %v5285_v44 = vmax.f32 %v5283_v34, %v5284_v30  ;;  %v6939_v1 = vshrl.u32 %v6898_v20, 16  ;;  %v12190_v23 = vld [vmem:[%s15579_s3] sm:$0xff]   ;;  %v12191_v60 = vld [vmem:[%s15579_s3 + $0x48] sm:$0xff]  }
 0x315   : > { %v5266_v14 = vmax.f32 %v5264_v47, %v5265_v54  ;;  %v6624_v37 = vrot.slane %v6622_v12, 4  ;;  %v6627_v55 = vrot.slane %v6625_v22, 5  ;;  %v6633_v18 = vrot.slane %v6631_v53, 5  ;;  %v6467_v8 = vld [vmem:[#allocation4 + $0x2c] sm:$0x1]  ;;  %11664 = vmatpush3.bf16.msra.mxu1 %v12190_v23  ;;  %v12192_v34 = vld [vmem:[%s15579_s3 + $0x8] sm:$0xff]  }
 0x316   : > { %v5272_v51 = vrot.slane %v5271_v5, 1  ;;  %v5279_v49 = vrot.slane %v5278_v10, 1  ;;  %v5286_v7 = vrot.slane %v5285_v44, 1  ;;  %v6941_v56 = vrot.slane %v6939_v1, 4  ;;  %v6300_v57 = vld [vmem:[#allocation4 + $0x20] sm:$0xf]  ;;  %11665 = vmatprep.subr.bf16.mxu1 %v12191_v60 }
 0x317   : > { %v5701_v11 = vsel %vm5568_vm0, %v5266_v14, -inf  ;;  %v6628_v13 = vor.u32 %v6627_v55, %v6624_v37  ;;  %v6942_v46 = vshll.u32 %v6898_v20, 16  ;;  %v6948_v28 = vshll.u32 %v6899_v25, 16  ;;  %v12193_v20 = vld [vmem:[%s15579_s3 + $0x50] sm:$0xff]   ;;  %v6261_v1 = vld [vmem:[#allocation4 + $0x34] sm:$0x1] }
 0x318   : > { %v5273_v29 = vmax.f32 %v5271_v5, %v5272_v51  ;;  %v5280_v16 = vmax.f32 %v5278_v10, %v5279_v49  ;;  %v5287_v45 = vmax.f32 %v5285_v44, %v5286_v7  ;;  %v5703_v36 = vmax.f32 %v5701_v11, %v5702_v21  ;;  %v6301_v10 = vld [vmem:[#allocation4 + $0x24] sm:$0x1]  ;;  %v14328_v44 = vpop.permute.xlu0 %6576  ;;  %v6757_v23 = vld [vmem:[#allocation4 + $0x28] sm:$0xe]  ;;  %v6758_v60 = vld [vmem:[#allocation4 + $0x2c] sm:$0x1] }
 0x319   : > { %v6629_v6 = vrot.slane %v6628_v13, 4  ;;  %v6944_v38 = vrot.slane %v6942_v46, 5  ;;  %v6950_v47 = vrot.slane %v6948_v28, 5  ;;  %v11242_v19 = vrot.slane %v6466_v3, 9  ;;  %11666 = vmatpush3.bf16.msra.mxu1 %v12192_v34  ;;  %v12195_v3 = vld [vmem:[%s15579_s3 + $0x58] sm:$0xff]  }
 0x31a   : > { %v5704_v24 = vsel %vm5568_vm0, %v5273_v29, -inf  ;;  %v5707_v21 = vsel %vm5568_vm0, %v5280_v16, -inf  ;;  %v5710_v30 = vsel %vm5568_vm0, %v5287_v45, -inf  ;;  %v11598_v54 = vpack.c.bf16 %v5703_v36, %v5703_v36  ;;  %11667 = vmatprep.subr.bf16.mxu1 %v12193_v20 }
 0x31b   : > { %v5706_v12 = vmax.f32 %v5704_v24, %v5705_v61  ;;  %v5709_v22 = vmax.f32 %v5707_v21, %v5708_v40  ;;  %v5712_v53 = vmax.f32 %v5710_v30, %v5711_v48  ;;  %v6634_v5 = vsel %vm13635_vm4, %v6629_v6, %v6633_v18  ;;  %v12194_v61 = vld [vmem:[%s15579_s3 + $0x10] sm:$0xff]   ;;  %v6258_v24 = vld [vmem:[#allocation4 + $0x30] sm:$0xf] }
 0x31c   : > { %v6120_v25 = vunpack.c.l.b16 %v11598_v54  ;;  %6741 = vst.msk [vmem:[#allocation5 + $0x4] sm:$0xf] %vm5825_vm8, %v6634_v5  ;;  %v6945_v14 = vor.u32 %v6944_v38, %v6941_v56  ;;  %v6513_v37 = vrot.slane %v6467_v8, 5  ;;  %v6368_v55 = vshrl.u32 %v6300_v57, 16  ;;  %v14358_v8 = vld [vmem:[%s15578_s2] ss:$0 sm:$0xff] }
 0x31d   : > { %v11599_v40 = vpack.c.bf16 %v5706_v12, %v5706_v12  ;;  %v11600_v48 = vpack.c.bf16 %v5709_v22, %v5709_v22  ;;  %v11623_v2 = vpack.c.bf16 %v5712_v53, %v5712_v53  ;;  %6837 = vst.msk [vmem:[#allocation5 + $0x4] sm:$0xf] %vm6447_vm1, %v14291_v58  ;;  %v6371_v18 = vshll.u32 %v6300_v57, 16  ;;  %11668 = vmatpush3.bf16.msra.mxu1 %v12194_v61  ;;  %v5853_v6 = vld [vmem:[#allocation4 + $0x38] sm:$0x1] }
 0x31e   : > { %v6179_v51 = vsel %vm6146_vm12, %v6120_v25, %v14295_v43  ;;  %v6946_v49 = vrot.slane %v6945_v14, 4  ;;  %v6514_v7 = vsel %vm13644_vm6, %v11242_v19, %v6513_v37  ;;  %v6370_v56 = vrot.slane %v6368_v55, 4  ;;  %6886 = vst.msk [vmem:[#allocation5 + $0x4] sm:$0xf] %vm6547_vm2, %v14300_v50  ;;  %v12196_v50 = vld [vmem:[%s15579_s3 + $0x18] sm:$0xff]   ;;  %v12197_v19 = vld [vmem:[%s15579_s3 + $0x60] sm:$0xff]   ;;  %11669 = vmatprep.subr.bf16.mxu1 %v12195_v3 }
 0x31f   : > { %v6121_v58 = vunpack.c.l.b16 %v11599_v40  ;;  %v6122_v11 = vunpack.c.l.b16 %v11600_v48  ;;  %v6262_v13 = vsel %vm13596_vm11, %v11623_v2, %v6261_v1  ;;  %6533 = vrot.lane.b32.xlu1 %v6514_v7, %s12631_s30  ;;  %v6373_v43 = vrot.slane %v6371_v18, 5  ;;  %v5878_v38 = vld [vmem:[#allocation4 + $0x3c] sm:$0x1]  ;;  %v12199_v55 = vld [vmem:[%s15579_s3 + $0x68] sm:$0xff]  }
 0x320   : > { %6263 = vst [vmem:[#allocation4 + $0x34] sm:$0x1] %v6262_v13  ;;  %v6951_v46 = vsel %vm13635_vm4, %v6946_v49, %v6950_v47  ;;  %v6377_v28 = vshll.u32 %v6301_v10, 16  ;;  %v11249_v29 = vrot.slane %v6757_v23, 9  ;;  %v6799_v16 = vrot.slane %v6758_v60, 5 }
 0x321   : > { %v6180_v45 = vsel %vm6148_vm10, %v6121_v58, %v6179_v51  ;;  %7026 = vrot.lane.b32.xlu0 %v6951_v46, %s12635_s19  ;;  %v6374_v36 = vor.u32 %v6373_v43, %v6370_v56  ;;  %v3913_v57 = vadd.f32 %v14358_v8, %v14152_v9  ;;  %v3905_v34 = vadd.f32 %v14358_v8, %v14157_v32  ;;  %v7023_v47 = vpop.permute.xlu0 %7022 }
 0x322   : > { %v6181_v20 = vsel %vm6150_vm7, %v6122_v11, %v6180_v45  ;;  %v6379_v21 = vrot.slane %v6377_v28, 5  ;;  %v6800_v30 = vsel %vm13644_vm6, %v11249_v29, %v6799_v16  ;;  %v3916_v9 = vadd.f32 %v14358_v8, %v14159_v62  ;;  %7046 = vst.msk [vmem:[#allocation5 + $0x4] sm:$0xf] %vm15602_vm9, %v7023_v47  ;;  %11670 = vmatpush3.bf16.msra.mxu1 %v12196_v50  ;;  %v12198_v62 = vld [vmem:[%s15579_s3 + $0x20] sm:$0xff]   ;;  %v12200_v11 = vld [vmem:[%s15579_s3 + $0x28] sm:$0xff]   ;;  %v12201_v29 = vld [vmem:[%s15579_s3 + $0x70] sm:$0xff]  }
 0x323   : > { %v6204_v32 = vpack.c.b16 %v6181_v20, %v6181_v20  ;;  %v6375_v54 = vrot.slane %v6374_v36, 4  ;;  %v3961_v12 = vmax.f32 %v3913_v57, 0.0  ;;  %v3959_v22 = vmax.f32 %v3905_v34, 0.0  ;;  %11671 = vmatprep.subr.bf16.mxu1 %v12197_v19  ;;  %v6280_v57 = vld [vmem:[#allocation4 + $0x20] sm:$0xf] }
 0x324   : > { %v14373_v53 = vmax.f32 %v3916_v9, 0.0  ;;  %v3908_v5 = vadd.f32 %v14358_v8, %v14165_v17  ;;  %v5854_v10 = vsel %vm13596_vm11, 0, %v5853_v6  ;;  %v5879_v25 = vsel %vm13610_vm13, 0, %v5878_v38  ;;  %6288 = vst.msk [vmem:[#allocation5 + $0x30] sm:$0xf] %vm5825_vm8, %v6280_v57 }
 0x325   : > { %v6259_v1 = vsel %vm13799_vm3, %v6204_v32, %v6258_v24  ;;  %v6380_v14 = vsel %vm13635_vm4, %v6375_v54, %v6379_v21  ;;  %v4441_v37 = vcombine.high %v3961_v12, %v3961_v12  ;;  %v4448_v17 = vrot.slane %v3961_v12, %v13683_v33  ;;  %5855 = vst [vmem:[#allocation4 + $0x38] sm:$0x1] %v5854_v10  ;;  %v12202_v21 = vld [vmem:[%s15579_s3 + $0x30] sm:$0xff]  }
 0x326   : > { %5880 = vst [vmem:[#allocation4 + $0x3c] sm:$0x1] %v5879_v25  ;;  %6260 = vst [vmem:[#allocation4 + $0x30] sm:$0xf] %v6259_v1  ;;  %6431 = vrot.lane.b32.xlu0 %v6380_v14, %s12632_s14  ;;  %v4407_v61 = vcombine.high %v3959_v22, %v3959_v22  ;;  %v4414_v40 = vrot.slane %v3959_v22, %v13683_v33  ;;  %v4458_v48 = vcombine.high %v14373_v53, %v14373_v53 }
 0x327   : > { %v14398_v2 = vrot.slane %v14373_v53, %v13683_v33  ;;  %v4455_v18 = vrot.slane %v4441_v37, %v13683_v33  ;;  %v4456_v23 = vcombine.high %v4448_v17, %v4448_v17  ;;  %v5400_v60 = vsel %vm4671_vm15, %v4448_v17, -inf  ;;  %v6428_v49 = vpop.permute.xlu0 %6427  ;;  %11672 = vmatpush3.bf16.msra.mxu1 %v12198_v62 }
 0x328   : > { %v14402_v51 = vmax.f32 %v3908_v5, 0.0  ;;  %v5401_v7 = vrot.slane %v5400_v60, 4  ;;  %v4421_v56 = vrot.slane %v4407_v61, %v13683_v33  ;;  %v4422_v3 = vcombine.high %v4414_v40, %v4414_v40  ;;  %6450 = vst.msk [vmem:[#allocation5 + $0x18] sm:$0xf] %vm6447_vm1, %v6428_v49  ;;  %11673 = vmatprep.subr.bf16.mxu1 %v12199_v55 }
 0x329   : > { %v5344_v58 = vsel %vm4671_vm15, %v4414_v40, -inf  ;;  %v4457_v13 = vcombine.high %v4455_v18, %v4455_v18  ;;  %v5407_v43 = vsel %vm4671_vm15, %v4456_v23, -inf  ;;  %v5414_v46 = vsel %vm4671_vm15, %v4455_v18, -inf  ;;  %6550 = vst.msk [vmem:[#allocation5 + $0x18] sm:$0xf] %vm6547_vm2, %v14315_v52  ;;  %v12204_v23 = vld [vmem:[%s15579_s3 + $0x38] sm:$0xff]  }
 0x32a   : > { %v5345_v28 = vrot.slane %v5344_v58, 4  ;;  %6821 = vrot.lane.b32.xlu0 %v6800_v30, %s12632_s14  ;;  %v5402_v16 = vmax.f32 %v5400_v60, %v5401_v7  ;;  %v5408_v50 = vrot.slane %v5407_v43, 4  ;;  %v5415_v45 = vrot.slane %v5414_v46, 4  ;;  %6599 = vst.msk [vmem:[#allocation5 + $0x18] sm:$0xf] %vm15602_vm9, %v14328_v44  ;;  %v12203_v44 = vld [vmem:[%s15579_s3 + $0x78] sm:$0xff]  }
 0x32b   : > { %v4423_v36 = vcombine.high %v4421_v56, %v4421_v56  ;;  %v5421_v34 = vsel %vm4671_vm15, %v4457_v13, -inf  ;;  %v5351_v52 = vsel %vm4671_vm15, %v4422_v3, -inf  ;;  %v5358_v38 = vsel %vm4671_vm15, %v4421_v56, -inf  ;;  %11674 = vmatpush3.bf16.msra.mxu1 %v12200_v11 }
 0x32c   : > { %v5346_v6 = vmax.f32 %v5344_v58, %v5345_v28  ;;  %v5403_v47 = vrot.slane %v5402_v16, 2  ;;  %v5409_v19 = vmax.f32 %v5407_v43, %v5408_v50  ;;  %v5416_v20 = vmax.f32 %v5414_v46, %v5415_v45  ;;  %11675 = vmatprep.subr.bf16.mxu1 %v12201_v29 }
 0x32d   : > { %v5422_v24 = vrot.slane %v5421_v34, 4  ;;  %v5352_v9 = vrot.slane %v5351_v52, 4  ;;  %v5359_v32 = vrot.slane %v5358_v38, 4  ;;  %v5365_v54 = vsel %vm4671_vm15, %v4423_v36, -inf  ;;  %v6850_v12 = vld [vmem:[#allocation4 + $0x30] sm:$0xf] }
 0x32e   : > { %v5347_v30 = vrot.slane %v5346_v6, 2  ;;  %v5404_v22 = vmax.f32 %v5402_v16, %v5403_v47  ;;  %v5410_v5 = vrot.slane %v5409_v19, 2  ;;  %v5417_v10 = vrot.slane %v5416_v20, 2  ;;  %6870 = vrot.lane.b32.xlu0 %v6850_v12, %s12631_s30  ;;  %v6561_v62 = vld [vmem:[#allocation4 + $0x30] sm:$0xf] }
 0x32f   : > { %v5423_v25 = vmax.f32 %v5421_v34, %v5422_v24  ;;  %v5353_v14 = vmax.f32 %v5351_v52, %v5352_v9  ;;  %v5360_v37 = vmax.f32 %v5358_v38, %v5359_v32  ;;  %v5366_v17 = vrot.slane %v5365_v54, 4  ;;  %6582 = vrot.lane.b32.xlu1 %v6561_v62, %s12635_s19  ;;  %11676 = vmatpush3.bf16.msra.mxu1 %v12202_v21 }
 0x330   : > { %v5348_v1 = vmax.f32 %v5346_v6, %v5347_v30  ;;  %v5405_v55 = vrot.slane %v5404_v22, 1  ;;  %v5411_v61 = vmax.f32 %v5409_v19, %v5410_v5  ;;  %v5418_v40 = vmax.f32 %v5416_v20, %v5417_v10  ;;  %11677 = vmatprep.subr.bf16.mxu1 %v12203_v44 }
 0x331   : > { %v5424_v18 = vrot.slane %v5423_v25, 2  ;;  %v5354_v49 = vrot.slane %v5353_v14, 2  ;;  %v5361_v7 = vrot.slane %v5360_v37, 2  ;;  %v5367_v56 = vmax.f32 %v5365_v54, %v5366_v17 }
 0x332   : > { %v5349_v60 = vrot.slane %v5348_v1, 1  ;;  %v5406_v3 = vmax.f32 %v5404_v22, %v5405_v55  ;;  %v5412_v58 = vrot.slane %v5411_v61, 1  ;;  %v5419_v11 = vrot.slane %v5418_v40, 1 }
 0x333   : > { %v5425_v13 = vmax.f32 %v5423_v25, %v5424_v18  ;;  %v5355_v46 = vmax.f32 %v5353_v14, %v5354_v49  ;;  %v5362_v28 = vmax.f32 %v5360_v37, %v5361_v7  ;;  %v5368_v29 = vrot.slane %v5367_v56, 2  ;;  %11678 = vmatpush3.bf16.msra.mxu1 %v12204_v23 }
 0x334   : > { %v5350_v43 = vmax.f32 %v5348_v1, %v5349_v60  ;;  %v5413_v16 = vmax.f32 %v5411_v61, %v5412_v58  ;;  %v5420_v50 = vmax.f32 %v5418_v40, %v5419_v11  ;;  %v5714_v36 = vsel %vm5568_vm0, %v5406_v3, -inf }
 0x335   : > { %v5426_v45 = vrot.slane %v5425_v13, 1  ;;  %v5356_v57 = vrot.slane %v5355_v46, 1  ;;  %v5363_v34 = vrot.slane %v5362_v28, 1  ;;  %v5369_v6 = vmax.f32 %v5367_v56, %v5368_v29 }
 0x336   : > { %v5713_v52 = vsel %vm5568_vm0, %v5350_v43, -inf  ;;  %v5717_v47 = vsel %vm5568_vm0, %v5413_v16, -inf  ;;  %v5720_v19 = vsel %vm5568_vm0, %v5420_v50, -inf  ;;  %v4472_v30 = vrot.slane %v4458_v48, %v13683_v33 }
 0x337   : > { %v5427_v38 = vmax.f32 %v5425_v13, %v5426_v45  ;;  %v5715_v20 = vmax.f32 %v5713_v52, %v5714_v36  ;;  %v5357_v24 = vmax.f32 %v5355_v46, %v5356_v57  ;;  %v5364_v21 = vmax.f32 %v5362_v28, %v5363_v34 }
 0x338   : > { %v5370_v44 = vrot.slane %v5369_v6, 1  ;;  %v4473_v54 = vcombine.high %v14398_v2, %v14398_v2  ;;  %v5428_v12 = vsel %vm4671_vm15, %v14398_v2, -inf  ;;  %v4474_v25 = vcombine.high %v4472_v30, %v4472_v30 }
 0x339   : > { %v5723_v9 = vsel %vm5568_vm0, %v5427_v38, -inf  ;;  %v11602_v32 = vpack.c.bf16 %v5715_v20, %v5715_v20  ;;  %v5716_v5 = vsel %vm5568_vm0, %v5357_v24, -inf  ;;  %v5719_v10 = vsel %vm5568_vm0, %v5364_v21, -inf }
 0x33a   : > { %v5371_v22 = vmax.f32 %v5369_v6, %v5370_v44  ;;  %v5718_v62 = vmax.f32 %v5716_v5, %v5717_v47  ;;  %v5721_v1 = vmax.f32 %v5719_v10, %v5720_v19  ;;  %v5429_v53 = vrot.slane %v5428_v12, 4 }
 0x33b   : > { %v6124_v14 = vunpack.c.l.b16 %v11602_v32  ;;  %v5435_v37 = vsel %vm4671_vm15, %v4473_v54, -inf  ;;  %v5442_v17 = vsel %vm4671_vm15, %v4472_v30, -inf  ;;  %v5449_v55 = vsel %vm4671_vm15, %v4474_v25, -inf }
 0x33c   : > { %v5722_v48 = vsel %vm5568_vm0, %v5371_v22, -inf  ;;  %v11603_v2 = vpack.c.bf16 %v5718_v62, %v5718_v62  ;;  %v11604_v40 = vpack.c.bf16 %v5721_v1, %v5721_v1  ;;  %v5430_v18 = vmax.f32 %v5428_v12, %v5429_v53 }
 0x33d   : > { %v5724_v61 = vmax.f32 %v5722_v48, %v5723_v9  ;;  %v5436_v23 = vrot.slane %v5435_v37, 4  ;;  %v5443_v60 = vrot.slane %v5442_v17, 4  ;;  %v5450_v49 = vrot.slane %v5449_v55, 4 }
 0x33e   : > { %v4424_v7 = vcombine.high %v14402_v51, %v14402_v51  ;;  %v6125_v3 = vunpack.c.l.b16 %v11603_v2  ;;  %v6126_v58 = vunpack.c.l.b16 %v11604_v40  ;;  %v5431_v11 = vrot.slane %v5430_v18, 2 }
 0x33f   : > { %v11605_v56 = vpack.c.bf16 %v5724_v61, %v5724_v61  ;;  %v5437_v13 = vmax.f32 %v5435_v37, %v5436_v23  ;;  %v5444_v43 = vmax.f32 %v5442_v17, %v5443_v60  ;;  %v5451_v46 = vmax.f32 %v5449_v55, %v5450_v49  ;;  %v6607_v55 = vld [vmem:[#allocation4 + $0x10] sm:$0xf]  ;;  %v6608_v23 = vld [vmem:[#allocation4 + $0x14] sm:$0x1]  ;;  %v6281_v49 = vld [vmem:[#allocation4 + $0x28] sm:$0xf] }
 0x340   : > { %v4431_v28 = vrot.slane %v14402_v51, %v13683_v33  ;;  %v6182_v16 = vsel %vm6140_vm5, %v6125_v3, %v6124_v14  ;;  %v5432_v50 = vmax.f32 %v5430_v18, %v5431_v11  ;;  %v4438_v45 = vrot.slane %v4424_v7, %v13683_v33  ;;  %v14467_v14 = vpop.permute.xlu1 %6815  ;;  %v6468_v60 = vld [vmem:[#allocation4 + $0x30] sm:$0xe]  ;;  %6289 = vst.msk [vmem:[#allocation5 + $0x3c] sm:$0xf] %vm5825_vm8, %v6281_v49 }
 0x341   : > { %v6127_v29 = vunpack.c.l.b16 %v11605_v56  ;;  %vm15668_vm9 = vcmask 1043459   ;;  %v5438_v57 = vrot.slane %v5437_v13, 2  ;;  %v5445_v34 = vrot.slane %v5444_v43, 2 }
 0x342   : > { %v6183_v36 = vsel %vm15668_vm9, %v6126_v58, %v6182_v16  ;;  %v5452_v6 = vrot.slane %v5451_v46, 2  ;;  %v5433_v52 = vrot.slane %v5432_v50, 1  ;;  %v4439_v38 = vcombine.high %v4431_v28, %v4431_v28 }
 0x343   : > { %v4440_v47 = vcombine.high %v4438_v45, %v4438_v45  ;;  %v5372_v19 = vsel %vm4671_vm15, %v4431_v28, -inf  ;;  %v5439_v20 = vmax.f32 %v5437_v13, %v5438_v57  ;;  %v5446_v24 = vmax.f32 %v5444_v43, %v5445_v34  ;;  %v6469_v28 = vld [vmem:[#allocation4 + $0x34] sm:$0x1]  ;;  %v6900_v57 = vld [vmem:[#allocation4 + $0x28] sm:$0xf] }
 0x344   : > { %v5453_v21 = vmax.f32 %v5451_v46, %v5452_v6  ;;  %v5373_v51 = vrot.slane %v5372_v19, 4  ;;  %v5434_v44 = vmax.f32 %v5432_v50, %v5433_v52  ;;  %v5379_v30 = vsel %vm4671_vm15, %v4439_v38, -inf  ;;  %v6865_v16 = vpop.permute.xlu1 %6864 }
 0x345   : > { %v5386_v9 = vsel %vm4671_vm15, %v4438_v45, -inf  ;;  %v5393_v32 = vsel %vm4671_vm15, %v4440_v47, -inf  ;;  %v5440_v54 = vrot.slane %v5439_v20, 1  ;;  %v5447_v12 = vrot.slane %v5446_v24, 1 }
 0x346   : > { %v5454_v22 = vrot.slane %v5453_v21, 1  ;;  %v5374_v5 = vmax.f32 %v5372_v19, %v5373_v51  ;;  %v5726_v10 = vsel %vm5568_vm0, %v5434_v44, -inf  ;;  %v5380_v25 = vrot.slane %v5379_v30, 4 }
 0x347   : > { %v5387_v62 = vrot.slane %v5386_v9, 4  ;;  %v5394_v1 = vrot.slane %v5393_v32, 4  ;;  %v5441_v53 = vmax.f32 %v5439_v20, %v5440_v54  ;;  %v5448_v48 = vmax.f32 %v5446_v24, %v5447_v12 }
 0x348   : > { %v5455_v37 = vmax.f32 %v5453_v21, %v5454_v22  ;;  %v5375_v17 = vrot.slane %v5374_v5, 2  ;;  %v5381_v61 = vmax.f32 %v5379_v30, %v5380_v25  ;;  %v14470_v18 = vsel %vm6144_vm14, %v6127_v29, %v6183_v36  ;;  %v6901_v30 = vld [vmem:[#allocation4 + $0x2c] sm:$0x1] }
 0x349   : > { %v5388_v2 = vmax.f32 %v5386_v9, %v5387_v62  ;;  %v5395_v40 = vmax.f32 %v5393_v32, %v5394_v1  ;;  %v5729_v7 = vsel %vm5568_vm0, %v5441_v53, -inf  ;;  %v5732_v56 = vsel %vm5568_vm0, %v5448_v48, -inf  ;;  %v14480_v53 = vpop.permute.xlu1 %6529 }
 0x34a   : > { %v5735_v3 = vsel %vm5568_vm0, %v5455_v37, -inf  ;;  %v5376_v58 = vmax.f32 %v5374_v5, %v5375_v17  ;;  %v5382_v11 = vrot.slane %v5381_v61, 2  ;;  %v6636_v46 = vshrl.u32 %v6607_v55, 16 }
 0x34b   : > { %v5389_v13 = vrot.slane %v5388_v2, 2  ;;  %v5396_v43 = vrot.slane %v5395_v40, 2  ;;  %v6639_v50 = vshll.u32 %v6607_v55, 16  ;;  %v6645_v45 = vshll.u32 %v6608_v23, 16 }
 0x34c   : > { %v5377_v29 = vrot.slane %v5376_v58, 1  ;;  %v11243_v36 = vrot.slane %v6468_v60, 9  ;;  %v5383_v34 = vmax.f32 %v5381_v61, %v5382_v11  ;;  %v6638_v38 = vrot.slane %v6636_v46, 4  ;;  %v6302_v61 = vld [vmem:[#allocation4 + $0x28] sm:$0xf] }
 0x34d   : > { %v5390_v6 = vmax.f32 %v5388_v2, %v5389_v13  ;;  %v5397_v52 = vmax.f32 %v5395_v40, %v5396_v43  ;;  %v6641_v19 = vrot.slane %v6639_v50, 5  ;;  %v6647_v20 = vrot.slane %v6645_v45, 5  ;;  %v6303_v13 = vld [vmem:[#allocation4 + $0x2c] sm:$0x1]  ;;  %v6267_v46 = vld [vmem:[#allocation4 + $0x3c] sm:$0x1]  ;;  %v14488_v45 = vpop.permute.xlu1 %6578 }
 0x34e   : > { %v5378_v47 = vmax.f32 %v5376_v58, %v5377_v29  ;;  %v6517_v24 = vrot.slane %v6469_v28, 5  ;;  %v5384_v21 = vrot.slane %v5383_v34, 1  ;;  %v6953_v9 = vshrl.u32 %v6900_v57, 16 }
 0x34f   : > { %v5391_v51 = vrot.slane %v5390_v6, 1  ;;  %v5398_v44 = vrot.slane %v5397_v52, 1  ;;  %v6642_v54 = vor.u32 %v6641_v19, %v6638_v38  ;;  %v6956_v22 = vshll.u32 %v6900_v57, 16 }
 0x350   : > { %v5725_v32 = vsel %vm5568_vm0, %v5378_v47, -inf  ;;  %v6518_v12 = vsel %vm13644_vm6, %v11243_v36, %v6517_v24  ;;  %v5385_v5 = vmax.f32 %v5383_v34, %v5384_v21  ;;  %v6955_v37 = vrot.slane %v6953_v9, 4 }
 0x351   : > { %v5392_v25 = vmax.f32 %v5390_v6, %v5391_v51  ;;  %v5399_v62 = vmax.f32 %v5397_v52, %v5398_v44  ;;  %v5727_v1 = vmax.f32 %v5725_v32, %v5726_v10  ;;  %6535 = vrot.lane.b32.xlu0 %v6518_v12, %s12631_s30  ;;  %v6643_v48 = vrot.slane %v6642_v54, 4  ;;  %v5856_v54 = vld [vmem:[#allocation4 + $0x40] sm:$0x1]  ;;  %v5881_v12 = vld [vmem:[#allocation4 + $0x44] sm:$0x1] }
 0x352   : > { %v6958_v17 = vrot.slane %v6956_v22, 5  ;;  %v6962_v55 = vshll.u32 %v6901_v30, 16  ;;  %v5728_v2 = vsel %vm5568_vm0, %v5385_v5, -inf  ;;  %v6382_v50 = vshrl.u32 %v6302_v61, 16  ;;  %v6264_v5 = vld [vmem:[#allocation4 + $0x38] sm:$0xf] }
 0x353   : > { %v5731_v40 = vsel %vm5568_vm0, %v5392_v25, -inf  ;;  %v5734_v23 = vsel %vm5568_vm0, %v5399_v62, -inf  ;;  %v11606_v60 = vpack.c.bf16 %v5727_v1, %v5727_v1  ;;  %v5730_v49 = vmax.f32 %v5728_v2, %v5729_v7 }
 0x354   : > { %v5733_v58 = vmax.f32 %v5731_v40, %v5732_v56  ;;  %v5736_v11 = vmax.f32 %v5734_v23, %v5735_v3  ;;  %v6648_v10 = vsel %vm13635_vm4, %v6643_v48, %v6647_v20  ;;  %v6959_v28 = vor.u32 %v6958_v17, %v6955_v37  ;;  %v6759_v56 = vld [vmem:[#allocation4 + $0x30] sm:$0xe]  ;;  %v6760_v3 = vld [vmem:[#allocation4 + $0x34] sm:$0x1] }
 0x355   : > { %v6128_v43 = vunpack.c.l.b16 %v11606_v60  ;;  %6742 = vst.msk [vmem:[#allocation5 + $0x10] sm:$0xf] %vm5825_vm8, %v6648_v10  ;;  %v6964_v29 = vrot.slane %v6962_v55, 5  ;;  %v11607_v36 = vpack.c.bf16 %v5730_v49, %v5730_v49  ;;  %v6385_v7 = vshll.u32 %v6302_v61, 16 }
 0x356   : > { %v11608_v57 = vpack.c.bf16 %v5733_v58, %v5733_v58  ;;  %v11624_v34 = vpack.c.bf16 %v5736_v11, %v5736_v11  ;;  %6838 = vst.msk [vmem:[#allocation5 + $0x10] sm:$0xf] %vm6447_vm1, %v14467_v14  ;;  %v6960_v52 = vrot.slane %v6959_v28, 4  ;;  %v6384_v38 = vrot.slane %v6382_v50, 4 }
 0x357   : > { %v6185_v6 = vsel %vm6146_vm12, %v6128_v43, %v14470_v18  ;;  %v6391_v47 = vshll.u32 %v6303_v13, 16  ;;  %6887 = vst.msk [vmem:[#allocation5 + $0x10] sm:$0xf] %vm6547_vm2, %v6865_v16  ;;  %v6129_v19 = vunpack.c.l.b16 %v11607_v36  ;;  %v6387_v21 = vrot.slane %v6385_v7, 5 }
 0x358   : > { %v6130_v20 = vunpack.c.l.b16 %v11608_v57  ;;  %v6268_v24 = vsel %vm13596_vm11, %v11624_v34, %v6267_v46  ;;  %v6965_v14 = vsel %vm13635_vm4, %v6960_v52, %v6964_v29  ;;  %v11250_v44 = vrot.slane %v6759_v56, 9 }
 0x359   : > { %6269 = vst [vmem:[#allocation4 + $0x3c] sm:$0x1] %v6268_v24  ;;  %v6393_v51 = vrot.slane %v6391_v47, 5  ;;  %v6803_v30 = vrot.slane %v6760_v3, 5  ;;  %v6186_v18 = vsel %vm6148_vm10, %v6129_v19, %v6185_v6  ;;  %7028 = vrot.lane.b32.xlu1 %v6965_v14, %s12635_s19  ;;  %v6388_v9 = vor.u32 %v6387_v21, %v6384_v38  ;;  %v12205_v47 = vld [vmem:[#allocation5] ss:$12 sps:$4 sm:$0xff]  }
 0x35a   : > { %v3929_v16 = vadd.f32 %v14358_v8, %v14252_v39  ;;  %v3921_v32 = vadd.f32 %v14358_v8, %v14254_v41  ;;  %v6187_v22 = vsel %vm6150_vm7, %v6130_v20, %v6186_v18  ;;  %v3932_v62 = vadd.f32 %v14358_v8, %v14256_v26  ;;  %v7025_v48 = vpop.permute.xlu1 %7024 }
 0x35b   : > { %v6804_v25 = vsel %vm13644_vm6, %v11250_v44, %v6803_v30  ;;  %v3924_v1 = vadd.f32 %v14358_v8, %v14273_v63  ;;  %v6206_v37 = vpack.c.b16 %v6187_v22, %v6187_v22  ;;  %v6389_v39 = vrot.slane %v6388_v9, 4 }
 0x35c   : > { %v3965_v17 = vmax.f32 %v3929_v16, 0.0  ;;  %v3963_v55 = vmax.f32 %v3921_v32, 0.0  ;;  %vm15669_vm9 = vcmask 1044224   ;;  %v14513_v41 = vmax.f32 %v3932_v62, 0.0 }
 0x35d   : > { %7047 = vst.msk [vmem:[#allocation5 + $0x10] sm:$0xf] %vm15669_vm9, %v7025_v48  ;;  %v14515_v61 = vmax.f32 %v3924_v1, 0.0  ;;  %v5857_v2 = vsel %vm13596_vm11, 0, %v5856_v54  ;;  %v5882_v26 = vsel %vm13610_vm13, 0, %v5881_v12  ;;  %v6265_v63 = vsel %vm13799_vm3, %v6206_v37, %v6264_v5  ;;  %vm15670_vm13 = vmmov %vm15669_vm9 }
 0x35e   : > { %v6394_v8 = vsel %vm13635_vm4, %v6389_v39, %v6393_v51  ;;  %v4509_v40 = vcombine.high %v3965_v17, %v3965_v17  ;;  %v4516_v23 = vrot.slane %v3965_v17, %v13683_v33  ;;  %5858 = vst [vmem:[#allocation4 + $0x40] sm:$0x1] %v5857_v2  ;;  %5883 = vst [vmem:[#allocation4 + $0x44] sm:$0x1] %v5882_v26  ;;  %v6282_v26 = vld [vmem:[#allocation4 + $0x30] sm:$0xf] }
 0x35f   : > { %6266 = vst [vmem:[#allocation4 + $0x38] sm:$0xf] %v6265_v63  ;;  %6433 = vrot.lane.b32.xlu1 %v6394_v8, %s12632_s14  ;;  %v4475_v60 = vcombine.high %v3963_v55, %v3963_v55  ;;  %v4482_v49 = vrot.slane %v3963_v55, %v13683_v33  ;;  %v4526_v27 = vcombine.high %v14513_v41, %v14513_v41  ;;  %v6430_v46 = vpop.permute.xlu1 %6429  ;;  %6290 = vst.msk [vmem:[#allocation5 + $0x48] sm:$0xf] %vm5825_vm8, %v6282_v26  ;;  %vm15671_vm9 = vcmask 1043459  }
 0x360   : > { %v14532_v58 = vrot.slane %v14513_v41, %v13683_v33  ;;  %v4523_v11 = vrot.slane %v4509_v40, %v13683_v33  ;;  %v4524_v10 = vcombine.high %v4516_v23, %v4516_v23  ;;  %v5512_v13 = vsel %vm4671_vm15, %v4516_v23, -inf  ;;  %6451 = vst.msk [vmem:[#allocation5 + $0x24] sm:$0xf] %vm6447_vm1, %v6430_v46 }
 0x361   : > { %v4492_v43 = vcombine.high %v14515_v61, %v14515_v61  ;;  %v5513_v28 = vrot.slane %v5512_v13, 4  ;;  %v4489_v29 = vrot.slane %v4475_v60, %v13683_v33  ;;  %v4490_v50 = vcombine.high %v4482_v49, %v4482_v49  ;;  %6551 = vst.msk [vmem:[#allocation5 + $0x24] sm:$0xf] %vm6547_vm2, %v14480_v53 }
 0x362   : > { %v5456_v36 = vsel %vm4671_vm15, %v4482_v49, -inf  ;;  %v4525_v57 = vcombine.high %v4523_v11, %v4523_v11  ;;  %v5519_v34 = vsel %vm4671_vm15, %v4524_v10, -inf  ;;  %v5526_v7 = vsel %vm4671_vm15, %v4523_v11, -inf  ;;  %6600 = vst.msk [vmem:[#allocation5 + $0x24] sm:$0xf] %vm15670_vm13, %v14488_v45 }
 0x363   : > { %v5457_v56 = vrot.slane %v5456_v36, 4  ;;  %6823 = vrot.lane.b32.xlu1 %v6804_v25, %s12632_s14  ;;  %v5514_v3 = vmax.f32 %v5512_v13, %v5513_v28  ;;  %v5520_v6 = vrot.slane %v5519_v34, 4  ;;  %v5527_v52 = vrot.slane %v5526_v7, 4 }
 0x364   : > { %v4491_v38 = vcombine.high %v4489_v29, %v4489_v29  ;;  %v5533_v19 = vsel %vm4671_vm15, %v4525_v57, -inf  ;;  %v5463_v24 = vsel %vm4671_vm15, %v4490_v50, -inf  ;;  %v5470_v21 = vsel %vm4671_vm15, %v4489_v29, -inf  ;;  %v12207_v14 = vld [vmem:[#allocation5 + $0x4] ss:$12 sps:$4 sm:$0xff]  }
 0x365   : > { %v5458_v20 = vmax.f32 %v5456_v36, %v5457_v56  ;;  %v5515_v51 = vrot.slane %v5514_v3, 2  ;;  %v5521_v53 = vmax.f32 %v5519_v34, %v5520_v6  ;;  %v5528_v44 = vmax.f32 %v5526_v7, %v5527_v52  ;;  %7405 = vmatprep.mubr.bf16.mxu1 %v12207_v14 }
 0x366   : > { %v5534_v30 = vrot.slane %v5533_v19, 4  ;;  %v5464_v9 = vrot.slane %v5463_v24, 4  ;;  %v5471_v16 = vrot.slane %v5470_v21, 4  ;;  %v5477_v32 = vsel %vm4671_vm15, %v4491_v38, -inf  ;;  %v6562_v54 = vld [vmem:[#allocation4 + $0x38] sm:$0xf]  ;;  %7406 = vmatmul.mubr.bf16.vlgmr.msra.gmra.mrb[0].mxu1 %v12205_v47 }
 0x367   : > { %v5459_v18 = vrot.slane %v5458_v20, 2  ;;  %v5516_v45 = vmax.f32 %v5514_v3, %v5515_v51  ;;  %v5522_v12 = vrot.slane %v5521_v53, 2  ;;  %v5529_v22 = vrot.slane %v5528_v44, 2  ;;  %6584 = vrot.lane.b32.xlu0 %v6562_v54, %s12635_s19  ;;  %v6851_v25 = vld [vmem:[#allocation4 + $0x38] sm:$0xf] }
 0x368   : > { %v5535_v5 = vmax.f32 %v5533_v19, %v5534_v30  ;;  %v5465_v1 = vmax.f32 %v5463_v24, %v5464_v9  ;;  %v5472_v48 = vmax.f32 %v5470_v21, %v5471_v16  ;;  %v5478_v37 = vrot.slane %v5477_v32, 4  ;;  %6872 = vrot.lane.b32.xlu1 %v6851_v25, %s12631_s30 }
 0x369   : > { %v5460_v62 = vmax.f32 %v5458_v20, %v5459_v18  ;;  %v5517_v39 = vrot.slane %v5516_v45, 1  ;;  %v5523_v17 = vmax.f32 %v5521_v53, %v5522_v12  ;;  %v5530_v55 = vmax.f32 %v5528_v44, %v5529_v22 }
 0x36a   : > { %v5536_v2 = vrot.slane %v5535_v5, 2  ;;  %v5466_v8 = vrot.slane %v5465_v1, 2  ;;  %v5473_v40 = vrot.slane %v5472_v48, 2  ;;  %v5479_v23 = vmax.f32 %v5477_v32, %v5478_v37 }
 0x36b   : > { %v5461_v63 = vrot.slane %v5460_v62, 1  ;;  %v5518_v60 = vmax.f32 %v5516_v45, %v5517_v39  ;;  %v5524_v49 = vrot.slane %v5523_v17, 1  ;;  %v5531_v11 = vrot.slane %v5530_v55, 1 }
 0x36c   : > { %v5537_v10 = vmax.f32 %v5535_v5, %v5536_v2  ;;  %v5467_v46 = vmax.f32 %v5465_v1, %v5466_v8  ;;  %v5474_v28 = vmax.f32 %v5472_v48, %v5473_v40  ;;  %v5480_v29 = vrot.slane %v5479_v23, 2 }
 0x36d   : > { %v5462_v13 = vmax.f32 %v5460_v62, %v5461_v63  ;;  %v5525_v50 = vmax.f32 %v5523_v17, %v5524_v49  ;;  %v5532_v36 = vmax.f32 %v5530_v55, %v5531_v11  ;;  %v5738_v34 = vsel %vm5568_vm0, %v5518_v60, -inf }
 0x36e   : > { %v5538_v57 = vrot.slane %v5537_v10, 1  ;;  %v5468_v7 = vrot.slane %v5467_v46, 1  ;;  %v5475_v56 = vrot.slane %v5474_v28, 1  ;;  %v5481_v3 = vmax.f32 %v5479_v23, %v5480_v29 }
 0x36f   : > { %v5737_v6 = vsel %vm5568_vm0, %v5462_v13, -inf  ;;  %v5741_v38 = vsel %vm5568_vm0, %v5525_v50, -inf  ;;  %v5744_v47 = vsel %vm5568_vm0, %v5532_v36, -inf  ;;  %v4540_v14 = vrot.slane %v4526_v27, %v13683_v33 }
 0x370   : > { %v5539_v52 = vmax.f32 %v5537_v10, %v5538_v57  ;;  %v5739_v19 = vmax.f32 %v5737_v6, %v5738_v34  ;;  %v5469_v20 = vmax.f32 %v5467_v46, %v5468_v7  ;;  %v5476_v24 = vmax.f32 %v5474_v28, %v5475_v56 }
 0x371   : > { %v5482_v21 = vrot.slane %v5481_v3, 1  ;;  %v4541_v44 = vcombine.high %v14532_v58, %v14532_v58  ;;  %v5540_v30 = vsel %vm4671_vm15, %v14532_v58, -inf  ;;  %v4542_v32 = vcombine.high %v4540_v14, %v4540_v14 }
 0x372   : > { %v5747_v51 = vsel %vm5568_vm0, %v5539_v52, -inf  ;;  %v11610_v53 = vpack.c.bf16 %v5739_v19, %v5739_v19  ;;  %v5740_v9 = vsel %vm5568_vm0, %v5469_v20, -inf  ;;  %v5743_v16 = vsel %vm5568_vm0, %v5476_v24, -inf }
 0x373   : > { %v5483_v18 = vmax.f32 %v5481_v3, %v5482_v21  ;;  %v5742_v54 = vmax.f32 %v5740_v9, %v5741_v38  ;;  %v5745_v45 = vmax.f32 %v5743_v16, %v5744_v47  ;;  %v5541_v41 = vrot.slane %v5540_v30, 4 }
 0x374   : > { %v6132_v12 = vunpack.c.l.b16 %v11610_v53  ;;  %v5547_v22 = vsel %vm4671_vm15, %v4541_v44, -inf  ;;  %v5554_v5 = vsel %vm4671_vm15, %v4540_v14, -inf  ;;  %v5561_v25 = vsel %vm4671_vm15, %v4542_v32, -inf }
 0x375   : > { %v5746_v27 = vsel %vm5568_vm0, %v5483_v18, -inf  ;;  %v11611_v58 = vpack.c.bf16 %v5742_v54, %v5742_v54  ;;  %v11612_v1 = vpack.c.bf16 %v5745_v45, %v5745_v45  ;;  %v5542_v48 = vmax.f32 %v5540_v30, %v5541_v41  ;;  %v6609_v54 = vld [vmem:[#allocation4 + $0x18] sm:$0xf]  ;;  %v14587_v45 = vpop.permute.xlu0 %6817 }
 0x376   : > { %v5748_v62 = vmax.f32 %v5746_v27, %v5747_v51  ;;  %v5548_v37 = vrot.slane %v5547_v22, 4  ;;  %v5555_v39 = vrot.slane %v5554_v5, 4  ;;  %v5562_v17 = vrot.slane %v5561_v25, 4 }
 0x377   : > { %v4499_v55 = vrot.slane %v14515_v61, %v13683_v33  ;;  %v6133_v26 = vunpack.c.l.b16 %v11611_v58  ;;  %v6134_v63 = vunpack.c.l.b16 %v11612_v1  ;;  %v5543_v8 = vrot.slane %v5542_v48, 2 }
 0x378   : > { %v11613_v2 = vpack.c.bf16 %v5748_v62, %v5748_v62  ;;  %v5549_v40 = vmax.f32 %v5547_v22, %v5548_v37  ;;  %v5556_v23 = vmax.f32 %v5554_v5, %v5555_v39  ;;  %v5563_v60 = vmax.f32 %v5561_v25, %v5562_v17  ;;  %v6610_v5 = vld [vmem:[#allocation4 + $0x1c] sm:$0x1]  ;;  %v6902_v25 = vld [vmem:[#allocation4 + $0x30] sm:$0xf] }
 0x379   : > { %v4506_v49 = vrot.slane %v4492_v43, %v13683_v33  ;;  %v6188_v10 = vsel %vm6140_vm5, %v6133_v26, %v6132_v12  ;;  %v5544_v13 = vmax.f32 %v5542_v48, %v5543_v8  ;;  %v4507_v46 = vcombine.high %v4499_v55, %v4499_v55 }
 0x37a   : > { %v6135_v11 = vunpack.c.l.b16 %v11613_v2  ;;  %v6189_v28 = vsel %vm15671_vm9, %v6134_v63, %v6188_v10  ;;  %v5550_v29 = vrot.slane %v5549_v40, 2  ;;  %v5557_v50 = vrot.slane %v5556_v23, 2  ;;  %v6903_v10 = vld [vmem:[#allocation4 + $0x34] sm:$0x1] }
 0x37b   : > { %v5564_v36 = vrot.slane %v5563_v60, 2  ;;  %v5545_v57 = vrot.slane %v5544_v13, 1  ;;  %v4508_v34 = vcombine.high %v4506_v49, %v4506_v49  ;;  %v5484_v7 = vsel %vm4671_vm15, %v4499_v55, -inf }
 0x37c   : > { %v5491_v56 = vsel %vm4671_vm15, %v4507_v46, -inf  ;;  %v5551_v3 = vmax.f32 %v5549_v40, %v5550_v29  ;;  %v5558_v6 = vmax.f32 %v5556_v23, %v5557_v50  ;;  %v5485_v43 = vrot.slane %v5484_v7, 4  ;;  %v6867_v40 = vpop.permute.xlu0 %6866 }
 0x37d   : > { %v5565_v61 = vmax.f32 %v5563_v60, %v5564_v36  ;;  %v5546_v52 = vmax.f32 %v5544_v13, %v5545_v57  ;;  %v5492_v38 = vrot.slane %v5491_v56, 4  ;;  %v5498_v47 = vsel %vm4671_vm15, %v4506_v49, -inf  ;;  %v6470_v13 = vld [vmem:[#allocation4 + $0x38] sm:$0xe] }
 0x37e   : > { %v5505_v19 = vsel %vm4671_vm15, %v4508_v34, -inf  ;;  %v5552_v20 = vrot.slane %v5551_v3, 1  ;;  %v5559_v24 = vrot.slane %v5558_v6, 1  ;;  %v5486_v14 = vmax.f32 %v5484_v7, %v5485_v43 }
 0x37f   : > { %v5566_v21 = vrot.slane %v5565_v61, 1  ;;  %v5750_v51 = vsel %vm5568_vm0, %v5546_v52, -inf  ;;  %v5493_v53 = vmax.f32 %v5491_v56, %v5492_v38  ;;  %v5499_v44 = vrot.slane %v5498_v47, 4 }
 0x380   : > { %v5506_v30 = vrot.slane %v5505_v19, 4  ;;  %v5553_v18 = vmax.f32 %v5551_v3, %v5552_v20  ;;  %v5560_v9 = vmax.f32 %v5558_v6, %v5559_v24  ;;  %v5487_v32 = vrot.slane %v5486_v14, 2  ;;  %v6283_v20 = vld [vmem:[#allocation4 + $0x38] sm:$0xf] }
 0x381   : > { %v5567_v16 = vmax.f32 %v5565_v61, %v5566_v21  ;;  %v5494_v12 = vrot.slane %v5493_v53, 2  ;;  %v5500_v41 = vmax.f32 %v5498_v47, %v5499_v44  ;;  %v14590_v22 = vsel %vm6144_vm14, %v6135_v11, %v6189_v28  ;;  %v6471_v61 = vld [vmem:[#allocation4 + $0x3c] sm:$0x1]  ;;  %v6304_v44 = vld [vmem:[#allocation4 + $0x30] sm:$0xf] }
 0x382   : > { %v5507_v27 = vmax.f32 %v5505_v19, %v5506_v30  ;;  %v5753_v62 = vsel %vm5568_vm0, %v5553_v18, -inf  ;;  %v5756_v58 = vsel %vm5568_vm0, %v5560_v9, -inf  ;;  %v5488_v48 = vmax.f32 %v5486_v14, %v5487_v32  ;;  %v14597_v30 = vpop.permute.xlu0 %6531  ;;  %6291 = vst.msk [vmem:[#allocation5 + $0x54] sm:$0xf] %vm5825_vm8, %v6283_v20  ;;  %v6307_v20 = vld [vmem:[#allocation4 + $0x3c] sm:$0x1] }
 0x383   : > { %v5759_v1 = vsel %vm5568_vm0, %v5567_v16, -inf  ;;  %v5495_v37 = vmax.f32 %v5493_v53, %v5494_v12  ;;  %v5501_v39 = vrot.slane %v5500_v41, 2  ;;  %v6650_v55 = vshrl.u32 %v6609_v54, 16 }
 0x384   : > { %v5508_v17 = vrot.slane %v5507_v27, 2  ;;  %v5489_v2 = vrot.slane %v5488_v48, 1  ;;  %v6653_v26 = vshll.u32 %v6609_v54, 16  ;;  %v6659_v63 = vshll.u32 %v6610_v5, 16 }
 0x385   : > { %v6967_v8 = vshrl.u32 %v6902_v25, 16  ;;  %v5496_v23 = vrot.slane %v5495_v37, 1  ;;  %v5502_v60 = vmax.f32 %v5500_v41, %v5501_v39  ;;  %v6652_v11 = vrot.slane %v6650_v55, 4 }
 0x386   : > { %v5509_v49 = vmax.f32 %v5507_v27, %v5508_v17  ;;  %v5490_v46 = vmax.f32 %v5488_v48, %v5489_v2  ;;  %v6655_v28 = vrot.slane %v6653_v26, 5  ;;  %v6661_v29 = vrot.slane %v6659_v63, 5  ;;  %v6305_v27 = vld [vmem:[#allocation4 + $0x34] sm:$0x1] }
 0x387   : > { %v6969_v50 = vrot.slane %v6967_v8, 4  ;;  %v5497_v36 = vmax.f32 %v5495_v37, %v5496_v23  ;;  %v5503_v57 = vrot.slane %v5502_v60, 1  ;;  %v6970_v7 = vshll.u32 %v6902_v25, 16  ;;  %v6273_v25 = vld [vmem:[#allocation4 + $0x44] sm:$0x1] }
 0x388   : > { %v5510_v34 = vrot.slane %v5509_v49, 1  ;;  %v5749_v56 = vsel %vm5568_vm0, %v5490_v46, -inf  ;;  %v6656_v3 = vor.u32 %v6655_v28, %v6652_v11  ;;  %v6976_v6 = vshll.u32 %v6903_v10, 16  ;;  %v6611_v23 = vld [vmem:[#allocation4 + $0x20] sm:$0xf] }
 0x389   : > { %v11244_v43 = vrot.slane %v6470_v13, 9  ;;  %v5504_v52 = vmax.f32 %v5502_v60, %v5503_v57  ;;  %v5751_v47 = vmax.f32 %v5749_v56, %v5750_v51  ;;  %v5752_v19 = vsel %vm5568_vm0, %v5497_v36, -inf  ;;  %v6612_v10 = vld [vmem:[#allocation4 + $0x24] sm:$0x1]  ;;  %v6904_v13 = vld [vmem:[#allocation4 + $0x38] sm:$0xf] }
 0x38a   : > { %v5511_v38 = vmax.f32 %v5509_v49, %v5510_v34  ;;  %v5754_v24 = vmax.f32 %v5752_v19, %v5753_v62  ;;  %v6657_v21 = vrot.slane %v6656_v3, 4  ;;  %v6972_v14 = vrot.slane %v6970_v7, 5  ;;  %v6270_v46 = vld [vmem:[#allocation4 + $0x40] sm:$0xf]  ;;  %v6905_v28 = vld [vmem:[#allocation4 + $0x3c] sm:$0x1] }
 0x38b   : > { %v6978_v53 = vrot.slane %v6976_v6, 5  ;;  %v5755_v18 = vsel %vm5568_vm0, %v5504_v52, -inf  ;;  %v11614_v16 = vpack.c.bf16 %v5751_v47, %v5751_v47  ;;  %v6521_v32 = vrot.slane %v6471_v61, 5  ;;  %v6762_v36 = vld [vmem:[#allocation4 + $0x3c] sm:$0x1]  ;;  %v12211_v7 = vld [vmem:[%s15579_s3 + $0x80] sm:$0xff]  }
 0x38c   : > { %v5758_v9 = vsel %vm5568_vm0, %v5511_v38, -inf  ;;  %v5757_v54 = vmax.f32 %v5755_v18, %v5756_v58  ;;  %v11615_v12 = vpack.c.bf16 %v5754_v24, %v5754_v24  ;;  %v6662_v41 = vsel %vm13635_vm4, %v6657_v21, %v6661_v29  ;;  %11844 = vmatprep.subr.bf16.mxu1 %v12211_v7 }
 0x38d   : > { %v5760_v51 = vmax.f32 %v5758_v9, %v5759_v1  ;;  %v6136_v5 = vunpack.c.l.b16 %v11614_v16  ;;  %6743 = vst.msk [vmem:[#allocation5 + $0x1c] sm:$0xf] %vm5825_vm8, %v6662_v41  ;;  %v6973_v62 = vor.u32 %v6972_v14, %v6969_v50  ;;  %v6522_v48 = vsel %vm13644_vm6, %v11244_v43, %v6521_v32  ;;  %v14610_v1 = vpop.permute.xlu0 %6580  ;;  %v6761_v50 = vld [vmem:[#allocation4 + $0x38] sm:$0xe]  ;;  %11845 = vmatpush3.bf16.msra.mxu1 %v12211_v7  ;;  %v6820_v16 = vpop.permute.xlu1 %6819 }
 0x38e   : > { %v6396_v37 = vshrl.u32 %v6304_v44, 16  ;;  %v11616_v39 = vpack.c.bf16 %v5757_v54, %v5757_v54  ;;  %v6137_v17 = vunpack.c.l.b16 %v11615_v12  ;;  %6839 = vst.msk [vmem:[#allocation5 + $0x1c] sm:$0xf] %vm6447_vm1, %v14587_v45  ;;  %6537 = vrot.lane.b32.xlu1 %v6522_v48, %s12631_s30  ;;  %v6399_v58 = vshll.u32 %v6304_v44, 16  ;;  %v6306_v43 = vld [vmem:[#allocation4 + $0x38] sm:$0xf] }
 0x38f   : > { %v11625_v55 = vpack.c.bf16 %v5760_v51, %v5760_v51  ;;  %v6191_v2 = vsel %vm6146_vm12, %v6136_v5, %v14590_v22  ;;  %v6974_v26 = vrot.slane %v6973_v62, 4  ;;  %v6405_v8 = vshll.u32 %v6305_v27, 16  ;;  %6888 = vst.msk [vmem:[#allocation5 + $0x1c] sm:$0xf] %vm6547_vm2, %v6867_v40  ;;  %v6909_v51 = vld [vmem:[#allocation4 + $0x4c] sm:$0x1] }
 0x390   : > { %v6398_v63 = vrot.slane %v6396_v37, 4  ;;  %v6138_v60 = vunpack.c.l.b16 %v11616_v39  ;;  %v6192_v49 = vsel %vm6148_vm10, %v6137_v17, %v6191_v2  ;;  %v6401_v11 = vrot.slane %v6399_v58, 5  ;;  %v6613_v5 = vld [vmem:[#allocation4 + $0x28] sm:$0xf] }
 0x391   : > { %v6274_v45 = vsel %vm13596_vm11, %v11625_v55, %v6273_v25  ;;  %v6979_v22 = vsel %vm13635_vm4, %v6974_v26, %v6978_v53  ;;  %v6664_v57 = vshrl.u32 %v6611_v23, 16  ;;  %v6667_v34 = vshll.u32 %v6611_v23, 16  ;;  %vm15672_vm11 = vmmov %vm15670_vm13 }
 0x392   : > { %6275 = vst [vmem:[#allocation4 + $0x44] sm:$0x1] %v6274_v45  ;;  %v6193_v29 = vsel %vm6150_vm7, %v6138_v60, %v6192_v49  ;;  %7030 = vrot.lane.b32.xlu0 %v6979_v22, %s12635_s19  ;;  %v6402_v40 = vor.u32 %v6401_v11, %v6398_v63  ;;  %v6407_v3 = vrot.slane %v6405_v8, 5  ;;  %v6673_v6 = vshll.u32 %v6612_v10, 16  ;;  %v6869_v45 = vpop.permute.xlu1 %6868  ;;  %v6614_v11 = vld [vmem:[#allocation4 + $0x2c] sm:$0x1]  ;;  %vm15673_vm15 = vmmov %vm15672_vm11 }
 0x393   : > { %v6208_v56 = vpack.c.b16 %v6193_v29, %v6193_v29  ;;  %v6981_v61 = vshrl.u32 %v6904_v13, 16  ;;  %v6666_v38 = vrot.slane %v6664_v57, 4  ;;  %v6669_v47 = vrot.slane %v6667_v34, 5  ;;  %v7027_v24 = vpop.permute.xlu0 %7026 }
 0x394   : > { %v6403_v52 = vrot.slane %v6402_v40, 4  ;;  %v6984_v19 = vshll.u32 %v6904_v13, 16  ;;  %v11251_v14 = vrot.slane %v6761_v50, 9  ;;  %v6990_v44 = vshll.u32 %v6905_v28, 16  ;;  %7048 = vst.msk [vmem:[#allocation5 + $0x1c] sm:$0xf] %vm15672_vm11, %v7027_v24 }
 0x395   : > { %v6271_v21 = vsel %vm13799_vm3, %v6208_v56, %v6270_v46  ;;  %v6983_v53 = vrot.slane %v6981_v61, 4  ;;  %v6670_v9 = vor.u32 %v6669_v47, %v6666_v38  ;;  %v6410_v54 = vshrl.u32 %v6306_v43, 16  ;;  %v6615_v28 = vld [vmem:[#allocation4 + $0x30] sm:$0xf] }
 0x396   : > { %6272 = vst [vmem:[#allocation4 + $0x40] sm:$0xf] %v6271_v21  ;;  %v6408_v18 = vsel %vm13635_vm4, %v6403_v52, %v6407_v3  ;;  %v6986_v32 = vrot.slane %v6984_v19, 5  ;;  %v6807_v12 = vrot.slane %v6762_v36, 5  ;;  %v6413_v42 = vshll.u32 %v6306_v43, 16 }
 0x397   : > { %6435 = vrot.lane.b32.xlu0 %v6408_v18, %s12632_s14  ;;  %v6419_v41 = vshll.u32 %v6307_v20, 16  ;;  %v7009_v27 = vshrl.u32 %v6908_v59, 16  ;;  %v6671_v25 = vrot.slane %v6670_v9, 4  ;;  %v6675_v62 = vrot.slane %v6673_v6, 5  ;;  %v6618_v19 = vld [vmem:[#allocation4 + $0x3c] sm:$0x1] }
 0x398   : > { %v6987_v48 = vor.u32 %v6986_v32, %v6983_v53  ;;  %v6412_v37 = vrot.slane %v6410_v54, 4  ;;  %v6808_v17 = vsel %vm13644_vm6, %v11251_v14, %v6807_v12  ;;  %v6992_v55 = vrot.slane %v6990_v44, 5  ;;  %v6432_v63 = vpop.permute.xlu0 %6431  ;;  %v6617_v44 = vld [vmem:[#allocation4 + $0x38] sm:$0xf] }
 0x399   : > { %v6907_v39 = vld [vmem:[#allocation4 + $0x44] sm:$0x1]  ;;  %v6415_v58 = vrot.slane %v6413_v42, 5  ;;  %v6676_v8 = vsel %vm13635_vm4, %v6671_v25, %v6675_v62  ;;  %v14637_v23 = vrot.slane %v6419_v41, 5  ;;  %v7011_v60 = vrot.slane %v7009_v27, 4 }
 0x39a   : > { %v7004_v2 = vshll.u32 %v6907_v39, 16  ;;  %v14633_v26 = vld [vmem:[#allocation4 + $0x44] sm:$0x1]  ;;  %v7012_v49 = vshll.u32 %v6908_v59, 16  ;;  %6452 = vst.msk [vmem:[#allocation5 + $0x30] sm:$0xf] %vm6447_vm1, %v6432_v63 }
 0x39b   : > { %6825 = vrot.lane.b32.xlu0 %v6808_v17, %s12632_s14  ;;  %6744 = vst.msk [vmem:[#allocation5 + $0x28] sm:$0xf] %vm5825_vm8, %v6676_v8  ;;  %v6988_v10 = vrot.slane %v6987_v48, 4  ;;  %v6416_v13 = vor.u32 %v6415_v58, %v6412_v37  ;;  %v7018_v46 = vshll.u32 %v6909_v51, 16  ;;  %v6678_v22 = vshrl.u32 %v6613_v5, 16  ;;  %v12214_v51 = vld [vmem:[%s15579_s3 + $0x88] sm:$0xff]  }
 0x39c   : > { %6552 = vst.msk [vmem:[#allocation5 + $0x30] sm:$0xf] %vm6547_vm2, %v14597_v30  ;;  %v14645_v29 = vrot.slane %v7004_v2, 5  ;;  %v6811_v40 = vrot.slane %v14633_v26, 5  ;;  %v7014_v50 = vrot.slane %v7012_v49, 5  ;;  %v6681_v36 = vshll.u32 %v6613_v5, 16  ;;  %v6822_v14 = vpop.permute.xlu0 %6821  ;;  %11846 = vmatprep.subr.bf16.mxu1 %v12214_v51 }
 0x39d   : > { %6840 = vst.msk [vmem:[#allocation5 + $0x28] sm:$0xf] %vm6447_vm1, %v6820_v16  ;;  %v6852_v57 = vld [vmem:[#allocation4 + $0x40] sm:$0xf]  ;;  %v6417_v59 = vrot.slane %v6416_v13, 4  ;;  %v6687_v7 = vshll.u32 %v6614_v11, 16  ;;  %11847 = vmatpush3.bf16.msra.mxu1 %v12214_v51 }
 0x39e   : > { %6601 = vst.msk [vmem:[#allocation5 + $0x30] sm:$0xf] %vm15673_vm15, %v14610_v1  ;;  %v6563_v34 = vld [vmem:[#allocation4 + $0x40] sm:$0xf]  ;;  %v6616_v30 = vld [vmem:[#allocation4 + $0x34] sm:$0x1]  ;;  %v7015_v6 = vor.u32 %v7014_v50, %v7011_v60  ;;  %v6993_v1 = vsel %vm13635_vm4, %v6988_v10, %v6992_v55 }
 0x39f   : > { %6889 = vst.msk [vmem:[#allocation5 + $0x28] sm:$0xf] %vm6547_vm2, %v6869_v45  ;;  %6586 = vrot.lane.b32.xlu1 %v6563_v34, %s12635_s19  ;;  %v6906_v56 = vld [vmem:[#allocation4 + $0x40] sm:$0xf]  ;;  %v6680_v61 = vrot.slane %v6678_v22, 4  ;;  %v6683_v43 = vrot.slane %v6681_v36, 5  ;;  %6874 = vrot.lane.b32.xlu0 %v6852_v57, %s12631_s30  ;;  %v6422_v20 = vsel %vm13635_vm4, %v6417_v59, %v14637_v23 }
 0x3a0   : > { %v6763_v3 = vld [vmem:[#allocation4 + $0x40] sm:$0xe]  ;;  %v6995_v52 = vshrl.u32 %v6906_v56, 16  ;;  %v6998_v38 = vshll.u32 %v6906_v56, 16  ;;  %v14655_v47 = vrot.slane %v7018_v46, 5  ;;  %v6692_v53 = vshrl.u32 %v6615_v28, 16  ;;  %v6871_v58 = vpop.permute.xlu0 %6870 }
 0x3a1   : > { %v11252_v24 = vrot.slane %v6763_v3, 9  ;;  %v6684_v21 = vor.u32 %v6683_v43, %v6680_v61  ;;  %v6619_v18 = vld [vmem:[#allocation4 + $0x40] sm:$0xf]  ;;  %v14660_v32 = vrot.slane %v7015_v6, 4  ;;  %v6695_v54 = vshll.u32 %v6615_v28, 16 }
 0x3a2   : > { %v6997_v9 = vrot.slane %v6995_v52, 4  ;;  %v7000_v16 = vrot.slane %v6998_v38, 5  ;;  %v6689_v42 = vrot.slane %v6687_v7, 5  ;;  %v6694_v41 = vrot.slane %v6692_v53, 4  ;;  %v7054_v37 = vld [vmem:[#allocation4 + $0x10] sm:$0xe] }
 0x3a3   : > { %7032 = vrot.lane.b32.xlu1 %v6993_v1, %s12635_s19  ;;  %v6685_v12 = vrot.slane %v6684_v21, 4  ;;  %v6701_v27 = vshll.u32 %v6616_v30, 16  ;;  %v6697_v25 = vrot.slane %v6695_v54, 5  ;;  %v6706_v62 = vshrl.u32 %v6617_v44, 16  ;;  %v7055_v39 = vld [vmem:[#allocation4 + $0x14] sm:$0x1] }
 0x3a4   : > { %v7001_v5 = vor.u32 %v7000_v16, %v6997_v9  ;;  %v6709_v48 = vshll.u32 %v6617_v44, 16  ;;  %v6812_v17 = vsel %vm13644_vm6, %v11252_v24, %v6811_v40  ;;  %v6715_v2 = vshll.u32 %v6618_v19, 16  ;;  %v7056_v63 = vld [vmem:[#allocation4 + $0x18] sm:$0xe]  ;;  %v7057_v8 = vld [vmem:[#allocation4 + $0x1c] sm:$0x1] }
 0x3a5   : > { %v6690_v55 = vsel %vm13635_vm4, %v6685_v12, %v6689_v42  ;;  %v6720_v26 = vshrl.u32 %v6619_v18, 16  ;;  %v6698_v60 = vor.u32 %v6697_v25, %v6694_v41  ;;  %v6708_v49 = vrot.slane %v6706_v62, 4  ;;  %v6620_v11 = vld [vmem:[#allocation4 + $0x44] sm:$0x1]  ;;  %v7058_v28 = vld [vmem:[#allocation4 + $0x20] sm:$0xe] }
 0x3a6   : > { %v7002_v23 = vrot.slane %v7001_v5, 4  ;;  %6745 = vst.msk [vmem:[#allocation5 + $0x34] sm:$0xf] %vm5825_vm8, %v6690_v55  ;;  %v6711_v45 = vrot.slane %v6709_v48, 5  ;;  %v6703_v10 = vrot.slane %v6701_v27, 5  ;;  %v6717_v13 = vrot.slane %v6715_v2, 5 }
 0x3a7   : > { %6437 = vrot.lane.b32.xlu1 %v6422_v20, %s12632_s14  ;;  %6841 = vst.msk [vmem:[#allocation5 + $0x34] sm:$0xf] %vm6447_vm1, %v6822_v14  ;;  %v6722_v46 = vrot.slane %v6720_v26, 4  ;;  %v6723_v22 = vshll.u32 %v6619_v18, 16  ;;  %v6699_v50 = vrot.slane %v6698_v60, 4  ;;  %v11253_v57 = vrot.slane %v7054_v37, 9 }
 0x3a8   : > { %v7007_v40 = vsel %vm13635_vm4, %v7002_v23, %v14645_v29  ;;  %6890 = vst.msk [vmem:[#allocation5 + $0x34] sm:$0xf] %vm6547_vm2, %v6871_v58  ;;  %v6712_v36 = vor.u32 %v6711_v45, %v6708_v49  ;;  %v7059_v34 = vld [vmem:[#allocation4 + $0x24] sm:$0x1]  ;;  %v7060_v59 = vld [vmem:[#allocation4 + $0x28] sm:$0xe]  ;;  %v7021_v24 = vsel %vm13635_vm4, %v14660_v32, %v14655_v47 }
 0x3a9   : > { %7034 = vrot.lane.b32.xlu0 %v7007_v40, %s12635_s19  ;;  %v6725_v7 = vrot.slane %v6723_v22, 5  ;;  %v6729_v30 = vshll.u32 %v6620_v11, 16  ;;  %v7088_v56 = vrot.slane %v7055_v39, 5  ;;  %v11254_v3 = vrot.slane %v7056_v63, 9  ;;  %v7061_v6 = vld [vmem:[#allocation4 + $0x2c] sm:$0x1] }
 0x3aa   : > { %v6704_v61 = vsel %vm13635_vm4, %v6699_v50, %v6703_v10  ;;  %v6713_v43 = vrot.slane %v6712_v36, 4  ;;  %v7092_v1 = vrot.slane %v7057_v8, 5  ;;  %v11255_v29 = vrot.slane %v7058_v28, 9  ;;  %v7063_v44 = vld [vmem:[#allocation4 + $0x34] sm:$0x1]  ;;  %v6534_v8 = vpop.permute.xlu1 %6533 }
 0x3ab   : > { %6827 = vrot.lane.b32.xlu1 %v6812_v17, %s12632_s14  ;;  %6746 = vst.msk [vmem:[#allocation5 + $0x40] sm:$0xf] %vm5825_vm8, %v6704_v61  ;;  %v6726_v52 = vor.u32 %v6725_v7, %v6722_v46  ;;  %v7089_v38 = vsel %vm13644_vm6, %v11253_v57, %v7088_v56  ;;  %v7096_v19 = vrot.slane %v7059_v34, 5  ;;  %v11256_v20 = vrot.slane %v7060_v59, 9  ;;  %v7062_v32 = vld [vmem:[#allocation4 + $0x30] sm:$0xe]  ;;  %s15534_s14 = scalar_lea.hbm %s15587_s11, %s11550_s24 }
 0x3ac   : > { %v6718_v21 = vsel %vm13635_vm4, %v6713_v43, %v6717_v13  ;;  %v7093_v14 = vsel %vm13644_vm6, %v11254_v3, %v7092_v1  ;;  %7126 = vst.msk [vmem:[#allocation5 + $0x8] sm:$0xf] %vm5825_vm8, %v7089_v38  ;;  %v7100_v53 = vrot.slane %v7061_v6, 5  ;;  %v6731_v9 = vrot.slane %v6729_v30, 5  ;;  %v7064_v41 = vld [vmem:[#allocation4 + $0x38] sm:$0xe] }
 0x3ad   : > { %6747 = vst.msk [vmem:[#allocation5 + $0x4c] sm:$0xf] %vm5825_vm8, %v6718_v21  ;;  %v6727_v18 = vrot.slane %v6726_v52, 4  ;;  %7127 = vst.msk [vmem:[#allocation5 + $0x14] sm:$0xf] %vm5825_vm8, %v7093_v14  ;;  %v7097_v16 = vsel %vm13644_vm6, %v11255_v29, %v7096_v19  ;;  %v11257_v51 = vrot.slane %v7062_v32, 9 }
 0x3ae   : > { %v7101_v47 = vsel %vm13644_vm6, %v11256_v20, %v7100_v53  ;;  %7128 = vst.msk [vmem:[#allocation5 + $0x20] sm:$0xf] %vm5825_vm8, %v7097_v16  ;;  %v7104_v12 = vrot.slane %v7063_v44, 5  ;;  %v7065_v27 = vld [vmem:[#allocation4 + $0x3c] sm:$0x1]  ;;  %v11258_v5 = vrot.slane %v7064_v41, 9  ;;  %v6583_v23 = vpop.permute.xlu1 %6582 }
 0x3af   : > { %7036 = vrot.lane.b32.xlu1 %v7021_v24, %s12635_s19  ;;  %v6732_v54 = vsel %vm13635_vm4, %v6727_v18, %v6731_v9  ;;  %7129 = vst.msk [vmem:[#allocation5 + $0x2c] sm:$0xf] %vm5825_vm8, %v7101_v47  ;;  %v7108_v25 = vrot.slane %v7065_v27, 5  ;;  %v7066_v62 = vld [vmem:[#allocation4 + $0x40] sm:$0xe]  ;;  %vm15674_vm4 = vmmov %vm15672_vm11  ;;  %vm7996_vm11 = vcmask 518146  }
 0x3b0   : > { %6748 = vst.msk [vmem:[#allocation5 + $0x58] sm:$0xf] %vm5825_vm8, %v6732_v54  ;;  %v7105_v42 = vsel %vm13644_vm6, %v11257_v51, %v7104_v12  ;;  %v7067_v48 = vld [vmem:[#allocation4 + $0x44] sm:$0x1]  ;;  %v7068_v37 = vld [vmem:[#allocation4 + $0x48] sm:$0xe]  ;;  %vm15675_vm12 = vmmov %vm15674_vm4 }
 0x3b1   : > { %7130 = vst.msk [vmem:[#allocation5 + $0x38] sm:$0xf] %vm5825_vm8, %v7105_v42  ;;  %v7109_v15 = vsel %vm13644_vm6, %v11258_v5, %v7108_v25  ;;  %v7069_v39 = vld [vmem:[#allocation4 + $0x4c] sm:$0x1]  ;;  %v11259_v17 = vrot.slane %v7066_v62, 9  ;;  %v7112_v55 = vrot.slane %v7067_v48, 5  ;;  %vm15678_vm7 = vmmov %vm15674_vm4 }
 0x3b2   : > { %v11260_v58 = vrot.slane %v7068_v37, 9  ;;  %7131 = vst.msk [vmem:[#allocation5 + $0x44] sm:$0xf] %vm5825_vm8, %v7109_v15  ;;  %v7116_v2 = vrot.slane %v7069_v39, 5  ;;  %v12210_v11 = vld [vmem:[#allocation5 + $0x18] ss:$12 sps:$4 sm:$0xff]   ;;  %vm15679_vm3 = vmmov %vm15674_vm4 }
 0x3b3   : > { %v7113_v26 = vsel %vm13644_vm6, %v11259_v17, %v7112_v55  ;;  %vm15680_vm13 = vmmov %vm15679_vm3  ;;  %v7987_v51 = vld [vmem:[#allocation6 + $0x8] sm:$0x1]  ;;  %v8002_v42 = vld [vmem:[#allocation6 + $0x8] sm:$0x4]  ;;  %s10804_s19 = scalar_lea.sflag [#allocation10], %s407_s16 }
 0x3b4   : > { %v7117_v63 = vsel %vm13644_vm6, %v11260_v58, %v7116_v2  ;;  %7132 = vst.msk [vmem:[#allocation5 + $0x50] sm:$0xf] %vm5825_vm8, %v7113_v26  ;;  %vm15677_vm6 = vmmov %vm15674_vm4  ;;  %v12218_v52 = vld [vmem:[#allocation5 + $0x8] ss:$12 sps:$4 sm:$0xff]   ;;  %v7984_v25 = vld [vmem:[#allocation6 + $0x4] sm:$0x1] }
 0x3b5   : > { %7133 = vst.msk [vmem:[#allocation5 + $0x5c] sm:$0xf] %vm5825_vm8, %v7117_v63  ;;  %vm15676_vm8 = vmmov %vm15674_vm4  ;;  %v7999_v62 = vld [vmem:[#allocation6 + $0x4] sm:$0x4]  ;;  %v7993_v15 = vld [vmem:[#allocation6 + $0x10] sm:$0x1] }
 0x3b6   : > { %vm15681_vm9 = vmmov %vm15679_vm3  ;;  %v12219_v38 = vld [vmem:[#allocation5 + $0x20] ss:$12 sps:$4 sm:$0xff]   ;;  %v8008_v39 = vld [vmem:[#allocation6 + $0x10] sm:$0x4] }
 0x3b7   : > { %v7990_v58 = vld [vmem:[#allocation6 + $0xc] sm:$0x1]  ;;  %v8005_v2 = vld [vmem:[#allocation6 + $0xc] sm:$0x4] }
 0x3b9   : > { %v12220_v19 = vld [vmem:[#allocation5 + $0x38] ss:$12 sps:$4 sm:$0xff]  }
 0x3bc   : > { %v12221_v20 = vld [vmem:[#allocation5 + $0x50] ss:$12 sps:$4 sm:$0xff]  }
 0x3c3   : > { %v6536_v13 = vpop.permute.xlu0 %6535 }
 0x3cb   : > { %v7029_v60 = vpop.permute.xlu1 %7028 }
 0x3cc   : > { %7049 = vst.msk [vmem:[#allocation5 + $0x28] sm:$0xf] %vm15674_vm4, %v7029_v60  ;;  %vm7997_vm4 = vsmask.f32 7946 }
 0x3d1   : > { %v6434_v49 = vpop.permute.xlu1 %6433 }
 0x3d2   : > { %6453 = vst.msk [vmem:[#allocation5 + $0x3c] sm:$0xf] %vm6447_vm1, %v6434_v49 }
 0x3d3   : > { %6553 = vst.msk [vmem:[#allocation5 + $0x3c] sm:$0xf] %vm6547_vm2, %v6534_v8  ;;  %v12208_v45 = vld [vmem:[#allocation5 + $0x1c] ss:$12 sps:$4 sm:$0xff]  }
 0x3d4   : > { %6602 = vst.msk [vmem:[#allocation5 + $0x3c] sm:$0xf] %vm15675_vm12, %v6583_v23  ;;  %7413 = vmatprep.mubr.bf16.mxu1 %v12208_v45  ;;  %vm14761_vm12 = vmand %vm7996_vm11, %vm7997_vm4  ;;  %vm7687_vm11 = vcmask 517120   ;;  %vm15689_vm4 = vcmask 1043459  }
 0x3d5   : > { %v6824_v31 = vpop.permute.xlu1 %6823  ;;  %7414 = vmatmul.mubr.bf16.gmra.mrb[4].mxu1 %v12210_v11  ;;  %v8003_v5 = vsel %vm14761_vm12, 0, %v8002_v42  ;;  %v8000_v37 = vsel %vm14761_vm12, 0, %v7999_v62  ;;  %v8009_v55 = vsel %vm14761_vm12, 0, %v8008_v39  ;;  %v8006_v63 = vsel %vm14761_vm12, 0, %v8005_v2 }
 0x3d6   : > { %6842 = vst.msk [vmem:[#allocation5 + $0x40] sm:$0xf] %vm6447_vm1, %v6824_v31  ;;  %8004 = vst [vmem:[#allocation6 + $0x8] sm:$0x4] %v8003_v5 }
 0x3d7   : > { %8001 = vst [vmem:[#allocation6 + $0x4] sm:$0x4] %v8000_v37  ;;  %8010 = vst [vmem:[#allocation6 + $0x10] sm:$0x4] %v8009_v55 }
 0x3d8   : > { %8007 = vst [vmem:[#allocation6 + $0xc] sm:$0x4] %v8006_v63 }
 0x3d9   : > { %v6585_v46 = vpop.permute.xlu0 %6584 }
 0x3da   : > { %v6873_v10 = vpop.permute.xlu1 %6872 }
 0x3db   : > { %6891 = vst.msk [vmem:[#allocation5 + $0x40] sm:$0xf] %vm6547_vm2, %v6873_v10 }
 0x400   : > { %v6538_v40 = vpop.permute.xlu1 %6537 }
 0x404   : > { %v7031_v22 = vpop.permute.xlu0 %7030 }
 0x405   : > { %7050 = vst.msk [vmem:[#allocation5 + $0x34] sm:$0xf] %vm15676_vm8, %v7031_v22  ;;  %vm8158_vm8 = vsmask.f32 1280 }
 0x409   : > { %v6436_v28 = vpop.permute.xlu0 %6435 }
 0x40a   : > { %6454 = vst.msk [vmem:[#allocation5 + $0x48] sm:$0xf] %vm6447_vm1, %v6436_v28 }
 0x40b   : > { %6554 = vst.msk [vmem:[#allocation5 + $0x48] sm:$0xf] %vm6547_vm2, %v6536_v13 }
 0x40c   : > { %6603 = vst.msk [vmem:[#allocation5 + $0x48] sm:$0xf] %vm15677_vm6, %v6585_v46  ;;  %v7142_v56 = vld [vmem:[#allocation5 + $0x30] sm:$0xff]  ;;  %vm8159_vm6 = vsmask.f32 3336 }
 0x40d   : > { %v6826_v50 = vpop.permute.xlu0 %6825 }
 0x40e   : > { %6843 = vst.msk [vmem:[#allocation5 + $0x4c] sm:$0xf] %vm6447_vm1, %v6826_v50 }
 0x411   : > { %v6587_v36 = vpop.permute.xlu1 %6586  ;;  %v6875_v57 = vpop.permute.xlu0 %6874 }
 0x412   : > { %6892 = vst.msk [vmem:[#allocation5 + $0x4c] sm:$0xf] %vm6547_vm2, %v6875_v57 }
 0x415   : > { %v7033_v34 = vpop.permute.xlu1 %7032 }
 0x416   : > { %7051 = vst.msk [vmem:[#allocation5 + $0x40] sm:$0xf] %vm15678_vm7, %v7033_v34  ;;  %vm8161_vm7 = vsmask.f32 5392 }
 0x419   : > { %v6438_v59 = vpop.permute.xlu1 %6437 }
 0x41a   : > { %6455 = vst.msk [vmem:[#allocation5 + $0x54] sm:$0xf] %vm6447_vm1, %v6438_v59 }
 0x41b   : > { %6555 = vst.msk [vmem:[#allocation5 + $0x54] sm:$0xf] %vm6547_vm2, %v6538_v40  ;;  %v7035_v7 = vpop.permute.xlu0 %7034 }
 0x41c   : > { %6604 = vst.msk [vmem:[#allocation5 + $0x54] sm:$0xf] %vm15679_vm3, %v6587_v36  ;;  %vm8160_vm3 = vmor %vm8158_vm8, %vm8159_vm6  ;;  %vm8278_vm8 = vcmask 1040384  }
 0x41d   : > { %7052 = vst.msk [vmem:[#allocation5 + $0x4c] sm:$0xf] %vm15680_vm13, %v7035_v7  ;;  %v6828_v30 = vpop.permute.xlu1 %6827  ;;  %v7144_v3 = vld [vmem:[#allocation5 + $0x3c] sm:$0xff]  ;;  %vm8162_vm13 = vmor %vm8160_vm3, %vm8161_vm7 }
 0x41e   : > { %v12212_v6 = vld [vmem:[#allocation5 + $0x34] ss:$12 sps:$4 sm:$0xff]   ;;  %6844 = vst.msk [vmem:[#allocation5 + $0x58] sm:$0xf] %vm6447_vm1, %v6828_v30  ;;  %v11268_v61 = vcombine.low %v7142_v56, %v7144_v3  ;;  %vm7977_vm1 = vcmask 518144   ;;  %vm8280_vm6 = vmor %vm8278_vm8, %vm6140_vm5 }
 0x41f   : > { %6893 = vst.msk [vmem:[#allocation5 + $0x58] sm:$0xf] %vm6547_vm2, %v14180_v35  ;;  %7421 = vmatprep.mubr.bf16.mxu1 %v12212_v6  ;;  %vm7982_vm2 = vcmask 516096   ;;  %vm8282_vm7 = vmor %vm8280_vm6, %vm6144_vm14 }
 0x420   : > { %7422 = vmatmul.mubr.bf16.gmra.mrb[8].mxu1 %v11268_v61  ;;  %7978 = vst.msk [vmem:[#allocation6] sm:$0x7] %vm7977_vm1, %v12625_v0  ;;  %7980 = vst.msk [vmem:[#allocation6 + $0x14] sm:$0x7] %vm7977_vm1, %v12625_v0 }
 0x421   : > { %v7037_v43 = vpop.permute.xlu1 %7036  ;;  %vm14990_vm3 = vmor %vm8282_vm7, %vm6148_vm10 }
 0x422   : > { %7053 = vst.msk [vmem:[#allocation5 + $0x58] sm:$0xf] %vm15681_vm9, %v7037_v43  ;;  %vm8163_vm9 = vsmask.f32 7448  ;;  %v14791_v43 = vld [vmem:[%s15580_s4] ss:$0 sm:$0xff] }
 0x423   : > { %v12217_v29 = vld [vmem:[#allocation5 + $0x48] ss:$12 sps:$4 sm:$0xff]  }
 0x427   : > { %v11312_v11 = vld.sshfl [vmem:[#allocation6] sm:$0x13 pattern:$0x76325410] }
 0x428   : > { %v8133_v10 = vcombine.high %v11312_v11, %v11312_v11  ;;  %v8166_v13 = vshrl.u32 %v11312_v11, 16  ;;  %v8169_v46 = vshll.u32 %v11312_v11, 16 }
 0x429   : > { %v12215_v1 = vld [vmem:[#allocation5 + $0x4c] ss:$12 sps:$4 sm:$0xff]  }
 0x42a   : > { %7429 = vmatprep.mubr.bf16.mxu1 %v12215_v1  ;;  %v8175_v22 = vshll.u32 %v8133_v10, 16  ;;  %v8168_v28 = vrot.slane %v8166_v13, 6  ;;  %v8171_v40 = vrot.slane %v8169_v46, 7  ;;  %v12224_v46 = vld [vmem:[#allocation8 + $0x48] sm:$0xff]  }
 0x42b   : > { %7430 = vmatmul.mubr.bf16.gmra.mrb[12].mxu1 %v12217_v29 }
 0x42c   : > { %11848 = vmatprep.mubr.msk.bf16.mxu1 %vm5568_vm0, %v12218_v52  ;;  %v8172_v50 = vor.u32 %v8171_v40, %v8168_v28  ;;  %v8177_v36 = vrot.slane %v8175_v22, 7 }
 0x42e   : > { %v8173_v59 = vrot.slane %v8172_v50, 2 }
 0x433   : > { %11849 = vmatmul.mubr.msk.bf16.vlgmr.msra.gmra.mrb[16].mxu1 %vm5568_vm0, %v12219_v38 }
 0x434   : > { %11852 = vmatprep.mubr.msk.bf16.mxu1 %vm5568_vm0, %v12220_v19 }
 0x439   : > { %v11679_v35 = vpop.f32.mrb[0].mxu1 }
 0x43a   : > { %v11680_v24 = vpop.f32.mrb[1].mxu1 }
 0x43b   : > { %11853 = vmatmul.mubr.msk.bf16.gmra.mrb[20].mxu1 %vm5568_vm0, %v12221_v20  ;;  %v14742_v21 = vadd.f32 %v11680_v24, %v11679_v35  ;;  %v11682_v14 = vpop.f32.mrb[2].mxu1  ;;  %vm15682_vm0 = vsmask.f32 256 }
 0x43c   : > { %v11683_v53 = vpop.f32.mrb[3].mxu1  ;;  %vm14755_vm15 = vmand %vm7982_vm2, %vm15682_vm0  ;;  %vm7912_vm0 = vcmask 523264  }
 0x43d   : > { %v14744_v44 = vadd.f32 %v11683_v53, %v11682_v14  ;;  %v7988_v41 = vsel %vm14755_vm15, 0, %v7987_v51  ;;  %v7985_v48 = vsel %vm14755_vm15, 0, %v7984_v25  ;;  %v7994_v17 = vsel %vm14755_vm15, 0, %v7993_v15  ;;  %vm14781_vm2 = vmor %vm8162_vm13, %vm8163_vm9 }
 0x43e   : > { %7989 = vst [vmem:[#allocation6 + $0x8] sm:$0x1] %v7988_v41  ;;  %7986 = vst [vmem:[#allocation6 + $0x4] sm:$0x1] %v7985_v48  ;;  %v7991_v26 = vsel %vm14755_vm15, 0, %v7990_v58  ;;  %v8178_v3 = vsel %vm14781_vm2, %v8173_v59, %v8177_v36  ;;  %v7408_v52 = vadd.f32 %v14742_v21, %v14791_v43  ;;  %vm9262_vm9 = vcmask 1041408  }
 0x43f   : > { %7995 = vst [vmem:[#allocation6 + $0x10] sm:$0x1] %v7994_v17  ;;  %7992 = vst [vmem:[#allocation6 + $0xc] sm:$0x1] %v7991_v26  ;;  %8221 = vrot.lane.b32.xlu0 %v8178_v3, %s12631_s30  ;;  %v7411_v14 = vadd.f32 %v14744_v44, %v14791_v43  ;;  %v8110_v3 = vld [vmem:[#allocation6] sm:$0x3] }
 0x440   : > { %8114 = vst.msk [vmem:[#allocation7] sm:$0x3] %vm7687_vm11, %v8110_v3  ;;  %vm8096_vm15 = vsmask.f32 2306 }
 0x441   : > { %vm14905_vm12 = vmand %vm7977_vm1, %vm8096_vm15 }
 0x442   : > { %vm15692_vm1 = vmmov %vm15689_vm4 }
 0x443   : > { %vm15695_vm10 = vmmov %vm15692_vm1 }
 0x444   : > { %vm15696_vm13 = vmmov %vm15692_vm1 }
 0x4a8   : > { %v11685_v18 = vpop.f32.mrb[4].mxu1 }
 0x4a9   : > { %v11686_v9 = vpop.f32.mrb[5].mxu1 }
 0x4aa   : > { %v14746_v16 = vadd.f32 %v11686_v9, %v11685_v18  ;;  %v11688_v47 = vpop.f32.mrb[6].mxu1 }
 0x4ab   : > { %v11689_v32 = vpop.f32.mrb[7].mxu1 }
 0x4ac   : > { %v14748_v54 = vadd.f32 %v11689_v32, %v11688_v47  ;;  %v7416_v1 = vadd.f32 %v14746_v16, %v14791_v43 }
 0x4ae   : > { %v7419_v20 = vadd.f32 %v14748_v54, %v14791_v43 }
 0x4f3   : > { %v11691_v8 = vpop.f32.mrb[8].mxu1 }
 0x4f4   : > { %v11692_v23 = vpop.f32.mrb[9].mxu1 }
 0x4f5   : > { %v11693_v60 = vadd.f32 %v11692_v23, %v11691_v8  ;;  %v11694_v49 = vpop.f32.mrb[10].mxu1  ;;  %v12222_v23 = vld [vmem:[#allocation8 + $0x40] sm:$0xff]  }
 0x4f6   : > { %v11695_v45 = vpop.f32.mrb[11].mxu1  ;;  %11709 = vmatprep.subr.bf16.mxu0 %v12222_v23 }
 0x4f7   : > { %v14779_v31 = vadd.f32 %v11695_v45, %v11694_v49  ;;  %v14802_v32 = vadd.f32 %v11693_v60, %v14791_v43  ;;  %v12223_v60 = vld [vmem:[#allocation8] sm:$0xff]  }
 0x4f8   : > { %11710 = vmatpush3.bf16.msra.mxu0 %v12223_v60 }
 0x4f9   : > { %11711 = vmatprep.subr.bf16.mxu0 %v12224_v46 }
 0x4fe   : > { %v11697_v34 = vpop.f32.mrb[12].mxu1 }
 0x4ff   : > { %v11698_v7 = vpop.f32.mrb[13].mxu1 }
 0x500   : > { %v11699_v30 = vadd.f32 %v11698_v7, %v11697_v34  ;;  %v11700_v56 = vpop.f32.mrb[14].mxu1 }
 0x501   : > { %v11701_v6 = vpop.f32.mrb[15].mxu1 }
 0x502   : > { %v11702_v61 = vadd.f32 %v11701_v6, %v11700_v56  ;;  %v14808_v54 = vadd.f32 %v11699_v30, %v14791_v43  ;;  %v12225_v56 = vld [vmem:[#allocation8 + $0x8] sm:$0xff]  }
 0x503   : > { %11712 = vmatpush3.bf16.msra.mxu0 %v12225_v56 }
 0x504   : > { %v14814_v27 = vadd.f32 %v11702_v61, %v14791_v43 }
 0x506   : > { %v11850_v29 = vpop.f32.mrb[16].mxu1 }
 0x507   : > { %v7481_v38 = vadd.f32 %v11850_v29, %v7416_v1  ;;  %v7472_v19 = vpop.f32.mrb[17].mxu1 }
 0x508   : > { %v7473_v35 = vadd.f32 %v7472_v19, %v7408_v52  ;;  %v11851_v24 = vpop.f32.mrb[18].mxu1  ;;  %v12226_v52 = vld [vmem:[#allocation8 + $0x50] sm:$0xff]  }
 0x509   : > { %v7505_v53 = vmax.f32 %v7481_v38, 0.0  ;;  %v7484_v18 = vadd.f32 %v11851_v24, %v7419_v20  ;;  %v7475_v9 = vpop.f32.mrb[19].mxu1  ;;  %11713 = vmatprep.subr.bf16.mxu0 %v12226_v52 }
 0x50a   : > { %v7503_v47 = vmax.f32 %v7473_v35, 0.0  ;;  %v7476_v16 = vadd.f32 %v7475_v9, %v7411_v14 }
 0x50b   : > { %v7553_v21 = vcombine.high %v7505_v53, %v7505_v53  ;;  %v7560_v51 = vrot.slane %v7505_v53, %v13683_v33  ;;  %v14805_v12 = vmax.f32 %v7484_v18, 0.0 }
 0x50c   : > { %v7519_v42 = vcombine.high %v7503_v47, %v7503_v47  ;;  %v7526_v44 = vrot.slane %v7503_v47, %v13683_v33  ;;  %v14811_v41 = vmax.f32 %v7476_v16, 0.0 }
 0x50d   : > { %v7567_v5 = vrot.slane %v7553_v21, %v13683_v33  ;;  %v7568_v25 = vcombine.high %v7560_v51, %v7560_v51  ;;  %v7744_v62 = vsel %vm7687_vm11, %v7560_v51, -inf  ;;  %v7570_v48 = vcombine.high %v14805_v12, %v14805_v12  ;;  %v12227_v51 = vld [vmem:[#allocation8 + $0x10] sm:$0xff]  }
 0x50e   : > { %v7745_v37 = vrot.slane %v7744_v62, 4  ;;  %v7533_v15 = vrot.slane %v7519_v42, %v13683_v33  ;;  %v7534_v39 = vcombine.high %v7526_v44, %v7526_v44  ;;  %v7688_v17 = vsel %vm7687_vm11, %v7526_v44, -inf  ;;  %v14822_v55 = vpop.f32.mrb[20].mxu1  ;;  %11714 = vmatpush3.bf16.msra.mxu0 %v12227_v51 }
 0x50f   : > { %v7569_v58 = vcombine.high %v7567_v5, %v7567_v5  ;;  %v7751_v2 = vsel %vm7687_vm11, %v7568_v25, -inf  ;;  %v7758_v26 = vsel %vm7687_vm11, %v7567_v5, -inf  ;;  %v7689_v63 = vrot.slane %v7688_v17, 4  ;;  %v14826_v8 = vpop.f32.mrb[21].mxu1 }
 0x510   : > { %v7746_v49 = vmax.f32 %v7744_v62, %v7745_v37  ;;  %v7752_v45 = vrot.slane %v7751_v2, 4  ;;  %v7759_v11 = vrot.slane %v7758_v26, 4  ;;  %v7535_v10 = vcombine.high %v7533_v15, %v7533_v15  ;;  %v14828_v13 = vpop.f32.mrb[22].mxu1 }
 0x511   : > { %v7765_v22 = vsel %vm7687_vm11, %v7569_v58, -inf  ;;  %v7690_v28 = vmax.f32 %v7688_v17, %v7689_v63  ;;  %v7695_v40 = vsel %vm7687_vm11, %v7534_v39, -inf  ;;  %v7702_v50 = vsel %vm7687_vm11, %v7533_v15, -inf  ;;  %v14833_v36 = vpop.f32.mrb[23].mxu1 }
 0x512   : > { %v7747_v34 = vrot.slane %v7746_v49, 2  ;;  %v7753_v59 = vmax.f32 %v7751_v2, %v7752_v45  ;;  %v7760_v7 = vmax.f32 %v7758_v26, %v7759_v11  ;;  %v7766_v30 = vrot.slane %v7765_v22, 4 }
 0x513   : > { %v7691_v6 = vrot.slane %v7690_v28, 2  ;;  %v7696_v61 = vrot.slane %v7695_v40, 4  ;;  %v7703_v1 = vrot.slane %v7702_v50, 4  ;;  %v7709_v29 = vsel %vm7687_vm11, %v7535_v10, -inf }
 0x514   : > { %v7748_v38 = vmax.f32 %v7746_v49, %v7747_v34  ;;  %v7754_v19 = vrot.slane %v7753_v59, 2  ;;  %v7761_v20 = vrot.slane %v7760_v7, 2  ;;  %v7767_v35 = vmax.f32 %v7765_v22, %v7766_v30 }
 0x515   : > { %v7692_v24 = vmax.f32 %v7690_v28, %v7691_v6  ;;  %v7697_v14 = vmax.f32 %v7695_v40, %v7696_v61  ;;  %v7704_v53 = vmax.f32 %v7702_v50, %v7703_v1  ;;  %v7710_v18 = vrot.slane %v7709_v29, 4 }
 0x516   : > { %v7749_v9 = vrot.slane %v7748_v38, 1  ;;  %v7755_v47 = vmax.f32 %v7753_v59, %v7754_v19  ;;  %v7762_v16 = vmax.f32 %v7760_v7, %v7761_v20  ;;  %v7768_v21 = vrot.slane %v7767_v35, 2 }
 0x517   : > { %v7693_v42 = vrot.slane %v7692_v24, 1  ;;  %v7698_v44 = vrot.slane %v7697_v14, 2  ;;  %v7705_v5 = vrot.slane %v7704_v53, 2  ;;  %v7711_v25 = vmax.f32 %v7709_v29, %v7710_v18 }
 0x518   : > { %v7750_v62 = vmax.f32 %v7748_v38, %v7749_v9  ;;  %v7756_v37 = vrot.slane %v7755_v47, 1  ;;  %v7763_v15 = vrot.slane %v7762_v16, 1  ;;  %v7769_v39 = vmax.f32 %v7767_v35, %v7768_v21 }
 0x519   : > { %v7694_v17 = vmax.f32 %v7692_v24, %v7693_v42  ;;  %v7699_v58 = vmax.f32 %v7697_v14, %v7698_v44  ;;  %v7706_v2 = vmax.f32 %v7704_v53, %v7705_v5  ;;  %v7712_v26 = vrot.slane %v7711_v25, 2 }
 0x51a   : > { %v7757_v63 = vmax.f32 %v7755_v47, %v7756_v37  ;;  %v7764_v23 = vmax.f32 %v7762_v16, %v7763_v15  ;;  %v7770_v60 = vrot.slane %v7769_v39, 1  ;;  %v14838_v49 = vsel %vm7912_vm0, %v7750_v62, -inf }
 0x51b   : > { %v7700_v45 = vrot.slane %v7699_v58, 1  ;;  %v7707_v11 = vrot.slane %v7706_v2, 1  ;;  %v7713_v10 = vmax.f32 %v7711_v25, %v7712_v26  ;;  %v14841_v46 = vsel %vm7912_vm0, %v7694_v17, -inf }
 0x51c   : > { %v7771_v22 = vmax.f32 %v7769_v39, %v7770_v60  ;;  %v14844_v28 = vsel %vm7912_vm0, %v7757_v63, -inf  ;;  %v14847_v40 = vsel %vm7912_vm0, %v7764_v23, -inf  ;;  %v7577_v50 = vrot.slane %v14805_v12, %v13683_v33 }
 0x51d   : > { %v7701_v34 = vmax.f32 %v7699_v58, %v7700_v45  ;;  %v7708_v59 = vmax.f32 %v7706_v2, %v7707_v11  ;;  %v7714_v7 = vrot.slane %v7713_v10, 1  ;;  %v7584_v30 = vrot.slane %v7570_v48, %v13683_v33 }
 0x51e   : > { %v14856_v56 = vsel %vm7912_vm0, %v7771_v22, -inf  ;;  %v7585_v3 = vcombine.high %v7577_v50, %v7577_v50  ;;  %v7772_v6 = vsel %vm7687_vm11, %v7577_v50, -inf  ;;  %v7536_v61 = vcombine.high %v14811_v41, %v14811_v41 }
 0x51f   : > { %v7715_v1 = vmax.f32 %v7713_v10, %v7714_v7  ;;  %v14862_v29 = vsel %vm7912_vm0, %v7701_v34, -inf  ;;  %v14865_v52 = vsel %vm7912_vm0, %v7708_v59, -inf  ;;  %v7586_v38 = vcombine.high %v7584_v30, %v7584_v30 }
 0x520   : > { %v7773_v19 = vrot.slane %v7772_v6, 4  ;;  %v7779_v12 = vsel %vm7687_vm11, %v7585_v3, -inf  ;;  %v7786_v48 = vsel %vm7687_vm11, %v7584_v30, -inf  ;;  %v7543_v20 = vrot.slane %v14811_v41, %v13683_v33 }
 0x521   : > { %v14872_v35 = vsel %vm7912_vm0, %v7715_v1, -inf  ;;  %v7780_v24 = vrot.slane %v7779_v12, 4  ;;  %v7787_v14 = vrot.slane %v7786_v48, 4  ;;  %v7793_v53 = vsel %vm7687_vm11, %v7586_v38, -inf }
 0x522   : > { %v7774_v18 = vmax.f32 %v7772_v6, %v7773_v19  ;;  %v7794_v9 = vrot.slane %v7793_v53, 4  ;;  %v7550_v47 = vrot.slane %v7536_v61, %v13683_v33  ;;  %v7551_v16 = vcombine.high %v7543_v20, %v7543_v20 }
 0x523   : > { %v7781_v21 = vmax.f32 %v7779_v12, %v7780_v24  ;;  %v7788_v51 = vmax.f32 %v7786_v48, %v7787_v14  ;;  %v7716_v42 = vsel %vm7687_vm11, %v7543_v20, -inf  ;;  %v14879_v44 = vadd.f32 %v14822_v55, %v14808_v54 }
 0x524   : > { %v7775_v41 = vrot.slane %v7774_v18, 2  ;;  %v7795_v5 = vmax.f32 %v7793_v53, %v7794_v9  ;;  %v7552_v25 = vcombine.high %v7550_v47, %v7550_v47  ;;  %v7717_v62 = vrot.slane %v7716_v42, 4 }
 0x525   : > { %v7782_v37 = vrot.slane %v7781_v21, 2  ;;  %v7789_v15 = vrot.slane %v7788_v51, 2  ;;  %v7723_v39 = vsel %vm7687_vm11, %v7551_v16, -inf  ;;  %v7730_v17 = vsel %vm7687_vm11, %v7550_v47, -inf }
 0x526   : > { %v7776_v58 = vmax.f32 %v7774_v18, %v7775_v41  ;;  %v7796_v2 = vrot.slane %v7795_v5, 2  ;;  %v7718_v26 = vmax.f32 %v7716_v42, %v7717_v62  ;;  %v7724_v63 = vrot.slane %v7723_v39, 4 }
 0x527   : > { %v7783_v23 = vmax.f32 %v7781_v21, %v7782_v37  ;;  %v7790_v60 = vmax.f32 %v7788_v51, %v7789_v15  ;;  %v7731_v45 = vrot.slane %v7730_v17, 4  ;;  %v7737_v54 = vsel %vm7687_vm11, %v7552_v25, -inf }
 0x528   : > { %v7777_v55 = vrot.slane %v7776_v58, 1  ;;  %v7797_v11 = vmax.f32 %v7795_v5, %v7796_v2  ;;  %v7719_v10 = vrot.slane %v7718_v26, 2  ;;  %v7725_v22 = vmax.f32 %v7723_v39, %v7724_v63 }
 0x529   : > { %v7784_v50 = vrot.slane %v7783_v23, 1  ;;  %v7791_v34 = vrot.slane %v7790_v60, 1  ;;  %v7732_v59 = vmax.f32 %v7730_v17, %v7731_v45  ;;  %v7738_v7 = vrot.slane %v7737_v54, 4 }
 0x52a   : > { %v7778_v30 = vmax.f32 %v7776_v58, %v7777_v55  ;;  %v7798_v3 = vrot.slane %v7797_v11, 1  ;;  %v7720_v6 = vmax.f32 %v7718_v26, %v7719_v10  ;;  %v7726_v61 = vrot.slane %v7725_v22, 2 }
 0x52b   : > { %v7785_v1 = vmax.f32 %v7783_v23, %v7784_v50  ;;  %v7792_v38 = vmax.f32 %v7790_v60, %v7791_v34  ;;  %v7733_v19 = vrot.slane %v7732_v59, 2  ;;  %v7739_v12 = vmax.f32 %v7737_v54, %v7738_v7 }
 0x52c   : > { %v7799_v48 = vmax.f32 %v7797_v11, %v7798_v3  ;;  %v7926_v20 = vsel %vm7912_vm0, %v7778_v30, -inf  ;;  %v7721_v24 = vrot.slane %v7720_v6, 1  ;;  %v7727_v14 = vmax.f32 %v7725_v22, %v7726_v61 }
 0x52d   : > { %v7927_v53 = vmax.f32 %v14838_v49, %v7926_v20  ;;  %v7929_v18 = vsel %vm7912_vm0, %v7785_v1, -inf  ;;  %v7932_v9 = vsel %vm7912_vm0, %v7792_v38, -inf  ;;  %v7734_v47 = vmax.f32 %v7732_v59, %v7733_v19 }
 0x52e   : > { %v7930_v16 = vmax.f32 %v14844_v28, %v7929_v18  ;;  %v7933_v21 = vmax.f32 %v14847_v40, %v7932_v9  ;;  %v7935_v51 = vsel %vm7912_vm0, %v7799_v48, -inf  ;;  %v7722_v42 = vmax.f32 %v7720_v6, %v7721_v24 }
 0x52f   : > { %v7936_v41 = vmax.f32 %v14856_v56, %v7935_v51  ;;  %v11630_v5 = vpack.c.bf16 %v7927_v53, %v7927_v53  ;;  %v7728_v25 = vrot.slane %v7727_v14, 1  ;;  %v7735_v62 = vrot.slane %v7734_v47, 1 }
 0x530   : > { %v11631_v37 = vpack.c.bf16 %v7930_v16, %v7930_v16  ;;  %v11632_v15 = vpack.c.bf16 %v7933_v21, %v7933_v21  ;;  %v7740_v49 = vrot.slane %v7739_v12, 2  ;;  %v7914_v39 = vsel %vm7912_vm0, %v7722_v42, -inf }
 0x531   : > { %v11633_v17 = vpack.c.bf16 %v7936_v41, %v7936_v41  ;;  %v8063_v58 = vunpack.c.l.b16 %v11630_v5  ;;  %v7729_v2 = vmax.f32 %v7727_v14, %v7728_v25  ;;  %v7736_v26 = vmax.f32 %v7734_v47, %v7735_v62 }
 0x532   : > { %v8064_v28 = vunpack.c.l.b16 %v11631_v37  ;;  %v8065_v63 = vunpack.c.l.b16 %v11632_v15  ;;  %v7741_v40 = vmax.f32 %v7739_v12, %v7740_v49  ;;  %v7915_v23 = vmax.f32 %v14841_v46, %v7914_v39 }
 0x533   : > { %v8066_v60 = vunpack.c.l.b16 %v11633_v17  ;;  %v7917_v56 = vsel %vm7912_vm0, %v7729_v2, -inf  ;;  %v7920_v45 = vsel %vm7912_vm0, %v7736_v26, -inf  ;;  %v7509_v54 = vmax.f32 %v14879_v44, 0.0  ;;  %v8101_v44 = vld [vmem:[#allocation6 + $0x8] sm:$0x7]  ;;  %v12228_v26 = vld [vmem:[#allocation8 + $0x58] sm:$0xff]  }
 0x534   : > { %v8078_v55 = vsel %vm6140_vm5, %v8064_v28, %v8063_v58  ;;  %v7742_v11 = vrot.slane %v7741_v40, 1  ;;  %v7918_v10 = vmax.f32 %v14862_v29, %v7917_v56  ;;  %v7921_v22 = vmax.f32 %v14865_v52, %v7920_v45  ;;  %v12229_v28 = vld [vmem:[#allocation8 + $0x18] sm:$0xff]   ;;  %11715 = vmatprep.subr.bf16.mxu0 %v12228_v26 }
 0x535   : > { %v8079_v50 = vsel %vm15689_vm4, %v8065_v63, %v8078_v55  ;;  %v11626_v34 = vpack.c.bf16 %v7915_v23, %v7915_v23  ;;  %v7621_v59 = vcombine.high %v7509_v54, %v7509_v54  ;;  %v7628_v46 = vrot.slane %v7509_v54, %v13683_v33  ;;  %11716 = vmatpush3.bf16.msra.mxu0 %v12229_v28 }
 0x536   : > { %v8080_v7 = vsel %vm6144_vm14, %v8066_v60, %v8079_v50  ;;  %v7743_v3 = vmax.f32 %v7741_v40, %v7742_v11  ;;  %v11627_v6 = vpack.c.bf16 %v7918_v10, %v7918_v10  ;;  %v11628_v29 = vpack.c.bf16 %v7921_v22, %v7921_v22  ;;  %v8098_v40 = vld [vmem:[#allocation6 + $0x4] sm:$0x7] }
 0x537   : > { %v8088_v61 = vpack.c.b16 %v8080_v7, %v8080_v7  ;;  %v8059_v52 = vunpack.c.l.b16 %v11626_v34  ;;  %v7635_v1 = vrot.slane %v7621_v59, %v13683_v33  ;;  %v7636_v38 = vcombine.high %v7628_v46, %v7628_v46 }
 0x538   : > { %v7923_v19 = vsel %vm7912_vm0, %v7743_v3, -inf  ;;  %v8060_v12 = vunpack.c.l.b16 %v11627_v6  ;;  %v8061_v48 = vunpack.c.l.b16 %v11628_v29  ;;  %v7856_v20 = vsel %vm7687_vm11, %v7628_v46, -inf }
 0x539   : > { %v8102_v24 = vsel %vm14905_vm12, %v8088_v61, %v8101_v44  ;;  %v7924_v14 = vmax.f32 %v14872_v35, %v7923_v19  ;;  %v7637_v53 = vcombine.high %v7635_v1, %v7635_v1  ;;  %v7857_v18 = vrot.slane %v7856_v20, 4 }
 0x53a   : > { %8103 = vst [vmem:[#allocation6 + $0x8] sm:$0x7] %v8102_v24  ;;  %v8075_v9 = vsel %vm6140_vm5, %v8060_v12, %v8059_v52  ;;  %v7863_v47 = vsel %vm7687_vm11, %v7636_v38, -inf  ;;  %v7870_v16 = vsel %vm7687_vm11, %v7635_v1, -inf  ;;  %v7489_v21 = vadd.f32 %v14826_v8, %v14802_v32 }
 0x53b   : > { %v11629_v51 = vpack.c.bf16 %v7924_v14, %v7924_v14  ;;  %v8076_v42 = vsel %vm15692_vm1, %v8061_v48, %v8075_v9  ;;  %v7858_v41 = vmax.f32 %v7856_v20, %v7857_v18  ;;  %v7864_v5 = vrot.slane %v7863_v47, 4 }
 0x53c   : > { %v7871_v25 = vrot.slane %v7870_v16, 4  ;;  %v7877_v35 = vsel %vm7687_vm11, %v7637_v53, -inf  ;;  %v7507_v62 = vmax.f32 %v7489_v21, 0.0  ;;  %v7500_v37 = vadd.f32 %v14828_v13, %v14814_v27 }
 0x53d   : > { %v8062_v15 = vunpack.c.l.b16 %v11629_v51  ;;  %v7859_v49 = vrot.slane %v7858_v41, 2  ;;  %v7865_v39 = vmax.f32 %v7863_v47, %v7864_v5  ;;  %v7878_v17 = vrot.slane %v7877_v35, 4 }
 0x53e   : > { %v7872_v58 = vmax.f32 %v7870_v16, %v7871_v25  ;;  %v7587_v2 = vcombine.high %v7507_v62, %v7507_v62  ;;  %v7594_v32 = vrot.slane %v7507_v62, %v13683_v33  ;;  %v7510_v8 = vmax.f32 %v7500_v37, 0.0 }
 0x53f   : > { %v8077_v63 = vsel %vm6144_vm14, %v8062_v15, %v8076_v42  ;;  %v7860_v23 = vmax.f32 %v7858_v41, %v7859_v49  ;;  %v7866_v60 = vrot.slane %v7865_v39, 2  ;;  %v7879_v56 = vmax.f32 %v7877_v35, %v7878_v17 }
 0x540   : > { %v8087_v45 = vpack.c.b16 %v8077_v63, %v8077_v63  ;;  %v7873_v54 = vrot.slane %v7872_v58, 2  ;;  %v7601_v27 = vrot.slane %v7587_v2, %v13683_v33  ;;  %v7602_v13 = vcombine.high %v7594_v32, %v7594_v32 }
 0x541   : > { %v7861_v55 = vrot.slane %v7860_v23, 1  ;;  %v7867_v11 = vmax.f32 %v7865_v39, %v7866_v60  ;;  %v7880_v10 = vrot.slane %v7879_v56, 2  ;;  %v7800_v22 = vsel %vm7687_vm11, %v7594_v32, -inf }
 0x542   : > { %v8099_v50 = vsel %vm14905_vm12, %v8087_v45, %v8098_v40  ;;  %v7874_v34 = vmax.f32 %v7872_v58, %v7873_v54  ;;  %v7603_v59 = vcombine.high %v7601_v27, %v7601_v27  ;;  %v7801_v46 = vrot.slane %v7800_v22, 4  ;;  %v11325_v7 = vld.sshfl [vmem:[#allocation6 + $0x8] sm:$0x3 pattern:$0x76325410] }
 0x543   : > { %8100 = vst [vmem:[#allocation6 + $0x4] sm:$0x7] %v8099_v50  ;;  %v7862_v44 = vmax.f32 %v7860_v23, %v7861_v55  ;;  %v7868_v3 = vrot.slane %v7867_v11, 1  ;;  %v7881_v6 = vmax.f32 %v7879_v56, %v7880_v10  ;;  %v7807_v29 = vsel %vm7687_vm11, %v7602_v13, -inf  ;;  %8347 = vrot.lane.b32.xlu1 %v11325_v7, %s12631_s30 }
 0x544   : > { %v7875_v61 = vrot.slane %v7874_v34, 1  ;;  %v7802_v52 = vmax.f32 %v7800_v22, %v7801_v46  ;;  %v7808_v1 = vrot.slane %v7807_v29, 4  ;;  %v7814_v38 = vsel %vm7687_vm11, %v7601_v27, -inf }
 0x545   : > { %v7869_v19 = vmax.f32 %v7867_v11, %v7868_v3  ;;  %v7882_v12 = vrot.slane %v7881_v6, 1  ;;  %v7815_v48 = vrot.slane %v7814_v38, 4  ;;  %v7427_v20 = vadd.f32 %v14779_v31, %v14791_v43  ;;  %v14955_v13 = vld.sshfl [vmem:[#allocation6 + $0x8] sm:$0x12 pattern:$0x76325410] }
 0x546   : > { %v7876_v24 = vmax.f32 %v7874_v34, %v7875_v61  ;;  %v7803_v14 = vrot.slane %v7802_v52, 2  ;;  %v7809_v53 = vmax.f32 %v7807_v29, %v7808_v1  ;;  %v7821_v18 = vsel %vm7687_vm11, %v7603_v59, -inf }
 0x547   : > { %v7883_v9 = vmax.f32 %v7881_v6, %v7882_v12  ;;  %v14937_v47 = vsel %vm7912_vm0, %v7862_v44, -inf  ;;  %v7816_v16 = vmax.f32 %v7814_v38, %v7815_v48  ;;  %v7822_v21 = vrot.slane %v7821_v18, 4 }
 0x548   : > { %v14940_v51 = vsel %vm7912_vm0, %v7869_v19, -inf  ;;  %v7804_v42 = vmax.f32 %v7802_v52, %v7803_v14  ;;  %v7810_v41 = vrot.slane %v7809_v53, 2  ;;  %v7638_v5 = vcombine.high %v7510_v8, %v7510_v8 }
 0x549   : > { %v14943_v25 = vsel %vm7912_vm0, %v7876_v24, -inf  ;;  %v7817_v31 = vrot.slane %v7816_v16, 2  ;;  %v7823_v43 = vmax.f32 %v7821_v18, %v7822_v21  ;;  %v7645_v35 = vrot.slane %v7510_v8, %v13683_v33 }
 0x54a   : > { %v7805_v62 = vrot.slane %v7804_v42, 1  ;;  %v7811_v37 = vmax.f32 %v7809_v53, %v7810_v41  ;;  %v7652_v15 = vrot.slane %v7638_v5, %v13683_v33  ;;  %v7492_v49 = vadd.f32 %v14833_v36, %v7427_v20  ;;  %v11324_v39 = vld.sshfl [vmem:[#allocation6 + $0x4] sm:$0x3 pattern:$0x76325410] }
 0x54b   : > { %v7818_v17 = vmax.f32 %v7816_v16, %v7817_v31  ;;  %v7824_v58 = vrot.slane %v7823_v43, 2  ;;  %v7653_v2 = vcombine.high %v7645_v35, %v7645_v35  ;;  %v7884_v32 = vsel %vm7687_vm11, %v7645_v35, -inf  ;;  %8345 = vrot.lane.b32.xlu0 %v11324_v39, %s12631_s30 }
 0x54c   : > { %v7806_v26 = vmax.f32 %v7804_v42, %v7805_v62  ;;  %v7812_v28 = vrot.slane %v7811_v37, 1  ;;  %v7654_v63 = vcombine.high %v7652_v15, %v7652_v15  ;;  %v7885_v40 = vrot.slane %v7884_v32, 4 }
 0x54d   : > { %v7819_v23 = vrot.slane %v7818_v17, 1  ;;  %v7825_v8 = vmax.f32 %v7823_v43, %v7824_v58  ;;  %v7891_v60 = vsel %vm7687_vm11, %v7653_v2, -inf  ;;  %v7898_v56 = vsel %vm7687_vm11, %v7652_v15, -inf }
 0x54e   : > { %v14953_v36 = vsel %vm7912_vm0, %v7883_v9, -inf  ;;  %v7813_v45 = vmax.f32 %v7811_v37, %v7812_v28  ;;  %v7886_v54 = vmax.f32 %v7884_v32, %v7885_v40  ;;  %v7892_v27 = vrot.slane %v7891_v60, 4 }
 0x54f   : > { %v7820_v55 = vmax.f32 %v7818_v17, %v7819_v23  ;;  %v7826_v11 = vrot.slane %v7825_v8, 1  ;;  %v7899_v10 = vrot.slane %v7898_v56, 4  ;;  %v7905_v22 = vsel %vm7687_vm11, %v7654_v63, -inf }
 0x550   : > { %v14959_v50 = vsel %vm7912_vm0, %v7806_v26, -inf  ;;  %v7887_v34 = vrot.slane %v7886_v54, 2  ;;  %v7893_v59 = vmax.f32 %v7891_v60, %v7892_v27  ;;  %v7906_v46 = vrot.slane %v7905_v22, 4 }
 0x551   : > { %v14961_v7 = vmax.f32 %v7825_v8, %v7826_v11  ;;  %v14964_v44 = vsel %vm7912_vm0, %v7813_v45, -inf  ;;  %v7900_v3 = vmax.f32 %v7898_v56, %v7899_v10  ;;  %v7508_v6 = vmax.f32 %v7492_v49, 0.0 }
 0x552   : > { %v14967_v29 = vsel %vm7912_vm0, %v7820_v55, -inf  ;;  %v7888_v61 = vmax.f32 %v7886_v54, %v7887_v34  ;;  %v7894_v52 = vrot.slane %v7893_v59, 2  ;;  %v7907_v1 = vmax.f32 %v7905_v22, %v7906_v46 }
 0x553   : > { %v7901_v38 = vrot.slane %v7900_v3, 2  ;;  %v7604_v19 = vcombine.high %v7508_v6, %v7508_v6  ;;  %v7611_v12 = vrot.slane %v7508_v6, %v13683_v33  ;;  %v8488_v48 = vcombine.high %v14955_v13, %v14955_v13 }
 0x554   : > { %v7889_v20 = vrot.slane %v7888_v61, 1  ;;  %v7895_v24 = vmax.f32 %v7893_v59, %v7894_v52  ;;  %v7908_v14 = vrot.slane %v7907_v1, 2  ;;  %v11337_v53 = vrot.slane %v14955_v13, 9 }
 0x555   : > { %v7902_v18 = vmax.f32 %v7900_v3, %v7901_v38  ;;  %v7618_v9 = vrot.slane %v7604_v19, %v13683_v33  ;;  %v7619_v16 = vcombine.high %v7611_v12, %v7611_v12  ;;  %v7828_v21 = vsel %vm7687_vm11, %v7611_v12, -inf  ;;  %v11332_v12 = vld.sshfl [vmem:[#allocation6 + $0x4] sm:$0x12 pattern:$0x76325410] }
 0x556   : > { %v7890_v42 = vmax.f32 %v7888_v61, %v7889_v20  ;;  %v7896_v41 = vrot.slane %v7895_v24, 1  ;;  %v7909_v5 = vmax.f32 %v7907_v1, %v7908_v14  ;;  %v7829_v31 = vrot.slane %v7828_v21, 4 }
 0x557   : > { %v7903_v43 = vrot.slane %v7902_v18, 1  ;;  %v7620_v35 = vcombine.high %v7618_v9, %v7618_v9  ;;  %v7835_v62 = vsel %vm7687_vm11, %v7619_v16, -inf  ;;  %v7842_v37 = vsel %vm7687_vm11, %v7618_v9, -inf }
 0x558   : > { %v7897_v15 = vmax.f32 %v7895_v24, %v7896_v41  ;;  %v7910_v49 = vrot.slane %v7909_v5, 1  ;;  %v7950_v39 = vsel %vm7912_vm0, %v7890_v42, -inf  ;;  %v7830_v17 = vmax.f32 %v7828_v21, %v7829_v31  ;;  %v11314_v9 = vld.sshfl [vmem:[#allocation6 + $0x8] sm:$0x13 pattern:$0x76325410] }
 0x559   : > { %v7904_v58 = vmax.f32 %v7902_v18, %v7903_v43  ;;  %v7951_v2 = vmax.f32 %v14937_v47, %v7950_v39  ;;  %v7836_v32 = vrot.slane %v7835_v62, 4  ;;  %v7843_v26 = vrot.slane %v7842_v37, 4  ;;  %v8107_v31 = vld [vmem:[#allocation6 + $0x10] sm:$0x7]  ;;  %v12230_v39 = vld [vmem:[#allocation8 + $0x60] sm:$0xff]  }
 0x55a   : > { %v7911_v28 = vmax.f32 %v7909_v5, %v7910_v49  ;;  %v7953_v63 = vsel %vm7912_vm0, %v7897_v15, -inf  ;;  %v7831_v40 = vrot.slane %v7830_v17, 2  ;;  %v7849_v23 = vsel %vm7687_vm11, %v7620_v35, -inf  ;;  %11717 = vmatprep.subr.bf16.mxu0 %v12230_v39  ;;  %v12235_v39 = vld [vmem:[#allocation8 + $0x88] sm:$0xff]  }
 0x55b   : > { %v7954_v8 = vmax.f32 %v14940_v51, %v7953_v63  ;;  %v7956_v60 = vsel %vm7912_vm0, %v7904_v58, -inf  ;;  %v11638_v56 = vpack.c.bf16 %v7951_v2, %v7951_v2  ;;  %v7837_v45 = vmax.f32 %v7835_v62, %v7836_v32  ;;  %v12232_v58 = vld [vmem:[#allocation8 + $0xc0] sm:$0xff]  }
 0x55c   : > { %v7957_v54 = vmax.f32 %v14943_v25, %v7956_v60  ;;  %v7959_v47 = vsel %vm7912_vm0, %v7911_v28, -inf  ;;  %v7832_v27 = vmax.f32 %v7830_v17, %v7831_v40  ;;  %v7844_v13 = vmax.f32 %v7842_v37, %v7843_v26  ;;  %v12231_v17 = vld [vmem:[#allocation8 + $0x20] sm:$0xff]   ;;  %11731 = vmatprep.subr.bf16.mxu1 %v12232_v58 }
 0x55d   : > { %v7960_v55 = vmax.f32 %v14953_v36, %v7959_v47  ;;  %v11639_v11 = vpack.c.bf16 %v7954_v8, %v7954_v8  ;;  %v8071_v10 = vunpack.c.l.b16 %v11638_v56  ;;  %v7838_v22 = vrot.slane %v7837_v45, 2  ;;  %v11313_v63 = vld.sshfl [vmem:[#allocation6 + $0x4] sm:$0x13 pattern:$0x76325410]  ;;  %11718 = vmatpush3.bf16.msra.mxu0 %v12231_v17 }
 0x55e   : > { %v11640_v34 = vpack.c.bf16 %v7957_v54, %v7957_v54  ;;  %v7833_v59 = vrot.slane %v7832_v27, 1  ;;  %v7845_v51 = vrot.slane %v7844_v13, 2  ;;  %v7850_v46 = vrot.slane %v7849_v23, 4  ;;  %v8111_v60 = vld [vmem:[#allocation6 + $0x4] sm:$0x3] }
 0x55f   : > { %v11641_v6 = vpack.c.bf16 %v7960_v55, %v7960_v55  ;;  %v8072_v25 = vunpack.c.l.b16 %v11639_v11  ;;  %v7839_v61 = vmax.f32 %v7837_v45, %v7838_v22  ;;  %v8511_v52 = vrot.slane %v8488_v48, 7  ;;  %v8112_v48 = vld [vmem:[#allocation6 + $0x8] sm:$0x3]  ;;  %8115 = vst.msk [vmem:[#allocation7 + $0xa] sm:$0x3] %vm7687_vm11, %v8111_v60 }
 0x560   : > { %v8073_v1 = vunpack.c.l.b16 %v11640_v34  ;;  %v7834_v38 = vmax.f32 %v7832_v27, %v7833_v59  ;;  %v7846_v19 = vmax.f32 %v7844_v13, %v7845_v51  ;;  %v7851_v36 = vmax.f32 %v7849_v23, %v7850_v46  ;;  %8116 = vst.msk [vmem:[#allocation7 + $0x14] sm:$0x3] %vm7687_vm11, %v8112_v48  ;;  %v12233_v27 = vld [vmem:[#allocation8 + $0x80] sm:$0xff]   ;;  %v8538_v17 = vld [vmem:[#allocation6 + $0x8] sm:$0x3] }
 0x561   : > { %v8074_v20 = vunpack.c.l.b16 %v11641_v6  ;;  %v8084_v24 = vsel %vm6140_vm5, %v8072_v25, %v8071_v10  ;;  %v7840_v14 = vrot.slane %v7839_v61, 1  ;;  %v8512_v18 = vsel %vm14990_vm3, %v11337_v53, %v8511_v52  ;;  %11732 = vmatpush3.bf16.msra.mxu1 %v12233_v27  ;;  %8542 = vst.msk [vmem:[#allocation7 + $0x6] sm:$0x3] %vm7687_vm11, %v8538_v17  ;;  %v12236_v60 = vld [vmem:[#allocation8 + $0x68] sm:$0xff]  }
 0x562   : > { %v8085_v16 = vsel %vm15695_vm10, %v8073_v1, %v8084_v24  ;;  %v7847_v21 = vrot.slane %v7846_v19, 1  ;;  %v7852_v42 = vrot.slane %v7851_v36, 2  ;;  %v7938_v41 = vsel %vm7912_vm0, %v7834_v38, -inf  ;;  %8523 = vrot.lane.b32.xlu1 %v8512_v18, %s12631_s30  ;;  %8307 = vst.msk [vmem:[#allocation7 + $0x16] sm:$0x3] %vm7687_vm11, %v8512_v18  ;;  %11719 = vmatprep.subr.bf16.mxu0 %v12236_v60 }
 0x563   : > { %8718 = vst.msk [vmem:[#allocation7 + $0x8] sm:$0x3] %vm7687_vm11, %v8512_v18  ;;  %v8086_v5 = vsel %vm6144_vm14, %v8074_v20, %v8085_v16  ;;  %v7841_v43 = vmax.f32 %v7839_v61, %v7840_v14  ;;  %v7939_v53 = vmax.f32 %v14959_v50, %v7938_v41  ;;  %v8480_v35 = vcombine.high %v11332_v12, %v11332_v12  ;;  %v11316_v24 = vld.sshfl [vmem:[#allocation6] sm:$0x12 pattern:$0x76325410] }
 0x564   : > { %v8090_v62 = vpack.c.b16 %v8086_v5, %v8086_v5  ;;  %v7848_v37 = vmax.f32 %v7846_v19, %v7847_v21  ;;  %v7853_v15 = vmax.f32 %v7851_v36, %v7852_v42  ;;  %v11336_v49 = vrot.slane %v11332_v12, 9  ;;  %v8104_v21 = vld [vmem:[#allocation6 + $0xc] sm:$0x7] }
 0x565   : > { %v7941_v2 = vsel %vm7912_vm0, %v7841_v43, -inf  ;;  %v11634_v32 = vpack.c.bf16 %v7939_v53, %v7939_v53  ;;  %v8507_v26 = vrot.slane %v8480_v35, 7  ;;  %v8149_v28 = vcombine.high %v11314_v9, %v11314_v9 }
 0x566   : > { %v8108_v40 = vsel %vm14905_vm12, %v8090_v62, %v8107_v31  ;;  %v7854_v50 = vrot.slane %v7853_v15, 1  ;;  %v7942_v23 = vmax.f32 %v14964_v44, %v7941_v2  ;;  %v7944_v8 = vsel %vm7912_vm0, %v7848_v37, -inf }
 0x567   : > { %v7946_v56 = vsel %vm7912_vm0, %v14961_v7, -inf  ;;  %8109 = vst [vmem:[#allocation6 + $0x10] sm:$0x7] %v8108_v40  ;;  %v7945_v45 = vmax.f32 %v14967_v29, %v7944_v8  ;;  %v8508_v54 = vsel %vm14990_vm3, %v11336_v49, %v8507_v26  ;;  %v8194_v47 = vshrl.u32 %v11314_v9, 16  ;;  %v12234_v49 = vld [vmem:[#allocation8 + $0xc8] sm:$0xff]  }
 0x568   : > { %v7855_v44 = vmax.f32 %v7853_v15, %v7854_v50  ;;  %v11635_v13 = vpack.c.bf16 %v7942_v23, %v7942_v23  ;;  %v8067_v55 = vunpack.c.l.b16 %v11634_v32  ;;  %8521 = vrot.lane.b32.xlu0 %v8508_v54, %s12631_s30  ;;  %v8197_v11 = vshll.u32 %v11314_v9, 16  ;;  %8306 = vst.msk [vmem:[#allocation7 + $0xc] sm:$0x3] %vm7687_vm11, %v8508_v54  ;;  %11733 = vmatprep.subr.bf16.mxu1 %v12234_v49  ;;  %v8222_v54 = vpop.permute.xlu0 %8221 }
 0x569   : > { %v11636_v7 = vpack.c.bf16 %v7945_v45, %v7945_v45  ;;  %v8196_v10 = vrot.slane %v8194_v47, 6  ;;  %v8141_v22 = vcombine.high %v11313_v63, %v11313_v63  ;;  %v8180_v29 = vshrl.u32 %v11313_v63, 16  ;;  %11734 = vmatpush3.bf16.msra.mxu1 %v12235_v39  ;;  %v12238_v45 = vld [vmem:[#allocation8 + $0xd0] sm:$0xff]  }
 0x56a   : > { %v7947_v34 = vsel %vm7912_vm0, %v7855_v44, -inf  ;;  %v8068_v59 = vunpack.c.l.b16 %v11635_v13  ;;  %v8199_v51 = vrot.slane %v8197_v11, 7  ;;  %v8203_v46 = vshll.u32 %v8149_v28, 16  ;;  %11735 = vmatprep.subr.bf16.mxu1 %v12238_v45 }
 0x56b   : > { %v7948_v6 = vmax.f32 %v7946_v56, %v7947_v34  ;;  %v8069_v25 = vunpack.c.l.b16 %v11636_v7  ;;  %v8182_v61 = vrot.slane %v8180_v29, 6  ;;  %v8183_v52 = vshll.u32 %v11313_v63, 16  ;;  %v12237_v56 = vld [vmem:[#allocation8 + $0x28] sm:$0xff]  }
 0x56c   : > { %v8081_v1 = vsel %vm6140_vm5, %v8068_v59, %v8067_v55  ;;  %v8200_v38 = vor.u32 %v8199_v51, %v8196_v10  ;;  %v8189_v19 = vshll.u32 %v8141_v22, 16  ;;  %v8205_v9 = vrot.slane %v8203_v46, 7  ;;  %11720 = vmatpush3.bf16.msra.mxu0 %v12237_v56  ;;  %v11343_v11 = vld.sshfl [vmem:[#allocation6 + $0x14] sm:$0x13 pattern:$0x76325410] }
 0x56d   : > { %v11637_v36 = vpack.c.bf16 %v7948_v6, %v7948_v6  ;;  %v8082_v12 = vsel %vm15696_vm13, %v8069_v25, %v8081_v1  ;;  %v8185_v20 = vrot.slane %v8183_v52, 7  ;;  %v8253_v53 = vcombine.high %v11316_v24, %v11316_v24  ;;  %v12239_v10 = vld [vmem:[#allocation8 + $0x90] sm:$0xff]   ;;  %v12240_v22 = vld [vmem:[#allocation8 + $0xd8] sm:$0xff]  }
 0x56e   : > { %v11327_v14 = vld.sshfl [vmem:[#allocation6 + $0x10] sm:$0x3 pattern:$0x76325410]  ;;  %v8201_v18 = vrot.slane %v8200_v38, 2  ;;  %v8191_v5 = vrot.slane %v8189_v19, 7  ;;  %11736 = vmatpush3.bf16.msra.mxu1 %v12239_v10  ;;  %v8585_v19 = vcombine.high %v11343_v11, %v11343_v11 }
 0x56f   : > { %v8070_v16 = vunpack.c.l.b16 %v11637_v36  ;;  %8351 = vrot.lane.b32.xlu1 %v11327_v14, %s12631_s30  ;;  %v8186_v42 = vor.u32 %v8185_v20, %v8182_v61  ;;  %v11335_v41 = vld.sshfl [vmem:[#allocation6 + $0x10] sm:$0x12 pattern:$0x76325410]  ;;  %vm8233_vm5 = vcmask 1041920   ;;  %v11320_v47 = vrot.slane %v11316_v24, 9  ;;  %11737 = vmatprep.subr.bf16.mxu1 %v12240_v22 }
 0x570   : > { %v15024_v48 = vsel %vm14781_vm2, %v8201_v18, %v8205_v9  ;;  %v8504_v31 = vcombine.high %v11335_v41, %v11335_v41  ;;  %v11342_v43 = vld.sshfl [vmem:[#allocation6 + $0x10] sm:$0x13 pattern:$0x76325410]  ;;  %v11339_v2 = vrot.slane %v11335_v41, 9  ;;  %v8287_v27 = vrot.slane %v8253_v53, 7 }
 0x571   : > { %v8083_v35 = vsel %vm6144_vm14, %v8070_v16, %v8082_v12  ;;  %8225 = vrot.lane.b32.xlu0 %v15024_v48, %s12631_s30  ;;  %v8187_v62 = vrot.slane %v8186_v42, 2  ;;  %v8577_v37 = vcombine.high %v11342_v43, %v11342_v43  ;;  %v8615_v15 = vshrl.u32 %v11342_v43, 16  ;;  %8462 = vst.msk [vmem:[#allocation7 + $0xe] sm:$0x3] %vm7687_vm11, %v15024_v48  ;;  %v12241_v12 = vld [vmem:[#allocation8 + $0x98] sm:$0xff]   ;;  %v12242_v24 = vld [vmem:[#allocation8 + $0x70] sm:$0xff]  }
 0x572   : > { %v8089_v58 = vpack.c.b16 %v8083_v35, %v8083_v35  ;;  %v8519_v32 = vrot.slane %v8504_v31, 7  ;;  %v8618_v26 = vshll.u32 %v11342_v43, 16  ;;  %8234 = vst.msk [vmem:[#allocation7] sm:$0x3] %vm8233_vm5, %v8222_v54  ;;  %v8288_v44 = vsel %vm14990_vm3, %v11320_v47, %v8287_v27  ;;  %v8540_v20 = vld [vmem:[#allocation6 + $0x10] sm:$0x3]  ;;  %11738 = vmatpush3.bf16.msra.mxu1 %v12241_v12  ;;  %11721 = vmatprep.subr.bf16.mxu0 %v12242_v24 }
 0x573   : > { %v8192_v28 = vsel %vm14781_vm2, %v8187_v62, %v8191_v5  ;;  %v8617_v63 = vrot.slane %v8615_v15, 6  ;;  %v8624_v8 = vshll.u32 %v8577_v37, 16  ;;  %8305 = vst.msk [vmem:[#allocation7 + $0x2] sm:$0x3] %vm7687_vm11, %v8288_v44  ;;  %v8629_v29 = vshrl.u32 %v11343_v11, 16  ;;  %v12244_v42 = vld [vmem:[#allocation8 + $0xe0] sm:$0xff]  }
 0x574   : > { %v8105_v40 = vsel %vm14905_vm12, %v8089_v58, %v8104_v21  ;;  %8223 = vrot.lane.b32.xlu1 %v8192_v28, %s12631_s30  ;;  %v8520_v50 = vsel %vm14990_vm3, %v11339_v2, %v8519_v32  ;;  %v8620_v23 = vrot.slane %v8618_v26, 7  ;;  %8461 = vst.msk [vmem:[#allocation7 + $0x4] sm:$0x3] %vm7687_vm11, %v8192_v28  ;;  %v8632_v34 = vshll.u32 %v11343_v11, 16  ;;  %8544 = vst.msk [vmem:[#allocation7 + $0x1a] sm:$0x3] %vm7687_vm11, %v8540_v20 }
 0x575   : > { %8106 = vst [vmem:[#allocation6 + $0xc] sm:$0x7] %v8105_v40  ;;  %8720 = vst.msk [vmem:[#allocation7 + $0x1c] sm:$0x3] %vm7687_vm11, %v8520_v50  ;;  %v8626_v55 = vrot.slane %v8624_v8, 7  ;;  %v8631_v36 = vrot.slane %v8629_v29, 6  ;;  %11739 = vmatprep.subr.bf16.mxu1 %v12244_v42 }
 0x576   : > { %v8621_v30 = vor.u32 %v8620_v23, %v8617_v63  ;;  %v8634_v16 = vrot.slane %v8632_v34, 7  ;;  %v12243_v21 = vld [vmem:[#allocation8 + $0x30] sm:$0xff]   ;;  %v12245_v53 = vld [vmem:[#allocation8 + $0xa0] sm:$0xff]   ;;  %v12246_v35 = vld [vmem:[#allocation8 + $0xe8] sm:$0xff]   ;;  %v8638_v17 = vshll.u32 %v8585_v19, 16  ;;  %v12636_v47 = vmov 0.0  }
 0x577   : > { %v8541_v31 = vld [vmem:[#allocation6 + $0x14] sm:$0x3]  ;;  %11722 = vmatpush3.bf16.msra.mxu0 %v12243_v21  ;;  %v12248_v37 = vld [vmem:[#allocation8 + $0x78] sm:$0xff]   ;;  %11740 = vmatpush3.bf16.msra.mxu1 %v12245_v53  ;;  %v12247_v58 = vld [vmem:[#allocation8 + $0xa8] sm:$0xff]   ;;  %vm12637_vm14 = vmmov 0  }
 0x578   : > { %8527 = vrot.lane.b32.xlu1 %v8520_v50, %s12631_s30  ;;  %v8622_v13 = vrot.slane %v8621_v30, 2  ;;  %8545 = vst.msk [vmem:[#allocation7 + $0x24] sm:$0x3] %vm7687_vm11, %v8541_v31  ;;  %v12249_v15 = vld [vmem:[#allocation8 + $0x38] sm:$0xff]   ;;  %11741 = vmatprep.subr.bf16.mxu1 %v12246_v35  ;;  %v12250_v32 = vld [vmem:[#allocation8 + $0xf0] sm:$0xff]   ;;  %v8640_v63 = vrot.slane %v8638_v17, 7 }
 0x579   : > { %11723 = vmatprep.subr.bf16.mxu0 %v12248_v37  ;;  %v11347_v26 = vld.sshfl [vmem:[#allocation6 + $0x14] sm:$0x12 pattern:$0x76325410]  ;;  %v12252_v23 = vld [vmem:[#allocation8 + $0xf8] sm:$0xff]  }
 0x57a   : > { %v15048_v7 = vsel %vm14781_vm2, %v8622_v13, %v8626_v55  ;;  %v8697_v40 = vcombine.high %v11347_v26, %v11347_v26  ;;  %v12251_v50 = vld [vmem:[#allocation8 + $0xb0] sm:$0xff]   ;;  %v11351_v8 = vrot.slane %v11347_v26, 9  ;;  %v12253_v54 = vld [vmem:[#allocation8 + $0xb8] sm:$0xff]  }
 0x57b   : > { %8464 = vst.msk [vmem:[#allocation7 + $0x22] sm:$0x3] %vm7687_vm11, %v15048_v7  ;;  %11724 = vmatpush3.bf16.msra.mxu0 %v12249_v15  ;;  %11742 = vmatpush3.bf16.msra.mxu1 %v12247_v58  ;;  %v12263_v42 = vld [vmem:[#allocation8 + $0x118] sm:$0xff]   ;;  %v12269_v35 = vld [vmem:[%s15583_s7 + $0x108] ss:$16 sps:$4 sm:$0xff]  }
 0x57c   : > { %v11326_v59 = vld.sshfl [vmem:[#allocation6 + $0xc] sm:$0x3 pattern:$0x76325410]  ;;  %11743 = vmatprep.subr.bf16.mxu1 %v12250_v32  ;;  %v8712_v60 = vrot.slane %v8697_v40, 7  ;;  %11856 = vmatprep.subr.bf16.mxu0 %v12636_v47 }
 0x57d   : > { %v8113_v51 = vld [vmem:[#allocation6 + $0xc] sm:$0x3]  ;;  %8349 = vrot.lane.b32.xlu0 %v11326_v59, %s12631_s30  ;;  %v12277_v15 = vld [vmem:[%s15583_s7 + $0x12c] ss:$16 sps:$4 sm:$0xff]   ;;  %v12281_v58 = vld [vmem:[%s15583_s7 + $0x148] ss:$16 sps:$4 sm:$0xff]  }
 0x57e   : > { %v11315_v46 = vld.sshfl [vmem:[#allocation6 + $0xc] sm:$0x13 pattern:$0x76325410]  ;;  %8117 = vst.msk [vmem:[#allocation7 + $0x1e] sm:$0x3] %vm7687_vm11, %v8113_v51  ;;  %v8713_v45 = vsel %vm14990_vm3, %v11351_v8, %v8712_v60 }
 0x57f   : > { %v8539_v6 = vld [vmem:[#allocation6 + $0xc] sm:$0x3]  ;;  %v8157_v25 = vcombine.high %v11315_v46, %v11315_v46  ;;  %v8208_v61 = vshrl.u32 %v11315_v46, 16  ;;  %v8211_v52 = vshll.u32 %v11315_v46, 16  ;;  %11744 = vmatpush3.bf16.msra.mxu1 %v12251_v50  ;;  %8721 = vst.msk [vmem:[#allocation7 + $0x26] sm:$0x3] %vm7687_vm11, %v8713_v45 }
 0x580   : > { %v11334_v1 = vld.sshfl [vmem:[#allocation6 + $0xc] sm:$0x12 pattern:$0x76325410]  ;;  %8543 = vst.msk [vmem:[#allocation7 + $0x10] sm:$0x3] %vm7687_vm11, %v8539_v6  ;;  %11745 = vmatprep.subr.bf16.mxu1 %v12252_v23 }
 0x581   : > { %v8496_v38 = vcombine.high %v11334_v1, %v11334_v1  ;;  %v8210_v14 = vrot.slane %v8208_v61, 6  ;;  %v8213_v18 = vrot.slane %v8211_v52, 7  ;;  %v8217_v9 = vshll.u32 %v8157_v25, 16  ;;  %8642 = vrot.lane.b32.xlu0 %v15024_v48, %s12631_s30  ;;  %v12268_v53 = vld [vmem:[%s15583_s7 + $0x104] ss:$16 sps:$4 sm:$0xff]  }
 0x582   : > { %v11338_v41 = vrot.slane %v11334_v1, 9  ;;  %v8635_v48 = vor.u32 %v8634_v16, %v8631_v36  ;;  %v12274_v37 = vld [vmem:[%s15583_s7 + $0x124] ss:$16 sps:$4 sm:$0xff]   ;;  %v12289_v26 = vld [vmem:[%s15583_s7 + $0x16c] ss:$16 sps:$4 sm:$0xff]  }
 0x583   : > { %v8515_v5 = vrot.slane %v8496_v38, 7  ;;  %v8214_v43 = vor.u32 %v8213_v18, %v8210_v14  ;;  %v8219_v39 = vrot.slane %v8217_v9, 7  ;;  %11746 = vmatpush3.bf16.msra.mxu1 %v12253_v54  ;;  %v12260_v14 = vld [vmem:[#allocation8 + $0x100] sm:$0xff]   ;;  %v12261_v18 = vld [vmem:[#allocation8 + $0x108] sm:$0xff]   ;;  %v12262_v9 = vld [vmem:[#allocation8 + $0x110] sm:$0xff]  }
 0x584   : > { %v8636_v28 = vrot.slane %v8635_v48, 2  ;;  %9551 = vmatprep.subr.bf16.mxu1 %v12268_v53  ;;  %v12278_v48 = vld [vmem:[%s15583_s7 + $0x140] ss:$16 sps:$4 sm:$0xff]   ;;  %v12280_v17 = vld [vmem:[%s15583_s7 + $0x144] ss:$16 sps:$4 sm:$0xff]  }
 0x585   : > { %v8516_v62 = vsel %vm14990_vm3, %v11338_v41, %v8515_v5  ;;  %v8215_v49 = vrot.slane %v8214_v43, 2  ;;  %v12266_v43 = vld [vmem:[%s15583_s7 + $0x100] ss:$16 sps:$4 sm:$0xff]   ;;  %v12286_v32 = vld [vmem:[%s15583_s7 + $0x164] ss:$16 sps:$4 sm:$0xff]  }
 0x586   : > { %8308 = vst.msk [vmem:[#allocation7 + $0x20] sm:$0x3] %vm7687_vm11, %v8516_v62  ;;  %8719 = vst.msk [vmem:[#allocation7 + $0x12] sm:$0x3] %vm7687_vm11, %v8516_v62  ;;  %8525 = vrot.lane.b32.xlu0 %v8516_v62, %s12631_s30  ;;  %v8641_v56 = vsel %vm14781_vm2, %v8636_v28, %v8640_v63  ;;  %v12271_v62 = vld [vmem:[%s15583_s7 + $0x10c] ss:$16 sps:$4 sm:$0xff]  }
 0x587   : > { %v8220_v2 = vsel %vm14781_vm2, %v8215_v49, %v8219_v39  ;;  %v12265_v21 = vld [vmem:[#allocation7 + $0x1c] ss:$10 sps:$4 sm:$0x33]   ;;  %v12272_v49 = vld [vmem:[%s15583_s7 + $0x120] ss:$16 sps:$4 sm:$0xff]  }
 0x588   : > { %8227 = vrot.lane.b32.xlu1 %v8220_v2, %s12631_s30  ;;  %8463 = vst.msk [vmem:[#allocation7 + $0x18] sm:$0x3] %vm7687_vm11, %v8220_v2  ;;  %v8868_v5 = vrot.slane %v12265_v21, %v13683_v33  ;;  %v12275_v39 = vld [vmem:[%s15583_s7 + $0x128] ss:$16 sps:$4 sm:$0xff]   ;;  %v12284_v28 = vld [vmem:[%s15583_s7 + $0x160] ss:$16 sps:$4 sm:$0xff]  }
 0x589   : > { %v12287_v63 = vld [vmem:[%s15583_s7 + $0x168] ss:$16 sps:$4 sm:$0xff]   ;;  %v12292_v40 = vld [vmem:[%s15583_s7 + $0x184] ss:$16 sps:$4 sm:$0xff]   ;;  %v12295_v50 = vld [vmem:[%s15583_s7 + $0x18c] ss:$16 sps:$4 sm:$0xff]  }
 0x58a   : > { %8646 = vrot.lane.b32.xlu0 %v15048_v7, %s12631_s30  ;;  %v12290_v23 = vld [vmem:[%s15583_s7 + $0x180] ss:$16 sps:$4 sm:$0xff]   ;;  %v12293_v8 = vld [vmem:[%s15583_s7 + $0x188] ss:$16 sps:$4 sm:$0xff]   ;;  %v12298_v60 = vld [vmem:[%s15583_s7 + $0x1a4] ss:$16 sps:$4 sm:$0xff]  }
 0x58b   : > { %v12296_v45 = vld [vmem:[%s15583_s7 + $0x1a0] ss:$16 sps:$4 sm:$0xff]   ;;  %v12299_v54 = vld [vmem:[%s15583_s7 + $0x1a8] ss:$16 sps:$4 sm:$0xff]  }
 0x58c   : > { %8644 = vrot.lane.b32.xlu1 %v8220_v2, %s12631_s30  ;;  %v12283_v2 = vld [vmem:[%s15583_s7 + $0x14c] ss:$16 sps:$4 sm:$0xff]  }
 0x58d   : > { %v12264_v16 = vld [vmem:[#allocation7 + $0x8] ss:$10 sps:$4 sm:$0x33]  }
 0x58e   : > { %v8861_v41 = vrot.slane %v12264_v16, %v13683_v33 }
 0x590   : > { %8648 = vrot.lane.b32.xlu1 %v8641_v56, %s12631_s30  ;;  %v8869_v31 = vcombine.low %v8861_v41, %v8868_v5  ;;  %v12301_v56 = vld [vmem:[%s15583_s7 + $0x1ac] ss:$16 sps:$4 sm:$0xff]   ;;  %s12549_s30 = scalar_lea.vmem %s15536_s12, 16 }
 0x591   : > { %p12550_p10 = scmp.ne.s32.totalorder %s15536_s12, %s12549_s30  ;;  %p12557_p7 = scmp.lt.s32.totalorder %s12555_s23, %s12549_s30 }
 0x593   : > { %p12551_p2 = pnand %p12550_p10, %p15697_p1  ;;  %p12558_p8 = por %p12557_p7, %p12556_p4 }
 0x595   : > { %p12552_p3 = pneg %p12551_p2 }
 0x597   : > { %p12559_p11 = pnand %p12558_p8, %p12552_p3 }
 0x5b5   : > { %v8348_v27 = vpop.permute.xlu1 %8347 }
 0x5b6   : > { %8358 = vst.msk [vmem:[#allocation7 + $0xc] sm:$0x3] %vm8233_vm5, %v8348_v27  ;;  %v12307_v27 = vld [vmem:[%s15583_s7 + $0x1cc] ss:$16 sps:$4 sm:$0xff]  }
 0x5bd   : > { %v8346_v30 = vpop.permute.xlu0 %8345 }
 0x5be   : > { %8357 = vst.msk [vmem:[#allocation7 + $0x2] sm:$0x3] %vm8233_vm5, %v8346_v30  ;;  %v12302_v30 = vld [vmem:[%s15583_s7 + $0x1c0] ss:$16 sps:$4 sm:$0xff]  }
 0x5d4   : > { %v8524_v57 = vpop.permute.xlu1 %8523 }
 0x5d5   : > { %8534 = vst.msk [vmem:[#allocation7 + $0xe] sm:$0x3] %vm8233_vm5, %v8524_v57  ;;  %v12305_v57 = vld [vmem:[%s15583_s7 + $0x1c8] ss:$16 sps:$4 sm:$0xff]  }
 0x5da   : > { %v8522_v3 = vpop.permute.xlu0 %8521 }
 0x5db   : > { %8533 = vst.msk [vmem:[#allocation7 + $0x4] sm:$0x3] %vm8233_vm5, %v8522_v3  ;;  %v12310_v3 = vld [vmem:[%s15583_s7 + $0x1e4] ss:$16 sps:$4 sm:$0xff]  }
 0x5e1   : > { %v8352_v44 = vpop.permute.xlu1 %8351 }
 0x5e2   : > { %8360 = vst.msk [vmem:[#allocation7 + $0x20] sm:$0x3] %vm8233_vm5, %v8352_v44  ;;  %v12313_v44 = vld [vmem:[%s15583_s7 + $0x1ec] ss:$16 sps:$4 sm:$0xff]  }
 0x5e3   : > { %v8226_v13 = vpop.permute.xlu0 %8225 }
 0x5e4   : > { %8236 = vst.msk [vmem:[#allocation7 + $0x14] sm:$0x3] %vm8233_vm5, %v8226_v13  ;;  %v12308_v13 = vld [vmem:[%s15583_s7 + $0x1e0] ss:$16 sps:$4 sm:$0xff]  }
 0x5e6   : > { %v8224_v55 = vpop.permute.xlu1 %8223 }
 0x5e7   : > { %8235 = vst.msk [vmem:[#allocation7 + $0xa] sm:$0x3] %vm8233_vm5, %v8224_v55  ;;  %v12311_v55 = vld [vmem:[%s15583_s7 + $0x1e8] ss:$16 sps:$4 sm:$0xff]  }
 0x5ea   : > { %v8528_v11 = vpop.permute.xlu1 %8527 }
 0x5eb   : > { %8536 = vst.msk [vmem:[#allocation7 + $0x22] sm:$0x3] %vm8233_vm5, %v8528_v11  ;;  %v12316_v11 = vld [vmem:[%s15583_s7 + $0x4] ss:$16 sps:$4 sm:$0xff]  }
 0x5ee   : > { %v12254_v46 = vld [vmem:[#allocation7] ss:$10 sps:$4 sm:$0xff]  }
 0x5ef   : > { %v8350_v7 = vpop.permute.xlu0 %8349  ;;  %v8827_v52 = vrot.slane %v12254_v46, %v13683_v33 }
 0x5f0   : > { %8359 = vst.msk [vmem:[#allocation7 + $0x16] sm:$0x3] %vm8233_vm5, %v8350_v7  ;;  %v12319_v7 = vld [vmem:[%s15583_s7 + $0xc] ss:$16 sps:$4 sm:$0xff]  }
 0x5f3   : > { %v8643_v10 = vpop.permute.xlu0 %8642 }
 0x5f4   : > { %8654 = vst.msk [vmem:[#allocation7 + $0x6] sm:$0x3] %vm8233_vm5, %v8643_v10 }
 0x5f8   : > { %v8526_v22 = vpop.permute.xlu0 %8525 }
 0x5f9   : > { %8535 = vst.msk [vmem:[#allocation7 + $0x18] sm:$0x3] %vm8233_vm5, %v8526_v22 }
 0x5fa   : > { %v8228_v29 = vpop.permute.xlu1 %8227 }
 0x5fb   : > { %8237 = vst.msk [vmem:[#allocation7 + $0x1e] sm:$0x3] %vm8233_vm5, %v8228_v29  ;;  %v11352_v29 = vld [vmem:[%s15582_s6] ss:$0 sm:$0xff] }
 0x5fc   : > { %v8647_v34 = vpop.permute.xlu0 %8646 }
 0x5fd   : > { %8656 = vst.msk [vmem:[#allocation7 + $0x1a] sm:$0x3] %vm8233_vm5, %v8647_v34 }
 0x5fe   : > { %v8645_v59 = vpop.permute.xlu1 %8644 }
 0x5ff   : > { %8655 = vst.msk [vmem:[#allocation7 + $0x10] sm:$0x3] %vm8233_vm5, %v8645_v59 }
 0x602   : > { %v8649_v51 = vpop.permute.xlu1 %8648  ;;  %v12256_v25 = vld [vmem:[#allocation7 + $0x14] ss:$10 sps:$4 sm:$0xff]  }
 0x603   : > { %8657 = vst.msk [vmem:[#allocation7 + $0x24] sm:$0x3] %vm8233_vm5, %v8649_v51  ;;  %v8841_v1 = vrot.slane %v12256_v25, %v13683_v33 }
 0x605   : > { %v8849_v36 = vcombine.low %v8827_v52, %v8841_v1  ;;  %v8850_v12 = vcombine.high %v8827_v52, %v8841_v1 }
 0x606   : > { %v12258_v6 = vld [vmem:[#allocation7 + $0x4] ss:$10 sps:$4 sm:$0xff]  }
 0x607   : > { %v8834_v38 = vrot.slane %v12258_v6, %v13683_v33  ;;  %9125 = vmatprep.mubr.bf16.mxu0 %v8850_v12 }
 0x608   : > { %9126 = vmatmul.mubr.bf16.vlgmr.msra.gmra.mrb[32].mxu0 %v8849_v36 }
 0x609   : > { %11857 = vmatpush3.bf16.msra.mxu0 %v12260_v14  ;;  %11864 = vmatprep.mubr.msk.bf16.mxu0 %vm12637_vm14, %v12636_v47 }
 0x60a   : > { %v12259_v61 = vld [vmem:[#allocation7 + $0x18] ss:$10 sps:$4 sm:$0xff]   ;;  %11858 = vmatprep.subr.bf16.mxu0 %v12636_v47 }
 0x60b   : > { %v8848_v19 = vrot.slane %v12259_v61, %v13683_v33 }
 0x60d   : > { %v8851_v20 = vcombine.low %v8834_v38, %v8848_v19  ;;  %v8852_v24 = vcombine.high %v8834_v38, %v8848_v19  ;;  %11859 = vmatpush3.bf16.msra.mxu0 %v12261_v18 }
 0x60e   : > { %11860 = vmatprep.subr.bf16.mxu0 %v12636_v47 }
 0x60f   : > { %9166 = vmatprep.mubr.bf16.mxu1 %v8852_v24 }
 0x610   : > { %9167 = vmatmul.mubr.bf16.vlgmr.msra.gmra.mrb[24].mxu1 %v8851_v20 }
 0x611   : > { %9583 = vmatprep.mubr.bf16.mxu1 %v12625_v0  ;;  %11861 = vmatpush3.bf16.msra.mxu0 %v12262_v9 }
 0x612   : > { %11862 = vmatprep.subr.bf16.mxu0 %v12636_v47  ;;  %9552 = vmatpush1.bf16.msra.mxu1 %v12266_v43  ;;  %v12304_v47 = vld [vmem:[%s15583_s7 + $0x1c4] ss:$16 sps:$4 sm:$0xff]  }
 0x613   : > { %9553 = vmatprep.subr.bf16.mxu1 %v12274_v37 }
 0x615   : > { %11863 = vmatpush3.bf16.msra.mxu0 %v12263_v42 }
 0x616   : > { %9592 = vmatprep.subr.bf16.mxu0 %v12271_v62  ;;  %9554 = vmatpush1.bf16.msra.mxu1 %v12272_v49 }
 0x617   : > { %9555 = vmatprep.subr.bf16.mxu1 %v12280_v17 }
 0x618   : > { %11865 = vmatmul.mubr.msk.bf16.vlgmr.msra.gmra.mrb[36].mxu0 %vm7912_vm0, %v8869_v31 }
 0x619   : > { %9624 = vmatprep.mubr.bf16.mxu0 %v12625_v0  ;;  %9593 = vmatpush1.bf16.msra.mxu0 %v12269_v35 }
 0x61a   : > { %9594 = vmatprep.subr.bf16.mxu0 %v12277_v15  ;;  %9556 = vmatpush1.bf16.msra.mxu1 %v12278_v48 }
 0x61b   : > { %9557 = vmatprep.subr.bf16.mxu1 %v12286_v32 }
 0x61d   : > { %9595 = vmatpush1.bf16.msra.mxu0 %v12275_v39 }
 0x61e   : > { %9596 = vmatprep.subr.bf16.mxu0 %v12283_v2  ;;  %9558 = vmatpush1.bf16.msra.mxu1 %v12284_v28 }
 0x61f   : > { %9559 = vmatprep.subr.bf16.mxu1 %v12292_v40 }
 0x621   : > { %9597 = vmatpush1.bf16.msra.mxu0 %v12281_v58 }
 0x622   : > { %9598 = vmatprep.subr.bf16.mxu0 %v12289_v26  ;;  %9560 = vmatpush1.bf16.msra.mxu1 %v12290_v23 }
 0x623   : > { %9561 = vmatprep.subr.bf16.mxu1 %v12298_v60 }
 0x625   : > { %9599 = vmatpush1.bf16.msra.mxu0 %v12287_v63 }
 0x626   : > { %9600 = vmatprep.subr.bf16.mxu0 %v12295_v50  ;;  %9562 = vmatpush1.bf16.msra.mxu1 %v12296_v45 }
 0x627   : > { %9563 = vmatprep.subr.bf16.mxu1 %v12304_v47 }
 0x629   : > { %9601 = vmatpush1.bf16.msra.mxu0 %v12293_v8 }
 0x62a   : > { %9602 = vmatprep.subr.bf16.mxu0 %v12301_v56  ;;  %9564 = vmatpush1.bf16.msra.mxu1 %v12302_v30 }
 0x62b   : > { %9565 = vmatprep.subr.bf16.mxu1 %v12310_v3 }
 0x62d   : > { %9603 = vmatpush1.bf16.msra.mxu0 %v12299_v54 }
 0x62e   : > { %9604 = vmatprep.subr.bf16.mxu0 %v12307_v27  ;;  %9566 = vmatpush1.bf16.msra.mxu1 %v12308_v13 }
 0x62f   : > { %9793 = vmatprep.subr.bf16.mxu1 %v12316_v11 }
 0x631   : > { %9605 = vmatpush1.bf16.msra.mxu0 %v12305_v57 }
 0x632   : > { %9606 = vmatprep.subr.bf16.mxu0 %v12313_v44 }
 0x635   : > { %9607 = vmatpush1.bf16.msra.mxu0 %v12311_v55 }
 0x636   : > { %9834 = vmatprep.subr.bf16.mxu0 %v12319_v7 }
 0x6db   : > { %v11725_v10 = vpop.f32.mrb[32].mxu0 }
 0x6dc   : > { %v11726_v34 = vpop.f32.mrb[33].mxu0 }
 0x6dd   : > { %v11727_v51 = vadd.f32 %v11726_v34, %v11725_v10  ;;  %v11728_v6 = vpop.f32.mrb[34].mxu0 }
 0x6de   : > { %v11729_v61 = vpop.f32.mrb[35].mxu0 }
 0x6df   : > { %v9128_v1 = vadd.f32 %v11727_v51, %v11352_v29  ;;  %v11730_v38 = vadd.f32 %v11729_v61, %v11728_v6 }
 0x6e1   : > { %v9131_v36 = vadd.f32 %v11730_v38, %v11352_v29 }
 0x6e3   : > { %v11747_v22 = vpop.f32.mrb[24].mxu1 }
 0x6e4   : > { %v11748_v59 = vpop.f32.mrb[25].mxu1 }
 0x6e5   : > { %v11749_v46 = vadd.f32 %v11748_v59, %v11747_v22  ;;  %v11750_v25 = vpop.f32.mrb[26].mxu1 }
 0x6e6   : > { %v11751_v52 = vpop.f32.mrb[27].mxu1 }
 0x6e7   : > { %v11752_v19 = vadd.f32 %v11751_v52, %v11750_v25  ;;  %v9169_v12 = vadd.f32 %v11749_v46, %v9128_v1 }
 0x6e9   : > { %v9172_v20 = vadd.f32 %v11752_v19, %v9131_v36  ;;  %v12314_v36 = vld [vmem:[%s15583_s7] ss:$16 sps:$4 sm:$0xff]  }
 0x6eb   : > { %v9209_v24 = vpop.f32.mrb[36].mxu0 }
 0x6ec   : > { %v9210_v14 = vadd.f32 %v9209_v24, %v9169_v12  ;;  %v11866_v18 = vpop.f32.mrb[37].mxu0  ;;  %v12317_v12 = vld [vmem:[%s15583_s7 + $0x8] ss:$16 sps:$4 sm:$0xff]  }
 0x6ed   : > { %v9212_v9 = vpop.f32.mrb[38].mxu0 }
 0x6ee   : > { %v9216_v16 = vmax.f32 %v9210_v14, 0.0  ;;  %v9213_v21 = vadd.f32 %v9212_v9, %v9172_v20  ;;  %v11867_v42 = vpop.f32.mrb[39].mxu0  ;;  %v12322_v9 = vld [vmem:[%s15583_s7 + $0x24] ss:$16 sps:$4 sm:$0xff]  }
 0x6f0   : > { %v9220_v41 = vcombine.high %v9216_v16, %v9216_v16  ;;  %v15207_v5 = vrot.slane %v9216_v16, %v13683_v33  ;;  %v9217_v31 = vmax.f32 %v9213_v21, 0.0  ;;  %v12325_v16 = vld [vmem:[%s15583_s7 + $0x2c] ss:$16 sps:$4 sm:$0xff]  }
 0x6f2   : > { %v9234_v43 = vrot.slane %v9220_v41, %v13683_v33  ;;  %v9235_v53 = vcombine.high %v15207_v5, %v15207_v5  ;;  %v9237_v35 = vcombine.high %v9217_v31, %v9217_v31  ;;  %v9244_v62 = vrot.slane %v9217_v31, %v13683_v33  ;;  %v12320_v31 = vld [vmem:[%s15583_s7 + $0x20] ss:$16 sps:$4 sm:$0xff]  }
 0x6f3   : > { %v9263_v41 = vsel %vm9262_vm9, %v15207_v5, -inf  ;;  %v12331_v5 = vld [vmem:[%s15583_s7 + $0x4c] ss:$16 sps:$4 sm:$0xff]  }
 0x6f4   : > { %v9236_v37 = vcombine.high %v9234_v43, %v9234_v43  ;;  %v9270_v15 = vsel %vm9262_vm9, %v9235_v53, -inf  ;;  %v9251_v49 = vrot.slane %v9237_v35, %v13683_v33  ;;  %v9252_v48 = vcombine.high %v9244_v62, %v9244_v62  ;;  %v12323_v53 = vld [vmem:[%s15583_s7 + $0x28] ss:$16 sps:$4 sm:$0xff]  }
 0x6f5   : > { %v9271_v39 = vrot.slane %v9270_v15, 4  ;;  %v9291_v2 = vsel %vm9262_vm9, %v9244_v62, -inf  ;;  %v9277_v21 = vsel %vm9262_vm9, %v9234_v43, -inf  ;;  %v12328_v43 = vld [vmem:[%s15583_s7 + $0x44] ss:$16 sps:$4 sm:$0xff]   ;;  %v9264_v62 = vrot.slane %v9263_v41, 4 }
 0x6f6   : > { %v9284_v17 = vsel %vm9262_vm9, %v9236_v37, -inf  ;;  %v9253_v58 = vcombine.high %v9251_v49, %v9251_v49  ;;  %v9305_v32 = vsel %vm9262_vm9, %v9251_v49, -inf  ;;  %v9292_v63 = vrot.slane %v9291_v2, 4  ;;  %v12326_v37 = vld [vmem:[%s15583_s7 + $0x40] ss:$16 sps:$4 sm:$0xff]  }
 0x6f7   : > { %v9272_v26 = vmax.f32 %v9270_v15, %v9271_v39  ;;  %v9285_v28 = vrot.slane %v9284_v17, 4  ;;  %v9298_v40 = vsel %vm9262_vm9, %v9252_v48, -inf  ;;  %v9306_v50 = vrot.slane %v9305_v32, 4  ;;  %v12329_v15 = vld [vmem:[%s15583_s7 + $0x48] ss:$16 sps:$4 sm:$0xff]  }
 0x6f8   : > { %v9312_v23 = vsel %vm9262_vm9, %v9253_v58, -inf  ;;  %v9293_v33 = vmax.f32 %v9291_v2, %v9292_v63  ;;  %v9299_v56 = vrot.slane %v9298_v40, 4  ;;  %v9278_v35 = vrot.slane %v9277_v21, 4  ;;  %v12334_v39 = vld [vmem:[%s15583_s7 + $0x64] ss:$16 sps:$4 sm:$0xff]  }
 0x6f9   : > { %v9273_v8 = vrot.slane %v9272_v26, 2  ;;  %v9286_v60 = vmax.f32 %v9284_v17, %v9285_v28  ;;  %v9307_v45 = vmax.f32 %v9305_v32, %v9306_v50  ;;  %v9313_v54 = vrot.slane %v9312_v23, 4  ;;  %v12337_v48 = vld [vmem:[%s15583_s7 + $0x6c] ss:$16 sps:$4 sm:$0xff]   ;;  %v12332_v58 = vld [vmem:[%s15583_s7 + $0x60] ss:$16 sps:$4 sm:$0xff]  }
 0x6fa   : > { %v9294_v30 = vrot.slane %v9293_v33, 2  ;;  %v9300_v57 = vmax.f32 %v9298_v40, %v9299_v56  ;;  %v9279_v49 = vmax.f32 %v9277_v21, %v9278_v35  ;;  %v9265_v17 = vmax.f32 %v9263_v41, %v9264_v62  ;;  %v12335_v2 = vld [vmem:[%s15583_s7 + $0x68] ss:$16 sps:$4 sm:$0xff]   ;;  %v12343_v28 = vld [vmem:[%s15583_s7 + $0x8c] ss:$16 sps:$4 sm:$0xff]  }
 0x6fb   : > { %v9274_v47 = vmax.f32 %v9272_v26, %v9273_v8  ;;  %v9287_v27 = vrot.slane %v9286_v60, 2  ;;  %v9308_v3 = vrot.slane %v9307_v45, 2  ;;  %v9314_v44 = vmax.f32 %v9312_v23, %v9313_v54  ;;  %v12340_v26 = vld [vmem:[%s15583_s7 + $0x84] ss:$16 sps:$4 sm:$0xff]   ;;  %v12338_v40 = vld [vmem:[%s15583_s7 + $0x80] ss:$16 sps:$4 sm:$0xff]  }
 0x6fc   : > { %v9295_v11 = vmax.f32 %v9293_v33, %v9294_v30  ;;  %v9301_v7 = vrot.slane %v9300_v57, 2  ;;  %v9280_v32 = vrot.slane %v9279_v49, 2  ;;  %v9266_v63 = vrot.slane %v9265_v17, 2  ;;  %v12341_v50 = vld [vmem:[%s15583_s7 + $0x88] ss:$16 sps:$4 sm:$0xff]  }
 0x6fd   : > { %v9275_v13 = vrot.slane %v9274_v47, 1  ;;  %v9288_v55 = vmax.f32 %v9286_v60, %v9287_v27  ;;  %v9309_v10 = vmax.f32 %v9307_v45, %v9308_v3  ;;  %v9315_v22 = vrot.slane %v9314_v44, 2  ;;  %v12346_v8 = vld [vmem:[%s15583_s7 + $0xa4] ss:$16 sps:$4 sm:$0xff]   ;;  %v12349_v60 = vld [vmem:[%s15583_s7 + $0xac] ss:$16 sps:$4 sm:$0xff]  }
 0x6fe   : > { %v9296_v34 = vrot.slane %v9295_v11, 1  ;;  %v9302_v59 = vmax.f32 %v9300_v57, %v9301_v7  ;;  %v9281_v23 = vmax.f32 %v9279_v49, %v9280_v32  ;;  %v9267_v33 = vmax.f32 %v9265_v17, %v9266_v63  ;;  %v12344_v56 = vld [vmem:[%s15583_s7 + $0xa0] ss:$16 sps:$4 sm:$0xff]   ;;  %v12347_v45 = vld [vmem:[%s15583_s7 + $0xa8] ss:$16 sps:$4 sm:$0xff]  }
 0x6ff   : > { %v9289_v29 = vrot.slane %v9288_v55, 1  ;;  %v9310_v51 = vrot.slane %v9309_v10, 1  ;;  %v9316_v46 = vmax.f32 %v9314_v44, %v9315_v22  ;;  %v9276_v6 = vmax.f32 %v9274_v47, %v9275_v13  ;;  %v12352_v54 = vld [vmem:[%s15583_s7 + $0xc4] ss:$16 sps:$4 sm:$0xff]   ;;  %v12355_v47 = vld [vmem:[%s15583_s7 + $0xcc] ss:$16 sps:$4 sm:$0xff]  }
 0x700   : > { %v9297_v61 = vmax.f32 %v9295_v11, %v9296_v34  ;;  %v9303_v1 = vrot.slane %v9302_v59, 1  ;;  %v9282_v27 = vrot.slane %v9281_v23, 1  ;;  %v9268_v30 = vrot.slane %v9267_v33, 1  ;;  %v12350_v57 = vld [vmem:[%s15583_s7 + $0xc0] ss:$16 sps:$4 sm:$0xff]  }
 0x701   : > { %v9290_v25 = vmax.f32 %v9288_v55, %v9289_v29  ;;  %v9311_v52 = vmax.f32 %v9309_v10, %v9310_v51  ;;  %v9317_v38 = vrot.slane %v9316_v46, 1  ;;  %v12353_v3 = vld [vmem:[%s15583_s7 + $0xc8] ss:$16 sps:$4 sm:$0xff]   ;;  %v12358_v44 = vld [vmem:[%s15583_s7 + $0xe4] ss:$16 sps:$4 sm:$0xff]  }
 0x702   : > { %v9304_v24 = vmax.f32 %v9302_v59, %v9303_v1  ;;  %v12361_v13 = vld [vmem:[%s15583_s7 + $0xec] ss:$16 sps:$4 sm:$0xff]   ;;  %v9283_v55 = vmax.f32 %v9281_v23, %v9282_v27  ;;  %v9269_v11 = vmax.f32 %v9267_v33, %v9268_v30  ;;  %v12356_v7 = vld [vmem:[%s15583_s7 + $0xe0] ss:$16 sps:$4 sm:$0xff]   ;;  %v12359_v10 = vld [vmem:[%s15583_s7 + $0xe8] ss:$16 sps:$4 sm:$0xff]  }
 0x703   : > { %v9320_v19 = vmax.f32 %v9276_v6, %v9290_v25  ;;  %v15226_v20 = vmax.f32 %v9297_v61, %v9311_v52  ;;  %v9318_v14 = vmax.f32 %v9316_v46, %v9317_v38  ;;  %v12364_v29 = vld [vmem:[%s15583_s7 + $0x204] ss:$16 sps:$4 sm:$0xff]   ;;  %v12367_v34 = vld [vmem:[%s15583_s7 + $0x20c] ss:$16 sps:$4 sm:$0xff]   ;;  %v12362_v59 = vld [vmem:[%s15583_s7 + $0x200] ss:$16 sps:$4 sm:$0xff]  }
 0x704   : > { %v9319_v22 = vmax.f32 %v9269_v11, %v9283_v55  ;;  %v12365_v51 = vld [vmem:[%s15583_s7 + $0x208] ss:$16 sps:$4 sm:$0xff]   ;;  %v12370_v6 = vld [vmem:[%s15583_s7 + $0x224] ss:$16 sps:$4 sm:$0xff]   ;;  %v12373_v25 = vld [vmem:[%s15583_s7 + $0x22c] ss:$16 sps:$4 sm:$0xff]  }
 0x705   : > { %v9324_v18 = vpack.c.bf16 %v9320_v19, %v9320_v19  ;;  %v15235_v42 = vmax.f32 %v9304_v24, %v9318_v14  ;;  %v12368_v61 = vld [vmem:[%s15583_s7 + $0x220] ss:$16 sps:$4 sm:$0xff]   ;;  %v12371_v52 = vld [vmem:[%s15583_s7 + $0x228] ss:$16 sps:$4 sm:$0xff]   ;;  %v12376_v1 = vld [vmem:[%s15583_s7 + $0x244] ss:$16 sps:$4 sm:$0xff]  }
 0x706   : > { %v9323_v46 = vpack.c.bf16 %v9319_v22, %v9319_v22  ;;  %v12379_v38 = vld [vmem:[%s15583_s7 + $0x24c] ss:$16 sps:$4 sm:$0xff]   ;;  %v12374_v19 = vld [vmem:[%s15583_s7 + $0x240] ss:$16 sps:$4 sm:$0xff]   ;;  %v12389_v41 = vld [vmem:[%s15583_s7 + $0x288] ss:$16 sps:$4 sm:$0xff]  }
 0x707   : > { %9584 = vmatmul.mubr.bf16.vlgmr.msra.gmra.mrb[28].mxu1 %v9324_v18  ;;  %9625 = vmatmul.mubr.bf16.vlgmr.msra.gmra.mrb[40].mxu0 %v9324_v18  ;;  %v12385_v24 = vld [vmem:[%s15583_s7 + $0x26c] ss:$16 sps:$4 sm:$0xff]   ;;  %v12380_v14 = vld [vmem:[%s15583_s7 + $0x260] ss:$16 sps:$4 sm:$0xff]   ;;  %v12383_v18 = vld [vmem:[%s15583_s7 + $0x268] ss:$16 sps:$4 sm:$0xff]  }
 0x708   : > { %9794 = vmatpush1.bf16.msra.mxu1 %v12314_v36  ;;  %9835 = vmatpush1.bf16.msra.mxu0 %v12317_v12  ;;  %v12377_v36 = vld [vmem:[%s15583_s7 + $0x248] ss:$16 sps:$4 sm:$0xff]   ;;  %v12382_v12 = vld [vmem:[%s15583_s7 + $0x264] ss:$16 sps:$4 sm:$0xff]   ;;  %v12386_v21 = vld [vmem:[%s15583_s7 + $0x280] ss:$16 sps:$4 sm:$0xff]  }
 0x709   : > { %9795 = vmatprep.subr.bf16.mxu1 %v12322_v9  ;;  %9836 = vmatprep.subr.bf16.mxu0 %v12325_v16  ;;  %v12388_v9 = vld [vmem:[%s15583_s7 + $0x284] ss:$16 sps:$4 sm:$0xff]   ;;  %v12391_v16 = vld [vmem:[%s15583_s7 + $0x28c] ss:$16 sps:$4 sm:$0xff]   ;;  %v12392_v35 = vld [vmem:[%s15583_s7 + $0x2a0] ss:$16 sps:$4 sm:$0xff]  }
 0x70a   : > { %9825 = vmatprep.mubr.bf16.mxu1 %v12625_v0  ;;  %9866 = vmatprep.mubr.bf16.mxu0 %v12625_v0  ;;  %v12403_v62 = vld [vmem:[%s15583_s7 + $0x2cc] ss:$16 sps:$4 sm:$0xff]   ;;  %v12406_v49 = vld [vmem:[%s15583_s7 + $0x2e4] ss:$16 sps:$4 sm:$0xff]   ;;  %v12407_v17 = vld [vmem:[%s15583_s7 + $0x2e8] ss:$16 sps:$4 sm:$0xff]  }
 0x70b   : > { %v12410_v32 = vld [vmem:[%s15583_s7 + $0x300] ss:$16 sps:$4 sm:$0xff]   ;;  %v12418_v63 = vld [vmem:[%s15583_s7 + $0x324] ss:$16 sps:$4 sm:$0xff]   ;;  %v12425_v33 = vld [vmem:[%s15583_s7 + $0x348] ss:$16 sps:$4 sm:$0xff]  }
 0x70c   : > { %9796 = vmatpush1.bf16.msra.mxu1 %v12320_v31  ;;  %9837 = vmatpush1.bf16.msra.mxu0 %v12323_v53  ;;  %v12394_v31 = vld [vmem:[%s15583_s7 + $0x2a4] ss:$16 sps:$4 sm:$0xff]   ;;  %v12397_v53 = vld [vmem:[%s15583_s7 + $0x2ac] ss:$16 sps:$4 sm:$0xff]   ;;  %v12434_v30 = vld [vmem:[%s15583_s7 + $0x380] ss:$16 sps:$4 sm:$0xff]  }
 0x70d   : > { %9797 = vmatprep.subr.bf16.mxu1 %v12328_v43  ;;  %9838 = vmatprep.subr.bf16.mxu0 %v12331_v5  ;;  %v12395_v43 = vld [vmem:[%s15583_s7 + $0x2a8] ss:$16 sps:$4 sm:$0xff]   ;;  %v12400_v5 = vld [vmem:[%s15583_s7 + $0x2c4] ss:$16 sps:$4 sm:$0xff]   ;;  %v12439_v27 = vld [vmem:[%s15583_s7 + $0x38c] ss:$16 sps:$4 sm:$0xff]  }
 0x70e   : > { %v12424_v23 = vld [vmem:[%s15583_s7 + $0x344] ss:$16 sps:$4 sm:$0xff]   ;;  %v12443_v55 = vld [vmem:[%s15583_s7 + $0x3a8] ss:$16 sps:$4 sm:$0xff]  }
 0x70f   : > { %v12448_v11 = vld [vmem:[%s15583_s7 + $0x3c4] ss:$16 sps:$4 sm:$0xff]   ;;  %v12449_v22 = vld [vmem:[%s15583_s7 + $0x3c8] ss:$16 sps:$4 sm:$0xff]  }
 0x710   : > { %9798 = vmatpush1.bf16.msra.mxu1 %v12326_v37  ;;  %9839 = vmatpush1.bf16.msra.mxu0 %v12329_v15  ;;  %v12398_v37 = vld [vmem:[%s15583_s7 + $0x2c0] ss:$16 sps:$4 sm:$0xff]   ;;  %v12401_v15 = vld [vmem:[%s15583_s7 + $0x2c8] ss:$16 sps:$4 sm:$0xff]  }
 0x711   : > { %9799 = vmatprep.subr.bf16.mxu1 %v12334_v39  ;;  %9840 = vmatprep.subr.bf16.mxu0 %v12337_v48  ;;  %v12409_v39 = vld [vmem:[%s15583_s7 + $0x2ec] ss:$16 sps:$4 sm:$0xff]   ;;  %v12404_v48 = vld [vmem:[%s15583_s7 + $0x2e0] ss:$16 sps:$4 sm:$0xff]  }
 0x714   : > { %9800 = vmatpush1.bf16.msra.mxu1 %v12332_v58  ;;  %9841 = vmatpush1.bf16.msra.mxu0 %v12335_v2  ;;  %v12412_v58 = vld [vmem:[%s15583_s7 + $0x304] ss:$16 sps:$4 sm:$0xff]   ;;  %v12415_v2 = vld [vmem:[%s15583_s7 + $0x30c] ss:$16 sps:$4 sm:$0xff]  }
 0x715   : > { %9801 = vmatprep.subr.bf16.mxu1 %v12340_v26  ;;  %9842 = vmatprep.subr.bf16.mxu0 %v12343_v28  ;;  %v12413_v26 = vld [vmem:[%s15583_s7 + $0x308] ss:$16 sps:$4 sm:$0xff]   ;;  %v9325_v28 = vpack.c.bf16 %v15226_v20, %v15226_v20 }
 0x716   : > { %v12419_v20 = vld [vmem:[%s15583_s7 + $0x328] ss:$16 sps:$4 sm:$0xff]  }
 0x718   : > { %9802 = vmatpush1.bf16.msra.mxu1 %v12338_v40  ;;  %9843 = vmatpush1.bf16.msra.mxu0 %v12341_v50  ;;  %v12421_v40 = vld [vmem:[%s15583_s7 + $0x32c] ss:$16 sps:$4 sm:$0xff]   ;;  %v12416_v50 = vld [vmem:[%s15583_s7 + $0x320] ss:$16 sps:$4 sm:$0xff]  }
 0x719   : > { %9803 = vmatprep.subr.bf16.mxu1 %v12346_v8  ;;  %9844 = vmatprep.subr.bf16.mxu0 %v12349_v60  ;;  %v12427_v8 = vld [vmem:[%s15583_s7 + $0x34c] ss:$16 sps:$4 sm:$0xff]   ;;  %v12422_v60 = vld [vmem:[%s15583_s7 + $0x340] ss:$16 sps:$4 sm:$0xff]  }
 0x71c   : > { %9804 = vmatpush1.bf16.msra.mxu1 %v12344_v56  ;;  %9845 = vmatpush1.bf16.msra.mxu0 %v12347_v45  ;;  %v12430_v56 = vld [vmem:[%s15583_s7 + $0x364] ss:$16 sps:$4 sm:$0xff]   ;;  %v12428_v45 = vld [vmem:[%s15583_s7 + $0x360] ss:$16 sps:$4 sm:$0xff]  }
 0x71d   : > { %9805 = vmatprep.subr.bf16.mxu1 %v12352_v54  ;;  %9846 = vmatprep.subr.bf16.mxu0 %v12355_v47  ;;  %v12431_v54 = vld [vmem:[%s15583_s7 + $0x368] ss:$16 sps:$4 sm:$0xff]   ;;  %v12436_v47 = vld [vmem:[%s15583_s7 + $0x384] ss:$16 sps:$4 sm:$0xff]  }
 0x720   : > { %9806 = vmatpush1.bf16.msra.mxu1 %v12350_v57  ;;  %9847 = vmatpush1.bf16.msra.mxu0 %v12353_v3  ;;  %v12437_v57 = vld [vmem:[%s15583_s7 + $0x388] ss:$16 sps:$4 sm:$0xff]   ;;  %v12442_v3 = vld [vmem:[%s15583_s7 + $0x3a4] ss:$16 sps:$4 sm:$0xff]  }
 0x721   : > { %9807 = vmatprep.subr.bf16.mxu1 %v12358_v44  ;;  %9848 = vmatprep.subr.bf16.mxu0 %v12361_v13  ;;  %v12445_v44 = vld [vmem:[%s15583_s7 + $0x3ac] ss:$16 sps:$4 sm:$0xff]   ;;  %v12440_v13 = vld [vmem:[%s15583_s7 + $0x3a0] ss:$16 sps:$4 sm:$0xff]  }
 0x724   : > { %9808 = vmatpush1.bf16.msra.mxu1 %v12356_v7  ;;  %9849 = vmatpush1.bf16.msra.mxu0 %v12359_v10  ;;  %v12451_v7 = vld [vmem:[%s15583_s7 + $0x3cc] ss:$16 sps:$4 sm:$0xff]   ;;  %v12446_v10 = vld [vmem:[%s15583_s7 + $0x3c0] ss:$16 sps:$4 sm:$0xff]  }
 0x725   : > { %10067 = vmatprep.subr.bf16.mxu1 %v12364_v29  ;;  %10108 = vmatprep.subr.bf16.mxu0 %v12367_v34  ;;  %v12454_v29 = vld [vmem:[%s15583_s7 + $0x3e4] ss:$16 sps:$4 sm:$0xff]   ;;  %v12457_v34 = vld [vmem:[%s15583_s7 + $0x3ec] ss:$16 sps:$4 sm:$0xff]  }
 0x727   : > { %9826 = vmatmul.mubr.bf16.vlgmr.msra.gmra.mrb[32].mxu1 %v9323_v46  ;;  %9867 = vmatmul.mubr.bf16.vlgmr.msra.gmra.mrb[44].mxu0 %v9323_v46  ;;  %v9326_v46 = vpack.c.bf16 %v15235_v42, %v15235_v42  ;;  %v12468_v42 = vld [vmem:[#allocation11 + $0x10] sm:$0xff]  }
 0x728   : > { %10068 = vmatpush1.bf16.msra.mxu1 %v12362_v59  ;;  %10109 = vmatpush1.bf16.msra.mxu0 %v12365_v51  ;;  %v12452_v59 = vld [vmem:[%s15583_s7 + $0x3e0] ss:$16 sps:$4 sm:$0xff]   ;;  %v12455_v51 = vld [vmem:[%s15583_s7 + $0x3e8] ss:$16 sps:$4 sm:$0xff]  }
 0x729   : > { %10069 = vmatprep.subr.bf16.mxu1 %v12370_v6  ;;  %10110 = vmatprep.subr.bf16.mxu0 %v12373_v25  ;;  %v12458_v6 = vld [vmem:[#allocation11 + $0x40] sm:$0xff]  }
 0x72a   : > { %10099 = vmatprep.mubr.bf16.mxu1 %v12625_v0  ;;  %10140 = vmatprep.mubr.bf16.mxu0 %v12625_v0  ;;  %v12459_v25 = vld [vmem:[#allocation11 + $0xc0] sm:$0xff]  }
 0x72c   : > { %10070 = vmatpush1.bf16.msra.mxu1 %v12368_v61  ;;  %10111 = vmatpush1.bf16.msra.mxu0 %v12371_v52  ;;  %v12460_v61 = vld [vmem:[#allocation11] sm:$0xff]  }
 0x72d   : > { %10071 = vmatprep.subr.bf16.mxu1 %v12376_v1  ;;  %10112 = vmatprep.subr.bf16.mxu0 %v12379_v38  ;;  %v12461_v52 = vld [vmem:[#allocation11 + $0x80] sm:$0xff]   ;;  %v12462_v1 = vld [vmem:[#allocation11 + $0x48] sm:$0xff]  }
 0x72e   : > { %v12463_v38 = vld [vmem:[#allocation11 + $0xc8] sm:$0xff]  }
 0x730   : > { %10072 = vmatpush1.bf16.msra.mxu1 %v12374_v19  ;;  %10113 = vmatpush1.bf16.msra.mxu0 %v12377_v36  ;;  %v12464_v19 = vld [vmem:[#allocation11 + $0x8] sm:$0xff]  }
 0x731   : > { %10073 = vmatprep.subr.bf16.mxu1 %v12382_v12  ;;  %10114 = vmatprep.subr.bf16.mxu0 %v12385_v24  ;;  %v12465_v36 = vld [vmem:[#allocation11 + $0x88] sm:$0xff]   ;;  %v12466_v12 = vld [vmem:[#allocation11 + $0x50] sm:$0xff]  }
 0x732   : > { %v12467_v24 = vld [vmem:[#allocation11 + $0xd0] sm:$0xff]  }
 0x734   : > { %10074 = vmatpush1.bf16.msra.mxu1 %v12380_v14  ;;  %10115 = vmatpush1.bf16.msra.mxu0 %v12383_v18  ;;  %v12469_v14 = vld [vmem:[#allocation11 + $0x90] sm:$0xff]   ;;  %v12470_v18 = vld [vmem:[#allocation11 + $0x58] sm:$0xff]  }
 0x735   : > { %10075 = vmatprep.subr.bf16.mxu1 %v12388_v9  ;;  %10116 = vmatprep.subr.bf16.mxu0 %v12391_v16  ;;  %v12471_v9 = vld [vmem:[#allocation11 + $0xd8] sm:$0xff]  }
 0x736   : > { %v12472_v16 = vld [vmem:[#allocation11 + $0x18] sm:$0xff]  }
 0x738   : > { %10076 = vmatpush1.bf16.msra.mxu1 %v12386_v21  ;;  %10117 = vmatpush1.bf16.msra.mxu0 %v12389_v41  ;;  %v12473_v21 = vld [vmem:[#allocation11 + $0x98] sm:$0xff]   ;;  %v12474_v41 = vld [vmem:[#allocation11 + $0x60] sm:$0xff]  }
 0x739   : > { %10077 = vmatprep.subr.bf16.mxu1 %v12394_v31  ;;  %10118 = vmatprep.subr.bf16.mxu0 %v12397_v53  ;;  %v12475_v31 = vld [vmem:[#allocation11 + $0xe0] sm:$0xff]  }
 0x73a   : > { %v12476_v53 = vld [vmem:[#allocation11 + $0x20] sm:$0xff]  }
 0x73c   : > { %10078 = vmatpush1.bf16.msra.mxu1 %v12392_v35  ;;  %10119 = vmatpush1.bf16.msra.mxu0 %v12395_v43  ;;  %v12477_v35 = vld [vmem:[#allocation11 + $0xa0] sm:$0xff]   ;;  %v12478_v43 = vld [vmem:[#allocation11 + $0x68] sm:$0xff]  }
 0x73d   : > { %10079 = vmatprep.subr.bf16.mxu1 %v12400_v5  ;;  %10120 = vmatprep.subr.bf16.mxu0 %v12403_v62  ;;  %v12479_v5 = vld [vmem:[#allocation11 + $0xe8] sm:$0xff]  }
 0x73e   : > { %v12480_v62 = vld [vmem:[#allocation11 + $0x28] sm:$0xff]  }
 0x740   : > { %10080 = vmatpush1.bf16.msra.mxu1 %v12398_v37  ;;  %10121 = vmatpush1.bf16.msra.mxu0 %v12401_v15  ;;  %v12481_v37 = vld [vmem:[#allocation11 + $0xa8] sm:$0xff]   ;;  %v12482_v15 = vld [vmem:[#allocation11 + $0x70] sm:$0xff]  }
 0x741   : > { %10081 = vmatprep.subr.bf16.mxu1 %v12406_v49  ;;  %10122 = vmatprep.subr.bf16.mxu0 %v12409_v39  ;;  %v12483_v49 = vld [vmem:[#allocation11 + $0xf0] sm:$0xff]  }
 0x742   : > { %v12484_v39 = vld [vmem:[#allocation11 + $0x30] sm:$0xff]  }
 0x744   : > { %10082 = vmatpush1.bf16.msra.mxu1 %v12404_v48  ;;  %10123 = vmatpush1.bf16.msra.mxu0 %v12407_v17  ;;  %v12485_v48 = vld [vmem:[#allocation11 + $0xb0] sm:$0xff]   ;;  %v12486_v17 = vld [vmem:[#allocation11 + $0x78] sm:$0xff]  }
 0x745   : > { %10345 = vmatprep.subr.bf16.mxu1 %v12412_v58  ;;  %10386 = vmatprep.subr.bf16.mxu0 %v12415_v2  ;;  %v12487_v58 = vld [vmem:[#allocation11 + $0xf8] sm:$0xff]  }
 0x746   : > { %v12488_v2 = vld [vmem:[#allocation11 + $0x38] sm:$0xff]  }
 0x747   : > { %10100 = vmatmul.mubr.bf16.vlgmr.msra.gmra.mrb[36].mxu1 %v9325_v28  ;;  %10141 = vmatmul.mubr.bf16.vlgmr.msra.gmra.mrb[48].mxu0 %v9325_v28 }
 0x748   : > { %10346 = vmatpush1.bf16.msra.mxu1 %v12410_v32  ;;  %10387 = vmatpush1.bf16.msra.mxu0 %v12413_v26  ;;  %v12489_v32 = vld [vmem:[#allocation11 + $0xb8] sm:$0xff]  }
 0x749   : > { %10347 = vmatprep.subr.bf16.mxu1 %v12418_v63  ;;  %10388 = vmatprep.subr.bf16.mxu0 %v12421_v40 }
 0x74a   : > { %10377 = vmatprep.mubr.bf16.mxu1 %v12625_v0  ;;  %10418 = vmatprep.mubr.bf16.mxu0 %v12625_v0  ;;  %v12433_v0 = vld [vmem:[%s15583_s7 + $0x36c] ss:$16 sps:$4 sm:$0xff]  }
 0x74c   : > { %10348 = vmatpush1.bf16.msra.mxu1 %v12416_v50  ;;  %10389 = vmatpush1.bf16.msra.mxu0 %v12419_v20 }
 0x74d   : > { %10349 = vmatprep.subr.bf16.mxu1 %v12424_v23  ;;  %10390 = vmatprep.subr.bf16.mxu0 %v12427_v8 }
 0x750   : > { %10350 = vmatpush1.bf16.msra.mxu1 %v12422_v60  ;;  %10391 = vmatpush1.bf16.msra.mxu0 %v12425_v33 }
 0x751   : > { %10351 = vmatprep.subr.bf16.mxu1 %v12430_v56  ;;  %10392 = vmatprep.subr.bf16.mxu0 %v12433_v0 }
 0x754   : > { %10352 = vmatpush1.bf16.msra.mxu1 %v12428_v45  ;;  %10393 = vmatpush1.bf16.msra.mxu0 %v12431_v54 }
 0x755   : > { %10353 = vmatprep.subr.bf16.mxu1 %v12436_v47  ;;  %10394 = vmatprep.subr.bf16.mxu0 %v12439_v27 }
 0x758   : > { %10354 = vmatpush1.bf16.msra.mxu1 %v12434_v30  ;;  %10395 = vmatpush1.bf16.msra.mxu0 %v12437_v57 }
 0x759   : > { %10355 = vmatprep.subr.bf16.mxu1 %v12442_v3  ;;  %10396 = vmatprep.subr.bf16.mxu0 %v12445_v44 }
 0x75c   : > { %10356 = vmatpush1.bf16.msra.mxu1 %v12440_v13  ;;  %10397 = vmatpush1.bf16.msra.mxu0 %v12443_v55 }
 0x75d   : > { %10357 = vmatprep.subr.bf16.mxu1 %v12448_v11  ;;  %10398 = vmatprep.subr.bf16.mxu0 %v12451_v7 }
 0x760   : > { %10358 = vmatpush1.bf16.msra.mxu1 %v12446_v10  ;;  %10399 = vmatpush1.bf16.msra.mxu0 %v12449_v22 }
 0x761   : > { %10359 = vmatprep.subr.bf16.mxu1 %v12454_v29  ;;  %10400 = vmatprep.subr.bf16.mxu0 %v12457_v34 }
 0x764   : > { %10360 = vmatpush1.bf16.msra.mxu1 %v12452_v59  ;;  %10401 = vmatpush1.bf16.msra.mxu0 %v12455_v51 }
 0x765   : > { %11758 = vmatprep.subr.bf16.mxu1 %v12458_v6  ;;  %11780 = vmatprep.subr.bf16.mxu0 %v12459_v25  ;;  %v10435_v25 = vsub.s32 0, %v13678_v4 }
 0x767   : > { %10378 = vmatmul.mubr.bf16.vlgmr.msra.gmra.mrb[40].mxu1 %v9326_v46  ;;  %10419 = vmatmul.mubr.bf16.vlgmr.msra.gmra.mrb[52].mxu0 %v9326_v46 }
 0x768   : > { %11759 = vmatpush3.bf16.msra.mxu1 %v12460_v61  ;;  %11781 = vmatpush3.bf16.msra.mxu0 %v12461_v52  ;;  %v10443_v61 = vsub.s32 2, %v13678_v4  ;;  %v10431_v52 = vld [vmem:[%s15584_s8] sm:$0xf] }
 0x769   : > { %11760 = vmatprep.subr.bf16.mxu1 %v12462_v1  ;;  %11782 = vmatprep.subr.bf16.mxu0 %v12463_v38  ;;  %v10439_v1 = vsub.s32 1, %v13678_v4  ;;  %v10447_v38 = vsub.s32 3, %v13678_v4 }
 0x76c   : > { %11761 = vmatpush3.bf16.msra.mxu1 %v12464_v19  ;;  %11783 = vmatpush3.bf16.msra.mxu0 %v12465_v36  ;;  %v10436_v19 = vrot.slane %v10431_v52, %v10435_v25  ;;  %v10444_v36 = vrot.slane %v10431_v52, %v10443_v61 }
 0x76d   : > { %11762 = vmatprep.subr.bf16.mxu1 %v12466_v12  ;;  %11784 = vmatprep.subr.bf16.mxu0 %v12467_v24 }
 0x770   : > { %11763 = vmatpush3.bf16.msra.mxu1 %v12468_v42  ;;  %11785 = vmatpush3.bf16.msra.mxu0 %v12469_v14  ;;  %v10440_v42 = vrot.slane %v10431_v52, %v10439_v1  ;;  %v10448_v14 = vrot.slane %v10431_v52, %v10447_v38 }
 0x771   : > { %11764 = vmatprep.subr.bf16.mxu1 %v12470_v18  ;;  %11786 = vmatprep.subr.bf16.mxu0 %v12471_v9 }
 0x774   : > { %11765 = vmatpush3.bf16.msra.mxu1 %v12472_v16  ;;  %11787 = vmatpush3.bf16.msra.mxu0 %v12473_v21 }
 0x775   : > { %11766 = vmatprep.subr.bf16.mxu1 %v12474_v41  ;;  %11788 = vmatprep.subr.bf16.mxu0 %v12475_v31 }
 0x778   : > { %11767 = vmatpush3.bf16.msra.mxu1 %v12476_v53  ;;  %11789 = vmatpush3.bf16.msra.mxu0 %v12477_v35 }
 0x779   : > { %11768 = vmatprep.subr.bf16.mxu1 %v12478_v43  ;;  %11790 = vmatprep.subr.bf16.mxu0 %v12479_v5 }
 0x77c   : > { %11769 = vmatpush3.bf16.msra.mxu1 %v12480_v62  ;;  %11791 = vmatpush3.bf16.msra.mxu0 %v12481_v37 }
 0x77d   : > { %11770 = vmatprep.subr.bf16.mxu1 %v12482_v15  ;;  %11792 = vmatprep.subr.bf16.mxu0 %v12483_v49 }
 0x780   : > { %11771 = vmatpush3.bf16.msra.mxu1 %v12484_v39  ;;  %11793 = vmatpush3.bf16.msra.mxu0 %v12485_v48 }
 0x781   : > { %11772 = vmatprep.subr.bf16.mxu1 %v12486_v17  ;;  %11794 = vmatprep.subr.bf16.mxu0 %v12487_v58 }
 0x784   : > { %11773 = vmatpush3.bf16.msra.mxu1 %v12488_v2  ;;  %11795 = vmatpush3.bf16.msra.mxu0 %v12489_v32 }
 0x7da   : > { %v9585_v26 = vpop.f32.mrb[28].mxu1  ;;  %v9626_v28 = vpop.f32.mrb[40].mxu0 }
 0x7db   : > { %v9587_v63 = vpop.f32.mrb[29].mxu1  ;;  %v9628_v40 = vpop.f32.mrb[41].mxu0 }
 0x7dc   : > { %v9589_v50 = vpop.f32.mrb[30].mxu1  ;;  %v9630_v20 = vpop.f32.mrb[42].mxu0 }
 0x7dd   : > { %v9590_v23 = vpop.f32.mrb[31].mxu1  ;;  %v9631_v8 = vpop.f32.mrb[43].mxu0 }
 0x7fa   : > { %v9827_v60 = vpop.f32.mrb[32].mxu1  ;;  %v9868_v33 = vpop.f32.mrb[44].mxu0 }
 0x7fb   : > { %v9828_v56 = vadd.f32 %v9827_v60, %v9585_v26  ;;  %v9869_v0 = vadd.f32 %v9868_v33, %v9626_v28  ;;  %v9829_v45 = vpop.f32.mrb[33].mxu1  ;;  %v9870_v54 = vpop.f32.mrb[45].mxu0 }
 0x7fc   : > { %v9830_v47 = vadd.f32 %v9829_v45, %v9587_v63  ;;  %v9871_v27 = vadd.f32 %v9870_v54, %v9628_v40  ;;  %v9831_v30 = vpop.f32.mrb[34].mxu1  ;;  %v9872_v57 = vpop.f32.mrb[46].mxu0  ;;  %v10529_v40 = vld [vmem:[%s15586_s10] sm:$0x1] }
 0x7fd   : > { %v9832_v3 = vpop.f32.mrb[35].mxu1  ;;  %v9873_v44 = vpop.f32.mrb[47].mxu0 }
 0x81a   : > { %v10101_v13 = vpop.f32.mrb[36].mxu1  ;;  %v10142_v55 = vpop.f32.mrb[48].mxu0 }
 0x81b   : > { %v10149_v11 = vadd.f32 %v10101_v13, %v9828_v56  ;;  %v10151_v7 = vadd.f32 %v10142_v55, %v9869_v0  ;;  %v10103_v10 = vpop.f32.mrb[37].mxu1  ;;  %v10144_v22 = vpop.f32.mrb[49].mxu0 }
 0x81c   : > { %v10150_v29 = vadd.f32 %v10103_v10, %v9830_v47  ;;  %v10152_v34 = vadd.f32 %v10144_v22, %v9871_v27  ;;  %v10105_v59 = vpop.f32.mrb[38].mxu1  ;;  %v10146_v51 = vpop.f32.mrb[50].mxu0 }
 0x81d   : > { %v10106_v46 = vpop.f32.mrb[39].mxu1  ;;  %v10147_v6 = vpop.f32.mrb[51].mxu0 }
 0x83a   : > { %v10379_v12 = vpop.f32.mrb[40].mxu1  ;;  %v10420_v24 = vpop.f32.mrb[52].mxu0 }
 0x83b   : > { %v10427_v18 = vadd.f32 %v10379_v12, %v10149_v11  ;;  %v10429_v9 = vadd.f32 %v10420_v24, %v10151_v7  ;;  %v10381_v16 = vpop.f32.mrb[41].mxu1  ;;  %v10422_v21 = vpop.f32.mrb[53].mxu0 }
 0x83c   : > { %v10428_v41 = vadd.f32 %v10381_v16, %v10150_v29  ;;  %v10430_v31 = vadd.f32 %v10422_v21, %v10152_v34  ;;  %v10383_v53 = vpop.f32.mrb[42].mxu1  ;;  %v10424_v35 = vpop.f32.mrb[54].mxu0 }
 0x83d   : > { %v10453_v43 = vadd.f32 %v10436_v19, %v10427_v18  ;;  %v10455_v5 = vadd.f32 %v10444_v36, %v10429_v9  ;;  %v10384_v62 = vpop.f32.mrb[43].mxu1  ;;  %v10425_v37 = vpop.f32.mrb[55].mxu0 }
 0x83e   : > { %v10454_v4 = vadd.f32 %v10440_v42, %v10428_v41  ;;  %v10456_v15 = vadd.f32 %v10448_v14, %v10430_v31 }
 0x83f   : > { %v10457_v49 = vmax.f32 %v10453_v43, 0.0  ;;  %v10459_v39 = vmax.f32 %v10455_v5, 0.0 }
 0x840   : > { %v10458_v48 = vmax.f32 %v10454_v4, 0.0  ;;  %v10460_v17 = vmax.f32 %v10456_v15, 0.0 }
 0x841   : > { %v10461_v32 = vpack.c.bf16 %v10457_v49, %v10457_v49  ;;  %v10463_v26 = vpack.c.bf16 %v10459_v39, %v10459_v39 }
 0x842   : > { %v10462_v58 = vpack.c.bf16 %v10458_v48, %v10458_v48  ;;  %v10464_v2 = vpack.c.bf16 %v10460_v17, %v10460_v17 }
 0x844   : > { %10754 = vmatprep.mubr.bf16.mxu1 %v10462_v58  ;;  %10794 = vmatprep.mubr.bf16.mxu0 %v10464_v2 }
 0x845   : > { %10755 = vmatmul.mubr.bf16.vlgmr.msra.gmra.mrb[44].mxu1 %v10461_v32  ;;  %10795 = vmatmul.mubr.bf16.vlgmr.msra.gmra.mrb[56].mxu0 %v10463_v26 }
 0x918   : > { %v11774_v28 = vpop.f32.mrb[44].mxu1  ;;  %v11796_v63 = vpop.f32.mrb[56].mxu0 }
 0x919   : > { %v11775_v50 = vpop.f32.mrb[45].mxu1  ;;  %v11797_v20 = vpop.f32.mrb[57].mxu0 }
 0x91a   : > { %v11776_v23 = vadd.f32 %v11775_v50, %v11774_v28  ;;  %v11798_v8 = vadd.f32 %v11797_v20, %v11796_v63  ;;  %v11777_v60 = vpop.f32.mrb[46].mxu1  ;;  %v11799_v33 = vpop.f32.mrb[58].mxu0 }
 0x91b   : > { %v11778_v56 = vpop.f32.mrb[47].mxu1  ;;  %v11800_v0 = vpop.f32.mrb[59].mxu0 }
 0x91c   : > { %v10757_v45 = vadd.f32 %v11776_v23, %v10529_v40 }
 0x91e   : > { %v10797_v54 = vadd.f32 %v11798_v8, %v10757_v45 }
 0x920   : > { %10802 = vst [vmem:[%s408_s25] sm:$0x1] %v10797_v54 }
 0x921   : > { %12562 = shalt.err (!%p12559_p11)
}
 0x922   : > { %s12563_s28 = scalar_lea.hbm %s15534_s14, 16  ;;  %s12567_s22 = scalar_lea.hbm %s15587_s11, 32 }
 0x923   : > { %p12564_p13 = scmp.ne.s32.totalorder %s15534_s14, %s12563_s28  ;;  %p12568_p6 = scmp.lt.u32.totalorder %s15534_s14, %s15587_s11 }
 0x924   : > { %p12569_p9 = scmp.lt.u32.totalorder %s12567_s22, %s12563_s28  ;;  %p12571_p10 = scmp.lt.u32.totalorder %s12563_s28, %s15534_s14 }
 0x925   : > { %p12565_p5 = pnand %p12564_p13, %p15697_p1 }
 0x926   : > { %p12570_p12 = por %p12569_p9, %p12568_p6 }
 0x927   : > { %p12566_p0 = pneg %p12565_p5 }
 0x928   : > { %p12572_p2 = por %p12571_p10, %p12570_p12 }
 0x92a   : > { %p12573_p3 = pnand %p12572_p2, %p12566_p0 }
 0x92c   : > { %12576 = shalt.err (!%p12573_p3)
}
 0x92d   : > { %11877 = dma.vmem_to_hbm [thread:$0]  (%p15697_p1), %s15536_s12, 16, %s15534_s14, %s10804_s19  }
 0x92e PF: > { %s15698_s25 = sld [smem:[#allocation17_spill]]  ;;  %s15699_s13 = sld [smem:[#allocation21_spill]] }
 0x92f   : > { %p11894_p4 = scmp.ge.s32.totalorder %s12619_s20, 2 }
 0x934   : > { %s10828_s15 = sand.u32 1, %s15698_s25   ;;  %p15700_p7 = scmp.ne.s32.totalorder %s15699_s13, 0 }
 0x935   : > { %s10829_s30 = scalar_lea.sflag [#allocation10], %s10828_s15 }
 0x936   : > { %p11887_p8 = pnand %p11894_p4, %p15700_p7 }
 0x938   : > { %12602 = dma.done.wait (!%p11887_p8), %s10829_s30, 16  }
 0x939   : > { %12604 = vsyncadd (!%p11887_p8), %s10829_s30, 4294967280  ;;  %s15701_s20 = sld [smem:[#allocation19_spill]]  ;;  %s15702_s21 = sld [smem:[#allocation18_spill]] }
 0x93a   : > { %s15703_s19 = sld [smem:[#allocation20_spill]]  ;;  %s15704_s17 = smov %s12611_s18 }
 0x93f   : > { %p23_p11 = scmp.ge.s32.totalorder %s15701_s20, 4   ;;  %s15705_s18 = smov %s15702_s21 }
 0x941   :  { %25 = sbr.rel (!%p23_p11) target bundleno = 5 (0x5), region = 117 }
 0x948   :  { %10833 = vsyncpa [#allocation9], 1 }
 0x949   :  { %10835 = vsyncpa [#allocation9 + $0x1], 1 }
 0x94a   :  { %10836 = vsyncpa [#allocation12], 1 }
 0x94b   :  { %10837 = vsyncpa [#allocation10], 1 }
 0x94c   :  { %10839 = vsyncpa [#allocation10 + $0x1], 1 }

</bundles_post_ra>
